<compile_context>
chip_gen: v6e
topology: v6e:2x2x1
jax: 0.10.0
libtpu: 0.0.40
codegen_flags: <defaults>
</compile_context>

<pallas_src>
import math
from functools import partial

import jax
import jax.numpy as jnp
from jax import lax
from jax.experimental import pallas as pl
from jax.experimental.pallas import tpu as pltpu

# ---- small synthetic config consistent with DocumentViT's forward ----
IMG = 32            # image_size
PATCH = 8           # patch_size
CIN = 3             # in_channels
DIM = 128           # dim
DEPTH = 2           # depth
HEADS = 4           # num_heads
HEAD_DIM = DIM // HEADS
MLP_HIDDEN = int(DIM * 4.0)
NUM_CLASSES = 4
BATCH = 2

N_TOKENS = (IMG // PATCH) ** 2 + 1          # 17 (patches + cls)
N_PAD = 32                                  # pad tokens to a multiple of 16 (bf16 sublane-clean)
HEAD_OUT = 128                              # lane-dense head output slab (sliced to NUM_CLASSES outside)

MXU_DTYPE = jnp.bfloat16                    # matmul operand + weight storage dtype (f32 accumulation)


# ------------------------------------------------------------- in-kernel helpers ----
def _ln(x, g, b):
    # row-wise LayerNorm over last dim, biased variance, eps=1e-5 (PyTorch default)
    mu = jnp.mean(x, axis=-1, keepdims=True)
    xc = x - mu
    var = jnp.mean(xc * xc, axis=-1, keepdims=True)
    return xc * lax.rsqrt(var + 1e-5) * g + b


def _gelu(y):
    # exact erf GELU (matches nn.GELU() default)
    return 0.5 * y * (1.0 + lax.erf(y * (1.0 / math.sqrt(2.0))))


def _mm(a, b):
    # MXU-dtype operands, f32 accumulation
    return jnp.dot(a.astype(MXU_DTYPE), b.astype(MXU_DTYPE),
                   preferred_element_type=jnp.float32)


# ------------------------------------------------------------------ fused kernel ----
def _vit_kernel(patches_ref, cls_ref, pos_ref, patch_w_ref, patch_b_ref,
                ln1_g_ref, ln1_b_ref, qkv_w_ref, qkv_b_ref, proj_w_ref, proj_b_ref,
                ln2_g_ref, ln2_b_ref, fc1_w_ref, fc1_b_ref, fc2_w_ref, fc2_b_ref,
                norm_g_ref, norm_b_ref, hln_g_ref, hln_b_ref, head_w_ref, head_b_ref,
                out_ref, buf,
                *, b_per, depth, heads, head_dim, scale, n_valid, n_pad, approx_recip):
    """Whole DocumentViT forward for `b_per` batch elements, fully VMEM-resident."""
    f32 = jnp.float32
    c = heads * head_dim                     # = DIM
    n_patch = n_valid - 1                    # patch tokens per image

    # -------- patch embed (Conv2d k=stride=PATCH rewritten as a matmul) --------
    xe = _mm(patches_ref[...], patch_w_ref[...]) + patch_b_ref[...]   # (b_per*n_patch, C)

    # -------- assemble [cls | patch tokens] + pos_embed, zero-pad rows to n_pad ----
    pos = pos_ref[...]                                                 # (n_valid, C)
    buf[...] = jnp.zeros_like(buf)
    for b in range(b_per):                                             # static, tiny
        r0 = b * n_pad
        buf[r0:r0 + 1, :] = cls_ref[...] + pos[0:1, :]
        buf[r0 + 1:r0 + n_valid, :] = (xe[b * n_patch:(b + 1) * n_patch, :]
                                       + pos[1:n_valid, :])
    x = buf[...]                                                       # (b_per*n_pad, C) f32

    # padded key tokens (>= n_valid) can never influence valid queries
    key_ok = lax.broadcasted_iota(jnp.int32, (n_pad, n_pad), 1) < n_valid

    # ------------------------------ transformer blocks ------------------------------
    for d in range(depth):                                             # static unroll
        # ---------- attention branch ----------
        h = _ln(x, ln1_g_ref[d], ln1_b_ref[d])
        qkv = _mm(h, qkv_w_ref[d]) + qkv_b_ref[d]                      # (R, 3C) f32
        qkv_m = qkv.astype(MXU_DTYPE)                                  # single cast; slice below

        # per-(batch, head) masked softmax attention; head outputs are lane-placed
        # into `buf` (static lane slices) so the projection is ONE K=C matmul.
        for b in range(b_per):
            r0 = b * n_pad
            for hh in range(heads):
                lo = hh * head_dim
                q = qkv_m[r0:r0 + n_pad, lo:lo + head_dim]
                k = qkv_m[r0:r0 + n_pad, c + lo:c + lo + head_dim]
                v = qkv_m[r0:r0 + n_pad, 2 * c + lo:2 * c + lo + head_dim]
                # q @ k^T via dot_general contracting last dims (no materialized k.T)
                s = lax.dot_general(q, k, (((1,), (1,)), ((), ())),
                                    preferred_element_type=f32) * scale
                s = jnp.where(key_ok, s, -1e30)
                s = s - jnp.max(s, axis=-1, keepdims=True)
                p = jnp.exp(s)
                p = p * pl.reciprocal(jnp.sum(p, axis=-1, keepdims=True),
                                      approx=approx_recip)
                o_h = jnp.dot(p.astype(MXU_DTYPE), v, preferred_element_type=f32)
                buf[r0:r0 + n_pad, lo:lo + head_dim] = o_h             # lane placement only

        attn = _mm(buf[...], proj_w_ref[d]) + proj_b_ref[d]            # one K=C projection
        x = x + attn                                                   # residual

        # ---------- MLP branch ----------
        h2 = _ln(x, ln2_g_ref[d], ln2_b_ref[d])
        m = _gelu(_mm(h2, fc1_w_ref[d]) + fc1_b_ref[d])                # (R, 4C)
        x = x + _mm(m, fc2_w_ref[d]) + fc2_b_ref[d]                    # residual

    # -------- final norm -> head LayerNorm -> head Linear (cls rows only) --------
    # norm(x)[:, 0] == norm(x[:, 0]) since LayerNorm is row-wise.
    for b in range(b_per):
        buf[b:b + 1, :] = x[b * n_pad:b * n_pad + 1, :]
    cls_rows = buf[0:b_per, :]                                         # (b_per, C)
    y = _ln(cls_rows, norm_g_ref[...], norm_b_ref[...])
    y = _ln(y, hln_g_ref[...], hln_b_ref[...])
    logits = _mm(y, head_w_ref[...]) + head_b_ref[...]                 # (b_per, 128) lane-dense
    out_ref[0, :, :] = logits


# --------------------------------------------------------------------- wrapper ----
def _num_tensorcores():
    """2 on v7x (2 TensorCores/chip), else 1.  Best-effort; safe default is 1."""
    try:
        kind = jax.devices()[0].device_kind.lower()
    except Exception:
        return 1
    return 2 if ("v7" in kind or "tpu7" in kind) else 1


def document_vit_forward(x_nchw, params, *, num_cores=1):
    B, Cin, H, W = x_nchw.shape
    Hp, Wp = H // PATCH, W // PATCH
    patch_dim = Cin * PATCH * PATCH
    n_patch = Hp * Wp

    # Conv2d(k=stride=PATCH) + Flatten(2) + permute(0,2,1) == patch-extract + matmul.
    # The matmul is fused into the kernel; only this reshape/transpose stays in XLA.
    # Patch-vector ordering (c, i, j) matches the conv-weight flattening used at init.
    patches = (x_nchw.reshape(B, Cin, Hp, PATCH, Wp, PATCH)
               .transpose(0, 2, 4, 1, 3, 5)
               .reshape(B * n_patch, patch_dim))

    # v5e/v6e (1 TC): fold batch into rows (G=1).  v7x (2 TC): one batch element per core.
    G = num_cores if (num_cores > 1 and B % num_cores == 0) else 1
    b_per = B // G

    def const_spec(arr):                       # VMEM-resident weight, same block every step
        nd = arr.ndim
        return pl.BlockSpec(arr.shape, lambda g, _nd=nd: (0,) * _nd)

    blk = params["blk"]
    weights = [params["cls_token"], params["pos_embed"],
               params["patch_w"], params["patch_b"],
               blk["ln1_g"], blk["ln1_b"], blk["qkv_w"], blk["qkv_b"],
               blk["proj_w"], blk["proj_b"], blk["ln2_g"], blk["ln2_b"],
               blk["fc1_w"], blk["fc1_b"], blk["fc2_w"], blk["fc2_b"],
               params["norm_g"], params["norm_b"],
               params["head_ln_g"], params["head_ln_b"],
               params["head_w"], params["head_b"]]

    out = pl.pallas_call(
        partial(_vit_kernel, b_per=b_per, depth=DEPTH, heads=HEADS,
                head_dim=HEAD_DIM, scale=HEAD_DIM ** -0.5,
                n_valid=N_TOKENS, n_pad=N_PAD,
                approx_recip=(MXU_DTYPE != jnp.float32)),
        out_shape=jax.ShapeDtypeStruct((G, b_per, HEAD_OUT), jnp.float32),
        grid=(G,),
        in_specs=[pl.BlockSpec((b_per * n_patch, patch_dim), lambda g: (g, 0))]
                 + [const_spec(w) for w in weights],
        out_specs=pl.BlockSpec((1, b_per, HEAD_OUT), lambda g: (g, 0, 0)),
        scratch_shapes=[pltpu.VMEM((b_per * N_PAD, DIM), jnp.float32)],
        compiler_params=pltpu.CompilerParams(
            dimension_semantics=("parallel",)),      # v7x: one batch element per TensorCore
    )(patches, *weights)

    return out.reshape(B, HEAD_OUT)[:, :NUM_CLASSES]


# ----------------------------------------------------------------------- params ----
def init_params(key):
    def nrm(k, shape, dtype, scale=0.02):
        return (scale * jax.random.normal(k, shape)).astype(dtype)

    wdt = MXU_DTYPE                    # weight storage dtype follows the matmul dtype
    keys = iter(jax.random.split(key, 12))
    patch_dim = CIN * PATCH * PATCH
    params = {
        # Conv2d(CIN, DIM, k=stride=PATCH) weight (DIM,CIN,P,P) flattened -> (patch_dim, DIM)
        "patch_w": nrm(next(keys), (patch_dim, DIM), wdt),
        "patch_b": jnp.zeros((1, DIM), jnp.float32),
        "cls_token": nrm(next(keys), (1, DIM), jnp.float32),
        "pos_embed": nrm(next(keys), (N_TOKENS, DIM), jnp.float32),
        "norm_g": jnp.ones((1, DIM), jnp.float32),
        "norm_b": jnp.zeros((1, DIM), jnp.float32),
        "head_ln_g": jnp.ones((1, DIM), jnp.float32),
        "head_ln_b": jnp.zeros((1, DIM), jnp.float32),
        # head Linear weight padded to a 128-lane slab (cols >= NUM_CLASSES are zero)
        "head_w": jnp.pad(nrm(next(keys), (DIM, NUM_CLASSES), wdt),
                          ((0, 0), (0, HEAD_OUT - NUM_CLASSES))),
        "head_b": jnp.zeros((1, HEAD_OUT), jnp.float32),
        # per-block weights stacked along a leading DEPTH axis (kept VMEM-resident)
        "blk": {
            "ln1_g": jnp.ones((DEPTH, 1, DIM), jnp.float32),
            "ln1_b": jnp.zeros((DEPTH, 1, DIM), jnp.float32),
            "qkv_w": nrm(next(keys), (DEPTH, DIM, 3 * DIM), wdt),
            "qkv_b": jnp.zeros((DEPTH, 1, 3 * DIM), jnp.float32),
            "proj_w": nrm(next(keys), (DEPTH, DIM, DIM), wdt),
            "proj_b": jnp.zeros((DEPTH, 1, DIM), jnp.float32),
            "ln2_g": jnp.ones((DEPTH, 1, DIM), jnp.float32),
            "ln2_b": jnp.zeros((DEPTH, 1, DIM), jnp.float32),
            "fc1_w": nrm(next(keys), (DEPTH, DIM, MLP_HIDDEN), wdt),
            "fc1_b": jnp.zeros((DEPTH, 1, MLP_HIDDEN), jnp.float32),
            "fc2_w": nrm(next(keys), (DEPTH, MLP_HIDDEN, DIM), wdt),
            "fc2_b": jnp.zeros((DEPTH, 1, DIM), jnp.float32),
        },
    }
    return params


# ------------------------------------------------------------------------- main ----
if __name__ == "__main__":
    key = jax.random.PRNGKey(0)
    kx, kp = jax.random.split(key)
    x = jax.random.normal(kx, (BATCH, CIN, IMG, IMG), dtype=jnp.float32)   # NCHW input
    params = init_params(kp)

    fwd = jax.jit(partial(document_vit_forward, num_cores=_num_tensorcores()))
    logits = fwd(x, params)
    jax.block_until_ready(logits)
    assert logits.shape == (BATCH, NUM_CLASSES)
    print("KERNEL_OK")
</pallas_src>

<mosaic_0001>
module attributes {stable_mosaic.version = 11 : i64} {
  func.func @_vit_kernel(%arg0: i32, %arg1: memref<32x192xf32, #tpu.memory_space<vmem>>, %arg2: memref<1x128xf32, #tpu.memory_space<vmem>>, %arg3: memref<17x128xf32, #tpu.memory_space<vmem>>, %arg4: memref<192x128xbf16, #tpu.memory_space<vmem>>, %arg5: memref<1x128xf32, #tpu.memory_space<vmem>>, %arg6: memref<2x1x128xf32, #tpu.memory_space<vmem>>, %arg7: memref<2x1x128xf32, #tpu.memory_space<vmem>>, %arg8: memref<2x128x384xbf16, #tpu.memory_space<vmem>>, %arg9: memref<2x1x384xf32, #tpu.memory_space<vmem>>, %arg10: memref<2x128x128xbf16, #tpu.memory_space<vmem>>, %arg11: memref<2x1x128xf32, #tpu.memory_space<vmem>>, %arg12: memref<2x1x128xf32, #tpu.memory_space<vmem>>, %arg13: memref<2x1x128xf32, #tpu.memory_space<vmem>>, %arg14: memref<2x128x512xbf16, #tpu.memory_space<vmem>>, %arg15: memref<2x1x512xf32, #tpu.memory_space<vmem>>, %arg16: memref<2x512x128xbf16, #tpu.memory_space<vmem>>, %arg17: memref<2x1x128xf32, #tpu.memory_space<vmem>>, %arg18: memref<1x128xf32, #tpu.memory_space<vmem>>, %arg19: memref<1x128xf32, #tpu.memory_space<vmem>>, %arg20: memref<1x128xf32, #tpu.memory_space<vmem>>, %arg21: memref<1x128xf32, #tpu.memory_space<vmem>>, %arg22: memref<128x128xbf16, #tpu.memory_space<vmem>>, %arg23: memref<1x128xf32, #tpu.memory_space<vmem>>, %arg24: memref<1x2x128xf32, #tpu.memory_space<vmem>>, %arg25: memref<64x128xf32, #tpu.memory_space<vmem>>) attributes {dimension_semantics = [#tpu.dimension_semantics<parallel>], iteration_bounds = array<i64: 1>, scalar_prefetch = 0 : i64, scratch_operands = 1 : i64, tpu.core_type = #tpu.core_type<tc>, window_params = [{transform_indices = @transform_0, window_bounds = array<i64: 32, 192>}, {pipeline_mode = #tpu.pipeline_mode<synchronous>, transform_indices = @transform_1, window_bounds = array<i64: 1, 128>}, {pipeline_mode = #tpu.pipeline_mode<synchronous>, transform_indices = @transform_2, window_bounds = array<i64: 17, 128>}, {pipeline_mode = #tpu.pipeline_mode<synchronous>, transform_indices = @transform_3, window_bounds = array<i64: 192, 128>}, {pipeline_mode = #tpu.pipeline_mode<synchronous>, transform_indices = @transform_4, window_bounds = array<i64: 1, 128>}, {pipeline_mode = #tpu.pipeline_mode<synchronous>, transform_indices = @transform_5, window_bounds = array<i64: 2, 1, 128>}, {pipeline_mode = #tpu.pipeline_mode<synchronous>, transform_indices = @transform_6, window_bounds = array<i64: 2, 1, 128>}, {pipeline_mode = #tpu.pipeline_mode<synchronous>, transform_indices = @transform_7, window_bounds = array<i64: 2, 128, 384>}, {pipeline_mode = #tpu.pipeline_mode<synchronous>, transform_indices = @transform_8, window_bounds = array<i64: 2, 1, 384>}, {pipeline_mode = #tpu.pipeline_mode<synchronous>, transform_indices = @transform_9, window_bounds = array<i64: 2, 128, 128>}, {pipeline_mode = #tpu.pipeline_mode<synchronous>, transform_indices = @transform_10, window_bounds = array<i64: 2, 1, 128>}, {pipeline_mode = #tpu.pipeline_mode<synchronous>, transform_indices = @transform_11, window_bounds = array<i64: 2, 1, 128>}, {pipeline_mode = #tpu.pipeline_mode<synchronous>, transform_indices = @transform_12, window_bounds = array<i64: 2, 1, 128>}, {pipeline_mode = #tpu.pipeline_mode<synchronous>, transform_indices = @transform_13, window_bounds = array<i64: 2, 128, 512>}, {pipeline_mode = #tpu.pipeline_mode<synchronous>, transform_indices = @transform_14, window_bounds = array<i64: 2, 1, 512>}, {pipeline_mode = #tpu.pipeline_mode<synchronous>, transform_indices = @transform_15, window_bounds = array<i64: 2, 512, 128>}, {pipeline_mode = #tpu.pipeline_mode<synchronous>, transform_indices = @transform_16, window_bounds = array<i64: 2, 1, 128>}, {pipeline_mode = #tpu.pipeline_mode<synchronous>, transform_indices = @transform_17, window_bounds = array<i64: 1, 128>}, {pipeline_mode = #tpu.pipeline_mode<synchronous>, transform_indices = @transform_18, window_bounds = array<i64: 1, 128>}, {pipeline_mode = #tpu.pipeline_mode<synchronous>, transform_indices = @transform_19, window_bounds = array<i64: 1, 128>}, {pipeline_mode = #tpu.pipeline_mode<synchronous>, transform_indices = @transform_20, window_bounds = array<i64: 1, 128>}, {pipeline_mode = #tpu.pipeline_mode<synchronous>, transform_indices = @transform_21, window_bounds = array<i64: 128, 128>}, {pipeline_mode = #tpu.pipeline_mode<synchronous>, transform_indices = @transform_22, window_bounds = array<i64: 1, 128>}, {transform_indices = @transform_23, window_bounds = array<i64: 1, 2, 128>}]} {
    %c0 = arith.constant 0 : index
    %c0_0 = arith.constant 0 : index
    %0 = vector.load %arg1[%c0, %c0_0] : memref<32x192xf32, #tpu.memory_space<vmem>>, vector<32x192xf32>
    %c0_1 = arith.constant 0 : index
    %c0_2 = arith.constant 0 : index
    %1 = vector.load %arg4[%c0_1, %c0_2] : memref<192x128xbf16, #tpu.memory_space<vmem>>, vector<192x128xbf16>
    %2 = arith.truncf %0 : vector<32x192xf32> to vector<32x192xbf16>
    %cst = arith.constant dense<0.000000e+00> : vector<32x128xf32>
    %3 = tpu.matmul %2, %1, %cst {dimension_numbers = #tpu.dot_dimension_numbers<[1], [0], [0], [1], [0, 0, 1, 1], [], []>} : vector<32x192xbf16>, vector<192x128xbf16>, vector<32x128xf32> -> vector<32x128xf32>
    %c0_3 = arith.constant 0 : index
    %c0_4 = arith.constant 0 : index
    %4 = vector.load %arg5[%c0_3, %c0_4] : memref<1x128xf32, #tpu.memory_space<vmem>>, vector<1x128xf32>
    %5 = vector.broadcast %4 : vector<1x128xf32> to vector<32x128xf32>
    %6 = arith.addf %3, %5 : vector<32x128xf32>
    %c0_5 = arith.constant 0 : index
    %c0_6 = arith.constant 0 : index
    %7 = vector.load %arg3[%c0_5, %c0_6] : memref<17x128xf32, #tpu.memory_space<vmem>>, vector<17x128xf32>
    %cst_7 = arith.constant 0.000000e+00 : f32
    %8 = vector.broadcast %cst_7 : f32 to vector<64x128xf32>
    %c0_8 = arith.constant 0 : index
    %c0_9 = arith.constant 0 : index
    %9 = vector.load %arg25[%c0_8, %c0_9] : memref<64x128xf32, #tpu.memory_space<vmem>>, vector<64x128xf32>
    tpu.vector_store %arg25[%c0_8, %c0_9], %8 {strides = array<i32>} : memref<64x128xf32, #tpu.memory_space<vmem>>, vector<64x128xf32>,
    %c0_10 = arith.constant 0 : index
    %c0_11 = arith.constant 0 : index
    %10 = vector.load %arg2[%c0_10, %c0_11] : memref<1x128xf32, #tpu.memory_space<vmem>>, vector<1x128xf32>
    %11 = vector.extract_strided_slice %7 {offsets = [0, 0], sizes = [1, 128], strides = [1, 1]} : vector<17x128xf32> to vector<1x128xf32>
    %12 = arith.addf %10, %11 : vector<1x128xf32>
    %c0_12 = arith.constant 0 : index
    %c0_13 = arith.constant 0 : index
    %13 = vector.load %arg25[%c0_12, %c0_13] : memref<64x128xf32, #tpu.memory_space<vmem>>, vector<1x128xf32>
    tpu.vector_store %arg25[%c0_12, %c0_13], %12 {strides = array<i32>} : memref<64x128xf32, #tpu.memory_space<vmem>>, vector<1x128xf32>,
    %14 = vector.extract_strided_slice %6 {offsets = [0, 0], sizes = [16, 128], strides = [1, 1]} : vector<32x128xf32> to vector<16x128xf32>
    %15 = vector.extract_strided_slice %7 {offsets = [1, 0], sizes = [16, 128], strides = [1, 1]} : vector<17x128xf32> to vector<16x128xf32>
    %16 = arith.addf %14, %15 : vector<16x128xf32>
    %c1 = arith.constant 1 : index
    %c0_14 = arith.constant 0 : index
    %17 = vector.load %arg25[%c1, %c0_14] : memref<64x128xf32, #tpu.memory_space<vmem>>, vector<16x128xf32>
    tpu.vector_store %arg25[%c1, %c0_14], %16 {strides = array<i32>} : memref<64x128xf32, #tpu.memory_space<vmem>>, vector<16x128xf32>,
    %c0_15 = arith.constant 0 : index
    %c0_16 = arith.constant 0 : index
    %18 = vector.load %arg2[%c0_15, %c0_16] : memref<1x128xf32, #tpu.memory_space<vmem>>, vector<1x128xf32>
    %19 = vector.extract_strided_slice %7 {offsets = [0, 0], sizes = [1, 128], strides = [1, 1]} : vector<17x128xf32> to vector<1x128xf32>
    %20 = arith.addf %18, %19 : vector<1x128xf32>
    %c32 = arith.constant 32 : index
    %c0_17 = arith.constant 0 : index
    %21 = vector.load %arg25[%c32, %c0_17] : memref<64x128xf32, #tpu.memory_space<vmem>>, vector<1x128xf32>
    tpu.vector_store %arg25[%c32, %c0_17], %20 {strides = array<i32>} : memref<64x128xf32, #tpu.memory_space<vmem>>, vector<1x128xf32>,
    %22 = vector.extract_strided_slice %6 {offsets = [16, 0], sizes = [16, 128], strides = [1, 1]} : vector<32x128xf32> to vector<16x128xf32>
    %23 = vector.extract_strided_slice %7 {offsets = [1, 0], sizes = [16, 128], strides = [1, 1]} : vector<17x128xf32> to vector<16x128xf32>
    %24 = arith.addf %22, %23 : vector<16x128xf32>
    %c33 = arith.constant 33 : index
    %c0_18 = arith.constant 0 : index
    %25 = vector.load %arg25[%c33, %c0_18] : memref<64x128xf32, #tpu.memory_space<vmem>>, vector<16x128xf32>
    tpu.vector_store %arg25[%c33, %c0_18], %24 {strides = array<i32>} : memref<64x128xf32, #tpu.memory_space<vmem>>, vector<16x128xf32>,
    %c0_19 = arith.constant 0 : index
    %c0_20 = arith.constant 0 : index
    %26 = vector.load %arg25[%c0_19, %c0_20] : memref<64x128xf32, #tpu.memory_space<vmem>>, vector<64x128xf32>
    %27 = tpu.iota {dimensions = array<i32: 1>} : vector<32x32xi32>
    %c17_i32 = arith.constant 17 : i32
    %28 = vector.broadcast %c17_i32 : i32 to vector<32x32xi32>
    %29 = arith.cmpi slt, %27, %28 : vector<32x32xi32>
    %c0_21 = arith.constant 0 : index
    %c0_22 = arith.constant 0 : index
    %c0_23 = arith.constant 0 : index
    %30 = vector.load %arg6[%c0_21, %c0_22, %c0_23] : memref<2x1x128xf32, #tpu.memory_space<vmem>>, vector<1x1x128xf32>
    %31 = vector.shape_cast %30 : vector<1x1x128xf32> to vector<1x128xf32>
    %c0_24 = arith.constant 0 : index
    %c0_25 = arith.constant 0 : index
    %c0_26 = arith.constant 0 : index
    %32 = vector.load %arg7[%c0_24, %c0_25, %c0_26] : memref<2x1x128xf32, #tpu.memory_space<vmem>>, vector<1x1x128xf32>
    %33 = vector.shape_cast %32 : vector<1x1x128xf32> to vector<1x128xf32>
    %cst_27 = arith.constant dense<0.000000e+00> : vector<64xf32>
    %34 = vector.multi_reduction <add>, %26, %cst_27 [1] : vector<64x128xf32> to vector<64xf32>
    %35 = vector.shape_cast %34 : vector<64xf32> to vector<64x1xf32>
    %cst_28 = arith.constant 1.280000e+02 : f32
    %36 = vector.broadcast %cst_28 : f32 to vector<64x1xf32>
    %37 = arith.divf %35, %36 : vector<64x1xf32>
    %38 = vector.broadcast %37 : vector<64x1xf32> to vector<64x128xf32>
    %39 = arith.subf %26, %38 : vector<64x128xf32>
    %40 = arith.mulf %39, %39 : vector<64x128xf32>
    %cst_29 = arith.constant dense<0.000000e+00> : vector<64xf32>
    %41 = vector.multi_reduction <add>, %40, %cst_29 [1] : vector<64x128xf32> to vector<64xf32>
    %42 = vector.shape_cast %41 : vector<64xf32> to vector<64x1xf32>
    %cst_30 = arith.constant 1.280000e+02 : f32
    %43 = vector.broadcast %cst_30 : f32 to vector<64x1xf32>
    %44 = arith.divf %42, %43 : vector<64x1xf32>
    %cst_31 = arith.constant 9.99999974E-6 : f32
    %45 = vector.broadcast %cst_31 : f32 to vector<64x1xf32>
    %46 = arith.addf %44, %45 : vector<64x1xf32>
    %47 = math.rsqrt %46 : vector<64x1xf32>
    %48 = vector.broadcast %47 : vector<64x1xf32> to vector<64x128xf32>
    %49 = arith.mulf %39, %48 : vector<64x128xf32>
    %50 = vector.broadcast %31 : vector<1x128xf32> to vector<64x128xf32>
    %51 = arith.mulf %49, %50 : vector<64x128xf32>
    %52 = vector.broadcast %33 : vector<1x128xf32> to vector<64x128xf32>
    %53 = arith.addf %51, %52 : vector<64x128xf32>
    %c0_32 = arith.constant 0 : index
    %c0_33 = arith.constant 0 : index
    %c0_34 = arith.constant 0 : index
    %54 = vector.load %arg8[%c0_32, %c0_33, %c0_34] : memref<2x128x384xbf16, #tpu.memory_space<vmem>>, vector<1x128x384xbf16>
    %55 = vector.shape_cast %54 : vector<1x128x384xbf16> to vector<128x384xbf16>
    %56 = arith.truncf %53 : vector<64x128xf32> to vector<64x128xbf16>
    %cst_35 = arith.constant dense<0.000000e+00> : vector<64x384xf32>
    %57 = tpu.matmul %56, %55, %cst_35 {dimension_numbers = #tpu.dot_dimension_numbers<[1], [0], [0], [1], [0, 0, 1, 1], [], []>} : vector<64x128xbf16>, vector<128x384xbf16>, vector<64x384xf32> -> vector<64x384xf32>
    %c0_36 = arith.constant 0 : index
    %c0_37 = arith.constant 0 : index
    %c0_38 = arith.constant 0 : index
    %58 = vector.load %arg9[%c0_36, %c0_37, %c0_38] : memref<2x1x384xf32, #tpu.memory_space<vmem>>, vector<1x1x384xf32>
    %59 = vector.shape_cast %58 : vector<1x1x384xf32> to vector<1x384xf32>
    %60 = vector.broadcast %59 : vector<1x384xf32> to vector<64x384xf32>
    %61 = arith.addf %57, %60 : vector<64x384xf32>
    %62 = arith.truncf %61 : vector<64x384xf32> to vector<64x384xbf16>
    %63 = vector.extract_strided_slice %62 {offsets = [0, 0], sizes = [32, 32], strides = [1, 1]} : vector<64x384xbf16> to vector<32x32xbf16>
    %64 = vector.extract_strided_slice %62 {offsets = [0, 128], sizes = [32, 32], strides = [1, 1]} : vector<64x384xbf16> to vector<32x32xbf16>
    %65 = vector.extract_strided_slice %62 {offsets = [0, 256], sizes = [32, 32], strides = [1, 1]} : vector<64x384xbf16> to vector<32x32xbf16>
    %cst_39 = arith.constant dense<0.000000e+00> : vector<32x32xf32>
    %66 = tpu.matmul %63, %64, %cst_39 {dimension_numbers = #tpu.dot_dimension_numbers<[1], [1], [0], [0], [0, 0, 1, 0], [], []>} : vector<32x32xbf16>, vector<32x32xbf16>, vector<32x32xf32> -> vector<32x32xf32>
    %cst_40 = arith.constant 0.176776692 : f32
    %67 = vector.broadcast %cst_40 : f32 to vector<32x32xf32>
    %68 = arith.mulf %66, %67 : vector<32x32xf32>
    %cst_41 = arith.constant -1.000000e+30 : f32
    %69 = vector.broadcast %cst_41 : f32 to vector<32x32xf32>
    %70 = arith.select %29, %68, %69 : vector<32x32xi1>, vector<32x32xf32>
    %cst_42 = arith.constant dense<0xFF800000> : vector<32xf32>
    %71 = vector.multi_reduction <maximumf>, %70, %cst_42 [1] : vector<32x32xf32> to vector<32xf32>
    %72 = vector.shape_cast %71 : vector<32xf32> to vector<32x1xf32>
    %73 = vector.broadcast %72 : vector<32x1xf32> to vector<32x32xf32>
    %74 = arith.subf %70, %73 : vector<32x32xf32>
    %75 = math.exp %74 : vector<32x32xf32>
    %cst_43 = arith.constant dense<0.000000e+00> : vector<32xf32>
    %76 = vector.multi_reduction <add>, %75, %cst_43 [1] : vector<32x32xf32> to vector<32xf32>
    %77 = vector.shape_cast %76 : vector<32xf32> to vector<32x1xf32>
    %78 = tpu.reciprocal %77 {approx = true} : vector<32x1xf32> -> vector<32x1xf32>
    %79 = vector.broadcast %78 : vector<32x1xf32> to vector<32x32xf32>
    %80 = arith.mulf %75, %79 : vector<32x32xf32>
    %81 = arith.truncf %80 : vector<32x32xf32> to vector<32x32xbf16>
    %cst_44 = arith.constant dense<0.000000e+00> : vector<32x32xf32>
    %82 = tpu.matmul %81, %65, %cst_44 {dimension_numbers = #tpu.dot_dimension_numbers<[1], [0], [0], [1], [0, 0, 1, 1], [], []>} : vector<32x32xbf16>, vector<32x32xbf16>, vector<32x32xf32> -> vector<32x32xf32>
    %c0_45 = arith.constant 0 : index
    %c0_46 = arith.constant 0 : index
    %83 = vector.load %arg25[%c0_45, %c0_46] : memref<64x128xf32, #tpu.memory_space<vmem>>, vector<32x32xf32>
    tpu.vector_store %arg25[%c0_45, %c0_46], %82 {strides = array<i32>} : memref<64x128xf32, #tpu.memory_space<vmem>>, vector<32x32xf32>,
    %84 = vector.extract_strided_slice %62 {offsets = [0, 32], sizes = [32, 32], strides = [1, 1]} : vector<64x384xbf16> to vector<32x32xbf16>
    %85 = vector.extract_strided_slice %62 {offsets = [0, 160], sizes = [32, 32], strides = [1, 1]} : vector<64x384xbf16> to vector<32x32xbf16>
    %86 = vector.extract_strided_slice %62 {offsets = [0, 288], sizes = [32, 32], strides = [1, 1]} : vector<64x384xbf16> to vector<32x32xbf16>
    %cst_47 = arith.constant dense<0.000000e+00> : vector<32x32xf32>
    %87 = tpu.matmul %84, %85, %cst_47 {dimension_numbers = #tpu.dot_dimension_numbers<[1], [1], [0], [0], [0, 0, 1, 0], [], []>} : vector<32x32xbf16>, vector<32x32xbf16>, vector<32x32xf32> -> vector<32x32xf32>
    %cst_48 = arith.constant 0.176776692 : f32
    %88 = vector.broadcast %cst_48 : f32 to vector<32x32xf32>
    %89 = arith.mulf %87, %88 : vector<32x32xf32>
    %cst_49 = arith.constant -1.000000e+30 : f32
    %90 = vector.broadcast %cst_49 : f32 to vector<32x32xf32>
    %91 = arith.select %29, %89, %90 : vector<32x32xi1>, vector<32x32xf32>
    %cst_50 = arith.constant dense<0xFF800000> : vector<32xf32>
    %92 = vector.multi_reduction <maximumf>, %91, %cst_50 [1] : vector<32x32xf32> to vector<32xf32>
    %93 = vector.shape_cast %92 : vector<32xf32> to vector<32x1xf32>
    %94 = vector.broadcast %93 : vector<32x1xf32> to vector<32x32xf32>
    %95 = arith.subf %91, %94 : vector<32x32xf32>
    %96 = math.exp %95 : vector<32x32xf32>
    %cst_51 = arith.constant dense<0.000000e+00> : vector<32xf32>
    %97 = vector.multi_reduction <add>, %96, %cst_51 [1] : vector<32x32xf32> to vector<32xf32>
    %98 = vector.shape_cast %97 : vector<32xf32> to vector<32x1xf32>
    %99 = tpu.reciprocal %98 {approx = true} : vector<32x1xf32> -> vector<32x1xf32>
    %100 = vector.broadcast %99 : vector<32x1xf32> to vector<32x32xf32>
    %101 = arith.mulf %96, %100 : vector<32x32xf32>
    %102 = arith.truncf %101 : vector<32x32xf32> to vector<32x32xbf16>
    %cst_52 = arith.constant dense<0.000000e+00> : vector<32x32xf32>
    %103 = tpu.matmul %102, %86, %cst_52 {dimension_numbers = #tpu.dot_dimension_numbers<[1], [0], [0], [1], [0, 0, 1, 1], [], []>} : vector<32x32xbf16>, vector<32x32xbf16>, vector<32x32xf32> -> vector<32x32xf32>
    %c0_53 = arith.constant 0 : index
    %c32_54 = arith.constant 32 : index
    %104 = vector.load %arg25[%c0_53, %c32_54] : memref<64x128xf32, #tpu.memory_space<vmem>>, vector<32x32xf32>
    tpu.vector_store %arg25[%c0_53, %c32_54], %103 {strides = array<i32>} : memref<64x128xf32, #tpu.memory_space<vmem>>, vector<32x32xf32>,
    %105 = vector.extract_strided_slice %62 {offsets = [0, 64], sizes = [32, 32], strides = [1, 1]} : vector<64x384xbf16> to vector<32x32xbf16>
    %106 = vector.extract_strided_slice %62 {offsets = [0, 192], sizes = [32, 32], strides = [1, 1]} : vector<64x384xbf16> to vector<32x32xbf16>
    %107 = vector.extract_strided_slice %62 {offsets = [0, 320], sizes = [32, 32], strides = [1, 1]} : vector<64x384xbf16> to vector<32x32xbf16>
    %cst_55 = arith.constant dense<0.000000e+00> : vector<32x32xf32>
    %108 = tpu.matmul %105, %106, %cst_55 {dimension_numbers = #tpu.dot_dimension_numbers<[1], [1], [0], [0], [0, 0, 1, 0], [], []>} : vector<32x32xbf16>, vector<32x32xbf16>, vector<32x32xf32> -> vector<32x32xf32>
    %cst_56 = arith.constant 0.176776692 : f32
    %109 = vector.broadcast %cst_56 : f32 to vector<32x32xf32>
    %110 = arith.mulf %108, %109 : vector<32x32xf32>
    %cst_57 = arith.constant -1.000000e+30 : f32
    %111 = vector.broadcast %cst_57 : f32 to vector<32x32xf32>
    %112 = arith.select %29, %110, %111 : vector<32x32xi1>, vector<32x32xf32>
    %cst_58 = arith.constant dense<0xFF800000> : vector<32xf32>
    %113 = vector.multi_reduction <maximumf>, %112, %cst_58 [1] : vector<32x32xf32> to vector<32xf32>
    %114 = vector.shape_cast %113 : vector<32xf32> to vector<32x1xf32>
    %115 = vector.broadcast %114 : vector<32x1xf32> to vector<32x32xf32>
    %116 = arith.subf %112, %115 : vector<32x32xf32>
    %117 = math.exp %116 : vector<32x32xf32>
    %cst_59 = arith.constant dense<0.000000e+00> : vector<32xf32>
    %118 = vector.multi_reduction <add>, %117, %cst_59 [1] : vector<32x32xf32> to vector<32xf32>
    %119 = vector.shape_cast %118 : vector<32xf32> to vector<32x1xf32>
    %120 = tpu.reciprocal %119 {approx = true} : vector<32x1xf32> -> vector<32x1xf32>
    %121 = vector.broadcast %120 : vector<32x1xf32> to vector<32x32xf32>
    %122 = arith.mulf %117, %121 : vector<32x32xf32>
    %123 = arith.truncf %122 : vector<32x32xf32> to vector<32x32xbf16>
    %cst_60 = arith.constant dense<0.000000e+00> : vector<32x32xf32>
    %124 = tpu.matmul %123, %107, %cst_60 {dimension_numbers = #tpu.dot_dimension_numbers<[1], [0], [0], [1], [0, 0, 1, 1], [], []>} : vector<32x32xbf16>, vector<32x32xbf16>, vector<32x32xf32> -> vector<32x32xf32>
    %c0_61 = arith.constant 0 : index
    %c64 = arith.constant 64 : index
    %125 = vector.load %arg25[%c0_61, %c64] : memref<64x128xf32, #tpu.memory_space<vmem>>, vector<32x32xf32>
    tpu.vector_store %arg25[%c0_61, %c64], %124 {strides = array<i32>} : memref<64x128xf32, #tpu.memory_space<vmem>>, vector<32x32xf32>,
    %126 = vector.extract_strided_slice %62 {offsets = [0, 96], sizes = [32, 32], strides = [1, 1]} : vector<64x384xbf16> to vector<32x32xbf16>
    %127 = vector.extract_strided_slice %62 {offsets = [0, 224], sizes = [32, 32], strides = [1, 1]} : vector<64x384xbf16> to vector<32x32xbf16>
    %128 = vector.extract_strided_slice %62 {offsets = [0, 352], sizes = [32, 32], strides = [1, 1]} : vector<64x384xbf16> to vector<32x32xbf16>
    %cst_62 = arith.constant dense<0.000000e+00> : vector<32x32xf32>
    %129 = tpu.matmul %126, %127, %cst_62 {dimension_numbers = #tpu.dot_dimension_numbers<[1], [1], [0], [0], [0, 0, 1, 0], [], []>} : vector<32x32xbf16>, vector<32x32xbf16>, vector<32x32xf32> -> vector<32x32xf32>
    %cst_63 = arith.constant 0.176776692 : f32
    %130 = vector.broadcast %cst_63 : f32 to vector<32x32xf32>
    %131 = arith.mulf %129, %130 : vector<32x32xf32>
    %cst_64 = arith.constant -1.000000e+30 : f32
    %132 = vector.broadcast %cst_64 : f32 to vector<32x32xf32>
    %133 = arith.select %29, %131, %132 : vector<32x32xi1>, vector<32x32xf32>
    %cst_65 = arith.constant dense<0xFF800000> : vector<32xf32>
    %134 = vector.multi_reduction <maximumf>, %133, %cst_65 [1] : vector<32x32xf32> to vector<32xf32>
    %135 = vector.shape_cast %134 : vector<32xf32> to vector<32x1xf32>
    %136 = vector.broadcast %135 : vector<32x1xf32> to vector<32x32xf32>
    %137 = arith.subf %133, %136 : vector<32x32xf32>
    %138 = math.exp %137 : vector<32x32xf32>
    %cst_66 = arith.constant dense<0.000000e+00> : vector<32xf32>
    %139 = vector.multi_reduction <add>, %138, %cst_66 [1] : vector<32x32xf32> to vector<32xf32>
    %140 = vector.shape_cast %139 : vector<32xf32> to vector<32x1xf32>
    %141 = tpu.reciprocal %140 {approx = true} : vector<32x1xf32> -> vector<32x1xf32>
    %142 = vector.broadcast %141 : vector<32x1xf32> to vector<32x32xf32>
    %143 = arith.mulf %138, %142 : vector<32x32xf32>
    %144 = arith.truncf %143 : vector<32x32xf32> to vector<32x32xbf16>
    %cst_67 = arith.constant dense<0.000000e+00> : vector<32x32xf32>
    %145 = tpu.matmul %144, %128, %cst_67 {dimension_numbers = #tpu.dot_dimension_numbers<[1], [0], [0], [1], [0, 0, 1, 1], [], []>} : vector<32x32xbf16>, vector<32x32xbf16>, vector<32x32xf32> -> vector<32x32xf32>
    %c0_68 = arith.constant 0 : index
    %c96 = arith.constant 96 : index
    %146 = vector.load %arg25[%c0_68, %c96] : memref<64x128xf32, #tpu.memory_space<vmem>>, vector<32x32xf32>
    tpu.vector_store %arg25[%c0_68, %c96], %145 {strides = array<i32>} : memref<64x128xf32, #tpu.memory_space<vmem>>, vector<32x32xf32>,
    %147 = vector.extract_strided_slice %62 {offsets = [32, 0], sizes = [32, 32], strides = [1, 1]} : vector<64x384xbf16> to vector<32x32xbf16>
    %148 = vector.extract_strided_slice %62 {offsets = [32, 128], sizes = [32, 32], strides = [1, 1]} : vector<64x384xbf16> to vector<32x32xbf16>
    %149 = vector.extract_strided_slice %62 {offsets = [32, 256], sizes = [32, 32], strides = [1, 1]} : vector<64x384xbf16> to vector<32x32xbf16>
    %cst_69 = arith.constant dense<0.000000e+00> : vector<32x32xf32>
    %150 = tpu.matmul %147, %148, %cst_69 {dimension_numbers = #tpu.dot_dimension_numbers<[1], [1], [0], [0], [0, 0, 1, 0], [], []>} : vector<32x32xbf16>, vector<32x32xbf16>, vector<32x32xf32> -> vector<32x32xf32>
    %cst_70 = arith.constant 0.176776692 : f32
    %151 = vector.broadcast %cst_70 : f32 to vector<32x32xf32>
    %152 = arith.mulf %150, %151 : vector<32x32xf32>
    %cst_71 = arith.constant -1.000000e+30 : f32
    %153 = vector.broadcast %cst_71 : f32 to vector<32x32xf32>
    %154 = arith.select %29, %152, %153 : vector<32x32xi1>, vector<32x32xf32>
    %cst_72 = arith.constant dense<0xFF800000> : vector<32xf32>
    %155 = vector.multi_reduction <maximumf>, %154, %cst_72 [1] : vector<32x32xf32> to vector<32xf32>
    %156 = vector.shape_cast %155 : vector<32xf32> to vector<32x1xf32>
    %157 = vector.broadcast %156 : vector<32x1xf32> to vector<32x32xf32>
    %158 = arith.subf %154, %157 : vector<32x32xf32>
    %159 = math.exp %158 : vector<32x32xf32>
    %cst_73 = arith.constant dense<0.000000e+00> : vector<32xf32>
    %160 = vector.multi_reduction <add>, %159, %cst_73 [1] : vector<32x32xf32> to vector<32xf32>
    %161 = vector.shape_cast %160 : vector<32xf32> to vector<32x1xf32>
    %162 = tpu.reciprocal %161 {approx = true} : vector<32x1xf32> -> vector<32x1xf32>
    %163 = vector.broadcast %162 : vector<32x1xf32> to vector<32x32xf32>
    %164 = arith.mulf %159, %163 : vector<32x32xf32>
    %165 = arith.truncf %164 : vector<32x32xf32> to vector<32x32xbf16>
    %cst_74 = arith.constant dense<0.000000e+00> : vector<32x32xf32>
    %166 = tpu.matmul %165, %149, %cst_74 {dimension_numbers = #tpu.dot_dimension_numbers<[1], [0], [0], [1], [0, 0, 1, 1], [], []>} : vector<32x32xbf16>, vector<32x32xbf16>, vector<32x32xf32> -> vector<32x32xf32>
    %c32_75 = arith.constant 32 : index
    %c0_76 = arith.constant 0 : index
    %167 = vector.load %arg25[%c32_75, %c0_76] : memref<64x128xf32, #tpu.memory_space<vmem>>, vector<32x32xf32>
    tpu.vector_store %arg25[%c32_75, %c0_76], %166 {strides = array<i32>} : memref<64x128xf32, #tpu.memory_space<vmem>>, vector<32x32xf32>,
    %168 = vector.extract_strided_slice %62 {offsets = [32, 32], sizes = [32, 32], strides = [1, 1]} : vector<64x384xbf16> to vector<32x32xbf16>
    %169 = vector.extract_strided_slice %62 {offsets = [32, 160], sizes = [32, 32], strides = [1, 1]} : vector<64x384xbf16> to vector<32x32xbf16>
    %170 = vector.extract_strided_slice %62 {offsets = [32, 288], sizes = [32, 32], strides = [1, 1]} : vector<64x384xbf16> to vector<32x32xbf16>
    %cst_77 = arith.constant dense<0.000000e+00> : vector<32x32xf32>
    %171 = tpu.matmul %168, %169, %cst_77 {dimension_numbers = #tpu.dot_dimension_numbers<[1], [1], [0], [0], [0, 0, 1, 0], [], []>} : vector<32x32xbf16>, vector<32x32xbf16>, vector<32x32xf32> -> vector<32x32xf32>
    %cst_78 = arith.constant 0.176776692 : f32
    %172 = vector.broadcast %cst_78 : f32 to vector<32x32xf32>
    %173 = arith.mulf %171, %172 : vector<32x32xf32>
    %cst_79 = arith.constant -1.000000e+30 : f32
    %174 = vector.broadcast %cst_79 : f32 to vector<32x32xf32>
    %175 = arith.select %29, %173, %174 : vector<32x32xi1>, vector<32x32xf32>
    %cst_80 = arith.constant dense<0xFF800000> : vector<32xf32>
    %176 = vector.multi_reduction <maximumf>, %175, %cst_80 [1] : vector<32x32xf32> to vector<32xf32>
    %177 = vector.shape_cast %176 : vector<32xf32> to vector<32x1xf32>
    %178 = vector.broadcast %177 : vector<32x1xf32> to vector<32x32xf32>
    %179 = arith.subf %175, %178 : vector<32x32xf32>
    %180 = math.exp %179 : vector<32x32xf32>
    %cst_81 = arith.constant dense<0.000000e+00> : vector<32xf32>
    %181 = vector.multi_reduction <add>, %180, %cst_81 [1] : vector<32x32xf32> to vector<32xf32>
    %182 = vector.shape_cast %181 : vector<32xf32> to vector<32x1xf32>
    %183 = tpu.reciprocal %182 {approx = true} : vector<32x1xf32> -> vector<32x1xf32>
    %184 = vector.broadcast %183 : vector<32x1xf32> to vector<32x32xf32>
    %185 = arith.mulf %180, %184 : vector<32x32xf32>
    %186 = arith.truncf %185 : vector<32x32xf32> to vector<32x32xbf16>
    %cst_82 = arith.constant dense<0.000000e+00> : vector<32x32xf32>
    %187 = tpu.matmul %186, %170, %cst_82 {dimension_numbers = #tpu.dot_dimension_numbers<[1], [0], [0], [1], [0, 0, 1, 1], [], []>} : vector<32x32xbf16>, vector<32x32xbf16>, vector<32x32xf32> -> vector<32x32xf32>
    %c32_83 = arith.constant 32 : index
    %c32_84 = arith.constant 32 : index
    %188 = vector.load %arg25[%c32_83, %c32_84] : memref<64x128xf32, #tpu.memory_space<vmem>>, vector<32x32xf32>
    tpu.vector_store %arg25[%c32_83, %c32_84], %187 {strides = array<i32>} : memref<64x128xf32, #tpu.memory_space<vmem>>, vector<32x32xf32>,
    %189 = vector.extract_strided_slice %62 {offsets = [32, 64], sizes = [32, 32], strides = [1, 1]} : vector<64x384xbf16> to vector<32x32xbf16>
    %190 = vector.extract_strided_slice %62 {offsets = [32, 192], sizes = [32, 32], strides = [1, 1]} : vector<64x384xbf16> to vector<32x32xbf16>
    %191 = vector.extract_strided_slice %62 {offsets = [32, 320], sizes = [32, 32], strides = [1, 1]} : vector<64x384xbf16> to vector<32x32xbf16>
    %cst_85 = arith.constant dense<0.000000e+00> : vector<32x32xf32>
    %192 = tpu.matmul %189, %190, %cst_85 {dimension_numbers = #tpu.dot_dimension_numbers<[1], [1], [0], [0], [0, 0, 1, 0], [], []>} : vector<32x32xbf16>, vector<32x32xbf16>, vector<32x32xf32> -> vector<32x32xf32>
    %cst_86 = arith.constant 0.176776692 : f32
    %193 = vector.broadcast %cst_86 : f32 to vector<32x32xf32>
    %194 = arith.mulf %192, %193 : vector<32x32xf32>
    %cst_87 = arith.constant -1.000000e+30 : f32
    %195 = vector.broadcast %cst_87 : f32 to vector<32x32xf32>
    %196 = arith.select %29, %194, %195 : vector<32x32xi1>, vector<32x32xf32>
    %cst_88 = arith.constant dense<0xFF800000> : vector<32xf32>
    %197 = vector.multi_reduction <maximumf>, %196, %cst_88 [1] : vector<32x32xf32> to vector<32xf32>
    %198 = vector.shape_cast %197 : vector<32xf32> to vector<32x1xf32>
    %199 = vector.broadcast %198 : vector<32x1xf32> to vector<32x32xf32>
    %200 = arith.subf %196, %199 : vector<32x32xf32>
    %201 = math.exp %200 : vector<32x32xf32>
    %cst_89 = arith.constant dense<0.000000e+00> : vector<32xf32>
    %202 = vector.multi_reduction <add>, %201, %cst_89 [1] : vector<32x32xf32> to vector<32xf32>
    %203 = vector.shape_cast %202 : vector<32xf32> to vector<32x1xf32>
    %204 = tpu.reciprocal %203 {approx = true} : vector<32x1xf32> -> vector<32x1xf32>
    %205 = vector.broadcast %204 : vector<32x1xf32> to vector<32x32xf32>
    %206 = arith.mulf %201, %205 : vector<32x32xf32>
    %207 = arith.truncf %206 : vector<32x32xf32> to vector<32x32xbf16>
    %cst_90 = arith.constant dense<0.000000e+00> : vector<32x32xf32>
    %208 = tpu.matmul %207, %191, %cst_90 {dimension_numbers = #tpu.dot_dimension_numbers<[1], [0], [0], [1], [0, 0, 1, 1], [], []>} : vector<32x32xbf16>, vector<32x32xbf16>, vector<32x32xf32> -> vector<32x32xf32>
    %c32_91 = arith.constant 32 : index
    %c64_92 = arith.constant 64 : index
    %209 = vector.load %arg25[%c32_91, %c64_92] : memref<64x128xf32, #tpu.memory_space<vmem>>, vector<32x32xf32>
    tpu.vector_store %arg25[%c32_91, %c64_92], %208 {strides = array<i32>} : memref<64x128xf32, #tpu.memory_space<vmem>>, vector<32x32xf32>,
    %210 = vector.extract_strided_slice %62 {offsets = [32, 96], sizes = [32, 32], strides = [1, 1]} : vector<64x384xbf16> to vector<32x32xbf16>
    %211 = vector.extract_strided_slice %62 {offsets = [32, 224], sizes = [32, 32], strides = [1, 1]} : vector<64x384xbf16> to vector<32x32xbf16>
    %212 = vector.extract_strided_slice %62 {offsets = [32, 352], sizes = [32, 32], strides = [1, 1]} : vector<64x384xbf16> to vector<32x32xbf16>
    %cst_93 = arith.constant dense<0.000000e+00> : vector<32x32xf32>
    %213 = tpu.matmul %210, %211, %cst_93 {dimension_numbers = #tpu.dot_dimension_numbers<[1], [1], [0], [0], [0, 0, 1, 0], [], []>} : vector<32x32xbf16>, vector<32x32xbf16>, vector<32x32xf32> -> vector<32x32xf32>
    %cst_94 = arith.constant 0.176776692 : f32
    %214 = vector.broadcast %cst_94 : f32 to vector<32x32xf32>
    %215 = arith.mulf %213, %214 : vector<32x32xf32>
    %cst_95 = arith.constant -1.000000e+30 : f32
    %216 = vector.broadcast %cst_95 : f32 to vector<32x32xf32>
    %217 = arith.select %29, %215, %216 : vector<32x32xi1>, vector<32x32xf32>
    %cst_96 = arith.constant dense<0xFF800000> : vector<32xf32>
    %218 = vector.multi_reduction <maximumf>, %217, %cst_96 [1] : vector<32x32xf32> to vector<32xf32>
    %219 = vector.shape_cast %218 : vector<32xf32> to vector<32x1xf32>
    %220 = vector.broadcast %219 : vector<32x1xf32> to vector<32x32xf32>
    %221 = arith.subf %217, %220 : vector<32x32xf32>
    %222 = math.exp %221 : vector<32x32xf32>
    %cst_97 = arith.constant dense<0.000000e+00> : vector<32xf32>
    %223 = vector.multi_reduction <add>, %222, %cst_97 [1] : vector<32x32xf32> to vector<32xf32>
    %224 = vector.shape_cast %223 : vector<32xf32> to vector<32x1xf32>
    %225 = tpu.reciprocal %224 {approx = true} : vector<32x1xf32> -> vector<32x1xf32>
    %226 = vector.broadcast %225 : vector<32x1xf32> to vector<32x32xf32>
    %227 = arith.mulf %222, %226 : vector<32x32xf32>
    %228 = arith.truncf %227 : vector<32x32xf32> to vector<32x32xbf16>
    %cst_98 = arith.constant dense<0.000000e+00> : vector<32x32xf32>
    %229 = tpu.matmul %228, %212, %cst_98 {dimension_numbers = #tpu.dot_dimension_numbers<[1], [0], [0], [1], [0, 0, 1, 1], [], []>} : vector<32x32xbf16>, vector<32x32xbf16>, vector<32x32xf32> -> vector<32x32xf32>
    %c32_99 = arith.constant 32 : index
    %c96_100 = arith.constant 96 : index
    %230 = vector.load %arg25[%c32_99, %c96_100] : memref<64x128xf32, #tpu.memory_space<vmem>>, vector<32x32xf32>
    tpu.vector_store %arg25[%c32_99, %c96_100], %229 {strides = array<i32>} : memref<64x128xf32, #tpu.memory_space<vmem>>, vector<32x32xf32>,
    %c0_101 = arith.constant 0 : index
    %c0_102 = arith.constant 0 : index
    %231 = vector.load %arg25[%c0_101, %c0_102] : memref<64x128xf32, #tpu.memory_space<vmem>>, vector<64x128xf32>
    %c0_103 = arith.constant 0 : index
    %c0_104 = arith.constant 0 : index
    %c0_105 = arith.constant 0 : index
    %232 = vector.load %arg10[%c0_103, %c0_104, %c0_105] : memref<2x128x128xbf16, #tpu.memory_space<vmem>>, vector<1x128x128xbf16>
    %233 = vector.shape_cast %232 : vector<1x128x128xbf16> to vector<128x128xbf16>
    %234 = arith.truncf %231 : vector<64x128xf32> to vector<64x128xbf16>
    %cst_106 = arith.constant dense<0.000000e+00> : vector<64x128xf32>
    %235 = tpu.matmul %234, %233, %cst_106 {dimension_numbers = #tpu.dot_dimension_numbers<[1], [0], [0], [1], [0, 0, 1, 1], [], []>} : vector<64x128xbf16>, vector<128x128xbf16>, vector<64x128xf32> -> vector<64x128xf32>
    %c0_107 = arith.constant 0 : index
    %c0_108 = arith.constant 0 : index
    %c0_109 = arith.constant 0 : index
    %236 = vector.load %arg11[%c0_107, %c0_108, %c0_109] : memref<2x1x128xf32, #tpu.memory_space<vmem>>, vector<1x1x128xf32>
    %237 = vector.shape_cast %236 : vector<1x1x128xf32> to vector<1x128xf32>
    %238 = vector.broadcast %237 : vector<1x128xf32> to vector<64x128xf32>
    %239 = arith.addf %235, %238 : vector<64x128xf32>
    %240 = arith.addf %26, %239 : vector<64x128xf32>
    %c0_110 = arith.constant 0 : index
    %c0_111 = arith.constant 0 : index
    %c0_112 = arith.constant 0 : index
    %241 = vector.load %arg12[%c0_110, %c0_111, %c0_112] : memref<2x1x128xf32, #tpu.memory_space<vmem>>, vector<1x1x128xf32>
    %242 = vector.shape_cast %241 : vector<1x1x128xf32> to vector<1x128xf32>
    %c0_113 = arith.constant 0 : index
    %c0_114 = arith.constant 0 : index
    %c0_115 = arith.constant 0 : index
    %243 = vector.load %arg13[%c0_113, %c0_114, %c0_115] : memref<2x1x128xf32, #tpu.memory_space<vmem>>, vector<1x1x128xf32>
    %244 = vector.shape_cast %243 : vector<1x1x128xf32> to vector<1x128xf32>
    %cst_116 = arith.constant dense<0.000000e+00> : vector<64xf32>
    %245 = vector.multi_reduction <add>, %240, %cst_116 [1] : vector<64x128xf32> to vector<64xf32>
    %246 = vector.shape_cast %245 : vector<64xf32> to vector<64x1xf32>
    %cst_117 = arith.constant 1.280000e+02 : f32
    %247 = vector.broadcast %cst_117 : f32 to vector<64x1xf32>
    %248 = arith.divf %246, %247 : vector<64x1xf32>
    %249 = vector.broadcast %248 : vector<64x1xf32> to vector<64x128xf32>
    %250 = arith.subf %240, %249 : vector<64x128xf32>
    %251 = arith.mulf %250, %250 : vector<64x128xf32>
    %cst_118 = arith.constant dense<0.000000e+00> : vector<64xf32>
    %252 = vector.multi_reduction <add>, %251, %cst_118 [1] : vector<64x128xf32> to vector<64xf32>
    %253 = vector.shape_cast %252 : vector<64xf32> to vector<64x1xf32>
    %cst_119 = arith.constant 1.280000e+02 : f32
    %254 = vector.broadcast %cst_119 : f32 to vector<64x1xf32>
    %255 = arith.divf %253, %254 : vector<64x1xf32>
    %cst_120 = arith.constant 9.99999974E-6 : f32
    %256 = vector.broadcast %cst_120 : f32 to vector<64x1xf32>
    %257 = arith.addf %255, %256 : vector<64x1xf32>
    %258 = math.rsqrt %257 : vector<64x1xf32>
    %259 = vector.broadcast %258 : vector<64x1xf32> to vector<64x128xf32>
    %260 = arith.mulf %250, %259 : vector<64x128xf32>
    %261 = vector.broadcast %242 : vector<1x128xf32> to vector<64x128xf32>
    %262 = arith.mulf %260, %261 : vector<64x128xf32>
    %263 = vector.broadcast %244 : vector<1x128xf32> to vector<64x128xf32>
    %264 = arith.addf %262, %263 : vector<64x128xf32>
    %c0_121 = arith.constant 0 : index
    %c0_122 = arith.constant 0 : index
    %c0_123 = arith.constant 0 : index
    %265 = vector.load %arg14[%c0_121, %c0_122, %c0_123] : memref<2x128x512xbf16, #tpu.memory_space<vmem>>, vector<1x128x512xbf16>
    %266 = vector.shape_cast %265 : vector<1x128x512xbf16> to vector<128x512xbf16>
    %267 = arith.truncf %264 : vector<64x128xf32> to vector<64x128xbf16>
    %cst_124 = arith.constant dense<0.000000e+00> : vector<64x512xf32>
    %268 = tpu.matmul %267, %266, %cst_124 {dimension_numbers = #tpu.dot_dimension_numbers<[1], [0], [0], [1], [0, 0, 1, 1], [], []>} : vector<64x128xbf16>, vector<128x512xbf16>, vector<64x512xf32> -> vector<64x512xf32>
    %c0_125 = arith.constant 0 : index
    %c0_126 = arith.constant 0 : index
    %c0_127 = arith.constant 0 : index
    %269 = vector.load %arg15[%c0_125, %c0_126, %c0_127] : memref<2x1x512xf32, #tpu.memory_space<vmem>>, vector<1x1x512xf32>
    %270 = vector.shape_cast %269 : vector<1x1x512xf32> to vector<1x512xf32>
    %271 = vector.broadcast %270 : vector<1x512xf32> to vector<64x512xf32>
    %272 = arith.addf %268, %271 : vector<64x512xf32>
    %cst_128 = arith.constant 5.000000e-01 : f32
    %273 = vector.broadcast %cst_128 : f32 to vector<64x512xf32>
    %274 = arith.mulf %273, %272 : vector<64x512xf32>
    %cst_129 = arith.constant 0.707106769 : f32
    %275 = vector.broadcast %cst_129 : f32 to vector<64x512xf32>
    %276 = arith.mulf %272, %275 : vector<64x512xf32>
    %277 = math.erf %276 : vector<64x512xf32>
    %cst_130 = arith.constant 1.000000e+00 : f32
    %278 = vector.broadcast %cst_130 : f32 to vector<64x512xf32>
    %279 = arith.addf %278, %277 : vector<64x512xf32>
    %280 = arith.mulf %274, %279 : vector<64x512xf32>
    %c0_131 = arith.constant 0 : index
    %c0_132 = arith.constant 0 : index
    %c0_133 = arith.constant 0 : index
    %281 = vector.load %arg16[%c0_131, %c0_132, %c0_133] : memref<2x512x128xbf16, #tpu.memory_space<vmem>>, vector<1x512x128xbf16>
    %282 = vector.shape_cast %281 : vector<1x512x128xbf16> to vector<512x128xbf16>
    %283 = arith.truncf %280 : vector<64x512xf32> to vector<64x512xbf16>
    %cst_134 = arith.constant dense<0.000000e+00> : vector<64x128xf32>
    %284 = tpu.matmul %283, %282, %cst_134 {dimension_numbers = #tpu.dot_dimension_numbers<[1], [0], [0], [1], [0, 0, 1, 1], [], []>} : vector<64x512xbf16>, vector<512x128xbf16>, vector<64x128xf32> -> vector<64x128xf32>
    %285 = arith.addf %240, %284 : vector<64x128xf32>
    %c0_135 = arith.constant 0 : index
    %c0_136 = arith.constant 0 : index
    %c0_137 = arith.constant 0 : index
    %286 = vector.load %arg17[%c0_135, %c0_136, %c0_137] : memref<2x1x128xf32, #tpu.memory_space<vmem>>, vector<1x1x128xf32>
    %287 = vector.shape_cast %286 : vector<1x1x128xf32> to vector<1x128xf32>
    %288 = vector.broadcast %287 : vector<1x128xf32> to vector<64x128xf32>
    %289 = arith.addf %285, %288 : vector<64x128xf32>
    %c1_138 = arith.constant 1 : index
    %c0_139 = arith.constant 0 : index
    %c0_140 = arith.constant 0 : index
    %290 = vector.load %arg6[%c1_138, %c0_139, %c0_140] : memref<2x1x128xf32, #tpu.memory_space<vmem>>, vector<1x1x128xf32>
    %291 = vector.shape_cast %290 : vector<1x1x128xf32> to vector<1x128xf32>
    %c1_141 = arith.constant 1 : index
    %c0_142 = arith.constant 0 : index
    %c0_143 = arith.constant 0 : index
    %292 = vector.load %arg7[%c1_141, %c0_142, %c0_143] : memref<2x1x128xf32, #tpu.memory_space<vmem>>, vector<1x1x128xf32>
    %293 = vector.shape_cast %292 : vector<1x1x128xf32> to vector<1x128xf32>
    %cst_144 = arith.constant dense<0.000000e+00> : vector<64xf32>
    %294 = vector.multi_reduction <add>, %289, %cst_144 [1] : vector<64x128xf32> to vector<64xf32>
    %295 = vector.shape_cast %294 : vector<64xf32> to vector<64x1xf32>
    %cst_145 = arith.constant 1.280000e+02 : f32
    %296 = vector.broadcast %cst_145 : f32 to vector<64x1xf32>
    %297 = arith.divf %295, %296 : vector<64x1xf32>
    %298 = vector.broadcast %297 : vector<64x1xf32> to vector<64x128xf32>
    %299 = arith.subf %289, %298 : vector<64x128xf32>
    %300 = arith.mulf %299, %299 : vector<64x128xf32>
    %cst_146 = arith.constant dense<0.000000e+00> : vector<64xf32>
    %301 = vector.multi_reduction <add>, %300, %cst_146 [1] : vector<64x128xf32> to vector<64xf32>
    %302 = vector.shape_cast %301 : vector<64xf32> to vector<64x1xf32>
    %cst_147 = arith.constant 1.280000e+02 : f32
    %303 = vector.broadcast %cst_147 : f32 to vector<64x1xf32>
    %304 = arith.divf %302, %303 : vector<64x1xf32>
    %cst_148 = arith.constant 9.99999974E-6 : f32
    %305 = vector.broadcast %cst_148 : f32 to vector<64x1xf32>
    %306 = arith.addf %304, %305 : vector<64x1xf32>
    %307 = math.rsqrt %306 : vector<64x1xf32>
    %308 = vector.broadcast %307 : vector<64x1xf32> to vector<64x128xf32>
    %309 = arith.mulf %299, %308 : vector<64x128xf32>
    %310 = vector.broadcast %291 : vector<1x128xf32> to vector<64x128xf32>
    %311 = arith.mulf %309, %310 : vector<64x128xf32>
    %312 = vector.broadcast %293 : vector<1x128xf32> to vector<64x128xf32>
    %313 = arith.addf %311, %312 : vector<64x128xf32>
    %c1_149 = arith.constant 1 : index
    %c0_150 = arith.constant 0 : index
    %c0_151 = arith.constant 0 : index
    %314 = vector.load %arg8[%c1_149, %c0_150, %c0_151] : memref<2x128x384xbf16, #tpu.memory_space<vmem>>, vector<1x128x384xbf16>
    %315 = vector.shape_cast %314 : vector<1x128x384xbf16> to vector<128x384xbf16>
    %316 = arith.truncf %313 : vector<64x128xf32> to vector<64x128xbf16>
    %cst_152 = arith.constant dense<0.000000e+00> : vector<64x384xf32>
    %317 = tpu.matmul %316, %315, %cst_152 {dimension_numbers = #tpu.dot_dimension_numbers<[1], [0], [0], [1], [0, 0, 1, 1], [], []>} : vector<64x128xbf16>, vector<128x384xbf16>, vector<64x384xf32> -> vector<64x384xf32>
    %c1_153 = arith.constant 1 : index
    %c0_154 = arith.constant 0 : index
    %c0_155 = arith.constant 0 : index
    %318 = vector.load %arg9[%c1_153, %c0_154, %c0_155] : memref<2x1x384xf32, #tpu.memory_space<vmem>>, vector<1x1x384xf32>
    %319 = vector.shape_cast %318 : vector<1x1x384xf32> to vector<1x384xf32>
    %320 = vector.broadcast %319 : vector<1x384xf32> to vector<64x384xf32>
    %321 = arith.addf %317, %320 : vector<64x384xf32>
    %322 = arith.truncf %321 : vector<64x384xf32> to vector<64x384xbf16>
    %323 = vector.extract_strided_slice %322 {offsets = [0, 0], sizes = [32, 32], strides = [1, 1]} : vector<64x384xbf16> to vector<32x32xbf16>
    %324 = vector.extract_strided_slice %322 {offsets = [0, 128], sizes = [32, 32], strides = [1, 1]} : vector<64x384xbf16> to vector<32x32xbf16>
    %325 = vector.extract_strided_slice %322 {offsets = [0, 256], sizes = [32, 32], strides = [1, 1]} : vector<64x384xbf16> to vector<32x32xbf16>
    %cst_156 = arith.constant dense<0.000000e+00> : vector<32x32xf32>
    %326 = tpu.matmul %323, %324, %cst_156 {dimension_numbers = #tpu.dot_dimension_numbers<[1], [1], [0], [0], [0, 0, 1, 0], [], []>} : vector<32x32xbf16>, vector<32x32xbf16>, vector<32x32xf32> -> vector<32x32xf32>
    %cst_157 = arith.constant 0.176776692 : f32
    %327 = vector.broadcast %cst_157 : f32 to vector<32x32xf32>
    %328 = arith.mulf %326, %327 : vector<32x32xf32>
    %cst_158 = arith.constant -1.000000e+30 : f32
    %329 = vector.broadcast %cst_158 : f32 to vector<32x32xf32>
    %330 = arith.select %29, %328, %329 : vector<32x32xi1>, vector<32x32xf32>
    %cst_159 = arith.constant dense<0xFF800000> : vector<32xf32>
    %331 = vector.multi_reduction <maximumf>, %330, %cst_159 [1] : vector<32x32xf32> to vector<32xf32>
    %332 = vector.shape_cast %331 : vector<32xf32> to vector<32x1xf32>
    %333 = vector.broadcast %332 : vector<32x1xf32> to vector<32x32xf32>
    %334 = arith.subf %330, %333 : vector<32x32xf32>
    %335 = math.exp %334 : vector<32x32xf32>
    %cst_160 = arith.constant dense<0.000000e+00> : vector<32xf32>
    %336 = vector.multi_reduction <add>, %335, %cst_160 [1] : vector<32x32xf32> to vector<32xf32>
    %337 = vector.shape_cast %336 : vector<32xf32> to vector<32x1xf32>
    %338 = tpu.reciprocal %337 {approx = true} : vector<32x1xf32> -> vector<32x1xf32>
    %339 = vector.broadcast %338 : vector<32x1xf32> to vector<32x32xf32>
    %340 = arith.mulf %335, %339 : vector<32x32xf32>
    %341 = arith.truncf %340 : vector<32x32xf32> to vector<32x32xbf16>
    %cst_161 = arith.constant dense<0.000000e+00> : vector<32x32xf32>
    %342 = tpu.matmul %341, %325, %cst_161 {dimension_numbers = #tpu.dot_dimension_numbers<[1], [0], [0], [1], [0, 0, 1, 1], [], []>} : vector<32x32xbf16>, vector<32x32xbf16>, vector<32x32xf32> -> vector<32x32xf32>
    %c0_162 = arith.constant 0 : index
    %c0_163 = arith.constant 0 : index
    %343 = vector.load %arg25[%c0_162, %c0_163] : memref<64x128xf32, #tpu.memory_space<vmem>>, vector<32x32xf32>
    tpu.vector_store %arg25[%c0_162, %c0_163], %342 {strides = array<i32>} : memref<64x128xf32, #tpu.memory_space<vmem>>, vector<32x32xf32>,
    %344 = vector.extract_strided_slice %322 {offsets = [0, 32], sizes = [32, 32], strides = [1, 1]} : vector<64x384xbf16> to vector<32x32xbf16>
    %345 = vector.extract_strided_slice %322 {offsets = [0, 160], sizes = [32, 32], strides = [1, 1]} : vector<64x384xbf16> to vector<32x32xbf16>
    %346 = vector.extract_strided_slice %322 {offsets = [0, 288], sizes = [32, 32], strides = [1, 1]} : vector<64x384xbf16> to vector<32x32xbf16>
    %cst_164 = arith.constant dense<0.000000e+00> : vector<32x32xf32>
    %347 = tpu.matmul %344, %345, %cst_164 {dimension_numbers = #tpu.dot_dimension_numbers<[1], [1], [0], [0], [0, 0, 1, 0], [], []>} : vector<32x32xbf16>, vector<32x32xbf16>, vector<32x32xf32> -> vector<32x32xf32>
    %cst_165 = arith.constant 0.176776692 : f32
    %348 = vector.broadcast %cst_165 : f32 to vector<32x32xf32>
    %349 = arith.mulf %347, %348 : vector<32x32xf32>
    %cst_166 = arith.constant -1.000000e+30 : f32
    %350 = vector.broadcast %cst_166 : f32 to vector<32x32xf32>
    %351 = arith.select %29, %349, %350 : vector<32x32xi1>, vector<32x32xf32>
    %cst_167 = arith.constant dense<0xFF800000> : vector<32xf32>
    %352 = vector.multi_reduction <maximumf>, %351, %cst_167 [1] : vector<32x32xf32> to vector<32xf32>
    %353 = vector.shape_cast %352 : vector<32xf32> to vector<32x1xf32>
    %354 = vector.broadcast %353 : vector<32x1xf32> to vector<32x32xf32>
    %355 = arith.subf %351, %354 : vector<32x32xf32>
    %356 = math.exp %355 : vector<32x32xf32>
    %cst_168 = arith.constant dense<0.000000e+00> : vector<32xf32>
    %357 = vector.multi_reduction <add>, %356, %cst_168 [1] : vector<32x32xf32> to vector<32xf32>
    %358 = vector.shape_cast %357 : vector<32xf32> to vector<32x1xf32>
    %359 = tpu.reciprocal %358 {approx = true} : vector<32x1xf32> -> vector<32x1xf32>
    %360 = vector.broadcast %359 : vector<32x1xf32> to vector<32x32xf32>
    %361 = arith.mulf %356, %360 : vector<32x32xf32>
    %362 = arith.truncf %361 : vector<32x32xf32> to vector<32x32xbf16>
    %cst_169 = arith.constant dense<0.000000e+00> : vector<32x32xf32>
    %363 = tpu.matmul %362, %346, %cst_169 {dimension_numbers = #tpu.dot_dimension_numbers<[1], [0], [0], [1], [0, 0, 1, 1], [], []>} : vector<32x32xbf16>, vector<32x32xbf16>, vector<32x32xf32> -> vector<32x32xf32>
    %c0_170 = arith.constant 0 : index
    %c32_171 = arith.constant 32 : index
    %364 = vector.load %arg25[%c0_170, %c32_171] : memref<64x128xf32, #tpu.memory_space<vmem>>, vector<32x32xf32>
    tpu.vector_store %arg25[%c0_170, %c32_171], %363 {strides = array<i32>} : memref<64x128xf32, #tpu.memory_space<vmem>>, vector<32x32xf32>,
    %365 = vector.extract_strided_slice %322 {offsets = [0, 64], sizes = [32, 32], strides = [1, 1]} : vector<64x384xbf16> to vector<32x32xbf16>
    %366 = vector.extract_strided_slice %322 {offsets = [0, 192], sizes = [32, 32], strides = [1, 1]} : vector<64x384xbf16> to vector<32x32xbf16>
    %367 = vector.extract_strided_slice %322 {offsets = [0, 320], sizes = [32, 32], strides = [1, 1]} : vector<64x384xbf16> to vector<32x32xbf16>
    %cst_172 = arith.constant dense<0.000000e+00> : vector<32x32xf32>
    %368 = tpu.matmul %365, %366, %cst_172 {dimension_numbers = #tpu.dot_dimension_numbers<[1], [1], [0], [0], [0, 0, 1, 0], [], []>} : vector<32x32xbf16>, vector<32x32xbf16>, vector<32x32xf32> -> vector<32x32xf32>
    %cst_173 = arith.constant 0.176776692 : f32
    %369 = vector.broadcast %cst_173 : f32 to vector<32x32xf32>
    %370 = arith.mulf %368, %369 : vector<32x32xf32>
    %cst_174 = arith.constant -1.000000e+30 : f32
    %371 = vector.broadcast %cst_174 : f32 to vector<32x32xf32>
    %372 = arith.select %29, %370, %371 : vector<32x32xi1>, vector<32x32xf32>
    %cst_175 = arith.constant dense<0xFF800000> : vector<32xf32>
    %373 = vector.multi_reduction <maximumf>, %372, %cst_175 [1] : vector<32x32xf32> to vector<32xf32>
    %374 = vector.shape_cast %373 : vector<32xf32> to vector<32x1xf32>
    %375 = vector.broadcast %374 : vector<32x1xf32> to vector<32x32xf32>
    %376 = arith.subf %372, %375 : vector<32x32xf32>
    %377 = math.exp %376 : vector<32x32xf32>
    %cst_176 = arith.constant dense<0.000000e+00> : vector<32xf32>
    %378 = vector.multi_reduction <add>, %377, %cst_176 [1] : vector<32x32xf32> to vector<32xf32>
    %379 = vector.shape_cast %378 : vector<32xf32> to vector<32x1xf32>
    %380 = tpu.reciprocal %379 {approx = true} : vector<32x1xf32> -> vector<32x1xf32>
    %381 = vector.broadcast %380 : vector<32x1xf32> to vector<32x32xf32>
    %382 = arith.mulf %377, %381 : vector<32x32xf32>
    %383 = arith.truncf %382 : vector<32x32xf32> to vector<32x32xbf16>
    %cst_177 = arith.constant dense<0.000000e+00> : vector<32x32xf32>
    %384 = tpu.matmul %383, %367, %cst_177 {dimension_numbers = #tpu.dot_dimension_numbers<[1], [0], [0], [1], [0, 0, 1, 1], [], []>} : vector<32x32xbf16>, vector<32x32xbf16>, vector<32x32xf32> -> vector<32x32xf32>
    %c0_178 = arith.constant 0 : index
    %c64_179 = arith.constant 64 : index
    %385 = vector.load %arg25[%c0_178, %c64_179] : memref<64x128xf32, #tpu.memory_space<vmem>>, vector<32x32xf32>
    tpu.vector_store %arg25[%c0_178, %c64_179], %384 {strides = array<i32>} : memref<64x128xf32, #tpu.memory_space<vmem>>, vector<32x32xf32>,
    %386 = vector.extract_strided_slice %322 {offsets = [0, 96], sizes = [32, 32], strides = [1, 1]} : vector<64x384xbf16> to vector<32x32xbf16>
    %387 = vector.extract_strided_slice %322 {offsets = [0, 224], sizes = [32, 32], strides = [1, 1]} : vector<64x384xbf16> to vector<32x32xbf16>
    %388 = vector.extract_strided_slice %322 {offsets = [0, 352], sizes = [32, 32], strides = [1, 1]} : vector<64x384xbf16> to vector<32x32xbf16>
    %cst_180 = arith.constant dense<0.000000e+00> : vector<32x32xf32>
    %389 = tpu.matmul %386, %387, %cst_180 {dimension_numbers = #tpu.dot_dimension_numbers<[1], [1], [0], [0], [0, 0, 1, 0], [], []>} : vector<32x32xbf16>, vector<32x32xbf16>, vector<32x32xf32> -> vector<32x32xf32>
    %cst_181 = arith.constant 0.176776692 : f32
    %390 = vector.broadcast %cst_181 : f32 to vector<32x32xf32>
    %391 = arith.mulf %389, %390 : vector<32x32xf32>
    %cst_182 = arith.constant -1.000000e+30 : f32
    %392 = vector.broadcast %cst_182 : f32 to vector<32x32xf32>
    %393 = arith.select %29, %391, %392 : vector<32x32xi1>, vector<32x32xf32>
    %cst_183 = arith.constant dense<0xFF800000> : vector<32xf32>
    %394 = vector.multi_reduction <maximumf>, %393, %cst_183 [1] : vector<32x32xf32> to vector<32xf32>
    %395 = vector.shape_cast %394 : vector<32xf32> to vector<32x1xf32>
    %396 = vector.broadcast %395 : vector<32x1xf32> to vector<32x32xf32>
    %397 = arith.subf %393, %396 : vector<32x32xf32>
    %398 = math.exp %397 : vector<32x32xf32>
    %cst_184 = arith.constant dense<0.000000e+00> : vector<32xf32>
    %399 = vector.multi_reduction <add>, %398, %cst_184 [1] : vector<32x32xf32> to vector<32xf32>
    %400 = vector.shape_cast %399 : vector<32xf32> to vector<32x1xf32>
    %401 = tpu.reciprocal %400 {approx = true} : vector<32x1xf32> -> vector<32x1xf32>
    %402 = vector.broadcast %401 : vector<32x1xf32> to vector<32x32xf32>
    %403 = arith.mulf %398, %402 : vector<32x32xf32>
    %404 = arith.truncf %403 : vector<32x32xf32> to vector<32x32xbf16>
    %cst_185 = arith.constant dense<0.000000e+00> : vector<32x32xf32>
    %405 = tpu.matmul %404, %388, %cst_185 {dimension_numbers = #tpu.dot_dimension_numbers<[1], [0], [0], [1], [0, 0, 1, 1], [], []>} : vector<32x32xbf16>, vector<32x32xbf16>, vector<32x32xf32> -> vector<32x32xf32>
    %c0_186 = arith.constant 0 : index
    %c96_187 = arith.constant 96 : index
    %406 = vector.load %arg25[%c0_186, %c96_187] : memref<64x128xf32, #tpu.memory_space<vmem>>, vector<32x32xf32>
    tpu.vector_store %arg25[%c0_186, %c96_187], %405 {strides = array<i32>} : memref<64x128xf32, #tpu.memory_space<vmem>>, vector<32x32xf32>,
    %407 = vector.extract_strided_slice %322 {offsets = [32, 0], sizes = [32, 32], strides = [1, 1]} : vector<64x384xbf16> to vector<32x32xbf16>
    %408 = vector.extract_strided_slice %322 {offsets = [32, 128], sizes = [32, 32], strides = [1, 1]} : vector<64x384xbf16> to vector<32x32xbf16>
    %409 = vector.extract_strided_slice %322 {offsets = [32, 256], sizes = [32, 32], strides = [1, 1]} : vector<64x384xbf16> to vector<32x32xbf16>
    %cst_188 = arith.constant dense<0.000000e+00> : vector<32x32xf32>
    %410 = tpu.matmul %407, %408, %cst_188 {dimension_numbers = #tpu.dot_dimension_numbers<[1], [1], [0], [0], [0, 0, 1, 0], [], []>} : vector<32x32xbf16>, vector<32x32xbf16>, vector<32x32xf32> -> vector<32x32xf32>
    %cst_189 = arith.constant 0.176776692 : f32
    %411 = vector.broadcast %cst_189 : f32 to vector<32x32xf32>
    %412 = arith.mulf %410, %411 : vector<32x32xf32>
    %cst_190 = arith.constant -1.000000e+30 : f32
    %413 = vector.broadcast %cst_190 : f32 to vector<32x32xf32>
    %414 = arith.select %29, %412, %413 : vector<32x32xi1>, vector<32x32xf32>
    %cst_191 = arith.constant dense<0xFF800000> : vector<32xf32>
    %415 = vector.multi_reduction <maximumf>, %414, %cst_191 [1] : vector<32x32xf32> to vector<32xf32>
    %416 = vector.shape_cast %415 : vector<32xf32> to vector<32x1xf32>
    %417 = vector.broadcast %416 : vector<32x1xf32> to vector<32x32xf32>
    %418 = arith.subf %414, %417 : vector<32x32xf32>
    %419 = math.exp %418 : vector<32x32xf32>
    %cst_192 = arith.constant dense<0.000000e+00> : vector<32xf32>
    %420 = vector.multi_reduction <add>, %419, %cst_192 [1] : vector<32x32xf32> to vector<32xf32>
    %421 = vector.shape_cast %420 : vector<32xf32> to vector<32x1xf32>
    %422 = tpu.reciprocal %421 {approx = true} : vector<32x1xf32> -> vector<32x1xf32>
    %423 = vector.broadcast %422 : vector<32x1xf32> to vector<32x32xf32>
    %424 = arith.mulf %419, %423 : vector<32x32xf32>
    %425 = arith.truncf %424 : vector<32x32xf32> to vector<32x32xbf16>
    %cst_193 = arith.constant dense<0.000000e+00> : vector<32x32xf32>
    %426 = tpu.matmul %425, %409, %cst_193 {dimension_numbers = #tpu.dot_dimension_numbers<[1], [0], [0], [1], [0, 0, 1, 1], [], []>} : vector<32x32xbf16>, vector<32x32xbf16>, vector<32x32xf32> -> vector<32x32xf32>
    %c32_194 = arith.constant 32 : index
    %c0_195 = arith.constant 0 : index
    %427 = vector.load %arg25[%c32_194, %c0_195] : memref<64x128xf32, #tpu.memory_space<vmem>>, vector<32x32xf32>
    tpu.vector_store %arg25[%c32_194, %c0_195], %426 {strides = array<i32>} : memref<64x128xf32, #tpu.memory_space<vmem>>, vector<32x32xf32>,
    %428 = vector.extract_strided_slice %322 {offsets = [32, 32], sizes = [32, 32], strides = [1, 1]} : vector<64x384xbf16> to vector<32x32xbf16>
    %429 = vector.extract_strided_slice %322 {offsets = [32, 160], sizes = [32, 32], strides = [1, 1]} : vector<64x384xbf16> to vector<32x32xbf16>
    %430 = vector.extract_strided_slice %322 {offsets = [32, 288], sizes = [32, 32], strides = [1, 1]} : vector<64x384xbf16> to vector<32x32xbf16>
    %cst_196 = arith.constant dense<0.000000e+00> : vector<32x32xf32>
    %431 = tpu.matmul %428, %429, %cst_196 {dimension_numbers = #tpu.dot_dimension_numbers<[1], [1], [0], [0], [0, 0, 1, 0], [], []>} : vector<32x32xbf16>, vector<32x32xbf16>, vector<32x32xf32> -> vector<32x32xf32>
    %cst_197 = arith.constant 0.176776692 : f32
    %432 = vector.broadcast %cst_197 : f32 to vector<32x32xf32>
    %433 = arith.mulf %431, %432 : vector<32x32xf32>
    %cst_198 = arith.constant -1.000000e+30 : f32
    %434 = vector.broadcast %cst_198 : f32 to vector<32x32xf32>
    %435 = arith.select %29, %433, %434 : vector<32x32xi1>, vector<32x32xf32>
    %cst_199 = arith.constant dense<0xFF800000> : vector<32xf32>
    %436 = vector.multi_reduction <maximumf>, %435, %cst_199 [1] : vector<32x32xf32> to vector<32xf32>
    %437 = vector.shape_cast %436 : vector<32xf32> to vector<32x1xf32>
    %438 = vector.broadcast %437 : vector<32x1xf32> to vector<32x32xf32>
    %439 = arith.subf %435, %438 : vector<32x32xf32>
    %440 = math.exp %439 : vector<32x32xf32>
    %cst_200 = arith.constant dense<0.000000e+00> : vector<32xf32>
    %441 = vector.multi_reduction <add>, %440, %cst_200 [1] : vector<32x32xf32> to vector<32xf32>
    %442 = vector.shape_cast %441 : vector<32xf32> to vector<32x1xf32>
    %443 = tpu.reciprocal %442 {approx = true} : vector<32x1xf32> -> vector<32x1xf32>
    %444 = vector.broadcast %443 : vector<32x1xf32> to vector<32x32xf32>
    %445 = arith.mulf %440, %444 : vector<32x32xf32>
    %446 = arith.truncf %445 : vector<32x32xf32> to vector<32x32xbf16>
    %cst_201 = arith.constant dense<0.000000e+00> : vector<32x32xf32>
    %447 = tpu.matmul %446, %430, %cst_201 {dimension_numbers = #tpu.dot_dimension_numbers<[1], [0], [0], [1], [0, 0, 1, 1], [], []>} : vector<32x32xbf16>, vector<32x32xbf16>, vector<32x32xf32> -> vector<32x32xf32>
    %c32_202 = arith.constant 32 : index
    %c32_203 = arith.constant 32 : index
    %448 = vector.load %arg25[%c32_202, %c32_203] : memref<64x128xf32, #tpu.memory_space<vmem>>, vector<32x32xf32>
    tpu.vector_store %arg25[%c32_202, %c32_203], %447 {strides = array<i32>} : memref<64x128xf32, #tpu.memory_space<vmem>>, vector<32x32xf32>,
    %449 = vector.extract_strided_slice %322 {offsets = [32, 64], sizes = [32, 32], strides = [1, 1]} : vector<64x384xbf16> to vector<32x32xbf16>
    %450 = vector.extract_strided_slice %322 {offsets = [32, 192], sizes = [32, 32], strides = [1, 1]} : vector<64x384xbf16> to vector<32x32xbf16>
    %451 = vector.extract_strided_slice %322 {offsets = [32, 320], sizes = [32, 32], strides = [1, 1]} : vector<64x384xbf16> to vector<32x32xbf16>
    %cst_204 = arith.constant dense<0.000000e+00> : vector<32x32xf32>
    %452 = tpu.matmul %449, %450, %cst_204 {dimension_numbers = #tpu.dot_dimension_numbers<[1], [1], [0], [0], [0, 0, 1, 0], [], []>} : vector<32x32xbf16>, vector<32x32xbf16>, vector<32x32xf32> -> vector<32x32xf32>
    %cst_205 = arith.constant 0.176776692 : f32
    %453 = vector.broadcast %cst_205 : f32 to vector<32x32xf32>
    %454 = arith.mulf %452, %453 : vector<32x32xf32>
    %cst_206 = arith.constant -1.000000e+30 : f32
    %455 = vector.broadcast %cst_206 : f32 to vector<32x32xf32>
    %456 = arith.select %29, %454, %455 : vector<32x32xi1>, vector<32x32xf32>
    %cst_207 = arith.constant dense<0xFF800000> : vector<32xf32>
    %457 = vector.multi_reduction <maximumf>, %456, %cst_207 [1] : vector<32x32xf32> to vector<32xf32>
    %458 = vector.shape_cast %457 : vector<32xf32> to vector<32x1xf32>
    %459 = vector.broadcast %458 : vector<32x1xf32> to vector<32x32xf32>
    %460 = arith.subf %456, %459 : vector<32x32xf32>
    %461 = math.exp %460 : vector<32x32xf32>
    %cst_208 = arith.constant dense<0.000000e+00> : vector<32xf32>
    %462 = vector.multi_reduction <add>, %461, %cst_208 [1] : vector<32x32xf32> to vector<32xf32>
    %463 = vector.shape_cast %462 : vector<32xf32> to vector<32x1xf32>
    %464 = tpu.reciprocal %463 {approx = true} : vector<32x1xf32> -> vector<32x1xf32>
    %465 = vector.broadcast %464 : vector<32x1xf32> to vector<32x32xf32>
    %466 = arith.mulf %461, %465 : vector<32x32xf32>
    %467 = arith.truncf %466 : vector<32x32xf32> to vector<32x32xbf16>
    %cst_209 = arith.constant dense<0.000000e+00> : vector<32x32xf32>
    %468 = tpu.matmul %467, %451, %cst_209 {dimension_numbers = #tpu.dot_dimension_numbers<[1], [0], [0], [1], [0, 0, 1, 1], [], []>} : vector<32x32xbf16>, vector<32x32xbf16>, vector<32x32xf32> -> vector<32x32xf32>
    %c32_210 = arith.constant 32 : index
    %c64_211 = arith.constant 64 : index
    %469 = vector.load %arg25[%c32_210, %c64_211] : memref<64x128xf32, #tpu.memory_space<vmem>>, vector<32x32xf32>
    tpu.vector_store %arg25[%c32_210, %c64_211], %468 {strides = array<i32>} : memref<64x128xf32, #tpu.memory_space<vmem>>, vector<32x32xf32>,
    %470 = vector.extract_strided_slice %322 {offsets = [32, 96], sizes = [32, 32], strides = [1, 1]} : vector<64x384xbf16> to vector<32x32xbf16>
    %471 = vector.extract_strided_slice %322 {offsets = [32, 224], sizes = [32, 32], strides = [1, 1]} : vector<64x384xbf16> to vector<32x32xbf16>
    %472 = vector.extract_strided_slice %322 {offsets = [32, 352], sizes = [32, 32], strides = [1, 1]} : vector<64x384xbf16> to vector<32x32xbf16>
    %cst_212 = arith.constant dense<0.000000e+00> : vector<32x32xf32>
    %473 = tpu.matmul %470, %471, %cst_212 {dimension_numbers = #tpu.dot_dimension_numbers<[1], [1], [0], [0], [0, 0, 1, 0], [], []>} : vector<32x32xbf16>, vector<32x32xbf16>, vector<32x32xf32> -> vector<32x32xf32>
    %cst_213 = arith.constant 0.176776692 : f32
    %474 = vector.broadcast %cst_213 : f32 to vector<32x32xf32>
    %475 = arith.mulf %473, %474 : vector<32x32xf32>
    %cst_214 = arith.constant -1.000000e+30 : f32
    %476 = vector.broadcast %cst_214 : f32 to vector<32x32xf32>
    %477 = arith.select %29, %475, %476 : vector<32x32xi1>, vector<32x32xf32>
    %cst_215 = arith.constant dense<0xFF800000> : vector<32xf32>
    %478 = vector.multi_reduction <maximumf>, %477, %cst_215 [1] : vector<32x32xf32> to vector<32xf32>
    %479 = vector.shape_cast %478 : vector<32xf32> to vector<32x1xf32>
    %480 = vector.broadcast %479 : vector<32x1xf32> to vector<32x32xf32>
    %481 = arith.subf %477, %480 : vector<32x32xf32>
    %482 = math.exp %481 : vector<32x32xf32>
    %cst_216 = arith.constant dense<0.000000e+00> : vector<32xf32>
    %483 = vector.multi_reduction <add>, %482, %cst_216 [1] : vector<32x32xf32> to vector<32xf32>
    %484 = vector.shape_cast %483 : vector<32xf32> to vector<32x1xf32>
    %485 = tpu.reciprocal %484 {approx = true} : vector<32x1xf32> -> vector<32x1xf32>
    %486 = vector.broadcast %485 : vector<32x1xf32> to vector<32x32xf32>
    %487 = arith.mulf %482, %486 : vector<32x32xf32>
    %488 = arith.truncf %487 : vector<32x32xf32> to vector<32x32xbf16>
    %cst_217 = arith.constant dense<0.000000e+00> : vector<32x32xf32>
    %489 = tpu.matmul %488, %472, %cst_217 {dimension_numbers = #tpu.dot_dimension_numbers<[1], [0], [0], [1], [0, 0, 1, 1], [], []>} : vector<32x32xbf16>, vector<32x32xbf16>, vector<32x32xf32> -> vector<32x32xf32>
    %c32_218 = arith.constant 32 : index
    %c96_219 = arith.constant 96 : index
    %490 = vector.load %arg25[%c32_218, %c96_219] : memref<64x128xf32, #tpu.memory_space<vmem>>, vector<32x32xf32>
    tpu.vector_store %arg25[%c32_218, %c96_219], %489 {strides = array<i32>} : memref<64x128xf32, #tpu.memory_space<vmem>>, vector<32x32xf32>,
    %c0_220 = arith.constant 0 : index
    %c0_221 = arith.constant 0 : index
    %491 = vector.load %arg25[%c0_220, %c0_221] : memref<64x128xf32, #tpu.memory_space<vmem>>, vector<64x128xf32>
    %c1_222 = arith.constant 1 : index
    %c0_223 = arith.constant 0 : index
    %c0_224 = arith.constant 0 : index
    %492 = vector.load %arg10[%c1_222, %c0_223, %c0_224] : memref<2x128x128xbf16, #tpu.memory_space<vmem>>, vector<1x128x128xbf16>
    %493 = vector.shape_cast %492 : vector<1x128x128xbf16> to vector<128x128xbf16>
    %494 = arith.truncf %491 : vector<64x128xf32> to vector<64x128xbf16>
    %cst_225 = arith.constant dense<0.000000e+00> : vector<64x128xf32>
    %495 = tpu.matmul %494, %493, %cst_225 {dimension_numbers = #tpu.dot_dimension_numbers<[1], [0], [0], [1], [0, 0, 1, 1], [], []>} : vector<64x128xbf16>, vector<128x128xbf16>, vector<64x128xf32> -> vector<64x128xf32>
    %c1_226 = arith.constant 1 : index
    %c0_227 = arith.constant 0 : index
    %c0_228 = arith.constant 0 : index
    %496 = vector.load %arg11[%c1_226, %c0_227, %c0_228] : memref<2x1x128xf32, #tpu.memory_space<vmem>>, vector<1x1x128xf32>
    %497 = vector.shape_cast %496 : vector<1x1x128xf32> to vector<1x128xf32>
    %498 = vector.broadcast %497 : vector<1x128xf32> to vector<64x128xf32>
    %499 = arith.addf %495, %498 : vector<64x128xf32>
    %500 = arith.addf %289, %499 : vector<64x128xf32>
    %c1_229 = arith.constant 1 : index
    %c0_230 = arith.constant 0 : index
    %c0_231 = arith.constant 0 : index
    %501 = vector.load %arg12[%c1_229, %c0_230, %c0_231] : memref<2x1x128xf32, #tpu.memory_space<vmem>>, vector<1x1x128xf32>
    %502 = vector.shape_cast %501 : vector<1x1x128xf32> to vector<1x128xf32>
    %c1_232 = arith.constant 1 : index
    %c0_233 = arith.constant 0 : index
    %c0_234 = arith.constant 0 : index
    %503 = vector.load %arg13[%c1_232, %c0_233, %c0_234] : memref<2x1x128xf32, #tpu.memory_space<vmem>>, vector<1x1x128xf32>
    %504 = vector.shape_cast %503 : vector<1x1x128xf32> to vector<1x128xf32>
    %cst_235 = arith.constant dense<0.000000e+00> : vector<64xf32>
    %505 = vector.multi_reduction <add>, %500, %cst_235 [1] : vector<64x128xf32> to vector<64xf32>
    %506 = vector.shape_cast %505 : vector<64xf32> to vector<64x1xf32>
    %cst_236 = arith.constant 1.280000e+02 : f32
    %507 = vector.broadcast %cst_236 : f32 to vector<64x1xf32>
    %508 = arith.divf %506, %507 : vector<64x1xf32>
    %509 = vector.broadcast %508 : vector<64x1xf32> to vector<64x128xf32>
    %510 = arith.subf %500, %509 : vector<64x128xf32>
    %511 = arith.mulf %510, %510 : vector<64x128xf32>
    %cst_237 = arith.constant dense<0.000000e+00> : vector<64xf32>
    %512 = vector.multi_reduction <add>, %511, %cst_237 [1] : vector<64x128xf32> to vector<64xf32>
    %513 = vector.shape_cast %512 : vector<64xf32> to vector<64x1xf32>
    %cst_238 = arith.constant 1.280000e+02 : f32
    %514 = vector.broadcast %cst_238 : f32 to vector<64x1xf32>
    %515 = arith.divf %513, %514 : vector<64x1xf32>
    %cst_239 = arith.constant 9.99999974E-6 : f32
    %516 = vector.broadcast %cst_239 : f32 to vector<64x1xf32>
    %517 = arith.addf %515, %516 : vector<64x1xf32>
    %518 = math.rsqrt %517 : vector<64x1xf32>
    %519 = vector.broadcast %518 : vector<64x1xf32> to vector<64x128xf32>
    %520 = arith.mulf %510, %519 : vector<64x128xf32>
    %521 = vector.broadcast %502 : vector<1x128xf32> to vector<64x128xf32>
    %522 = arith.mulf %520, %521 : vector<64x128xf32>
    %523 = vector.broadcast %504 : vector<1x128xf32> to vector<64x128xf32>
    %524 = arith.addf %522, %523 : vector<64x128xf32>
    %c1_240 = arith.constant 1 : index
    %c0_241 = arith.constant 0 : index
    %c0_242 = arith.constant 0 : index
    %525 = vector.load %arg14[%c1_240, %c0_241, %c0_242] : memref<2x128x512xbf16, #tpu.memory_space<vmem>>, vector<1x128x512xbf16>
    %526 = vector.shape_cast %525 : vector<1x128x512xbf16> to vector<128x512xbf16>
    %527 = arith.truncf %524 : vector<64x128xf32> to vector<64x128xbf16>
    %cst_243 = arith.constant dense<0.000000e+00> : vector<64x512xf32>
    %528 = tpu.matmul %527, %526, %cst_243 {dimension_numbers = #tpu.dot_dimension_numbers<[1], [0], [0], [1], [0, 0, 1, 1], [], []>} : vector<64x128xbf16>, vector<128x512xbf16>, vector<64x512xf32> -> vector<64x512xf32>
    %c1_244 = arith.constant 1 : index
    %c0_245 = arith.constant 0 : index
    %c0_246 = arith.constant 0 : index
    %529 = vector.load %arg15[%c1_244, %c0_245, %c0_246] : memref<2x1x512xf32, #tpu.memory_space<vmem>>, vector<1x1x512xf32>
    %530 = vector.shape_cast %529 : vector<1x1x512xf32> to vector<1x512xf32>
    %531 = vector.broadcast %530 : vector<1x512xf32> to vector<64x512xf32>
    %532 = arith.addf %528, %531 : vector<64x512xf32>
    %cst_247 = arith.constant 5.000000e-01 : f32
    %533 = vector.broadcast %cst_247 : f32 to vector<64x512xf32>
    %534 = arith.mulf %533, %532 : vector<64x512xf32>
    %cst_248 = arith.constant 0.707106769 : f32
    %535 = vector.broadcast %cst_248 : f32 to vector<64x512xf32>
    %536 = arith.mulf %532, %535 : vector<64x512xf32>
    %537 = math.erf %536 : vector<64x512xf32>
    %cst_249 = arith.constant 1.000000e+00 : f32
    %538 = vector.broadcast %cst_249 : f32 to vector<64x512xf32>
    %539 = arith.addf %538, %537 : vector<64x512xf32>
    %540 = arith.mulf %534, %539 : vector<64x512xf32>
    %c1_250 = arith.constant 1 : index
    %c0_251 = arith.constant 0 : index
    %c0_252 = arith.constant 0 : index
    %541 = vector.load %arg16[%c1_250, %c0_251, %c0_252] : memref<2x512x128xbf16, #tpu.memory_space<vmem>>, vector<1x512x128xbf16>
    %542 = vector.shape_cast %541 : vector<1x512x128xbf16> to vector<512x128xbf16>
    %543 = arith.truncf %540 : vector<64x512xf32> to vector<64x512xbf16>
    %cst_253 = arith.constant dense<0.000000e+00> : vector<64x128xf32>
    %544 = tpu.matmul %543, %542, %cst_253 {dimension_numbers = #tpu.dot_dimension_numbers<[1], [0], [0], [1], [0, 0, 1, 1], [], []>} : vector<64x512xbf16>, vector<512x128xbf16>, vector<64x128xf32> -> vector<64x128xf32>
    %545 = arith.addf %500, %544 : vector<64x128xf32>
    %c1_254 = arith.constant 1 : index
    %c0_255 = arith.constant 0 : index
    %c0_256 = arith.constant 0 : index
    %546 = vector.load %arg17[%c1_254, %c0_255, %c0_256] : memref<2x1x128xf32, #tpu.memory_space<vmem>>, vector<1x1x128xf32>
    %547 = vector.shape_cast %546 : vector<1x1x128xf32> to vector<1x128xf32>
    %548 = vector.broadcast %547 : vector<1x128xf32> to vector<64x128xf32>
    %549 = arith.addf %545, %548 : vector<64x128xf32>
    %550 = vector.extract_strided_slice %549 {offsets = [0, 0], sizes = [1, 128], strides = [1, 1]} : vector<64x128xf32> to vector<1x128xf32>
    %c0_257 = arith.constant 0 : index
    %c0_258 = arith.constant 0 : index
    %551 = vector.load %arg25[%c0_257, %c0_258] : memref<64x128xf32, #tpu.memory_space<vmem>>, vector<1x128xf32>
    tpu.vector_store %arg25[%c0_257, %c0_258], %550 {strides = array<i32>} : memref<64x128xf32, #tpu.memory_space<vmem>>, vector<1x128xf32>,
    %552 = vector.extract_strided_slice %549 {offsets = [32, 0], sizes = [1, 128], strides = [1, 1]} : vector<64x128xf32> to vector<1x128xf32>
    %c1_259 = arith.constant 1 : index
    %c0_260 = arith.constant 0 : index
    %553 = vector.load %arg25[%c1_259, %c0_260] : memref<64x128xf32, #tpu.memory_space<vmem>>, vector<1x128xf32>
    tpu.vector_store %arg25[%c1_259, %c0_260], %552 {strides = array<i32>} : memref<64x128xf32, #tpu.memory_space<vmem>>, vector<1x128xf32>,
    %c0_261 = arith.constant 0 : index
    %c0_262 = arith.constant 0 : index
    %554 = vector.load %arg25[%c0_261, %c0_262] : memref<64x128xf32, #tpu.memory_space<vmem>>, vector<2x128xf32>
    %c0_263 = arith.constant 0 : index
    %c0_264 = arith.constant 0 : index
    %555 = vector.load %arg18[%c0_263, %c0_264] : memref<1x128xf32, #tpu.memory_space<vmem>>, vector<1x128xf32>
    %c0_265 = arith.constant 0 : index
    %c0_266 = arith.constant 0 : index
    %556 = vector.load %arg19[%c0_265, %c0_266] : memref<1x128xf32, #tpu.memory_space<vmem>>, vector<1x128xf32>
    %cst_267 = arith.constant dense<0.000000e+00> : vector<2xf32>
    %557 = vector.multi_reduction <add>, %554, %cst_267 [1] : vector<2x128xf32> to vector<2xf32>
    %558 = vector.shape_cast %557 : vector<2xf32> to vector<2x1xf32>
    %cst_268 = arith.constant 1.280000e+02 : f32
    %559 = vector.broadcast %cst_268 : f32 to vector<2x1xf32>
    %560 = arith.divf %558, %559 : vector<2x1xf32>
    %561 = vector.broadcast %560 : vector<2x1xf32> to vector<2x128xf32>
    %562 = arith.subf %554, %561 : vector<2x128xf32>
    %563 = arith.mulf %562, %562 : vector<2x128xf32>
    %cst_269 = arith.constant dense<0.000000e+00> : vector<2xf32>
    %564 = vector.multi_reduction <add>, %563, %cst_269 [1] : vector<2x128xf32> to vector<2xf32>
    %565 = vector.shape_cast %564 : vector<2xf32> to vector<2x1xf32>
    %cst_270 = arith.constant 1.280000e+02 : f32
    %566 = vector.broadcast %cst_270 : f32 to vector<2x1xf32>
    %567 = arith.divf %565, %566 : vector<2x1xf32>
    %cst_271 = arith.constant 9.99999974E-6 : f32
    %568 = vector.broadcast %cst_271 : f32 to vector<2x1xf32>
    %569 = arith.addf %567, %568 : vector<2x1xf32>
    %570 = math.rsqrt %569 : vector<2x1xf32>
    %571 = vector.broadcast %570 : vector<2x1xf32> to vector<2x128xf32>
    %572 = arith.mulf %562, %571 : vector<2x128xf32>
    %573 = vector.broadcast %555 : vector<1x128xf32> to vector<2x128xf32>
    %574 = arith.mulf %572, %573 : vector<2x128xf32>
    %575 = vector.broadcast %556 : vector<1x128xf32> to vector<2x128xf32>
    %576 = arith.addf %574, %575 : vector<2x128xf32>
    %c0_272 = arith.constant 0 : index
    %c0_273 = arith.constant 0 : index
    %577 = vector.load %arg20[%c0_272, %c0_273] : memref<1x128xf32, #tpu.memory_space<vmem>>, vector<1x128xf32>
    %c0_274 = arith.constant 0 : index
    %c0_275 = arith.constant 0 : index
    %578 = vector.load %arg21[%c0_274, %c0_275] : memref<1x128xf32, #tpu.memory_space<vmem>>, vector<1x128xf32>
    %cst_276 = arith.constant dense<0.000000e+00> : vector<2xf32>
    %579 = vector.multi_reduction <add>, %576, %cst_276 [1] : vector<2x128xf32> to vector<2xf32>
    %580 = vector.shape_cast %579 : vector<2xf32> to vector<2x1xf32>
    %cst_277 = arith.constant 1.280000e+02 : f32
    %581 = vector.broadcast %cst_277 : f32 to vector<2x1xf32>
    %582 = arith.divf %580, %581 : vector<2x1xf32>
    %583 = vector.broadcast %582 : vector<2x1xf32> to vector<2x128xf32>
    %584 = arith.subf %576, %583 : vector<2x128xf32>
    %585 = arith.mulf %584, %584 : vector<2x128xf32>
    %cst_278 = arith.constant dense<0.000000e+00> : vector<2xf32>
    %586 = vector.multi_reduction <add>, %585, %cst_278 [1] : vector<2x128xf32> to vector<2xf32>
    %587 = vector.shape_cast %586 : vector<2xf32> to vector<2x1xf32>
    %cst_279 = arith.constant 1.280000e+02 : f32
    %588 = vector.broadcast %cst_279 : f32 to vector<2x1xf32>
    %589 = arith.divf %587, %588 : vector<2x1xf32>
    %cst_280 = arith.constant 9.99999974E-6 : f32
    %590 = vector.broadcast %cst_280 : f32 to vector<2x1xf32>
    %591 = arith.addf %589, %590 : vector<2x1xf32>
    %592 = math.rsqrt %591 : vector<2x1xf32>
    %593 = vector.broadcast %592 : vector<2x1xf32> to vector<2x128xf32>
    %594 = arith.mulf %584, %593 : vector<2x128xf32>
    %595 = vector.broadcast %577 : vector<1x128xf32> to vector<2x128xf32>
    %596 = arith.mulf %594, %595 : vector<2x128xf32>
    %597 = vector.broadcast %578 : vector<1x128xf32> to vector<2x128xf32>
    %598 = arith.addf %596, %597 : vector<2x128xf32>
    %c0_281 = arith.constant 0 : index
    %c0_282 = arith.constant 0 : index
    %599 = vector.load %arg22[%c0_281, %c0_282] : memref<128x128xbf16, #tpu.memory_space<vmem>>, vector<128x128xbf16>
    %600 = arith.truncf %598 : vector<2x128xf32> to vector<2x128xbf16>
    %cst_283 = arith.constant dense<0.000000e+00> : vector<2x128xf32>
    %601 = tpu.matmul %600, %599, %cst_283 {dimension_numbers = #tpu.dot_dimension_numbers<[1], [0], [0], [1], [0, 0, 1, 1], [], []>} : vector<2x128xbf16>, vector<128x128xbf16>, vector<2x128xf32> -> vector<2x128xf32>
    %c0_284 = arith.constant 0 : index
    %c0_285 = arith.constant 0 : index
    %602 = vector.load %arg23[%c0_284, %c0_285] : memref<1x128xf32, #tpu.memory_space<vmem>>, vector<1x128xf32>
    %603 = vector.broadcast %602 : vector<1x128xf32> to vector<2x128xf32>
    %604 = arith.addf %601, %603 : vector<2x128xf32>
    %c0_286 = arith.constant 0 : index
    %c0_287 = arith.constant 0 : index
    %c0_288 = arith.constant 0 : index
    %605 = vector.load %arg24[%c0_286, %c0_287, %c0_288] : memref<1x2x128xf32, #tpu.memory_space<vmem>>, vector<1x2x128xf32>
    %606 = vector.shape_cast %605 : vector<1x2x128xf32> to vector<2x128xf32>
    %607 = vector.shape_cast %604 : vector<2x128xf32> to vector<1x2x128xf32>
    tpu.vector_store %arg24[%c0_286, %c0_287, %c0_288], %607 {strides = array<i32>} : memref<1x2x128xf32, #tpu.memory_space<vmem>>, vector<1x2x128xf32>,
    return
  }
  func.func @transform_0(%arg0: i32) -> (i32, i32) {
    %c0_i32 = arith.constant 0 : i32
    %c0_i32_0 = arith.constant 0 : i32
    return %arg0, %c0_i32 : i32, i32
  }
  func.func @transform_1(%arg0: i32) -> (i32, i32) {
    %c0_i32 = arith.constant 0 : i32
    %c0_i32_0 = arith.constant 0 : i32
    %c0_i32_1 = arith.constant 0 : i32
    return %c0_i32, %c0_i32_0 : i32, i32
  }
  func.func @transform_2(%arg0: i32) -> (i32, i32) {
    %c0_i32 = arith.constant 0 : i32
    %c0_i32_0 = arith.constant 0 : i32
    %c0_i32_1 = arith.constant 0 : i32
    return %c0_i32, %c0_i32_0 : i32, i32
  }
  func.func @transform_3(%arg0: i32) -> (i32, i32) {
    %c0_i32 = arith.constant 0 : i32
    %c0_i32_0 = arith.constant 0 : i32
    %c0_i32_1 = arith.constant 0 : i32
    return %c0_i32, %c0_i32_0 : i32, i32
  }
  func.func @transform_4(%arg0: i32) -> (i32, i32) {
    %c0_i32 = arith.constant 0 : i32
    %c0_i32_0 = arith.constant 0 : i32
    %c0_i32_1 = arith.constant 0 : i32
    return %c0_i32, %c0_i32_0 : i32, i32
  }
  func.func @transform_5(%arg0: i32) -> (i32, i32, i32) {
    %c0_i32 = arith.constant 0 : i32
    %c0_i32_0 = arith.constant 0 : i32
    %c0_i32_1 = arith.constant 0 : i32
    %c0_i32_2 = arith.constant 0 : i32
    return %c0_i32, %c0_i32_0, %c0_i32_1 : i32, i32, i32
  }
  func.func @transform_6(%arg0: i32) -> (i32, i32, i32) {
    %c0_i32 = arith.constant 0 : i32
    %c0_i32_0 = arith.constant 0 : i32
    %c0_i32_1 = arith.constant 0 : i32
    %c0_i32_2 = arith.constant 0 : i32
    return %c0_i32, %c0_i32_0, %c0_i32_1 : i32, i32, i32
  }
  func.func @transform_7(%arg0: i32) -> (i32, i32, i32) {
    %c0_i32 = arith.constant 0 : i32
    %c0_i32_0 = arith.constant 0 : i32
    %c0_i32_1 = arith.constant 0 : i32
    %c0_i32_2 = arith.constant 0 : i32
    return %c0_i32, %c0_i32_0, %c0_i32_1 : i32, i32, i32
  }
  func.func @transform_8(%arg0: i32) -> (i32, i32, i32) {
    %c0_i32 = arith.constant 0 : i32
    %c0_i32_0 = arith.constant 0 : i32
    %c0_i32_1 = arith.constant 0 : i32
    %c0_i32_2 = arith.constant 0 : i32
    return %c0_i32, %c0_i32_0, %c0_i32_1 : i32, i32, i32
  }
  func.func @transform_9(%arg0: i32) -> (i32, i32, i32) {
    %c0_i32 = arith.constant 0 : i32
    %c0_i32_0 = arith.constant 0 : i32
    %c0_i32_1 = arith.constant 0 : i32
    %c0_i32_2 = arith.constant 0 : i32
    return %c0_i32, %c0_i32_0, %c0_i32_1 : i32, i32, i32
  }
  func.func @transform_10(%arg0: i32) -> (i32, i32, i32) {
    %c0_i32 = arith.constant 0 : i32
    %c0_i32_0 = arith.constant 0 : i32
    %c0_i32_1 = arith.constant 0 : i32
    %c0_i32_2 = arith.constant 0 : i32
    return %c0_i32, %c0_i32_0, %c0_i32_1 : i32, i32, i32
  }
  func.func @transform_11(%arg0: i32) -> (i32, i32, i32) {
    %c0_i32 = arith.constant 0 : i32
    %c0_i32_0 = arith.constant 0 : i32
    %c0_i32_1 = arith.constant 0 : i32
    %c0_i32_2 = arith.constant 0 : i32
    return %c0_i32, %c0_i32_0, %c0_i32_1 : i32, i32, i32
  }
  func.func @transform_12(%arg0: i32) -> (i32, i32, i32) {
    %c0_i32 = arith.constant 0 : i32
    %c0_i32_0 = arith.constant 0 : i32
    %c0_i32_1 = arith.constant 0 : i32
    %c0_i32_2 = arith.constant 0 : i32
    return %c0_i32, %c0_i32_0, %c0_i32_1 : i32, i32, i32
  }
  func.func @transform_13(%arg0: i32) -> (i32, i32, i32) {
    %c0_i32 = arith.constant 0 : i32
    %c0_i32_0 = arith.constant 0 : i32
    %c0_i32_1 = arith.constant 0 : i32
    %c0_i32_2 = arith.constant 0 : i32
    return %c0_i32, %c0_i32_0, %c0_i32_1 : i32, i32, i32
  }
  func.func @transform_14(%arg0: i32) -> (i32, i32, i32) {
    %c0_i32 = arith.constant 0 : i32
    %c0_i32_0 = arith.constant 0 : i32
    %c0_i32_1 = arith.constant 0 : i32
    %c0_i32_2 = arith.constant 0 : i32
    return %c0_i32, %c0_i32_0, %c0_i32_1 : i32, i32, i32
  }
  func.func @transform_15(%arg0: i32) -> (i32, i32, i32) {
    %c0_i32 = arith.constant 0 : i32
    %c0_i32_0 = arith.constant 0 : i32
    %c0_i32_1 = arith.constant 0 : i32
    %c0_i32_2 = arith.constant 0 : i32
    return %c0_i32, %c0_i32_0, %c0_i32_1 : i32, i32, i32
  }
  func.func @transform_16(%arg0: i32) -> (i32, i32, i32) {
    %c0_i32 = arith.constant 0 : i32
    %c0_i32_0 = arith.constant 0 : i32
    %c0_i32_1 = arith.constant 0 : i32
    %c0_i32_2 = arith.constant 0 : i32
    return %c0_i32, %c0_i32_0, %c0_i32_1 : i32, i32, i32
  }
  func.func @transform_17(%arg0: i32) -> (i32, i32) {
    %c0_i32 = arith.constant 0 : i32
    %c0_i32_0 = arith.constant 0 : i32
    %c0_i32_1 = arith.constant 0 : i32
    return %c0_i32, %c0_i32_0 : i32, i32
  }
  func.func @transform_18(%arg0: i32) -> (i32, i32) {
    %c0_i32 = arith.constant 0 : i32
    %c0_i32_0 = arith.constant 0 : i32
    %c0_i32_1 = arith.constant 0 : i32
    return %c0_i32, %c0_i32_0 : i32, i32
  }
  func.func @transform_19(%arg0: i32) -> (i32, i32) {
    %c0_i32 = arith.constant 0 : i32
    %c0_i32_0 = arith.constant 0 : i32
    %c0_i32_1 = arith.constant 0 : i32
    return %c0_i32, %c0_i32_0 : i32, i32
  }
  func.func @transform_20(%arg0: i32) -> (i32, i32) {
    %c0_i32 = arith.constant 0 : i32
    %c0_i32_0 = arith.constant 0 : i32
    %c0_i32_1 = arith.constant 0 : i32
    return %c0_i32, %c0_i32_0 : i32, i32
  }
  func.func @transform_21(%arg0: i32) -> (i32, i32) {
    %c0_i32 = arith.constant 0 : i32
    %c0_i32_0 = arith.constant 0 : i32
    %c0_i32_1 = arith.constant 0 : i32
    return %c0_i32, %c0_i32_0 : i32, i32
  }
  func.func @transform_22(%arg0: i32) -> (i32, i32) {
    %c0_i32 = arith.constant 0 : i32
    %c0_i32_0 = arith.constant 0 : i32
    %c0_i32_1 = arith.constant 0 : i32
    return %c0_i32, %c0_i32_0 : i32, i32
  }
  func.func @transform_23(%arg0: i32) -> (i32, i32, i32) {
    %c0_i32 = arith.constant 0 : i32
    %c0_i32_0 = arith.constant 0 : i32
    %c0_i32_1 = arith.constant 0 : i32
    return %arg0, %c0_i32, %c0_i32_0 : i32, i32, i32
  }
}

</mosaic_0001>

<bundles_post_ra>
// kernel: document_vit_forward.1
= control target key start
LH: loop header
LB: loop body
LE: loop exit
PB: predicated region body
PF: predicated region fallthrough
CT: control target
= control target key end

     0   :  { %s11590_s0 = inlined_call_operand.vmem [shape: f32[32,192], index: 0, kind: input, shape index: {}]   ;;  %s11591_s1 = inlined_call_operand.vmem [shape: f32[1,128], index: 1, kind: input, shape index: {}]   ;;  %s11592_s2 = inlined_call_operand.vmem [shape: f32[17,128], index: 2, kind: input, shape index: {}]   ;;  %s11593_s3 = inlined_call_operand.vmem [shape: bf16[192,128], index: 3, kind: input, shape index: {}]   ;;  %s11594_s4 = inlined_call_operand.vmem [shape: f32[1,128], index: 4, kind: input, shape index: {}]   ;;  %s11595_s5 = inlined_call_operand.vmem [shape: f32[2,1,128], index: 5, kind: input, shape index: {}]   ;;  %s11596_s6 = inlined_call_operand.vmem [shape: f32[2,1,128], index: 6, kind: input, shape index: {}]   ;;  %s11597_s7 = inlined_call_operand.vmem [shape: bf16[2,128,384], index: 7, kind: input, shape index: {}]   ;;  %s11598_s8 = inlined_call_operand.vmem [shape: f32[2,1,384], index: 8, kind: input, shape index: {}]   ;;  %s11599_s9 = inlined_call_operand.vmem [shape: bf16[2,128,128], index: 9, kind: input, shape index: {}]   ;;  %s11600_s10 = inlined_call_operand.vmem [shape: f32[2,1,128], index: 10, kind: input, shape index: {}]   ;;  %s11601_s11 = inlined_call_operand.vmem [shape: f32[2,1,128], index: 11, kind: input, shape index: {}]   ;;  %s11602_s12 = inlined_call_operand.vmem [shape: f32[2,1,128], index: 12, kind: input, shape index: {}]   ;;  %s11603_s13 = inlined_call_operand.vmem [shape: bf16[2,128,512], index: 13, kind: input, shape index: {}]   ;;  %s11604_s14 = inlined_call_operand.vmem [shape: f32[2,1,512], index: 14, kind: input, shape index: {}]   ;;  %s11605_s15 = inlined_call_operand.vmem [shape: bf16[2,512,128], index: 15, kind: input, shape index: {}]   ;;  %s11606_s16 = inlined_call_operand.vmem [shape: f32[2,1,128], index: 16, kind: input, shape index: {}]   ;;  %s11607_s17 = inlined_call_operand.vmem [shape: f32[1,128], index: 17, kind: input, shape index: {}]   ;;  %s11608_s18 = inlined_call_operand.vmem [shape: f32[1,128], index: 18, kind: input, shape index: {}]   ;;  %s11609_s19 = inlined_call_operand.vmem [shape: f32[1,128], index: 19, kind: input, shape index: {}]   ;;  %s11610_s20 = inlined_call_operand.vmem [shape: f32[1,128], index: 20, kind: input, shape index: {}]   ;;  %s11611_s21 = inlined_call_operand.vmem [shape: bf16[128,128], index: 21, kind: input, shape index: {}]   ;;  %s11612_s22 = inlined_call_operand.vmem [shape: f32[1,128], index: 22, kind: input, shape index: {}]   ;;  %s11613_s23 = inlined_call_operand.hbm [shape: f32[1,2,128], index: 23, kind: output, shape index: {}]  }
   0x1   :  { %11630 = sst [smem:[#allocation6_spill]] %s11590_s0 }
   0x2   :  { %11631 = sst [smem:[#allocation7_spill]] %s11591_s1 }
   0x3   :  { %11632 = sst [smem:[#allocation8_spill]] %s11592_s2 }
   0x4   :  { %11633 = sst [smem:[#allocation9_spill]] %s11593_s3 }
   0x5   :  { %11634 = sst [smem:[#allocation10_spill]] %s11594_s4 }
   0x6   :  { %11635 = sst [smem:[#allocation11_spill]] %s11595_s5 }
   0x7   :  { %11636 = sst [smem:[#allocation12_spill]] %s11596_s6 }
   0x8   :  { %11637 = sst [smem:[#allocation13_spill]] %s11597_s7 }
   0x9   :  { %s11638_s24 = sld [smem:[#allocation9_spill]]  ;;  %v8926_v1 = vmov 0   ;;  %vm191_vm0 = vcmask 523264   ;;  %v11628_v27 = vmov 0.0  }
   0xa   :  { %198 = vmatprep.subr.bf16.mxu0 %v8926_v1  ;;  %626 = vmatprep.mubr.bf16.mxu1 %v8926_v1  ;;  %s11639_s28 = sld [smem:[#allocation6_spill]]  ;;  %250 = vst [vmem:[#allocation2] sm:$0xff] %v11628_v27  ;;  %251 = vst [vmem:[#allocation2 + $0x8] sm:$0xff] %v11628_v27 }
   0xb   :  { %s11640_s25 = sld [smem:[#allocation8_spill]]  ;;  %252 = vst [vmem:[#allocation2 + $0x10] sm:$0xff] %v11628_v27  ;;  %253 = vst [vmem:[#allocation2 + $0x18] sm:$0xff] %v11628_v27 }
   0xc   :  { %s11641_s26 = sld [smem:[#allocation7_spill]]  ;;  %254 = vst [vmem:[#allocation2 + $0x20] sm:$0xff] %v11628_v27  ;;  %255 = vst [vmem:[#allocation2 + $0x28] sm:$0xff] %v11628_v27 }
   0xd   :  { %256 = vst [vmem:[#allocation2 + $0x30] sm:$0xff] %v11628_v27  ;;  %257 = vst [vmem:[#allocation2 + $0x38] sm:$0xff] %v11628_v27 }
   0xf   :  { %v8192_v0 = vld [vmem:[%s11638_s24 + $0x38] sm:$0xff]   ;;  %v8193_v2 = vld [vmem:[%s11638_s24 + $0x30] sm:$0xff]   ;;  %v8194_v3 = vld [vmem:[%s11638_s24 + $0x28] sm:$0xff]  }
  0x10   :  { %199 = vmatpush1.bf16.msra.mxu0 %v8192_v0  ;;  %v8195_v4 = vld [vmem:[%s11638_s24 + $0x20] sm:$0xff]   ;;  %v77_v5 = vld [vmem:[%s11639_s28 + $0x8] sm:$0xff]  ;;  %v79_v6 = vld [vmem:[%s11639_s28 + $0x18] sm:$0xff] }
  0x11   :  { %200 = vmatprep.subr.bf16.mxu0 %v8926_v1  ;;  %v109_v7 = vpack.c.bf16 %v79_v6, %v77_v5  ;;  %v8196_v8 = vld [vmem:[%s11638_s24 + $0x18] sm:$0xff]   ;;  %v8197_v9 = vld [vmem:[%s11638_s24 + $0x10] sm:$0xff]   ;;  %v8198_v10 = vld [vmem:[%s11638_s24 + $0x8] sm:$0xff]  }
  0x12   :  { %v8199_v11 = vld [vmem:[%s11638_s24] sm:$0xff]   ;;  %v8200_v12 = vld [vmem:[%s11638_s24 + $0x58] sm:$0xff]   ;;  %v8201_v13 = vld [vmem:[%s11638_s24 + $0x50] sm:$0xff]  }
  0x13   :  { %7001 = vmatprep.mubr.msk.bf16.mxu0 %vm191_vm0, %v109_v7  ;;  %v8202_v14 = vld [vmem:[%s11638_s24 + $0x48] sm:$0xff]   ;;  %v8203_v15 = vld [vmem:[%s11638_s24 + $0x40] sm:$0xff]   ;;  %v78_v17 = vld [vmem:[%s11639_s28 + $0x10] sm:$0xff] }
  0x14   :  { %201 = vmatpush1.bf16.msra.mxu0 %v8193_v2  ;;  %v76_v16 = vld [vmem:[%s11639_s28] sm:$0xff]  ;;  %v81_v18 = vld [vmem:[%s11639_s28 + $0x28] sm:$0xff]  ;;  %v83_v19 = vld [vmem:[%s11639_s28 + $0x38] sm:$0xff] }
  0x15   :  { %202 = vmatprep.subr.bf16.mxu0 %v8926_v1  ;;  %v108_v20 = vpack.c.bf16 %v78_v17, %v76_v16  ;;  %v111_v21 = vpack.c.bf16 %v83_v19, %v81_v18  ;;  %v80_v22 = vld [vmem:[%s11639_s28 + $0x20] sm:$0xff]  ;;  %v82_v23 = vld [vmem:[%s11639_s28 + $0x30] sm:$0xff] }
  0x16   :  { %v110_v24 = vpack.c.bf16 %v82_v23, %v80_v22  ;;  %v247_v25 = vld [vmem:[%s11640_s25] sm:$0xff] }
  0x17   :  { %v258_v26 = vld [vmem:[%s11641_s26] sm:$0x1] }
  0x18   :  { %203 = vmatpush1.bf16.msra.mxu0 %v8194_v3  ;;  %v259_v28 = vadd.f32 %v258_v26, %v247_v25 }
  0x19   :  { %204 = vmatprep.subr.bf16.mxu0 %v8926_v1 }
  0x1a   :  { %260 = vst [vmem:[#allocation2] sm:$0x1] %v259_v28 }
  0x1c   :  { %205 = vmatpush1.bf16.msra.mxu0 %v8195_v4 }
  0x1d   :  { %206 = vmatprep.subr.bf16.mxu0 %v8926_v1 }
  0x20   :  { %207 = vmatpush1.bf16.msra.mxu0 %v8196_v8 }
  0x21   :  { %208 = vmatprep.subr.bf16.mxu0 %v8926_v1 }
  0x24   :  { %209 = vmatpush1.bf16.msra.mxu0 %v8197_v9 }
  0x25   :  { %210 = vmatprep.subr.bf16.mxu0 %v8926_v1 }
  0x28   :  { %211 = vmatpush1.bf16.msra.mxu0 %v8198_v10 }
  0x29   :  { %212 = vmatprep.subr.bf16.mxu0 %v8926_v1 }
  0x2c   :  { %213 = vmatpush1.bf16.msra.mxu0 %v8199_v11 }
  0x2d   :  { %222 = vmatprep.subr.bf16.mxu0 %v8926_v1 }
  0x30   :  { %223 = vmatpush2.bf16.msra.mxu0 %v8200_v12 }
  0x31   :  { %224 = vmatprep.subr.bf16.mxu0 %v8926_v1 }
  0x34   :  { %225 = vmatpush2.bf16.msra.mxu0 %v8201_v13 }
  0x35   :  { %226 = vmatprep.subr.bf16.mxu0 %v8926_v1 }
  0x38   :  { %227 = vmatpush2.bf16.msra.mxu0 %v8202_v14 }
  0x39   :  { %228 = vmatprep.subr.bf16.mxu0 %v8926_v1 }
  0x3c   :  { %229 = vmatpush2.bf16.msra.mxu0 %v8203_v15 }
  0x3f   :  { %231 = vmatmul.mubr.bf16.vlgmr.msra.gmra.mxu0 %v108_v20 }
  0x40   :  { %7002 = vmatprep.mubr.msk.bf16.mxu0 %vm191_vm0, %v111_v21 }
  0x47   :  { %239 = vmatmul.mubr.bf16.gmra.mxu0 %v110_v24 }
  0x48   :  { %28 = vsyncpa [#allocation4], 0  ;;  %v248_v29 = vld [vmem:[%s11640_s25 + $0x8] sm:$0xff]  ;;  %v265_v30 = vrot.slane %v247_v25, 1  ;;  %vm264_vm1 = vcmask 1046528   ;;  %s11642_s29 = sld [smem:[#allocation10_spill]] }
  0x49   :  { %v266_v31 = vrot.slane %v248_v29, 1  ;;  %v249_v32 = vld [vmem:[%s11640_s25 + $0x10] sm:$0x1]  ;;  %v276_v49 = vld [vmem:[%s11641_s26] sm:$0x1]  ;;  %s11643_s25 = sld [smem:[#allocation13_spill]] }
  0x4a   :  { %v268_v36 = vrot.slane %v249_v32, 1  ;;  %v277_v51 = vadd.f32 %v276_v49, %v247_v25  ;;  %s11644_s2 = sld [smem:[#allocation11_spill]]  ;;  %vm744_vm2 = vcmask 261120   ;;  %s11625_s5 = smov 96   ;;  %vm1125_vm4 = vcmask 523520  }
  0x4b   :  { %v267_v35 = vsel %vm264_vm1, %v265_v30, %v266_v31  ;;  %s11645_s7 = sld [smem:[#allocation12_spill]]  ;;  %s11623_s1 = smov 64   ;;  %vm1330_vm5 = vcmask 785920   ;;  %vm1535_vm6 = vcmask 1048320   ;;  %vm6804_vm7 = vcmask 1041408  }
  0x4c   :  { %v269_v41 = vsel %vm264_vm1, %v266_v31, %v268_v36  ;;  %278 = vst [vmem:[#allocation2 + $0x20] sm:$0x1] %v277_v51  ;;  %s11621_s26 = smov 32   ;;  %s11647_s4 = smov 64   ;;  %vm8931_vm8 = vmmov 0  }
  0x4d   :  { %s11648_s30 = smov 32  }
  0x4e   :  { %v6988_v33 = vld [vmem:[%s11642_s29] ss:$0 sm:$0xff] }
  0x4f   :  { %v8204_v58 = vld [vmem:[%s11643_s25 + $0xac] ss:$12 sps:$4 sm:$0xff]   ;;  %v8206_v59 = vld [vmem:[%s11643_s25 + $0xa8] ss:$12 sps:$4 sm:$0xff]   ;;  %v8209_v17 = vld [vmem:[%s11643_s25 + $0x90] ss:$12 sps:$4 sm:$0xff]  }
  0x50   :  { %594 = vmatprep.subr.bf16.mxu1 %v8204_v58  ;;  %v8207_v16 = vld [vmem:[%s11643_s25 + $0x94] ss:$12 sps:$4 sm:$0xff]   ;;  %v8210_v18 = vld [vmem:[%s11643_s25 + $0x7c] ss:$12 sps:$4 sm:$0xff]   ;;  %v8212_v19 = vld [vmem:[%s11643_s25 + $0x78] ss:$12 sps:$4 sm:$0xff]  }
  0x51   :  { %595 = vmatpush1.bf16.msra.mxu1 %v8206_v59  ;;  %v8213_v20 = vld [vmem:[%s11643_s25 + $0x64] ss:$12 sps:$4 sm:$0xff]   ;;  %v8215_v21 = vld [vmem:[%s11643_s25 + $0x60] ss:$12 sps:$4 sm:$0xff]   ;;  %v8218_v23 = vld [vmem:[%s11643_s25 + $0x48] ss:$12 sps:$4 sm:$0xff]  }
  0x52   :  { %596 = vmatprep.subr.bf16.mxu1 %v8207_v16  ;;  %v8216_v22 = vld [vmem:[%s11643_s25 + $0x4c] ss:$12 sps:$4 sm:$0xff]   ;;  %v8219_v24 = vld [vmem:[%s11643_s25 + $0x34] ss:$12 sps:$4 sm:$0xff]   ;;  %v8221_v25 = vld [vmem:[%s11643_s25 + $0x30] ss:$12 sps:$4 sm:$0xff]  }
  0x53   :  { %v8222_v26 = vld [vmem:[%s11643_s25 + $0x1c] ss:$12 sps:$4 sm:$0xff]   ;;  %v8224_v28 = vld [vmem:[%s11643_s25 + $0x18] ss:$12 sps:$4 sm:$0xff]   ;;  %v8227_v30 = vld [vmem:[%s11643_s25] ss:$12 sps:$4 sm:$0xff]  }
  0x54   :  { %v8225_v29 = vld [vmem:[%s11643_s25 + $0x4] ss:$12 sps:$4 sm:$0xff]  }
  0x55   :  { %597 = vmatpush1.bf16.msra.mxu1 %v8209_v17 }
  0x56   :  { %598 = vmatprep.subr.bf16.mxu1 %v8210_v18 }
  0x59   :  { %599 = vmatpush1.bf16.msra.mxu1 %v8212_v19 }
  0x5a   :  { %600 = vmatprep.subr.bf16.mxu1 %v8213_v20 }
  0x5d   :  { %601 = vmatpush1.bf16.msra.mxu1 %v8215_v21 }
  0x5e   :  { %602 = vmatprep.subr.bf16.mxu1 %v8216_v22 }
  0x61   :  { %603 = vmatpush1.bf16.msra.mxu1 %v8218_v23 }
  0x62   :  { %604 = vmatprep.subr.bf16.mxu1 %v8219_v24  ;;  %v8230_v24 = vld [vmem:[%s11643_s25 + $0x80] ss:$12 sps:$4 sm:$0xff]  }
  0x65   :  { %605 = vmatpush1.bf16.msra.mxu1 %v8221_v25  ;;  %v8231_v25 = vld [vmem:[%s11643_s25 + $0x68] ss:$12 sps:$4 sm:$0xff]  }
  0x66   :  { %606 = vmatprep.subr.bf16.mxu1 %v8222_v26  ;;  %v8232_v26 = vld [vmem:[%s11643_s25 + $0x50] ss:$12 sps:$4 sm:$0xff]  }
  0x69   :  { %607 = vmatpush1.bf16.msra.mxu1 %v8224_v28  ;;  %v8233_v28 = vld [vmem:[%s11643_s25 + $0x38] ss:$12 sps:$4 sm:$0xff]  }
  0x6a   :  { %608 = vmatprep.subr.bf16.mxu1 %v8225_v29  ;;  %v8234_v29 = vld [vmem:[%s11643_s25 + $0x20] ss:$12 sps:$4 sm:$0xff]  }
  0x6d   :  { %609 = vmatpush1.bf16.msra.mxu1 %v8227_v30  ;;  %v8235_v30 = vld [vmem:[%s11643_s25 + $0x8] ss:$12 sps:$4 sm:$0xff]  }
  0xff   :  { %v232_v34 = vpop.f32.mrf.mxu0 }
 0x100   :  { %v233_v37 = vadd.f32 %v6988_v33, %v232_v34 }
 0x101   :  { %v234_v38 = vpop.f32.mrf.mxu0 }
 0x102   :  { %v272_v39 = vadd.f32 %v267_v35, %v233_v37 }
 0x103   :  { %v235_v40 = vpop.f32.mrf.mxu0 }
 0x104   :  { %274 = vst [vmem:[#allocation2 + $0x1] sm:$0xff] %v272_v39  ;;  %v236_v42 = vadd.f32 %v6988_v33, %v235_v40 }
 0x105   :  { %v237_v43 = vpop.f32.mrf.mxu0 }
 0x106   :  { %v273_v44 = vadd.f32 %v269_v41, %v236_v42 }
 0x107   :  { %v240_v48 = vpop.f32.mrf.mxu0 }
 0x108   :  { %275 = vst [vmem:[#allocation2 + $0x9] sm:$0xff] %v273_v44  ;;  %v241_v50 = vadd.f32 %v6988_v33, %v240_v48 }
 0x109   :  { %v242_v52 = vpop.f32.mrf.mxu0 }
 0x10a   :  { %v279_v53 = vadd.f32 %v267_v35, %v241_v50 }
 0x10b   :  { %v9151_v45 = vld [vmem:[#allocation2] sm:$0xff]  ;;  %v243_v54 = vpop.f32.mrf.mxu0 }
 0x10c   :  { %296 = vadd.xlane.f32.xlu0 %v9151_v45  ;;  %281 = vst [vmem:[#allocation2 + $0x21] sm:$0xff] %v279_v53  ;;  %v244_v55 = vadd.f32 %v6988_v33, %v243_v54 }
 0x10d   :  { %v245_v56 = vpop.f32.mrf.mxu0 }
 0x10e   :  { %v280_v57 = vadd.f32 %v269_v41, %v244_v55 }
 0x10f   :  { %v9154_v46 = vld [vmem:[#allocation2 + $0x10] sm:$0xff]  ;;  %v9156_v47 = vld [vmem:[#allocation2 + $0x8] sm:$0xff] }
 0x110   :  { %300 = vadd.xlane.f32.xlu1 %v9154_v46  ;;  %298 = vadd.xlane.f32.xlu0 %v9156_v47  ;;  %282 = vst [vmem:[#allocation2 + $0x29] sm:$0xff] %v280_v57 }
 0x113   :  { %v9187_v12 = vld [vmem:[#allocation2 + $0x20] sm:$0xff] }
 0x114   :  { %302 = vadd.xlane.f32.xlu1 %v11628_v27 }
 0x117   :  { %v9192_v14 = vld [vmem:[#allocation2 + $0x30] sm:$0xff]  ;;  %v9194_v15 = vld [vmem:[#allocation2 + $0x28] sm:$0xff] }
 0x195   :  { %v297_v60 = vpop.xlane.xlu0 %296 }
 0x196   :  { %v313_v61 = vmul.f32 0.0078125, %v297_v60 }
 0x198   :  { %v9171_v62 = vsub.f32 %v9151_v45, %v313_v61 }
 0x199   :  { %v301_v63 = vpop.xlane.xlu1 %300  ;;  %v299_v0 = vpop.xlane.xlu0 %298 }
 0x19a   :  { %v315_v2 = vmul.f32 0.0078125, %v301_v63  ;;  %v314_v3 = vmul.f32 0.0078125, %v299_v0  ;;  %v329_v4 = vmul.f32 %v9171_v62, %v9171_v62  ;;  %v9262_v0 = vld [vmem:[%s11644_s2] ss:$0 sm:$0xff] }
 0x19c   :  { %337 = vadd.xlane.f32.xlu0 %v329_v4  ;;  %v9176_v5 = vsub.f32 %v9154_v46, %v315_v2  ;;  %v9179_v6 = vsub.f32 %v9156_v47, %v314_v3 }
 0x19d   :  { %v303_v7 = vpop.xlane.xlu1 %302 }
 0x19e   :  { %v316_v8 = vmul.f32 0.0078125, %v303_v7  ;;  %v331_v9 = vmul.f32 %v9176_v5, %v9176_v5  ;;  %v330_v10 = vmul.f32 %v9179_v6, %v9179_v6 }
 0x1a0   :  { %341 = vadd.xlane.f32.xlu0 %v331_v9  ;;  %339 = vadd.xlane.f32.xlu1 %v330_v10  ;;  %v9185_v11 = vsub.f32 0.0, %v316_v8  ;;  %v9271_v9 = vld [vmem:[%s11645_s7] ss:$0 sm:$0xff] }
 0x1a2   :  { %v332_v13 = vmul.f32 %v9185_v11, %v9185_v11 }
 0x1a4   :  { %304 = vadd.xlane.f32.xlu0 %v9187_v12  ;;  %343 = vadd.xlane.f32.xlu1 %v332_v13 }
 0x1a8   :  { %308 = vadd.xlane.f32.xlu0 %v9192_v14  ;;  %306 = vadd.xlane.f32.xlu1 %v9194_v15 }
 0x1ac   :  { %310 = vadd.xlane.f32.xlu1 %v11628_v27 }
 0x225   :  { %v338_v31 = vpop.xlane.xlu0 %337 }
 0x226   :  { %v353_v32 = vmul.f32 0.0078125, %v338_v31 }
 0x228   :  { %v361_v33 = vadd.f32 1e-05, %v353_v32 }
 0x229   :  { %v340_v34 = vpop.xlane.xlu1 %339  ;;  %v342_v35 = vpop.xlane.xlu0 %341 }
 0x22a   :  { %8452 = vrsqrt.f32 %v361_v33  ;;  %v354_v36 = vmul.f32 0.0078125, %v340_v34  ;;  %v355_v37 = vmul.f32 0.0078125, %v342_v35 }
 0x22c   :  { %v362_v38 = vadd.f32 1e-05, %v354_v36  ;;  %v363_v39 = vadd.f32 1e-05, %v355_v37 }
 0x22d   :  { %v344_v40 = vpop.xlane.xlu1 %343  ;;  %v305_v41 = vpop.xlane.xlu0 %304 }
 0x22e   :  { %8454 = vrsqrt.f32 %v362_v38  ;;  %v356_v42 = vmul.f32 0.0078125, %v344_v40  ;;  %v317_v43 = vmul.f32 0.0078125, %v305_v41 }
 0x22f   :  { %8456 = vrsqrt.f32 %v363_v39 }
 0x230   :  { %v364_v44 = vadd.f32 1e-05, %v356_v42  ;;  %v9242_v48 = vsub.f32 %v9187_v12, %v317_v43 }
 0x231   :  { %v307_v49 = vpop.xlane.xlu1 %306  ;;  %v309_v50 = vpop.xlane.xlu0 %308 }
 0x232   :  { %8458 = vrsqrt.f32 %v364_v44  ;;  %v318_v51 = vmul.f32 0.0078125, %v307_v49  ;;  %v319_v52 = vmul.f32 0.0078125, %v309_v50  ;;  %v333_v53 = vmul.f32 %v9242_v48, %v9242_v48 }
 0x234   :  { %345 = vadd.xlane.f32.xlu0 %v333_v53  ;;  %v9247_v54 = vsub.f32 %v9194_v15, %v318_v51  ;;  %v9250_v55 = vsub.f32 %v9192_v14, %v319_v52 }
 0x235   :  { %v311_v56 = vpop.xlane.xlu1 %310 }
 0x236   :  { %v320_v57 = vmul.f32 0.0078125, %v311_v56  ;;  %v334_v58 = vmul.f32 %v9247_v54, %v9247_v54  ;;  %v335_v59 = vmul.f32 %v9250_v55, %v9250_v55 }
 0x237   :  { %v8453_v60 = vpop.eup %8452 }
 0x238   :  { %347 = vadd.xlane.f32.xlu1 %v334_v58  ;;  %349 = vadd.xlane.f32.xlu0 %v335_v59  ;;  %v9256_v61 = vsub.f32 0.0, %v320_v57  ;;  %v377_v63 = vmul.f32 %v8453_v60, %v9171_v62 }
 0x23a   :  { %v336_v2 = vmul.f32 %v9256_v61, %v9256_v61  ;;  %v391_v7 = vmul.f32 %v9262_v0, %v377_v63 }
 0x23b   :  { %v8455_v3 = vpop.eup %8454 }
 0x23c   :  { %351 = vadd.xlane.f32.xlu1 %v336_v2  ;;  %v378_v4 = vmul.f32 %v8455_v3, %v9179_v6  ;;  %v8457_v8 = vpop.eup %8456  ;;  %v405_v13 = vadd.f32 %v9271_v9, %v391_v7  ;;  %v9338_v7 = vld [vmem:[%s11598_s8] sm:$0x7] }
 0x23d   :  { %v379_v17 = vmul.f32 %v8457_v8, %v9176_v5  ;;  %v8228_v5 = vld [vmem:[%s11643_s25 + $0xb0] ss:$12 sps:$4 sm:$0xff]  }
 0x23e   :  { %v392_v62 = vmul.f32 %v9262_v0, %v378_v4  ;;  %7781 = vmatprep.subr.bf16.mxu1 %v8228_v5 }
 0x23f   :  { %v8459_v10 = vpop.eup %8458  ;;  %v393_v20 = vmul.f32 %v9262_v0, %v379_v17 }
 0x240   :  { %v406_v16 = vadd.f32 %v9271_v9, %v392_v62  ;;  %v380_v18 = vmul.f32 %v8459_v10, %v9185_v11  ;;  %v8229_v11 = vld [vmem:[%s11643_s25 + $0x98] ss:$12 sps:$4 sm:$0xff]  }
 0x241   :  { %v407_v22 = vadd.f32 %v9271_v9, %v393_v20 }
 0x242   :  { %v9278_v6 = vpack.c.bf16 %v406_v16, %v405_v13  ;;  %v394_v19 = vmul.f32 %v9262_v0, %v380_v18 }
 0x244   :  { %627 = vmatmul.mubr.bf16.vlgmr.msra.gmra.mxu1 %v9278_v6  ;;  %v408_v21 = vadd.f32 %v9271_v9, %v394_v19 }
 0x245   :  { %636 = vmatprep.mubr.bf16.mxu1 %v8926_v1  ;;  %7782 = vmatpush3.bf16.msra.mxu1 %v8228_v5 }
 0x246   :  { %v9286_v23 = vpack.c.bf16 %v408_v21, %v407_v22  ;;  %7783 = vmatprep.subr.bf16.mxu1 %v8229_v11 }
 0x249   :  { %7784 = vmatpush3.bf16.msra.mxu1 %v8229_v11 }
 0x24a   :  { %7785 = vmatprep.subr.bf16.mxu1 %v8230_v24 }
 0x24c   :  { %637 = vmatmul.mubr.bf16.gmra.mxu1 %v9286_v23 }
 0x24d   :  { %646 = vmatprep.mubr.bf16.mxu1 %v8926_v1  ;;  %7786 = vmatpush3.bf16.msra.mxu1 %v8230_v24 }
 0x24e   :  { %7787 = vmatprep.subr.bf16.mxu1 %v8231_v25 }
 0x251   :  { %7788 = vmatpush3.bf16.msra.mxu1 %v8231_v25 }
 0x252   :  { %7789 = vmatprep.subr.bf16.mxu1 %v8232_v26 }
 0x255   :  { %7790 = vmatpush3.bf16.msra.mxu1 %v8232_v26 }
 0x256   :  { %7791 = vmatprep.subr.bf16.mxu1 %v8233_v28 }
 0x259   :  { %7792 = vmatpush3.bf16.msra.mxu1 %v8233_v28 }
 0x25a   :  { %7793 = vmatprep.subr.bf16.mxu1 %v8234_v29 }
 0x25d   :  { %7794 = vmatpush3.bf16.msra.mxu1 %v8234_v29 }
 0x25e   :  { %7795 = vmatprep.subr.bf16.mxu1 %v8235_v30 }
 0x261   :  { %7796 = vmatpush3.bf16.msra.mxu1 %v8235_v30 }
 0x2bd   :  { %v346_v31 = vpop.xlane.xlu0 %345 }
 0x2be   :  { %v357_v32 = vmul.f32 0.0078125, %v346_v31 }
 0x2c0   :  { %v365_v33 = vadd.f32 1e-05, %v357_v32 }
 0x2c1   :  { %v348_v34 = vpop.xlane.xlu1 %347  ;;  %v350_v35 = vpop.xlane.xlu0 %349 }
 0x2c2   :  { %8460 = vrsqrt.f32 %v365_v33  ;;  %v358_v36 = vmul.f32 0.0078125, %v348_v34  ;;  %v359_v37 = vmul.f32 0.0078125, %v350_v35 }
 0x2c4   :  { %v366_v38 = vadd.f32 1e-05, %v358_v36  ;;  %v367_v39 = vadd.f32 1e-05, %v359_v37 }
 0x2c5   :  { %v352_v40 = vpop.xlane.xlu1 %351 }
 0x2c6   :  { %8462 = vrsqrt.f32 %v366_v38  ;;  %v360_v41 = vmul.f32 0.0078125, %v352_v40 }
 0x2c7   :  { %8464 = vrsqrt.f32 %v367_v39 }
 0x2c8   :  { %v368_v42 = vadd.f32 1e-05, %v360_v41 }
 0x2ca   :  { %8466 = vrsqrt.f32 %v368_v42 }
 0x2cf   :  { %v8461_v43 = vpop.eup %8460 }
 0x2d0   :  { %v381_v44 = vmul.f32 %v8461_v43, %v9242_v48 }
 0x2d2   :  { %v395_v51 = vmul.f32 %v9262_v0, %v381_v44 }
 0x2d3   :  { %v8463_v49 = vpop.eup %8462 }
 0x2d4   :  { %v382_v50 = vmul.f32 %v8463_v49, %v9247_v54  ;;  %v8465_v52 = vpop.eup %8464  ;;  %v409_v57 = vadd.f32 %v9271_v9, %v395_v51 }
 0x2d5   :  { %v383_v59 = vmul.f32 %v8465_v52, %v9250_v55  ;;  %v291_v55 = vlaneseq }
 0x2d6   :  { %v396_v53 = vmul.f32 %v9262_v0, %v382_v50 }
 0x2d7   :  { %v8467_v56 = vpop.eup %8466  ;;  %v397_v54 = vmul.f32 %v9262_v0, %v383_v59 }
 0x2d8   :  { %v410_v58 = vadd.f32 %v9271_v9, %v396_v53  ;;  %v384_v60 = vmul.f32 %v8467_v56, %v9256_v61  ;;  %v9330_v61 = vshrl.u32 %v291_v55, 7 }
 0x2d9   :  { %v411_v3 = vadd.f32 %v9271_v9, %v397_v54 }
 0x2da   :  { %v447_v63 = vpack.c.bf16 %v410_v58, %v409_v57  ;;  %v398_v48 = vmul.f32 %v9262_v0, %v384_v60  ;;  %v9333_v0 = vsub.s32 0, %v9330_v61  ;;  %v9341_v8 = vsub.s32 1, %v9330_v61 }
 0x2db   :  { %v9396_v58 = vsub.s32 2, %v9330_v61 }
 0x2dc   :  { %647 = vmatmul.mubr.bf16.gmra.mxu1 %v447_v63  ;;  %v412_v2 = vadd.f32 %v9271_v9, %v398_v48  ;;  %v454_v62 = vrot.slane %v9338_v7, %v9333_v0  ;;  %v9347_v13 = vrot.slane %v9338_v7, %v9341_v8 }
 0x2dd   :  { %656 = vmatprep.mubr.bf16.mxu1 %v8926_v1  ;;  %v462_v48 = vrot.slane %v9338_v7, %v9396_v58 }
 0x2de   :  { %v448_v4 = vpack.c.bf16 %v412_v2, %v411_v3 }
 0x2e4   :  { %657 = vmatmul.mubr.bf16.gmra.mxu1 %v448_v4 }
 0x2e5   :  { %7797 = vmatprep.mubr.bf16.mxu1 %v9278_v6 }
 0x2ec   :  { %7798 = vmatmul.mubr.bf16.vlgmr.msra.gmra.mxu1 %v9286_v23 }
 0x2ed   :  { %7801 = vmatprep.mubr.bf16.mxu1 %v447_v63 }
 0x2f4   :  { %7802 = vmatmul.mubr.bf16.gmra.mxu1 %v448_v4 }
 0x304   :  { %v628_v9 = vpop.f32.mrf.mxu1 }
 0x305   :  { %v629_v17 = vadd.f32 %v628_v9, %v454_v62 }
 0x306   :  { %v630_v10 = vpop.f32.mrf.mxu1 }
 0x307   :  { %v631_v19 = vadd.f32 %v630_v10, %v9347_v13 }
 0x308   :  { %v632_v16 = vpop.f32.mrf.mxu1 }
 0x309   :  { %v633_v18 = vadd.f32 %v632_v16, %v454_v62 }
 0x30a   :  { %v634_v6 = vpop.f32.mrf.mxu1 }
 0x30b   :  { %v9350_v20 = vpack.c.bf16 %v633_v18, %v629_v17  ;;  %v635_v21 = vadd.f32 %v634_v6, %v9347_v13 }
 0x30c   :  { %v638_v22 = vpop.f32.mrf.mxu1 }
 0x30d   :  { %v9353_v23 = vpack.c.bf16 %v635_v21, %v631_v19  ;;  %7809 = vmatprep.mubr.msk.bf16.mxu1 %vm744_vm2, %v9350_v20  ;;  %v639_v26 = vadd.f32 %v638_v22, %v454_v62 }
 0x30e   :  { %v640_v5 = vpop.f32.mrf.mxu1 }
 0x30f   :  { %927 = vrot.lane.b32.xlu1 %v9353_v23, %s11625_s5  ;;  %v641_v28 = vadd.f32 %v640_v5, %v9347_v13  ;;  %v752_v33 = vsel %vm744_vm2, %v9353_v23, 0 }
 0x310   :  { %v642_v11 = vpop.f32.mrf.mxu1 }
 0x311   :  { %v643_v24 = vadd.f32 %v642_v11, %v454_v62 }
 0x312   :  { %v644_v25 = vpop.f32.mrf.mxu1 }
 0x313   :  { %v645_v29 = vadd.f32 %v644_v25, %v9347_v13  ;;  %921 = vrot.lane.b32.xlu1 %v9350_v20, %s11625_s5  ;;  %v9363_v30 = vpack.c.bf16 %v643_v24, %v639_v26  ;;  %v9417_v26 = vand.u32 127, %v291_v55 }
 0x315   :  { %v9365_v31 = vpack.c.bf16 %v645_v29, %v641_v28  ;;  %vm293_vm3 = vcmp.lt.s32.totalorder %v9417_v26, 17 }
 0x317   :  { %8153 = vmatprep.subr.msk.bf16.mxu1 %vm744_vm2, %v9365_v31  ;;  %923 = vrot.lane.b32.xlu1 %v9363_v30, %s11625_s5  ;;  %v755_v32 = vsel %vm744_vm2, %v9365_v31, 0 }
 0x318   :  { %929 = vrot.lane.b32.xlu0 %v9365_v31, %s11625_s5  ;;  %7806 = vmatpush3.bf16.xpose.msra.mxu1 %v755_v32 }
 0x319   :  { %8154 = vmatprep.subr.msk.bf16.mxu1 %vm744_vm2, %v9353_v23 }
 0x320   :  { %7808 = vmatpush3.bf16.xpose.msra.mxu1 %v752_v33 }
 0x327   :  { %7810 = vmatmul.mubr.msk.bf16.vlgmr.msra.gmra.mxu1 %vm744_vm2, %v9363_v30 }
 0x381   :  { %v928_v34 = vpop.permute.xlu1 %927 }
 0x382   :  { %v938_v38 = vsel %vm744_vm2, %v928_v34, 0 }
 0x385   :  { %v922_v35 = vpop.permute.xlu1 %921 }
 0x386   :  { %7825 = vmatprep.mubr.msk.bf16.mxu1 %vm744_vm2, %v922_v35 }
 0x389   :  { %v924_v39 = vpop.permute.xlu1 %923 }
 0x38a   :  { %v930_v36 = vpop.permute.xlu0 %929 }
 0x38b   :  { %8155 = vmatprep.subr.msk.bf16.mxu1 %vm744_vm2, %v930_v36  ;;  %v941_v37 = vsel %vm744_vm2, %v930_v36, 0 }
 0x38c   :  { %7822 = vmatpush3.bf16.xpose.msra.mxu1 %v941_v37 }
 0x38d   :  { %8156 = vmatprep.subr.msk.bf16.mxu1 %vm744_vm2, %v928_v34 }
 0x394   :  { %7824 = vmatpush3.bf16.xpose.msra.mxu1 %v938_v38 }
 0x39b   :  { %7826 = vmatmul.mubr.msk.bf16.vlgmr.msra.gmra.mxu1 %vm744_vm2, %v924_v39 }
 0x39c   :  { %v648_v40 = vpop.f32.mrf.mxu1 }
 0x39d   :  { %v649_v43 = vadd.f32 %v648_v40, %v454_v62 }
 0x39e   :  { %v9387_v41 = vpop.f32.mrf.mxu1 }
 0x3a0   :  { %v652_v42 = vpop.f32.mrf.mxu1 }
 0x3a1   :  { %v653_v44 = vadd.f32 %v652_v42, %v454_v62 }
 0x3a2   :  { %v9389_v49 = vpop.f32.mrf.mxu1 }
 0x3a3   :  { %v9391_v50 = vpack.c.bf16 %v653_v44, %v649_v43 }
 0x3a4   :  { %v658_v51 = vpop.f32.mrf.mxu1 }
 0x3a5   :  { %v659_v56 = vadd.f32 %v658_v51, %v454_v62 }
 0x3a6   :  { %v9393_v52 = vpop.f32.mrf.mxu1 }
 0x3a8   :  { %v662_v53 = vpop.f32.mrf.mxu1 }
 0x3a9   :  { %v663_v57 = vadd.f32 %v662_v53, %v454_v62 }
 0x3aa   :  { %v9398_v59 = vpop.f32.mrf.mxu1 }
 0x3ab   :  { %v9400_v60 = vpack.c.bf16 %v663_v57, %v659_v56 }
 0x3ac   :  { %v7799_v63 = vpop.f32.mrf.mxu1 }
 0x3ad   :  { %v710_v3 = vadd.f32 %v7799_v63, %v462_v48 }
 0x3ae   :  { %v701_v54 = vpop.f32.mrf.mxu1 }
 0x3af   :  { %v702_v10 = vadd.f32 %v701_v54, %v462_v48 }
 0x3b0   :  { %v7800_v2 = vpop.f32.mrf.mxu1 }
 0x3b1   :  { %v713_v4 = vadd.f32 %v7800_v2, %v462_v48 }
 0x3b2   :  { %v704_v9 = vpop.f32.mrf.mxu1 }
 0x3b3   :  { %v9404_v16 = vpack.c.bf16 %v713_v4, %v710_v3  ;;  %v705_v62 = vadd.f32 %v704_v9, %v462_v48 }
 0x3b4   :  { %v7803_v17 = vpop.f32.mrf.mxu1 }
 0x3b5   :  { %v9406_v18 = vpack.c.bf16 %v705_v62, %v702_v10  ;;  %v726_v6 = vadd.f32 %v7803_v17, %v462_v48  ;;  %7813 = vmatprep.subr.bf16.mxu0 %v9404_v16 }
 0x3b6   :  { %v717_v19 = vpop.f32.mrf.mxu1  ;;  %7814 = vmatpush3.bf16.msra.mxu0 %v9404_v16 }
 0x3b7   :  { %v718_v21 = vadd.f32 %v717_v19, %v462_v48  ;;  %7815 = vmatprep.subr.bf16.mxu0 %v9406_v18 }
 0x3b8   :  { %v7804_v7 = vpop.f32.mrf.mxu1 }
 0x3b9   :  { %v729_v22 = vadd.f32 %v7804_v7, %v462_v48 }
 0x3ba   :  { %v720_v5 = vpop.f32.mrf.mxu1  ;;  %7816 = vmatpush3.bf16.msra.mxu0 %v9406_v18 }
 0x3bb   :  { %v9412_v11 = vpack.c.bf16 %v729_v22, %v726_v6  ;;  %v721_v24 = vadd.f32 %v720_v5, %v462_v48 }
 0x3bd   :  { %v9414_v25 = vpack.c.bf16 %v721_v24, %v718_v21 }
 0x3e7   :  { %v7811_v28 = vpop.f32.mrf.mxu1 }
 0x3e8   :  { %v808_v32 = vmul.f32 0.17677669, %v7811_v28 }
 0x3e9   :  { %v791_v29 = vpop.f32.mrf.mxu1 }
 0x3ea   :  { %v806_v33 = vmul.f32 0.17677669, %v791_v29  ;;  %v812_v55 = vsel %vm293_vm3, %v808_v32, -1e+30 }
 0x3eb   :  { %v7812_v34 = vpop.f32.mrf.mxu1  ;;  %v820_v42 = vsel %vm744_vm2, %v812_v55, -inf }
 0x3ec   :  { %v810_v35 = vsel %vm293_vm3, %v806_v33, -1e+30  ;;  %v809_v38 = vmul.f32 0.17677669, %v7812_v34 }
 0x3ed   :  { %v794_v36 = vpop.f32.mrf.mxu1  ;;  %v814_v37 = vsel %vm744_vm2, %v810_v35, -inf }
 0x3ee   :  { %v807_v39 = vmul.f32 0.17677669, %v794_v36  ;;  %815 = vmax.xlane.f32.xlu0 %v814_v37  ;;  %v813_v44 = vsel %vm293_vm3, %v809_v38, -1e+30 }
 0x3ef   :  { %v823_v51 = vsel %vm744_vm2, %v813_v44, -inf }
 0x3f0   :  { %v811_v40 = vsel %vm293_vm3, %v807_v39, -1e+30 }
 0x3f1   :  { %v817_v43 = vsel %vm744_vm2, %v811_v40, -inf }
 0x3f2   :  { %821 = vmax.xlane.f32.xlu0 %v820_v42  ;;  %818 = vmax.xlane.f32.xlu1 %v817_v43 }
 0x3f6   :  { %824 = vmax.xlane.f32.xlu0 %v823_v51 }
 0x45b   :  { %v7827_v53 = vpop.f32.mrf.mxu1 }
 0x45c   :  { %v994_v57 = vmul.f32 0.17677669, %v7827_v53 }
 0x45d   :  { %v977_v56 = vpop.f32.mrf.mxu1 }
 0x45e   :  { %v992_v63 = vmul.f32 0.17677669, %v977_v56  ;;  %v998_v10 = vsel %vm293_vm3, %v994_v57, -1e+30 }
 0x45f   :  { %v7828_v48 = vpop.f32.mrf.mxu1  ;;  %v1006_v17 = vsel %vm744_vm2, %v998_v10, -inf }
 0x460   :  { %v996_v54 = vsel %vm293_vm3, %v992_v63, -1e+30  ;;  %v995_v4 = vmul.f32 0.17677669, %v7828_v48 }
 0x461   :  { %v980_v2 = vpop.f32.mrf.mxu1  ;;  %v1000_v3 = vsel %vm744_vm2, %v996_v54, -inf }
 0x462   :  { %v993_v9 = vmul.f32 0.17677669, %v980_v2  ;;  %1001 = vmax.xlane.f32.xlu0 %v1000_v3  ;;  %v999_v19 = vsel %vm293_vm3, %v995_v4, -1e+30 }
 0x463   :  { %v1009_v21 = vsel %vm744_vm2, %v999_v19, -inf }
 0x464   :  { %v997_v62 = vsel %vm293_vm3, %v993_v9, -1e+30 }
 0x465   :  { %v1003_v6 = vsel %vm744_vm2, %v997_v62, -inf }
 0x466   :  { %1007 = vmax.xlane.f32.xlu0 %v1006_v17  ;;  %1004 = vmax.xlane.f32.xlu1 %v1003_v6 }
 0x46a   :  { %1010 = vmax.xlane.f32.xlu1 %v1009_v21 }
 0x477   :  { %v816_v7 = vpop.xlane.xlu0 %815 }
 0x478   :  { %v826_v22 = vsub.f32 %v810_v35, %v816_v7 }
 0x47a   :  { %v830_v33 = vmul.f32 1.442695, %v826_v22 }
 0x47b   :  { %v819_v5 = vpop.xlane.xlu1 %818  ;;  %v822_v24 = vpop.xlane.xlu0 %821 }
 0x47c   :  { %v828_v28 = vsub.f32 %v812_v55, %v822_v24  ;;  %v827_v29 = vsub.f32 %v811_v40, %v819_v5 }
 0x47e   :  { %v834_v32 = vmul.f32 1.442695, %v828_v28  ;;  %v832_v37 = vmul.f32 1.442695, %v827_v29 }
 0x47f   :  { %v825_v34 = vpop.xlane.xlu0 %824 }
 0x480   :  { %v829_v36 = vsub.f32 %v813_v44, %v825_v34  ;;  %8468 = vpow2.f32 %v834_v32 }
 0x481   :  { %8470 = vpow2.f32 %v830_v33 }
 0x482   :  { %v836_v38 = vmul.f32 1.442695, %v829_v36 }
 0x484   :  { %8472 = vpow2.f32 %v836_v38 }
 0x485   :  { %8474 = vpow2.f32 %v832_v37 }
 0x48d   :  { %v8469_v39 = vpop.eup %8468 }
 0x48e   :  { %v844_v42 = vsel %vm744_vm2, %v8469_v39, 0.0  ;;  %v8471_v43 = vpop.eup %8470 }
 0x48f   :  { %845 = vadd.xlane.f32.xlu0 %v844_v42  ;;  %v838_v40 = vsel %vm744_vm2, %v8471_v43, 0.0 }
 0x491   :  { %v8473_v35 = vpop.eup %8472 }
 0x492   :  { %v847_v51 = vsel %vm744_vm2, %v8473_v35, 0.0  ;;  %v8475_v55 = vpop.eup %8474 }
 0x493   :  { %848 = vadd.xlane.f32.xlu1 %v847_v51  ;;  %839 = vadd.xlane.f32.xlu0 %v838_v40  ;;  %v841_v44 = vsel %vm744_vm2, %v8475_v55, 0.0 }
 0x497   :  { %842 = vadd.xlane.f32.xlu1 %v841_v44 }
 0x4a8   :  { %1048 = vrot.lane.b32.xlu1 %v9406_v18, %s11625_s5 }
 0x4eb   :  { %v1002_v53 = vpop.xlane.xlu0 %1001 }
 0x4ec   :  { %v1012_v56 = vsub.f32 %v996_v54, %v1002_v53 }
 0x4ee   :  { %v1016_v4 = vmul.f32 1.442695, %v1012_v56 }
 0x4ef   :  { %v1005_v57 = vpop.xlane.xlu1 %1004  ;;  %v1008_v63 = vpop.xlane.xlu0 %1007 }
 0x4f0   :  { %v1014_v48 = vsub.f32 %v998_v10, %v1008_v63  ;;  %v1013_v2 = vsub.f32 %v997_v62, %v1005_v57 }
 0x4f2   :  { %v1020_v3 = vmul.f32 1.442695, %v1014_v48  ;;  %v1018_v6 = vmul.f32 1.442695, %v1013_v2 }
 0x4f3   :  { %v1011_v9 = vpop.xlane.xlu1 %1010 }
 0x4f4   :  { %v1015_v17 = vsub.f32 %v999_v19, %v1011_v9  ;;  %8476 = vpow2.f32 %v1020_v3 }
 0x4f5   :  { %8478 = vpow2.f32 %v1016_v4 }
 0x4f6   :  { %v1022_v21 = vmul.f32 1.442695, %v1015_v17 }
 0x4f8   :  { %8480 = vpow2.f32 %v1022_v21 }
 0x4f9   :  { %8482 = vpow2.f32 %v1018_v6 }
 0x501   :  { %v8477_v7 = vpop.eup %8476 }
 0x502   :  { %v1030_v22 = vsel %vm744_vm2, %v8477_v7, 0.0  ;;  %v8479_v5 = vpop.eup %8478 }
 0x503   :  { %1031 = vadd.xlane.f32.xlu0 %v1030_v22  ;;  %v1024_v62 = vsel %vm744_vm2, %v8479_v5, 0.0 }
 0x505   :  { %v8481_v54 = vpop.eup %8480 }
 0x506   :  { %v1033_v24 = vsel %vm744_vm2, %v8481_v54, 0.0  ;;  %v8483_v10 = vpop.eup %8482 }
 0x507   :  { %1034 = vadd.xlane.f32.xlu1 %v1033_v24  ;;  %1025 = vadd.xlane.f32.xlu0 %v1024_v62  ;;  %v1027_v19 = vsel %vm744_vm2, %v8483_v10, 0.0 }
 0x50b   :  { %1028 = vadd.xlane.f32.xlu1 %v1027_v19 }
 0x518   :  { %v846_v28 = vpop.xlane.xlu0 %845 }
 0x51c   :  { %1136 = vrot.lane.b32.xlu1 %v9365_v31, %s11623_s1  ;;  %v849_v29 = vpop.xlane.xlu1 %848  ;;  %v840_v32 = vpop.xlane.xlu0 %839 }
 0x51d   :  { %8484 = vrcp.f32 %v849_v29  ;;  %1050 = vrot.lane.b32.xlu0 %v9404_v16, %s11625_s5 }
 0x51e   :  { %8486 = vrcp.f32 %v840_v32 }
 0x51f   :  { %8488 = vrcp.f32 %v846_v28 }
 0x520   :  { %1134 = vrot.lane.b32.xlu1 %v9353_v23, %s11623_s1  ;;  %v843_v33 = vpop.xlane.xlu1 %842 }
 0x521   :  { %8490 = vrcp.f32 %v843_v33  ;;  %1130 = vrot.lane.b32.xlu0 %v9350_v20, %s11623_s1 }
 0x524   :  { %1132 = vrot.lane.b32.xlu1 %v9363_v30, %s11623_s1  ;;  %v1049_v57 = vpop.permute.xlu1 %1048 }
 0x52a   :  { %v8485_v34 = vpop.eup %8484 }
 0x52b   :  { %v8487_v36 = vpop.eup %8486  ;;  %v857_v42 = vmul.f32 %v8485_v34, %v8473_v35 }
 0x52c   :  { %v8489_v37 = vpop.eup %8488  ;;  %v854_v51 = vmul.f32 %v8487_v36, %v8471_v43 }
 0x52d   :  { %v856_v44 = vmul.f32 %v8489_v37, %v8469_v39 }
 0x52e   :  { %v8491_v38 = vpop.eup %8490 }
 0x52f   :  { %v855_v40 = vmul.f32 %v8491_v38, %v8475_v55  ;;  %v859_v56 = vpack.c.bf16 %v857_v42, %v856_v44 }
 0x531   :  { %v858_v53 = vpack.c.bf16 %v855_v40, %v854_v51 }
 0x533   :  { %7817 = vmatprep.mubr.msk.bf16.mxu0 %vm744_vm2, %v858_v53 }
 0x534   :  { %7818 = vmatmul.mubr.msk.bf16.vlgmr.msra.gmra.mxu0 %vm744_vm2, %v859_v56 }
 0x58c   :  { %v1032_v63 = vpop.xlane.xlu0 %1031 }
 0x590   :  { %v1035_v48 = vpop.xlane.xlu1 %1034  ;;  %v1026_v2 = vpop.xlane.xlu0 %1025 }
 0x591   :  { %8492 = vrcp.f32 %v1035_v48 }
 0x592   :  { %8494 = vrcp.f32 %v1026_v2 }
 0x593   :  { %8496 = vrcp.f32 %v1032_v63 }
 0x594   :  { %v1029_v3 = vpop.xlane.xlu1 %1028  ;;  %v1051_v4 = vpop.permute.xlu0 %1050 }
 0x595   :  { %8498 = vrcp.f32 %v1029_v3  ;;  %7829 = vmatprep.subr.bf16.mxu0 %v1051_v4 }
 0x596   :  { %7830 = vmatpush3.bf16.msra.mxu0 %v1051_v4 }
 0x597   :  { %7831 = vmatprep.subr.bf16.mxu0 %v1049_v57 }
 0x598   :  { %v1137_v39 = vpop.permute.xlu1 %1136  ;;  %v1131_v19 = vpop.permute.xlu0 %1130 }
 0x599   :  { %v1148_v28 = vsel %vm744_vm2, %v1137_v39, 0 }
 0x59a   :  { %7832 = vmatpush3.bf16.msra.mxu0 %v1049_v57 }
 0x59b   :  { %8157 = vmatprep.subr.msk.bf16.mxu0 %vm744_vm2, %v1137_v39 }
 0x59c   :  { %v1135_v29 = vpop.permute.xlu1 %1134 }
 0x59e   :  { %v8493_v43 = vpop.eup %8492 }
 0x59f   :  { %v8495_v35 = vpop.eup %8494  ;;  %v1043_v17 = vmul.f32 %v8493_v43, %v8481_v54  ;;  %v1145_v54 = vsel %vm744_vm2, %v1135_v29, 0 }
 0x5a0   :  { %v8497_v55 = vpop.eup %8496  ;;  %v1040_v6 = vmul.f32 %v8495_v35, %v8479_v5  ;;  %v1133_v5 = vpop.permute.xlu1 %1132 }
 0x5a1   :  { %v1042_v22 = vmul.f32 %v8497_v55, %v8477_v7 }
 0x5a2   :  { %v8499_v9 = vpop.eup %8498 }
 0x5a3   :  { %v1041_v21 = vmul.f32 %v8499_v9, %v8483_v10  ;;  %v1045_v62 = vpack.c.bf16 %v1043_v17, %v1042_v22 }
 0x5a5   :  { %v1044_v24 = vpack.c.bf16 %v1041_v21, %v1040_v6 }
 0x5a7   :  { %7833 = vmatprep.mubr.msk.bf16.mxu0 %vm744_vm2, %v1044_v24 }
 0x5a8   :  { %7834 = vmatmul.mubr.msk.bf16.vlgmr.msra.gmra.mxu0 %vm744_vm2, %v1045_v62 }
 0x5a9   :  { %7838 = vmatpush3.bf16.xpose.msra.mxu0 %v1148_v28  ;;  %7841 = vmatprep.mubr.msk.bf16.mxu0 %vm744_vm2, %v1131_v19 }
 0x5aa   :  { %8158 = vmatprep.subr.msk.bf16.mxu0 %vm744_vm2, %v1135_v29 }
 0x5b1   :  { %7840 = vmatpush3.bf16.xpose.msra.mxu0 %v1145_v54 }
 0x5b8   :  { %7842 = vmatmul.mubr.msk.bf16.vlgmr.msra.gmra.mxu0 %vm744_vm2, %v1133_v5 }
 0x5f4   :  { %v7819_v7 = vpop.f32.mrf.mxu0 }
 0x5f5   :  { %917 = vst.msk [vmem:[#allocation2 + $0x10] sm:$0xff] %vm744_vm2, %v7819_v7 }
 0x5f6   :  { %v900_v10 = vpop.f32.mrf.mxu0 }
 0x5f7   :  { %915 = vst.msk [vmem:[#allocation2] sm:$0xff] %vm744_vm2, %v900_v10 }
 0x5f8   :  { %v7820_v32 = vpop.f32.mrf.mxu0 }
 0x5f9   :  { %918 = vst.msk [vmem:[#allocation2 + $0x18] sm:$0xff] %vm744_vm2, %v7820_v32 }
 0x5fa   :  { %v903_v33 = vpop.f32.mrf.mxu0 }
 0x5fb   :  { %916 = vst.msk [vmem:[#allocation2 + $0x8] sm:$0xff] %vm744_vm2, %v903_v33 }
 0x668   :  { %v9478_v34 = vpop.f32.mrf.mxu0 }
 0x66a   :  { %v9480_v36 = vpop.f32.mrf.mxu0 }
 0x66c   :  { %v9482_v37 = vpop.f32.mrf.mxu0 }
 0x66e   :  { %v9484_v38 = vpop.f32.mrf.mxu0 }
 0x678   :  { %v7843_v42 = vpop.f32.mrf.mxu0 }
 0x679   :  { %v1201_v40 = vmul.f32 0.17677669, %v7843_v42 }
 0x67a   :  { %v1184_v51 = vpop.f32.mrf.mxu0 }
 0x67b   :  { %v1199_v44 = vmul.f32 0.17677669, %v1184_v51  ;;  %v1205_v3 = vsel %vm293_vm3, %v1201_v40, -1e+30 }
 0x67c   :  { %v7844_v53 = vpop.f32.mrf.mxu0  ;;  %v1213_v39 = vsel %vm744_vm2, %v1205_v3, -inf }
 0x67d   :  { %v1203_v56 = vsel %vm293_vm3, %v1199_v44, -1e+30  ;;  %v1202_v48 = vmul.f32 0.17677669, %v7844_v53 }
 0x67e   :  { %v1187_v57 = vpop.f32.mrf.mxu0  ;;  %v1207_v63 = vsel %vm744_vm2, %v1203_v56, -inf }
 0x67f   :  { %v1200_v2 = vmul.f32 0.17677669, %v1187_v57  ;;  %1208 = vmax.xlane.f32.xlu0 %v1207_v63  ;;  %v1206_v35 = vsel %vm293_vm3, %v1202_v48, -1e+30 }
 0x680   :  { %v1216_v55 = vsel %vm744_vm2, %v1206_v35, -inf }
 0x681   :  { %v1204_v4 = vsel %vm293_vm3, %v1200_v2, -1e+30 }
 0x682   :  { %v1210_v43 = vsel %vm744_vm2, %v1204_v4, -inf }
 0x683   :  { %1214 = vmax.xlane.f32.xlu0 %v1213_v39  ;;  %1211 = vmax.xlane.f32.xlu1 %v1210_v43 }
 0x687   :  { %1217 = vmax.xlane.f32.xlu0 %v1216_v55 }
 0x694   :  { %1253 = vrot.lane.b32.xlu1 %v9406_v18, %s11623_s1 }
 0x708   :  { %v1209_v9 = vpop.xlane.xlu0 %1208 }
 0x709   :  { %v1219_v17 = vsub.f32 %v1203_v56, %v1209_v9 }
 0x70b   :  { %v1223_v24 = vmul.f32 1.442695, %v1219_v17 }
 0x70c   :  { %v1215_v6 = vpop.xlane.xlu0 %1214  ;;  %v1212_v21 = vpop.xlane.xlu1 %1211 }
 0x70d   :  { %v1221_v22 = vsub.f32 %v1205_v3, %v1215_v6  ;;  %v1220_v19 = vsub.f32 %v1204_v4, %v1212_v21 }
 0x70f   :  { %v1227_v62 = vmul.f32 1.442695, %v1221_v22  ;;  %v1225_v54 = vmul.f32 1.442695, %v1220_v19 }
 0x710   :  { %v1218_v28 = vpop.xlane.xlu0 %1217  ;;  %v1254_v53 = vpop.permute.xlu1 %1253 }
 0x711   :  { %8500 = vpow2.f32 %v1227_v62  ;;  %v1222_v29 = vsub.f32 %v1206_v35, %v1218_v28 }
 0x712   :  { %8502 = vpow2.f32 %v1223_v24 }
 0x713   :  { %v1229_v5 = vmul.f32 1.442695, %v1222_v29 }
 0x715   :  { %8504 = vpow2.f32 %v1229_v5 }
 0x716   :  { %8506 = vpow2.f32 %v1225_v54 }
 0x71e   :  { %v8501_v7 = vpop.eup %8500 }
 0x71f   :  { %v1237_v10 = vsel %vm744_vm2, %v8501_v7, 0.0  ;;  %v8503_v32 = vpop.eup %8502 }
 0x720   :  { %1238 = vadd.xlane.f32.xlu0 %v1237_v10  ;;  %v1231_v42 = vsel %vm744_vm2, %v8503_v32, 0.0 }
 0x722   :  { %v8505_v33 = vpop.eup %8504 }
 0x723   :  { %v1240_v51 = vsel %vm744_vm2, %v8505_v33, 0.0  ;;  %v8507_v40 = vpop.eup %8506 }
 0x724   :  { %1232 = vadd.xlane.f32.xlu0 %v1231_v42  ;;  %1241 = vadd.xlane.f32.xlu1 %v1240_v51  ;;  %v1234_v44 = vsel %vm744_vm2, %v8507_v40, 0.0 }
 0x728   :  { %1235 = vadd.xlane.f32.xlu1 %v1234_v44 }
 0x739   :  { %1341 = vrot.lane.b32.xlu1 %v9365_v31, %s11621_s26 }
 0x73a   :  { %1255 = vrot.lane.b32.xlu0 %v9404_v16, %s11623_s1 }
 0x73d   :  { %1339 = vrot.lane.b32.xlu1 %v9353_v23, %s11621_s26 }
 0x73e   :  { %1335 = vrot.lane.b32.xlu0 %v9350_v20, %s11621_s26 }
 0x741   :  { %1337 = vrot.lane.b32.xlu1 %v9363_v30, %s11621_s26 }
 0x7a9   :  { %v1239_v56 = vpop.xlane.xlu0 %1238 }
 0x7ad   :  { %v1233_v57 = vpop.xlane.xlu0 %1232  ;;  %v1242_v63 = vpop.xlane.xlu1 %1241 }
 0x7ae   :  { %8508 = vrcp.f32 %v1242_v63 }
 0x7af   :  { %8510 = vrcp.f32 %v1233_v57 }
 0x7b0   :  { %8512 = vrcp.f32 %v1239_v56 }
 0x7b1   :  { %v1256_v31 = vpop.permute.xlu0 %1255  ;;  %v1236_v48 = vpop.xlane.xlu1 %1235 }
 0x7b2   :  { %8514 = vrcp.f32 %v1236_v48  ;;  %7845 = vmatprep.subr.bf16.mxu1 %v1256_v31 }
 0x7b3   :  { %7846 = vmatpush3.bf16.msra.mxu1 %v1256_v31 }
 0x7b4   :  { %7847 = vmatprep.subr.bf16.mxu1 %v1254_v53 }
 0x7b5   :  { %v1342_v23 = vpop.permute.xlu1 %1341  ;;  %v1336_v17 = vpop.permute.xlu0 %1335 }
 0x7b6   :  { %v1353_v6 = vsel %vm744_vm2, %v1342_v23, 0 }
 0x7b7   :  { %7848 = vmatpush3.bf16.msra.mxu1 %v1254_v53 }
 0x7b8   :  { %8159 = vmatprep.subr.msk.bf16.mxu1 %vm744_vm2, %v1342_v23 }
 0x7b9   :  { %v1340_v21 = vpop.permute.xlu1 %1339 }
 0x7ba   :  { %v1350_v22 = vsel %vm744_vm2, %v1340_v21, 0 }
 0x7bb   :  { %v8509_v20 = vpop.eup %8508 }
 0x7bc   :  { %v8511_v2 = vpop.eup %8510  ;;  %v1250_v4 = vmul.f32 %v8509_v20, %v8505_v33 }
 0x7bd   :  { %v8513_v30 = vpop.eup %8512  ;;  %v1247_v39 = vmul.f32 %v8511_v2, %v8503_v32  ;;  %v1338_v24 = vpop.permute.xlu1 %1337 }
 0x7be   :  { %v1249_v35 = vmul.f32 %v8513_v30, %v8501_v7 }
 0x7bf   :  { %v8515_v3 = vpop.eup %8514 }
 0x7c0   :  { %v1248_v43 = vmul.f32 %v8515_v3, %v8507_v40  ;;  %v1252_v9 = vpack.c.bf16 %v1250_v4, %v1249_v35 }
 0x7c2   :  { %v1251_v55 = vpack.c.bf16 %v1248_v43, %v1247_v39 }
 0x7c4   :  { %7849 = vmatprep.mubr.msk.bf16.mxu1 %vm744_vm2, %v1251_v55 }
 0x7c5   :  { %7850 = vmatmul.mubr.msk.bf16.vlgmr.msra.gmra.mxu1 %vm744_vm2, %v1252_v9 }
 0x7c6   :  { %7854 = vmatpush3.bf16.xpose.msra.mxu1 %v1353_v6  ;;  %7857 = vmatprep.mubr.msk.bf16.mxu1 %vm744_vm2, %v1336_v17 }
 0x7c7   :  { %8160 = vmatprep.subr.msk.bf16.mxu1 %vm744_vm2, %v1340_v21 }
 0x7ce   :  { %7856 = vmatpush3.bf16.xpose.msra.mxu1 %v1350_v22 }
 0x7cf   :  { %7877 = vmatprep.subr.bf16.mxu1 %v9412_v11 }
 0x7d5   :  { %7858 = vmatmul.mubr.msk.bf16.vlgmr.msra.gmra.mxu1 %vm744_vm2, %v1338_v24 }
 0x7d6   :  { %7878 = vmatpush3.bf16.msra.mxu1 %v9412_v11 }
 0x7d7   :  { %7879 = vmatprep.subr.bf16.mxu1 %v9414_v25 }
 0x7da   :  { %7880 = vmatpush3.bf16.msra.mxu1 %v9414_v25 }
 0x885   :  { %v9526_v62 = vpop.f32.mrf.mxu1 }
 0x887   :  { %v9528_v19 = vpop.f32.mrf.mxu1 }
 0x889   :  { %v9530_v28 = vpop.f32.mrf.mxu1 }
 0x88b   :  { %v9532_v29 = vpop.f32.mrf.mxu1 }
 0x895   :  { %v7859_v54 = vpop.f32.mrf.mxu1 }
 0x896   :  { %v1406_v7 = vmul.f32 0.17677669, %v7859_v54 }
 0x897   :  { %v1389_v5 = vpop.f32.mrf.mxu1 }
 0x898   :  { %v1404_v10 = vmul.f32 0.17677669, %v1389_v5  ;;  %v1410_v53 = vsel %vm293_vm3, %v1406_v7, -1e+30 }
 0x899   :  { %v7860_v32 = vpop.f32.mrf.mxu1  ;;  %v1418_v57 = vsel %vm744_vm2, %v1410_v53, -inf }
 0x89a   :  { %v1408_v33 = vsel %vm293_vm3, %v1404_v10, -1e+30  ;;  %v1407_v40 = vmul.f32 0.17677669, %v7860_v32 }
 0x89b   :  { %v1392_v42 = vpop.f32.mrf.mxu1  ;;  %v1412_v51 = vsel %vm744_vm2, %v1408_v33, -inf }
 0x89c   :  { %v1405_v44 = vmul.f32 0.17677669, %v1392_v42  ;;  %1413 = vmax.xlane.f32.xlu0 %v1412_v51  ;;  %v1411_v31 = vsel %vm293_vm3, %v1407_v40, -1e+30 }
 0x89d   :  { %v1421_v48 = vsel %vm744_vm2, %v1411_v31, -inf }
 0x89e   :  { %v1409_v56 = vsel %vm293_vm3, %v1405_v44, -1e+30  ;;  %v665_v44 = vadd.f32 %v9398_v59, %v9347_v13 }
 0x89f   :  { %v1415_v63 = vsel %vm744_vm2, %v1409_v56, -inf }
 0x8a0   :  { %1419 = vmax.xlane.f32.xlu0 %v1418_v57  ;;  %1416 = vmax.xlane.f32.xlu1 %v1415_v63 }
 0x8a4   :  { %1422 = vmax.xlane.f32.xlu0 %v1421_v48 }
 0x925   :  { %v1414_v23 = vpop.xlane.xlu0 %1413 }
 0x926   :  { %v1424_v20 = vsub.f32 %v1408_v33, %v1414_v23 }
 0x928   :  { %v1428_v4 = vmul.f32 1.442695, %v1424_v20  ;;  %v655_v20 = vadd.f32 %v9389_v49, %v9347_v13 }
 0x929   :  { %v1420_v2 = vpop.xlane.xlu0 %1419  ;;  %v1417_v30 = vpop.xlane.xlu1 %1416 }
 0x92a   :  { %v1426_v3 = vsub.f32 %v1410_v53, %v1420_v2  ;;  %v1425_v43 = vsub.f32 %v1409_v56, %v1417_v30  ;;  %v651_v30 = vadd.f32 %v9387_v41, %v9347_v13 }
 0x92c   :  { %v1432_v39 = vmul.f32 1.442695, %v1426_v3  ;;  %v1430_v9 = vmul.f32 1.442695, %v1425_v43 }
 0x92d   :  { %v1423_v35 = vpop.xlane.xlu0 %1422 }
 0x92e   :  { %8516 = vpow2.f32 %v1432_v39  ;;  %v1427_v55 = vsub.f32 %v1411_v31, %v1423_v35 }
 0x92f   :  { %8518 = vpow2.f32 %v1428_v4  ;;  %v9567_v4 = vpack.c.bf16 %v655_v20, %v651_v30 }
 0x930   :  { %v1434_v17 = vmul.f32 1.442695, %v1427_v55 }
 0x932   :  { %8520 = vpow2.f32 %v1434_v17 }
 0x933   :  { %8522 = vpow2.f32 %v1430_v9 }
 0x93b   :  { %v8517_v6 = vpop.eup %8516 }
 0x93c   :  { %v1442_v21 = vsel %vm744_vm2, %v8517_v6, 0.0  ;;  %v8519_v22 = vpop.eup %8518 }
 0x93d   :  { %1443 = vadd.xlane.f32.xlu0 %v1442_v21  ;;  %v1436_v54 = vsel %vm744_vm2, %v8519_v22, 0.0 }
 0x93f   :  { %v8521_v24 = vpop.eup %8520 }
 0x940   :  { %v1445_v5 = vsel %vm744_vm2, %v8521_v24, 0.0  ;;  %v8523_v7 = vpop.eup %8522 }
 0x941   :  { %1437 = vadd.xlane.f32.xlu0 %v1436_v54  ;;  %1446 = vadd.xlane.f32.xlu1 %v1445_v5  ;;  %v1439_v10 = vsel %vm744_vm2, %v8523_v7, 0.0 }
 0x945   :  { %1440 = vadd.xlane.f32.xlu1 %v1439_v10 }
 0x956   :  { %1458 = vrot.lane.b32.xlu1 %v9406_v18, %s11621_s26  ;;  %v661_v18 = vadd.f32 %v9393_v52, %v9347_v13  ;;  %v1547_v13 = vsel %vm744_vm2, %v9567_v4, 0 }
 0x957   :  { %1460 = vrot.lane.b32.xlu0 %v9404_v16, %s11621_s26 }
 0x958   :  { %v9558_v56 = vpack.c.bf16 %v665_v44, %v661_v18 }
 0x95a   :  { %v1550_v39 = vsel %vm744_vm2, %v9558_v56, 0 }
 0x9c6   :  { %v1444_v32 = vpop.xlane.xlu0 %1443 }
 0x9ca   :  { %v1438_v33 = vpop.xlane.xlu0 %1437  ;;  %v1447_v42 = vpop.xlane.xlu1 %1446 }
 0x9cb   :  { %8524 = vrcp.f32 %v1447_v42 }
 0x9cc   :  { %8526 = vrcp.f32 %v1438_v33 }
 0x9cd   :  { %8528 = vrcp.f32 %v1444_v32 }
 0x9ce   :  { %v1461_v51 = vpop.permute.xlu0 %1460  ;;  %v1441_v40 = vpop.xlane.xlu1 %1440 }
 0x9cf   :  { %8530 = vrcp.f32 %v1441_v40  ;;  %7861 = vmatprep.subr.bf16.mxu0 %v1461_v51 }
 0x9d0   :  { %7862 = vmatpush3.bf16.msra.mxu0 %v1461_v51 }
 0x9d2   :  { %v1459_v53 = vpop.permute.xlu1 %1458 }
 0x9d3   :  { %7863 = vmatprep.subr.bf16.mxu0 %v1459_v53 }
 0x9d4   :  { %7864 = vmatpush3.bf16.msra.mxu0 %v1459_v53 }
 0x9d5   :  { %8161 = vmatprep.subr.msk.bf16.mxu0 %vm744_vm2, %v9558_v56 }
 0x9d8   :  { %v8525_v16 = vpop.eup %8524 }
 0x9d9   :  { %v8527_v57 = vpop.eup %8526  ;;  %v1455_v48 = vmul.f32 %v8525_v16, %v8521_v24 }
 0x9da   :  { %v8529_v63 = vpop.eup %8528  ;;  %v1452_v59 = vmul.f32 %v8527_v57, %v8519_v22 }
 0x9db   :  { %v1454_v2 = vmul.f32 %v8529_v63, %v8517_v6 }
 0x9dc   :  { %v8531_v31 = vpop.eup %8530 }
 0x9dd   :  { %v1453_v23 = vmul.f32 %v8531_v31, %v8523_v7  ;;  %v1457_v3 = vpack.c.bf16 %v1455_v48, %v1454_v2 }
 0x9df   :  { %v1456_v52 = vpack.c.bf16 %v1453_v23, %v1452_v59 }
 0x9e1   :  { %7865 = vmatprep.mubr.msk.bf16.mxu0 %vm744_vm2, %v1456_v52 }
 0x9e2   :  { %7866 = vmatmul.mubr.msk.bf16.vlgmr.msra.gmra.mxu0 %vm744_vm2, %v1457_v3 }
 0x9e3   :  { %7870 = vmatpush3.bf16.xpose.msra.mxu0 %v1550_v39  ;;  %7873 = vmatprep.mubr.msk.bf16.mxu0 %vm744_vm2, %v9391_v50 }
 0x9e4   :  { %8162 = vmatprep.subr.msk.bf16.mxu0 %vm744_vm2, %v9567_v4 }
 0x9eb   :  { %7872 = vmatpush3.bf16.xpose.msra.mxu0 %v1547_v13 }
 0x9f2   :  { %7874 = vmatmul.mubr.msk.bf16.vlgmr.msra.gmra.mxu0 %vm744_vm2, %v9400_v60 }
 0xaa2   :  { %v9580_v41 = vpop.f32.mrf.mxu0 }
 0xaa4   :  { %v9582_v49 = vpop.f32.mrf.mxu0 }
 0xaa6   :  { %v9584_v43 = vpop.f32.mrf.mxu0 }
 0xaa8   :  { %v9586_v35 = vpop.f32.mrf.mxu0 }
 0xab2   :  { %v7875_v55 = vpop.f32.mrf.mxu0 }
 0xab3   :  { %v1603_v5 = vmul.f32 0.17677669, %v7875_v55 }
 0xab4   :  { %v1586_v9 = vpop.f32.mrf.mxu0 }
 0xab5   :  { %v1601_v17 = vmul.f32 0.17677669, %v1586_v9  ;;  %v1607_v51 = vsel %vm293_vm3, %v1603_v5, -1e+30 }
 0xab6   :  { %v7876_v6 = vpop.f32.mrf.mxu0  ;;  %v1615_v40 = vsel %vm744_vm2, %v1607_v51, -inf }
 0xab7   :  { %v1604_v21 = vmul.f32 0.17677669, %v7876_v6  ;;  %v1605_v22 = vsel %vm293_vm3, %v1601_v17, -1e+30 }
 0xab8   :  { %v1589_v24 = vpop.f32.mrf.mxu0  ;;  %v1609_v54 = vsel %vm744_vm2, %v1605_v22, -inf }
 0xab9   :  { %v1602_v7 = vmul.f32 0.17677669, %v1589_v24  ;;  %1610 = vmax.xlane.f32.xlu1 %v1609_v54  ;;  %v1608_v10 = vsel %vm293_vm3, %v1604_v21, -1e+30 }
 0xaba   :  { %v1618_v33 = vsel %vm744_vm2, %v1608_v10, -inf }
 0xabb   :  { %v1606_v32 = vsel %vm293_vm3, %v1602_v7, -1e+30 }
 0xabc   :  { %v1612_v42 = vsel %vm744_vm2, %v1606_v32, -inf }
 0xabd   :  { %1619 = vmax.xlane.f32.xlu1 %v1618_v33  ;;  %1613 = vmax.xlane.f32.xlu0 %v1612_v42 }
 0xac1   :  { %1616 = vmax.xlane.f32.xlu0 %v1615_v40 }
 0xb42   :  { %v1611_v44 = vpop.xlane.xlu1 %1610 }
 0xb43   :  { %v1621_v63 = vsub.f32 %v1605_v22, %v1611_v44 }
 0xb45   :  { %v1625_v20 = vmul.f32 1.442695, %v1621_v63 }
 0xb46   :  { %v1620_v18 = vpop.xlane.xlu1 %1619  ;;  %v1614_v53 = vpop.xlane.xlu0 %1613 }
 0xb47   :  { %v1624_v16 = vsub.f32 %v1608_v10, %v1620_v18  ;;  %v1622_v57 = vsub.f32 %v1606_v32, %v1614_v53 }
 0xb49   :  { %v1627_v31 = vmul.f32 1.442695, %v1622_v57  ;;  %v1631_v48 = vmul.f32 1.442695, %v1624_v16 }
 0xb4a   :  { %v1617_v59 = vpop.xlane.xlu0 %1616 }
 0xb4b   :  { %v1623_v23 = vsub.f32 %v1607_v51, %v1617_v59  ;;  %8532 = vpow2.f32 %v1627_v31 }
 0xb4c   :  { %8534 = vpow2.f32 %v1631_v48 }
 0xb4d   :  { %v1629_v2 = vmul.f32 1.442695, %v1623_v23 }
 0xb4f   :  { %8536 = vpow2.f32 %v1629_v2 }
 0xb50   :  { %8538 = vpow2.f32 %v1625_v20 }
 0xb58   :  { %v8533_v52 = vpop.eup %8532 }
 0xb59   :  { %v1636_v30 = vsel %vm744_vm2, %v8533_v52, 0.0  ;;  %v8535_v3 = vpop.eup %8534 }
 0xb5a   :  { %1637 = vadd.xlane.f32.xlu1 %v1636_v30  ;;  %v1642_v9 = vsel %vm744_vm2, %v8535_v3, 0.0 }
 0xb5c   :  { %v8537_v39 = vpop.eup %8536 }
 0xb5d   :  { %v1639_v13 = vsel %vm744_vm2, %v8537_v39, 0.0  ;;  %v8539_v55 = vpop.eup %8538 }
 0xb5e   :  { %1640 = vadd.xlane.f32.xlu0 %v1639_v13  ;;  %1643 = vadd.xlane.f32.xlu1 %v1642_v9  ;;  %v1633_v17 = vsel %vm744_vm2, %v8539_v55, 0.0 }
 0xb62   :  { %1634 = vadd.xlane.f32.xlu0 %v1633_v17 }
 0xb6f   :  { %1722 = vrot.lane.b32.xlu1 %v9567_v4, %s11625_s5 }
 0xb73   :  { %1716 = vrot.lane.b32.xlu1 %v9391_v50, %s11625_s5 }
 0xb77   :  { %1718 = vrot.lane.b32.xlu1 %v9400_v60, %s11625_s5 }
 0xb78   :  { %1724 = vrot.lane.b32.xlu0 %v9558_v56, %s11625_s5 }
 0xbe3   :  { %v1638_v6 = vpop.xlane.xlu1 %1637 }
 0xbe7   :  { %v1641_v21 = vpop.xlane.xlu0 %1640  ;;  %v1644_v22 = vpop.xlane.xlu1 %1643 }
 0xbe8   :  { %8540 = vrcp.f32 %v1641_v21 }
 0xbe9   :  { %8542 = vrcp.f32 %v1644_v22 }
 0xbea   :  { %8544 = vrcp.f32 %v1638_v6 }
 0xbeb   :  { %v1635_v24 = vpop.xlane.xlu0 %1634  ;;  %v1723_v33 = vpop.permute.xlu1 %1722 }
 0xbec   :  { %8546 = vrcp.f32 %v1635_v24  ;;  %v1733_v63 = vsel %vm744_vm2, %v1723_v33, 0 }
 0xbef   :  { %v1725_v54 = vpop.permute.xlu0 %1724  ;;  %v1717_v16 = vpop.permute.xlu1 %1716 }
 0xbf0   :  { %8163 = vmatprep.subr.msk.bf16.mxu1 %vm744_vm2, %v1725_v54  ;;  %v1736_v57 = vsel %vm744_vm2, %v1725_v54, 0 }
 0xbf3   :  { %v1719_v31 = vpop.permute.xlu1 %1718 }
 0xbf5   :  { %v8541_v5 = vpop.eup %8540 }
 0xbf6   :  { %v8543_v7 = vpop.eup %8542  ;;  %v1651_v42 = vmul.f32 %v8541_v5, %v8537_v39 }
 0xbf7   :  { %v8545_v10 = vpop.eup %8544  ;;  %v1652_v51 = vmul.f32 %v8543_v7, %v8535_v3 }
 0xbf8   :  { %v1650_v44 = vmul.f32 %v8545_v10, %v8533_v52 }
 0xbf9   :  { %v8547_v32 = vpop.eup %8546  ;;  %v1654_v53 = vpack.c.bf16 %v1652_v51, %v1651_v42 }
 0xbfa   :  { %v1649_v40 = vmul.f32 %v8547_v32, %v8539_v55 }
 0xbfc   :  { %v1653_v18 = vpack.c.bf16 %v1650_v44, %v1649_v40 }
 0xbfe   :  { %7881 = vmatprep.mubr.msk.bf16.mxu1 %vm744_vm2, %v1653_v18 }
 0xbff   :  { %7882 = vmatmul.mubr.msk.bf16.vlgmr.msra.gmra.mxu1 %vm744_vm2, %v1654_v53 }
 0xc00   :  { %7886 = vmatpush3.bf16.xpose.msra.mxu1 %v1736_v57  ;;  %7889 = vmatprep.mubr.msk.bf16.mxu1 %vm744_vm2, %v1717_v16 }
 0xc01   :  { %8164 = vmatprep.subr.msk.bf16.mxu1 %vm744_vm2, %v1723_v33 }
 0xc08   :  { %7888 = vmatpush3.bf16.xpose.msra.mxu1 %v1733_v63 }
 0xc0f   :  { %7890 = vmatmul.mubr.msk.bf16.vlgmr.msra.gmra.mxu1 %vm744_vm2, %v1719_v31 }
 0xcbf   :  { %v7883_v48 = vpop.f32.mrf.mxu1 }
 0xcc0   :  { %1712 = vst.msk [vmem:[#allocation2 + $0x30] sm:$0xff] %vm744_vm2, %v7883_v48 }
 0xcc1   :  { %v1695_v59 = vpop.f32.mrf.mxu1 }
 0xcc2   :  { %1710 = vst.msk [vmem:[#allocation2 + $0x20] sm:$0xff] %vm744_vm2, %v1695_v59 }
 0xcc3   :  { %v7884_v23 = vpop.f32.mrf.mxu1 }
 0xcc4   :  { %1713 = vst.msk [vmem:[#allocation2 + $0x38] sm:$0xff] %vm744_vm2, %v7884_v23 }
 0xcc5   :  { %v1698_v20 = vpop.f32.mrf.mxu1 }
 0xcc6   :  { %1711 = vst.msk [vmem:[#allocation2 + $0x28] sm:$0xff] %vm744_vm2, %v1698_v20 }
 0xccf   :  { %v7891_v2 = vpop.f32.mrf.mxu1 }
 0xcd0   :  { %v1789_v30 = vmul.f32 0.17677669, %v7891_v2 }
 0xcd1   :  { %v1772_v52 = vpop.f32.mrf.mxu1 }
 0xcd2   :  { %v1787_v3 = vmul.f32 0.17677669, %v1772_v52  ;;  %v1793_v21 = vsel %vm293_vm3, %v1789_v30, -1e+30 }
 0xcd3   :  { %v7892_v39 = vpop.f32.mrf.mxu1  ;;  %v1801_v24 = vsel %vm744_vm2, %v1793_v21, -inf }
 0xcd4   :  { %v1791_v13 = vsel %vm293_vm3, %v1787_v3, -1e+30  ;;  %v1790_v17 = vmul.f32 0.17677669, %v7892_v39 }
 0xcd5   :  { %v1775_v55 = vpop.f32.mrf.mxu1  ;;  %v1795_v9 = vsel %vm744_vm2, %v1791_v13, -inf }
 0xcd6   :  { %v1788_v6 = vmul.f32 0.17677669, %v1775_v55  ;;  %1796 = vmax.xlane.f32.xlu0 %v1795_v9  ;;  %v1794_v5 = vsel %vm293_vm3, %v1790_v17, -1e+30 }
 0xcd7   :  { %v1804_v7 = vsel %vm744_vm2, %v1794_v5, -inf }
 0xcd8   :  { %v1792_v22 = vsel %vm293_vm3, %v1788_v6, -1e+30 }
 0xcd9   :  { %v1798_v54 = vsel %vm744_vm2, %v1792_v22, -inf }
 0xcda   :  { %1802 = vmax.xlane.f32.xlu0 %v1801_v24  ;;  %1799 = vmax.xlane.f32.xlu1 %v1798_v54 }
 0xcde   :  { %1805 = vmax.xlane.f32.xlu0 %v1804_v7 }
 0xceb   :  { %1843 = vrot.lane.b32.xlu1 %v9414_v25, %s11625_s5 }
 0xd5f   :  { %v1797_v10 = vpop.xlane.xlu0 %1796 }
 0xd60   :  { %v1807_v32 = vsub.f32 %v1791_v13, %v1797_v10 }
 0xd62   :  { %v1811_v40 = vmul.f32 1.442695, %v1807_v32 }
 0xd63   :  { %v1803_v33 = vpop.xlane.xlu0 %1802  ;;  %v1800_v42 = vpop.xlane.xlu1 %1799 }
 0xd64   :  { %v1809_v51 = vsub.f32 %v1793_v21, %v1803_v33  ;;  %v1808_v18 = vsub.f32 %v1792_v22, %v1800_v42 }
 0xd66   :  { %v1815_v44 = vmul.f32 1.442695, %v1809_v51  ;;  %v1813_v57 = vmul.f32 1.442695, %v1808_v18 }
 0xd67   :  { %v1806_v53 = vpop.xlane.xlu0 %1805  ;;  %v1844_v3 = vpop.permute.xlu1 %1843 }
 0xd68   :  { %8548 = vpow2.f32 %v1815_v44  ;;  %v1810_v16 = vsub.f32 %v1794_v5, %v1806_v53 }
 0xd69   :  { %8550 = vpow2.f32 %v1811_v40 }
 0xd6a   :  { %v1817_v63 = vmul.f32 1.442695, %v1810_v16 }
 0xd6c   :  { %8552 = vpow2.f32 %v1817_v63 }
 0xd6d   :  { %8554 = vpow2.f32 %v1813_v57 }
 0xd75   :  { %v8549_v31 = vpop.eup %8548 }
 0xd76   :  { %v1825_v48 = vsel %vm744_vm2, %v8549_v31, 0.0  ;;  %v8551_v59 = vpop.eup %8550 }
 0xd77   :  { %1826 = vadd.xlane.f32.xlu0 %v1825_v48  ;;  %v1819_v20 = vsel %vm744_vm2, %v8551_v59, 0.0 }
 0xd79   :  { %v8553_v23 = vpop.eup %8552 }
 0xd7a   :  { %v1828_v2 = vsel %vm744_vm2, %v8553_v23, 0.0  ;;  %v8555_v52 = vpop.eup %8554 }
 0xd7b   :  { %1820 = vadd.xlane.f32.xlu0 %v1819_v20  ;;  %1829 = vadd.xlane.f32.xlu1 %v1828_v2  ;;  %v1822_v30 = vsel %vm744_vm2, %v8555_v52, 0.0 }
 0xd7f   :  { %1823 = vadd.xlane.f32.xlu1 %v1822_v30 }
 0xd90   :  { %1930 = vrot.lane.b32.xlu1 %v9558_v56, %s11623_s1 }
 0xd91   :  { %1845 = vrot.lane.b32.xlu0 %v9412_v11, %s11625_s5 }
 0xd94   :  { %1928 = vrot.lane.b32.xlu1 %v9567_v4, %s11623_s1 }
 0xd95   :  { %1924 = vrot.lane.b32.xlu0 %v9391_v50, %s11623_s1 }
 0xd98   :  { %1926 = vrot.lane.b32.xlu1 %v9400_v60, %s11623_s1 }
 0xe00   :  { %v1827_v39 = vpop.xlane.xlu0 %1826 }
 0xe04   :  { %v1821_v13 = vpop.xlane.xlu0 %1820  ;;  %v1830_v55 = vpop.xlane.xlu1 %1829 }
 0xe05   :  { %8556 = vrcp.f32 %v1830_v55 }
 0xe06   :  { %8558 = vrcp.f32 %v1821_v13 }
 0xe07   :  { %8560 = vrcp.f32 %v1827_v39 }
 0xe08   :  { %v1846_v9 = vpop.permute.xlu0 %1845  ;;  %v1824_v17 = vpop.xlane.xlu1 %1823 }
 0xe09   :  { %8562 = vrcp.f32 %v1824_v17  ;;  %7893 = vmatprep.subr.bf16.mxu0 %v1846_v9 }
 0xe0a   :  { %7894 = vmatpush3.bf16.msra.mxu0 %v1846_v9 }
 0xe0b   :  { %7895 = vmatprep.subr.bf16.mxu0 %v1844_v3 }
 0xe0c   :  { %v1931_v6 = vpop.permute.xlu1 %1930  ;;  %v1925_v51 = vpop.permute.xlu0 %1924 }
 0xe0d   :  { %v1942_v40 = vsel %vm744_vm2, %v1931_v6, 0 }
 0xe0e   :  { %7896 = vmatpush3.bf16.msra.mxu0 %v1844_v3 }
 0xe0f   :  { %8165 = vmatprep.subr.msk.bf16.mxu0 %vm744_vm2, %v1931_v6 }
 0xe10   :  { %v1929_v44 = vpop.permute.xlu1 %1928 }
 0xe11   :  { %v1939_v18 = vsel %vm744_vm2, %v1929_v44, 0 }
 0xe12   :  { %v8557_v21 = vpop.eup %8556 }
 0xe13   :  { %v8559_v22 = vpop.eup %8558  ;;  %v1838_v5 = vmul.f32 %v8557_v21, %v8553_v23 }
 0xe14   :  { %v8561_v24 = vpop.eup %8560  ;;  %v1835_v7 = vmul.f32 %v8559_v22, %v8551_v59  ;;  %v1927_v53 = vpop.permute.xlu1 %1926 }
 0xe15   :  { %v1837_v32 = vmul.f32 %v8561_v24, %v8549_v31 }
 0xe16   :  { %v8563_v54 = vpop.eup %8562 }
 0xe17   :  { %v1836_v10 = vmul.f32 %v8563_v54, %v8555_v52  ;;  %v1840_v42 = vpack.c.bf16 %v1838_v5, %v1837_v32 }
 0xe19   :  { %v1839_v33 = vpack.c.bf16 %v1836_v10, %v1835_v7 }
 0xe1b   :  { %7897 = vmatprep.mubr.msk.bf16.mxu0 %vm744_vm2, %v1839_v33 }
 0xe1c   :  { %7898 = vmatmul.mubr.msk.bf16.vlgmr.msra.gmra.mxu0 %vm744_vm2, %v1840_v42 }
 0xe1d   :  { %7902 = vmatpush3.bf16.xpose.msra.mxu0 %v1942_v40  ;;  %7905 = vmatprep.mubr.msk.bf16.mxu0 %vm744_vm2, %v1925_v51 }
 0xe1e   :  { %8166 = vmatprep.subr.msk.bf16.mxu0 %vm744_vm2, %v1929_v44 }
 0xe25   :  { %7904 = vmatpush3.bf16.xpose.msra.mxu0 %v1939_v18 }
 0xe2c   :  { %7906 = vmatmul.mubr.msk.bf16.vlgmr.msra.gmra.mxu0 %vm744_vm2, %v1927_v53 }
 0xedc   :  { %v9660_v16 = vpop.f32.mrf.mxu0 }
 0xede   :  { %v9662_v57 = vpop.f32.mrf.mxu0 }
 0xee0   :  { %v9664_v63 = vpop.f32.mrf.mxu0 }
 0xee2   :  { %v9666_v31 = vpop.f32.mrf.mxu0 }
 0xeec   :  { %v7907_v48 = vpop.f32.mrf.mxu0 }
 0xeed   :  { %v1995_v23 = vmul.f32 0.17677669, %v7907_v48 }
 0xeee   :  { %v1978_v59 = vpop.f32.mrf.mxu0 }
 0xeef   :  { %v1993_v20 = vmul.f32 0.17677669, %v1978_v59  ;;  %v1999_v55 = vsel %vm293_vm3, %v1995_v23, -1e+30 }
 0xef0   :  { %v7908_v2 = vpop.f32.mrf.mxu0  ;;  %v2007_v17 = vsel %vm744_vm2, %v1999_v55, -inf }
 0xef1   :  { %v1997_v52 = vsel %vm293_vm3, %v1993_v20, -1e+30  ;;  %v1996_v39 = vmul.f32 0.17677669, %v7908_v2 }
 0xef2   :  { %v1981_v30 = vpop.f32.mrf.mxu0  ;;  %v2001_v3 = vsel %vm744_vm2, %v1997_v52, -inf }
 0xef3   :  { %v1994_v13 = vmul.f32 0.17677669, %v1981_v30  ;;  %2002 = vmax.xlane.f32.xlu0 %v2001_v3  ;;  %v2000_v21 = vsel %vm293_vm3, %v1996_v39, -1e+30 }
 0xef4   :  { %v2010_v22 = vsel %vm744_vm2, %v2000_v21, -inf }
 0xef5   :  { %v1998_v9 = vsel %vm293_vm3, %v1994_v13, -1e+30 }
 0xef6   :  { %v2004_v6 = vsel %vm744_vm2, %v1998_v9, -inf }
 0xef7   :  { %2008 = vmax.xlane.f32.xlu0 %v2007_v17  ;;  %2005 = vmax.xlane.f32.xlu1 %v2004_v6 }
 0xefb   :  { %2011 = vmax.xlane.f32.xlu0 %v2010_v22 }
 0xf08   :  { %2047 = vrot.lane.b32.xlu1 %v9414_v25, %s11623_s1 }
 0xf7c   :  { %v2003_v24 = vpop.xlane.xlu0 %2002 }
 0xf7d   :  { %v2013_v54 = vsub.f32 %v1997_v52, %v2003_v24 }
 0xf7f   :  { %v2017_v32 = vmul.f32 1.442695, %v2013_v54 }
 0xf80   :  { %v2009_v5 = vpop.xlane.xlu0 %2008  ;;  %v2006_v7 = vpop.xlane.xlu1 %2005 }
 0xf81   :  { %v2015_v10 = vsub.f32 %v1999_v55, %v2009_v5  ;;  %v2014_v42 = vsub.f32 %v1998_v9, %v2006_v7 }
 0xf83   :  { %v2021_v33 = vmul.f32 1.442695, %v2015_v10  ;;  %v2019_v44 = vmul.f32 1.442695, %v2014_v42 }
 0xf84   :  { %v2012_v51 = vpop.xlane.xlu0 %2011  ;;  %v2048_v3 = vpop.permute.xlu1 %2047 }
 0xf85   :  { %8564 = vpow2.f32 %v2021_v33  ;;  %v2016_v40 = vsub.f32 %v2000_v21, %v2012_v51 }
 0xf86   :  { %8566 = vpow2.f32 %v2017_v32 }
 0xf87   :  { %v2023_v18 = vmul.f32 1.442695, %v2016_v40 }
 0xf89   :  { %8568 = vpow2.f32 %v2023_v18 }
 0xf8a   :  { %8570 = vpow2.f32 %v2019_v44 }
 0xf92   :  { %v8565_v53 = vpop.eup %8564 }
 0xf93   :  { %v2031_v48 = vsel %vm744_vm2, %v8565_v53, 0.0  ;;  %v8567_v59 = vpop.eup %8566 }
 0xf94   :  { %2032 = vadd.xlane.f32.xlu0 %v2031_v48  ;;  %v2025_v20 = vsel %vm744_vm2, %v8567_v59, 0.0 }
 0xf96   :  { %v8569_v23 = vpop.eup %8568 }
 0xf97   :  { %v2034_v2 = vsel %vm744_vm2, %v8569_v23, 0.0  ;;  %v8571_v52 = vpop.eup %8570 }
 0xf98   :  { %2026 = vadd.xlane.f32.xlu0 %v2025_v20  ;;  %2035 = vadd.xlane.f32.xlu1 %v2034_v2  ;;  %v2028_v30 = vsel %vm744_vm2, %v8571_v52, 0.0 }
 0xf9c   :  { %2029 = vadd.xlane.f32.xlu1 %v2028_v30 }
 0xfad   :  { %2134 = vrot.lane.b32.xlu1 %v9558_v56, %s11621_s26 }
 0xfae   :  { %2049 = vrot.lane.b32.xlu0 %v9412_v11, %s11623_s1 }
 0xfb1   :  { %2132 = vrot.lane.b32.xlu1 %v9567_v4, %s11621_s26 }
 0xfb2   :  { %2128 = vrot.lane.b32.xlu0 %v9391_v50, %s11621_s26 }
 0xfb5   :  { %2130 = vrot.lane.b32.xlu1 %v9400_v60, %s11621_s26 }
0x101d   :  { %v2033_v39 = vpop.xlane.xlu0 %2032 }
0x1021   :  { %v2027_v13 = vpop.xlane.xlu0 %2026  ;;  %v2036_v55 = vpop.xlane.xlu1 %2035 }
0x1022   :  { %8572 = vrcp.f32 %v2036_v55 }
0x1023   :  { %8574 = vrcp.f32 %v2027_v13 }
0x1024   :  { %8576 = vrcp.f32 %v2033_v39 }
0x1025   :  { %v2050_v56 = vpop.permute.xlu0 %2049  ;;  %v2030_v9 = vpop.xlane.xlu1 %2029 }
0x1026   :  { %8578 = vrcp.f32 %v2030_v9  ;;  %7909 = vmatprep.subr.bf16.mxu1 %v2050_v56 }
0x1027   :  { %7910 = vmatpush3.bf16.msra.mxu1 %v2050_v56 }
0x1028   :  { %7911 = vmatprep.subr.bf16.mxu1 %v2048_v3 }
0x1029   :  { %v2135_v4 = vpop.permute.xlu1 %2134  ;;  %v2129_v10 = vpop.permute.xlu0 %2128 }
0x102a   :  { %v2146_v32 = vsel %vm744_vm2, %v2135_v4, 0 }
0x102b   :  { %7912 = vmatpush3.bf16.msra.mxu1 %v2048_v3 }
0x102c   :  { %8167 = vmatprep.subr.msk.bf16.mxu1 %vm744_vm2, %v2135_v4 }
0x102d   :  { %v2133_v33 = vpop.permute.xlu1 %2132 }
0x102e   :  { %v2143_v42 = vsel %vm744_vm2, %v2133_v33, 0 }
0x102f   :  { %v8573_v50 = vpop.eup %8572 }
0x1030   :  { %v8575_v17 = vpop.eup %8574  ;;  %v2044_v21 = vmul.f32 %v8573_v50, %v8569_v23 }
0x1031   :  { %v8577_v60 = vpop.eup %8576  ;;  %v2041_v22 = vmul.f32 %v8575_v17, %v8567_v59  ;;  %v2131_v51 = vpop.permute.xlu1 %2130 }
0x1032   :  { %v2043_v54 = vmul.f32 %v8577_v60, %v8565_v53 }
0x1033   :  { %v8579_v6 = vpop.eup %8578 }
0x1034   :  { %v2042_v24 = vmul.f32 %v8579_v6, %v8571_v52  ;;  %v2046_v7 = vpack.c.bf16 %v2044_v21, %v2043_v54 }
0x1036   :  { %v2045_v5 = vpack.c.bf16 %v2042_v24, %v2041_v22 }
0x1038   :  { %7913 = vmatprep.mubr.msk.bf16.mxu1 %vm744_vm2, %v2045_v5 }
0x1039   :  { %7914 = vmatmul.mubr.msk.bf16.vlgmr.msra.gmra.mxu1 %vm744_vm2, %v2046_v7 }
0x103a   :  { %7918 = vmatpush3.bf16.xpose.msra.mxu1 %v2146_v32  ;;  %7921 = vmatprep.mubr.msk.bf16.mxu1 %vm744_vm2, %v2129_v10 }
0x103b   :  { %8168 = vmatprep.subr.msk.bf16.mxu1 %vm744_vm2, %v2133_v33 }
0x1042   :  { %7920 = vmatpush3.bf16.xpose.msra.mxu1 %v2143_v42 }
0x1049   :  { %7922 = vmatmul.mubr.msk.bf16.vlgmr.msra.gmra.mxu1 %vm744_vm2, %v2131_v51 }
0x104a   :  { %2856 = vmatprep.mubr.bf16.mxu1 %v8926_v1 }
0x10f9   :  { %v9705_v40 = vpop.f32.mrf.mxu1 }
0x10fb   :  { %v9707_v44 = vpop.f32.mrf.mxu1 }
0x10fd   :  { %v9709_v18 = vpop.f32.mrf.mxu1 }
0x10ff   :  { %v9711_v53 = vpop.f32.mrf.mxu1 }
0x1109   :  { %v7923_v48 = vpop.f32.mrf.mxu1 }
0x110a   :  { %v2199_v23 = vmul.f32 0.17677669, %v7923_v48 }
0x110b   :  { %v2182_v59 = vpop.f32.mrf.mxu1 }
0x110c   :  { %v2197_v20 = vmul.f32 0.17677669, %v2182_v59  ;;  %v2203_v39 = vsel %vm293_vm3, %v2199_v23, -1e+30 }
0x110d   :  { %v7924_v2 = vpop.f32.mrf.mxu1  ;;  %v2211_v9 = vsel %vm744_vm2, %v2203_v39, -inf }
0x110e   :  { %v2201_v52 = vsel %vm293_vm3, %v2197_v20, -1e+30  ;;  %v2200_v13 = vmul.f32 0.17677669, %v7924_v2 }
0x110f   :  { %v2185_v30 = vpop.f32.mrf.mxu1  ;;  %v2205_v3 = vsel %vm744_vm2, %v2201_v52, -inf }
0x1110   :  { %v2198_v55 = vmul.f32 0.17677669, %v2185_v30  ;;  %2206 = vmax.xlane.f32.xlu0 %v2205_v3  ;;  %v2204_v50 = vsel %vm293_vm3, %v2200_v13, -1e+30  ;;  %v8237_v13 = vld [vmem:[%s11599_s9 + $0x30] sm:$0xff]  }
0x1111   :  { %v2214_v17 = vsel %vm744_vm2, %v2204_v50, -inf }
0x1112   :  { %v2202_v56 = vsel %vm293_vm3, %v2198_v55, -1e+30 }
0x1113   :  { %v2208_v4 = vsel %vm744_vm2, %v2202_v56, -inf }
0x1114   :  { %2212 = vmax.xlane.f32.xlu0 %v2211_v9  ;;  %2209 = vmax.xlane.f32.xlu1 %v2208_v4  ;;  %v8238_v9 = vld [vmem:[%s11599_s9 + $0x28] sm:$0xff]  }
0x1118   :  { %2215 = vmax.xlane.f32.xlu0 %v2214_v17  ;;  %v8239_v17 = vld [vmem:[%s11599_s9 + $0x20] sm:$0xff]  }
0x1199   :  { %v2207_v60 = vpop.xlane.xlu0 %2206 }
0x119a   :  { %v2217_v6 = vsub.f32 %v2201_v52, %v2207_v60 }
0x119c   :  { %v2221_v54 = vmul.f32 1.442695, %v2217_v6 }
0x119d   :  { %v2213_v21 = vpop.xlane.xlu0 %2212  ;;  %v2210_v22 = vpop.xlane.xlu1 %2209 }
0x119e   :  { %v2219_v24 = vsub.f32 %v2203_v39, %v2213_v21  ;;  %v2218_v7 = vsub.f32 %v2202_v56, %v2210_v22  ;;  %v8240_v21 = vld [vmem:[%s11599_s9 + $0x18] sm:$0xff]  }
0x11a0   :  { %v2225_v5 = vmul.f32 1.442695, %v2219_v24  ;;  %v2223_v33 = vmul.f32 1.442695, %v2218_v7 }
0x11a1   :  { %v2216_v10 = vpop.xlane.xlu0 %2215 }
0x11a2   :  { %8580 = vpow2.f32 %v2225_v5  ;;  %v2220_v32 = vsub.f32 %v2204_v50, %v2216_v10 }
0x11a3   :  { %8582 = vpow2.f32 %v2221_v54  ;;  %v8241_v54 = vld [vmem:[%s11599_s9 + $0x10] sm:$0xff]  }
0x11a4   :  { %v2227_v42 = vmul.f32 1.442695, %v2220_v32 }
0x11a6   :  { %8584 = vpow2.f32 %v2227_v42  ;;  %v8242_v42 = vld [vmem:[%s11599_s9 + $0x8] sm:$0xff]  }
0x11a7   :  { %8586 = vpow2.f32 %v2223_v33 }
0x11af   :  { %v9725_v51 = vpop.eup %8580 }
0x11b0   :  { %v2235_v48 = vsel %vm744_vm2, %v9725_v51, 0.0  ;;  %v9729_v59 = vpop.eup %8582 }
0x11b1   :  { %2236 = vadd.xlane.f32.xlu0 %v2235_v48  ;;  %v2229_v20 = vsel %vm744_vm2, %v9729_v59, 0.0  ;;  %v8243_v48 = vld [vmem:[%s11599_s9] sm:$0xff]  }
0x11b3   :  { %v9731_v23 = vpop.eup %8584 }
0x11b4   :  { %v2238_v2 = vsel %vm744_vm2, %v9731_v23, 0.0  ;;  %v8587_v52 = vpop.eup %8586 }
0x11b5   :  { %2230 = vadd.xlane.f32.xlu0 %v2229_v20  ;;  %2239 = vadd.xlane.f32.xlu1 %v2238_v2  ;;  %v2232_v30 = vsel %vm744_vm2, %v8587_v52, 0.0 }
0x11b9   :  { %2233 = vadd.xlane.f32.xlu1 %v2232_v30 }
0x11ca   :  { %2251 = vrot.lane.b32.xlu1 %v9414_v25, %s11621_s26 }
0x11cb   :  { %2253 = vrot.lane.b32.xlu0 %v9412_v11, %s11621_s26 }
0x11ce   :  { %1113 = vrot.lane.b32.xlu1 %v9480_v36, %s11621_s26 }
0x11cf   :  { %1117 = vrot.lane.b32.xlu0 %v9478_v34, %s11621_s26 }
0x11d2   :  { %1115 = vrot.lane.b32.xlu1 %v9484_v38, %s11621_s26  ;;  %v8236_v38 = vld [vmem:[%s11599_s9 + $0x38] sm:$0xff]  }
0x11d3   :  { %1318 = vrot.lane.b32.xlu0 %v9528_v19, %s11623_s1 }
0x11d6   :  { %1119 = vrot.lane.b32.xlu1 %v9482_v37, %s11621_s26 }
0x11d7   :  { %1322 = vrot.lane.b32.xlu0 %v9526_v62, %s11623_s1 }
0x11da   :  { %1320 = vrot.lane.b32.xlu1 %v9532_v29, %s11623_s1 }
0x11db   :  { %1523 = vrot.lane.b32.xlu0 %v9582_v49, %s11625_s5 }
0x11de   :  { %1324 = vrot.lane.b32.xlu1 %v9530_v28, %s11623_s1 }
0x11df   :  { %1527 = vrot.lane.b32.xlu0 %v9580_v41, %s11625_s5 }
0x11e2   :  { %1525 = vrot.lane.b32.xlu1 %v9586_v35, %s11625_s5 }
0x11e3   :  { %1908 = vrot.lane.b32.xlu0 %v9662_v57, %s11621_s26 }
0x11e6   :  { %1529 = vrot.lane.b32.xlu1 %v9584_v43, %s11625_s5 }
0x11e7   :  { %1912 = vrot.lane.b32.xlu0 %v9660_v16, %s11621_s26 }
0x11ea   :  { %1910 = vrot.lane.b32.xlu1 %v9666_v31, %s11621_s26 }
0x11eb   :  { %2112 = vrot.lane.b32.xlu0 %v9707_v44, %s11623_s1 }
0x11ee   :  { %1914 = vrot.lane.b32.xlu1 %v9664_v63, %s11621_s26 }
0x11ef   :  { %2116 = vrot.lane.b32.xlu0 %v9705_v40, %s11623_s1 }
0x11f2   :  { %2114 = vrot.lane.b32.xlu1 %v9711_v53, %s11623_s1 }
0x11f6   :  { %2118 = vrot.lane.b32.xlu1 %v9709_v18, %s11623_s1 }
0x123a   :  { %v2237_v11 = vpop.xlane.xlu0 %2236 }
0x123e   :  { %v2231_v25 = vpop.xlane.xlu0 %2230  ;;  %v2240_v34 = vpop.xlane.xlu1 %2239 }
0x123f   :  { %8588 = vrcp.f32 %v2240_v34 }
0x1240   :  { %8590 = vrcp.f32 %v2231_v25 }
0x1241   :  { %8592 = vrcp.f32 %v2237_v11 }
0x1242   :  { %v2254_v36 = vpop.permute.xlu0 %2253  ;;  %v2234_v37 = vpop.xlane.xlu1 %2233 }
0x1243   :  { %8594 = vrcp.f32 %v2234_v37  ;;  %7925 = vmatprep.subr.bf16.mxu0 %v2254_v36  ;;  %v9838_v37 = vld [vmem:[%s11600_s10] ss:$0 sm:$0xff] }
0x1244   :  { %7926 = vmatpush3.bf16.msra.mxu0 %v2254_v36 }
0x1246   :  { %v1118_v62 = vpop.permute.xlu0 %1117  ;;  %v2252_v19 = vpop.permute.xlu1 %2251 }
0x1247   :  { %1128 = vst.msk [vmem:[#allocation2 + $0x10] sm:$0xff] %vm1125_vm4, %v1118_v62  ;;  %7927 = vmatprep.subr.bf16.mxu0 %v2252_v19 }
0x1248   :  { %7928 = vmatpush3.bf16.msra.mxu0 %v2252_v19 }
0x1249   :  { %7933 = vmatprep.subr.bf16.mxu0 %v8236_v38 }
0x124a   :  { %v1319_v28 = vpop.permute.xlu0 %1318  ;;  %v1114_v29 = vpop.permute.xlu1 %1113 }
0x124b   :  { %1126 = vst.msk [vmem:[#allocation2] sm:$0xff] %vm1125_vm4, %v1114_v29 }
0x124c   :  { %1331 = vst.msk [vmem:[#allocation2] sm:$0xff] %vm1330_vm5, %v1319_v28  ;;  %v8589_v41 = vpop.eup %8588 }
0x124d   :  { %v8591_v49 = vpop.eup %8590  ;;  %v2248_v63 = vmul.f32 %v8589_v41, %v9731_v23 }
0x124e   :  { %v1323_v43 = vpop.permute.xlu0 %1322  ;;  %v1116_v35 = vpop.permute.xlu1 %1115  ;;  %v2245_v31 = vmul.f32 %v8591_v49, %v9729_v59 }
0x124f   :  { %v8593_v16 = vpop.eup %8592  ;;  %1333 = vst.msk [vmem:[#allocation2 + $0x10] sm:$0xff] %vm1330_vm5, %v1323_v43 }
0x1250   :  { %1127 = vst.msk [vmem:[#allocation2 + $0x8] sm:$0xff] %vm1125_vm4, %v1116_v35  ;;  %v8595_v57 = vpop.eup %8594  ;;  %v2247_v53 = vmul.f32 %v8593_v16, %v9725_v51 }
0x1251   :  { %v2246_v40 = vmul.f32 %v8595_v57, %v8587_v52 }
0x1252   :  { %v1524_v44 = vpop.permute.xlu0 %1523  ;;  %v1120_v18 = vpop.permute.xlu1 %1119  ;;  %v2250_v39 = vpack.c.bf16 %v2248_v63, %v2247_v53 }
0x1253   :  { %1536 = vst.msk [vmem:[#allocation2] sm:$0xff] %vm1535_vm6, %v1524_v44  ;;  %v2249_v3 = vpack.c.bf16 %v2246_v40, %v2245_v31 }
0x1254   :  { %1129 = vst.msk [vmem:[#allocation2 + $0x18] sm:$0xff] %vm1125_vm4, %v1120_v18 }
0x1255   :  { %7929 = vmatprep.mubr.msk.bf16.mxu0 %vm744_vm2, %v2249_v3 }
0x1256   :  { %v1528_v55 = vpop.permute.xlu0 %1527  ;;  %7930 = vmatmul.mubr.msk.bf16.vlgmr.msra.gmra.mxu0 %vm744_vm2, %v2250_v39  ;;  %v1321_v56 = vpop.permute.xlu1 %1320 }
0x1257   :  { %1538 = vst.msk [vmem:[#allocation2 + $0x10] sm:$0xff] %vm1535_vm6, %v1528_v55  ;;  %7934 = vmatpush3.bf16.msra.mxu0 %v8236_v38 }
0x1258   :  { %1332 = vst.msk [vmem:[#allocation2 + $0x8] sm:$0xff] %vm1330_vm5, %v1321_v56  ;;  %7935 = vmatprep.subr.bf16.mxu0 %v8237_v13 }
0x125a   :  { %v1909_v4 = vpop.permute.xlu0 %1908  ;;  %v1325_v50 = vpop.permute.xlu1 %1324  ;;  %v2332_v10 = vld [vmem:[#allocation2] sm:$0xff] }
0x125b   :  { %1920 = vst.msk [vmem:[#allocation2 + $0x20] sm:$0xff] %vm1125_vm4, %v1909_v4  ;;  %7936 = vmatpush3.bf16.msra.mxu0 %v8237_v13 }
0x125c   :  { %1334 = vst.msk [vmem:[#allocation2 + $0x18] sm:$0xff] %vm1330_vm5, %v1325_v50  ;;  %7937 = vmatprep.subr.bf16.mxu0 %v8238_v9 }
0x125e   :  { %v1913_v60 = vpop.permute.xlu0 %1912  ;;  %v1526_v6 = vpop.permute.xlu1 %1525  ;;  %v2334_v2 = vld [vmem:[#allocation2 + $0x10] sm:$0xff] }
0x125f   :  { %1922 = vst.msk [vmem:[#allocation2 + $0x30] sm:$0xff] %vm1125_vm4, %v1913_v60  ;;  %7938 = vmatpush3.bf16.msra.mxu0 %v8238_v9 }
0x1260   :  { %1537 = vst.msk [vmem:[#allocation2 + $0x8] sm:$0xff] %vm1535_vm6, %v1526_v6  ;;  %7939 = vmatprep.subr.bf16.mxu0 %v8239_v17 }
0x1262   :  { %v2113_v22 = vpop.permute.xlu0 %2112  ;;  %v1530_v24 = vpop.permute.xlu1 %1529 }
0x1263   :  { %2124 = vst.msk [vmem:[#allocation2 + $0x20] sm:$0xff] %vm1330_vm5, %v2113_v22  ;;  %7940 = vmatpush3.bf16.msra.mxu0 %v8239_v17 }
0x1264   :  { %1539 = vst.msk [vmem:[#allocation2 + $0x18] sm:$0xff] %vm1535_vm6, %v1530_v24  ;;  %7941 = vmatprep.subr.bf16.mxu0 %v8240_v21 }
0x1266   :  { %v2117_v5 = vpop.permute.xlu0 %2116  ;;  %v1911_v7 = vpop.permute.xlu1 %1910 }
0x1267   :  { %v2333_v32 = vld [vmem:[#allocation2 + $0x8] sm:$0xff]  ;;  %2126 = vst.msk [vmem:[#allocation2 + $0x30] sm:$0xff] %vm1330_vm5, %v2117_v5  ;;  %7942 = vmatpush3.bf16.msra.mxu0 %v8240_v21 }
0x1268   :  { %1921 = vst.msk [vmem:[#allocation2 + $0x28] sm:$0xff] %vm1125_vm4, %v1911_v7  ;;  %v2356_v33 = vpack.c.bf16 %v2333_v32, %v2332_v10  ;;  %7943 = vmatprep.subr.bf16.mxu0 %v8241_v54  ;;  %v8246_v7 = vld [vmem:[%s11603_s13 + $0xe4] ss:$16 sps:$4 sm:$0xff]   ;;  %v8249_v10 = vld [vmem:[%s11603_s13 + $0xec] ss:$16 sps:$4 sm:$0xff]  }
0x1269   :  { %v8244_v32 = vld [vmem:[%s11603_s13 + $0xe0] ss:$16 sps:$4 sm:$0xff]   ;;  %2824 = vmatprep.subr.bf16.mxu1 %v8246_v7 }
0x126a   :  { %7949 = vmatprep.mubr.bf16.mxu0 %v2356_v33  ;;  %v1915_v51 = vpop.permute.xlu1 %1914  ;;  %v8247_v33 = vld [vmem:[%s11603_s13 + $0xe8] ss:$16 sps:$4 sm:$0xff]   ;;  %2825 = vmatpush1.bf16.msra.mxu1 %v8244_v32 }
0x126b   :  { %7944 = vmatpush3.bf16.msra.mxu0 %v8241_v54  ;;  %1923 = vst.msk [vmem:[#allocation2 + $0x38] sm:$0xff] %vm1125_vm4, %v1915_v51  ;;  %v2335_v23 = vld [vmem:[#allocation2 + $0x18] sm:$0xff] }
0x126c   :  { %7945 = vmatprep.subr.bf16.mxu0 %v8242_v42  ;;  %v2357_v52 = vpack.c.bf16 %v2335_v23, %v2334_v2  ;;  %v8255_v51 = vld [vmem:[%s11603_s13 + $0xcc] ss:$16 sps:$4 sm:$0xff]   ;;  %v8258_v23 = vld [vmem:[%s11603_s13 + $0xa4] ss:$16 sps:$4 sm:$0xff]   ;;  %v8256_v2 = vld [vmem:[%s11603_s13 + $0xa0] ss:$16 sps:$4 sm:$0xff]  }
0x126e   :  { %v2115_v59 = vpop.permute.xlu1 %2114 }
0x126f   :  { %7946 = vmatpush3.bf16.msra.mxu0 %v8242_v42  ;;  %2125 = vst.msk [vmem:[#allocation2 + $0x28] sm:$0xff] %vm1330_vm5, %v2115_v59  ;;  %v8252_v42 = vld [vmem:[%s11603_s13 + $0xc4] ss:$16 sps:$4 sm:$0xff]   ;;  %v8253_v59 = vld [vmem:[%s11603_s13 + $0xc8] ss:$16 sps:$4 sm:$0xff]  }
0x1270   :  { %7947 = vmatprep.subr.bf16.mxu0 %v8243_v48  ;;  %2826 = vmatprep.subr.bf16.mxu1 %v8252_v42 }
0x1272   :  { %v2119_v20 = vpop.permute.xlu1 %2118 }
0x1273   :  { %7948 = vmatpush3.bf16.msra.mxu0 %v8243_v48  ;;  %2127 = vst.msk [vmem:[#allocation2 + $0x38] sm:$0xff] %vm1330_vm5, %v2119_v20  ;;  %v8250_v48 = vld [vmem:[%s11603_s13 + $0xc0] ss:$16 sps:$4 sm:$0xff]   ;;  %v8261_v20 = vld [vmem:[%s11603_s13 + $0xac] ss:$16 sps:$4 sm:$0xff]  }
0x1274   :  { %2897 = vmatprep.subr.bf16.mxu0 %v8249_v10  ;;  %2827 = vmatpush1.bf16.msra.mxu1 %v8250_v48 }
0x1275   :  { %2828 = vmatprep.subr.bf16.mxu1 %v8258_v23 }
0x1276   :  { %7950 = vmatmul.mubr.bf16.vlgmr.msra.gmra.mxu0 %v2357_v52  ;;  %v8259_v52 = vld [vmem:[%s11603_s13 + $0xa8] ss:$16 sps:$4 sm:$0xff]  }
0x1277   :  { %2898 = vmatpush1.bf16.msra.mxu0 %v8247_v33 }
0x1278   :  { %2899 = vmatprep.subr.bf16.mxu0 %v8255_v51  ;;  %2829 = vmatpush1.bf16.msra.mxu1 %v8256_v2 }
0x127b   :  { %2900 = vmatpush1.bf16.msra.mxu0 %v8253_v59 }
0x127c   :  { %2901 = vmatprep.subr.bf16.mxu0 %v8261_v20 }
0x127f   :  { %2902 = vmatpush1.bf16.msra.mxu0 %v8259_v52 }
0x1316   :  { %v7931_v30 = vpop.f32.mrf.mxu0 }
0x1318   :  { %v2297_v11 = vpop.f32.mrf.mxu0 }
0x1319   :  { %2316 = vrot.lane.b32.xlu0 %v2297_v11, %s11625_s5  ;;  %v8267_v11 = vld [vmem:[%s11603_s13 + $0x8c] ss:$16 sps:$4 sm:$0xff]  }
0x131a   :  { %v7932_v25 = vpop.f32.mrf.mxu0  ;;  %2903 = vmatprep.subr.bf16.mxu0 %v8267_v11  ;;  %v10010_v11 = vld [vmem:[%s11602_s12] ss:$0 sm:$0xff] }
0x131c   :  { %v2300_v34 = vpop.f32.mrf.mxu0 }
0x131d   :  { %2320 = vrot.lane.b32.xlu0 %v7931_v30, %s11625_s5  ;;  %2318 = vrot.lane.b32.xlu1 %v2300_v34, %s11625_s5  ;;  %v8264_v30 = vld [vmem:[%s11603_s13 + $0x84] ss:$16 sps:$4 sm:$0xff]   ;;  %v8265_v34 = vld [vmem:[%s11603_s13 + $0x88] ss:$16 sps:$4 sm:$0xff]  }
0x131e   :  { %2830 = vmatprep.subr.bf16.mxu1 %v8264_v30  ;;  %2904 = vmatpush1.bf16.msra.mxu0 %v8265_v34 }
0x1321   :  { %2322 = vrot.lane.b32.xlu1 %v7932_v25, %s11625_s5  ;;  %v8262_v25 = vld [vmem:[%s11603_s13 + $0x80] ss:$16 sps:$4 sm:$0xff]  }
0x1322   :  { %2831 = vmatpush1.bf16.msra.mxu1 %v8262_v25 }
0x1336   :  { %v7951_v36 = vpop.f32.mrf.mxu0 }
0x1337   :  { %v2458_v28 = vadd.f32 %v7951_v36, %v9838_v37  ;;  %v8268_v36 = vld [vmem:[%s11603_s13 + $0x60] ss:$16 sps:$4 sm:$0xff]  }
0x1338   :  { %v2449_v38 = vpop.f32.mrf.mxu0 }
0x1339   :  { %v2450_v62 = vadd.f32 %v9838_v37, %v2449_v38  ;;  %v9847_v49 = vadd.f32 %v2458_v28, %v9154_v46  ;;  %v8270_v38 = vld [vmem:[%s11603_s13 + $0x64] ss:$16 sps:$4 sm:$0xff]  }
0x133a   :  { %v7952_v19 = vpop.f32.mrf.mxu0  ;;  %2832 = vmatprep.subr.bf16.mxu1 %v8270_v38  ;;  %v8276_v28 = vld [vmem:[%s11603_s13 + $0x44] ss:$16 sps:$4 sm:$0xff]  }
0x133b   :  { %v9843_v29 = vadd.f32 %v2450_v62, %v9151_v45  ;;  %v9850_v43 = vadd.f32 %v7952_v19, %v9838_v37  ;;  %v8271_v62 = vld [vmem:[%s11603_s13 + $0x68] ss:$16 sps:$4 sm:$0xff]   ;;  %v8273_v19 = vld [vmem:[%s11603_s13 + $0x6c] ss:$16 sps:$4 sm:$0xff]   ;;  %2833 = vmatpush1.bf16.msra.mxu1 %v8268_v36 }
0x133c   :  { %v2452_v41 = vpop.f32.mrf.mxu0  ;;  %2905 = vmatprep.subr.bf16.mxu0 %v8273_v19  ;;  %2834 = vmatprep.subr.bf16.mxu1 %v8276_v28 }
0x133d   :  { %2490 = vadd.xlane.f32.xlu0 %v9843_v29  ;;  %v2453_v35 = vadd.f32 %v9838_v37, %v2452_v41  ;;  %v8279_v41 = vld [vmem:[%s11603_s13 + $0x4c] ss:$16 sps:$4 sm:$0xff]   ;;  %2906 = vmatpush1.bf16.msra.mxu0 %v8271_v62 }
0x133e   :  { %2907 = vmatprep.subr.bf16.mxu0 %v8279_v41 }
0x133f   :  { %v9855_v16 = vadd.f32 %v2453_v35, %v9156_v47  ;;  %v8274_v35 = vld [vmem:[%s11603_s13 + $0x40] ss:$16 sps:$4 sm:$0xff]  }
0x1340   :  { %2835 = vmatpush1.bf16.msra.mxu1 %v8274_v35 }
0x1341   :  { %2494 = vadd.xlane.f32.xlu0 %v9847_v49 }
0x1345   :  { %2496 = vadd.xlane.f32.xlu0 %v9850_v43  ;;  %2492 = vadd.xlane.f32.xlu1 %v9855_v16 }
0x138b   :  { %v2317_v45 = vpop.permute.xlu0 %2316 }
0x138c   :  { %2328 = vst.msk [vmem:[#allocation2 + $0x20] sm:$0xff] %vm1535_vm6, %v2317_v45  ;;  %v8277_v45 = vld [vmem:[%s11603_s13 + $0x48] ss:$16 sps:$4 sm:$0xff]  }
0x138d   :  { %2908 = vmatpush1.bf16.msra.mxu0 %v8277_v45 }
0x138f   :  { %v2321_v57 = vpop.permute.xlu0 %2320  ;;  %v2319_v46 = vpop.permute.xlu1 %2318 }
0x1390   :  { %2330 = vst.msk [vmem:[#allocation2 + $0x30] sm:$0xff] %vm1535_vm6, %v2321_v57  ;;  %2329 = vst.msk [vmem:[#allocation2 + $0x28] sm:$0xff] %vm1535_vm6, %v2319_v46  ;;  %v8282_v57 = vld [vmem:[%s11603_s13 + $0x24] ss:$16 sps:$4 sm:$0xff]   ;;  %v8285_v46 = vld [vmem:[%s11603_s13 + $0x2c] ss:$16 sps:$4 sm:$0xff]  }
0x1391   :  { %2836 = vmatprep.subr.bf16.mxu1 %v8282_v57  ;;  %2909 = vmatprep.subr.bf16.mxu0 %v8285_v46 }
0x1393   :  { %v2323_v63 = vpop.permute.xlu1 %2322  ;;  %v2336_v31 = vld [vmem:[#allocation2 + $0x20] sm:$0xff] }
0x1394   :  { %2331 = vst.msk [vmem:[#allocation2 + $0x38] sm:$0xff] %vm1535_vm6, %v2323_v63  ;;  %v8280_v63 = vld [vmem:[%s11603_s13 + $0x20] ss:$16 sps:$4 sm:$0xff]  }
0x1395   :  { %2837 = vmatpush1.bf16.msra.mxu1 %v8280_v63 }
0x1397   :  { %v2337_v40 = vld [vmem:[#allocation2 + $0x28] sm:$0xff]  ;;  %v2338_v44 = vld [vmem:[#allocation2 + $0x30] sm:$0xff] }
0x1398   :  { %v2358_v47 = vpack.c.bf16 %v2337_v40, %v2336_v31  ;;  %v8283_v31 = vld [vmem:[%s11603_s13 + $0x28] ss:$16 sps:$4 sm:$0xff]   ;;  %v8288_v40 = vld [vmem:[%s11603_s13 + $0x4] ss:$16 sps:$4 sm:$0xff]  }
0x1399   :  { %2910 = vmatpush1.bf16.msra.mxu0 %v8283_v31  ;;  %2838 = vmatprep.subr.bf16.mxu1 %v8288_v40 }
0x139a   :  { %7953 = vmatprep.mubr.bf16.mxu0 %v2358_v47  ;;  %v8291_v47 = vld [vmem:[%s11603_s13 + $0xc] ss:$16 sps:$4 sm:$0xff]  }
0x139b   :  { %v2339_v18 = vld [vmem:[#allocation2 + $0x38] sm:$0xff]  ;;  %2911 = vmatprep.subr.bf16.mxu0 %v8291_v47 }
0x139c   :  { %v2359_v53 = vpack.c.bf16 %v2339_v18, %v2338_v44  ;;  %v8286_v44 = vld [vmem:[%s11603_s13] ss:$16 sps:$4 sm:$0xff]   ;;  %v8289_v18 = vld [vmem:[%s11603_s13 + $0x8] ss:$16 sps:$4 sm:$0xff]  }
0x139d   :  { %2839 = vmatpush1.bf16.msra.mxu1 %v8286_v44  ;;  %2912 = vmatpush1.bf16.msra.mxu0 %v8289_v18 }
0x139e   :  { %7954 = vmatmul.mubr.bf16.gmra.mxu0 %v2359_v53 }
0x139f   :  { %2929 = vmatprep.mubr.bf16.mxu0 %v8926_v1 }
0x13c6   :  { %v2491_v3 = vpop.xlane.xlu0 %2490 }
0x13c7   :  { %v2506_v39 = vmul.f32 0.0078125, %v2491_v3 }
0x13c9   :  { %v9865_v13 = vsub.f32 %v9843_v29, %v2506_v39 }
0x13ca   :  { %v2495_v55 = vpop.xlane.xlu0 %2494 }
0x13cb   :  { %v2508_v56 = vmul.f32 0.0078125, %v2495_v55  ;;  %v2522_v9 = vmul.f32 %v9865_v13, %v9865_v13 }
0x13cd   :  { %v9870_v4 = vsub.f32 %v9847_v49, %v2508_v56  ;;  %2530 = vadd.xlane.f32.xlu0 %v2522_v9 }
0x13ce   :  { %v2497_v50 = vpop.xlane.xlu0 %2496  ;;  %v2493_v17 = vpop.xlane.xlu1 %2492 }
0x13cf   :  { %v2509_v60 = vmul.f32 0.0078125, %v2497_v50  ;;  %v2507_v6 = vmul.f32 0.0078125, %v2493_v17  ;;  %v2524_v21 = vmul.f32 %v9870_v4, %v9870_v4 }
0x13d1   :  { %v9875_v22 = vsub.f32 %v9855_v16, %v2507_v6  ;;  %2534 = vadd.xlane.f32.xlu0 %v2524_v21  ;;  %v9878_v24 = vsub.f32 %v9850_v43, %v2509_v60 }
0x13d3   :  { %v2523_v54 = vmul.f32 %v9875_v22, %v9875_v22  ;;  %v2525_v5 = vmul.f32 %v9878_v24, %v9878_v24 }
0x13d5   :  { %2532 = vadd.xlane.f32.xlu1 %v2523_v54 }
0x13d9   :  { %2536 = vadd.xlane.f32.xlu1 %v2525_v5 }
0x1456   :  { %v2531_v53 = vpop.xlane.xlu0 %2530 }
0x1457   :  { %v2546_v3 = vmul.f32 0.0078125, %v2531_v53 }
0x1459   :  { %v2554_v39 = vadd.f32 1e-05, %v2546_v3 }
0x145a   :  { %v2535_v55 = vpop.xlane.xlu0 %2534 }
0x145b   :  { %8596 = vrsqrt.f32 %v2554_v39  ;;  %v2548_v56 = vmul.f32 0.0078125, %v2535_v55 }
0x145d   :  { %v2556_v6 = vadd.f32 1e-05, %v2548_v56 }
0x145e   :  { %v7955_v9 = vpop.f32.mrf.mxu0  ;;  %v2533_v50 = vpop.xlane.xlu1 %2532 }
0x145f   :  { %v2547_v17 = vmul.f32 0.0078125, %v2533_v50  ;;  %v2474_v10 = vadd.f32 %v7955_v9, %v9838_v37  ;;  %v8292_v50 = vld [vmem:[%s11605_s15 + $0x78] sm:$0xff]  }
0x1460   :  { %v2465_v60 = vpop.f32.mrf.mxu0  ;;  %7524 = vmatprep.subr.bf16.mxu1 %v8292_v50  ;;  %v11627_v50 = vsub.s32 3, %v9330_v61 }
0x1461   :  { %v2555_v21 = vadd.f32 1e-05, %v2547_v17  ;;  %v2466_v54 = vadd.f32 %v9838_v37, %v2465_v60  ;;  %v9988_v59 = vadd.f32 %v2474_v10, %v9192_v14  ;;  %v10003_v14 = vld [vmem:[%s11601_s11] ss:$0 sm:$0xff]  ;;  %v8293_v17 = vld [vmem:[%s11605_s15 + $0xf8] sm:$0xff]   ;;  %v8300_v10 = vld [vmem:[%s11605_s15 + $0x68] sm:$0xff]  }
0x1462   :  { %v7956_v5 = vpop.f32.mrf.mxu0  ;;  %v2537_v7 = vpop.xlane.xlu1 %2536  ;;  %v8294_v60 = vld [vmem:[%s11605_s15 + $0x38] sm:$0xff]   ;;  %7564 = vmatprep.subr.bf16.mxu0 %v8293_v17 }
0x1463   :  { %8598 = vrsqrt.f32 %v2555_v21  ;;  %v9983_v32 = vadd.f32 %v2466_v54, %v9187_v12  ;;  %v2549_v33 = vmul.f32 0.0078125, %v2537_v7  ;;  %v9991_v23 = vadd.f32 %v7956_v5, %v9838_v37  ;;  %v8296_v21 = vld [vmem:[%s11605_s15 + $0x70] sm:$0xff]  }
0x1464   :  { %v2468_v42 = vpop.f32.mrf.mxu0  ;;  %8600 = vrsqrt.f32 %v2556_v6  ;;  %v8295_v6 = vld [vmem:[%s11605_s15 + $0xb8] sm:$0xff]   ;;  %v8297_v54 = vld [vmem:[%s11605_s15 + $0xf0] sm:$0xff]  }
0x1465   :  { %v2557_v51 = vadd.f32 1e-05, %v2549_v33  ;;  %v2469_v48 = vadd.f32 %v9838_v37, %v2468_v42  ;;  %2498 = vadd.xlane.f32.xlu0 %v9983_v32  ;;  %v8298_v5 = vld [vmem:[%s11605_s15 + $0x30] sm:$0xff]   ;;  %v8301_v33 = vld [vmem:[%s11605_s15 + $0xe8] sm:$0xff]  }
0x1466   :  { %v8299_v7 = vld [vmem:[%s11605_s15 + $0xb0] sm:$0xff]   ;;  %v8302_v42 = vld [vmem:[%s11605_s15 + $0x28] sm:$0xff]  }
0x1467   :  { %8602 = vrsqrt.f32 %v2557_v51  ;;  %v9994_v20 = vadd.f32 %v2469_v48, %v9194_v15  ;;  %v8303_v51 = vld [vmem:[%s11605_s15 + $0xa8] sm:$0xff]   ;;  %v8304_v48 = vld [vmem:[%s11605_s15 + $0x60] sm:$0xff]  }
0x1468   :  { %v8597_v12 = vpop.eup %8596 }
0x1469   :  { %2502 = vadd.xlane.f32.xlu0 %v9988_v59  ;;  %2500 = vadd.xlane.f32.xlu1 %v9994_v20  ;;  %v2570_v2 = vmul.f32 %v8597_v12, %v9865_v13  ;;  %v8305_v12 = vld [vmem:[%s11605_s15 + $0xe0] sm:$0xff]  }
0x146b   :  { %v2584_v15 = vmul.f32 %v10003_v14, %v2570_v2  ;;  %v8306_v2 = vld [vmem:[%s11605_s15 + $0x20] sm:$0xff]  }
0x146d   :  { %2504 = vadd.xlane.f32.xlu1 %v9991_v23  ;;  %v2598_v13 = vadd.f32 %v10010_v11, %v2584_v15  ;;  %v8309_v15 = vld [vmem:[%s11605_s15 + $0xd8] sm:$0xff]  }
0x1470   :  { %v8599_v37 = vpop.eup %8598 }
0x1471   :  { %v2571_v52 = vmul.f32 %v8599_v37, %v9875_v22  ;;  %v8601_v30 = vpop.eup %8600  ;;  %v8307_v37 = vld [vmem:[%s11605_s15 + $0xa0] sm:$0xff]  }
0x1472   :  { %v2572_v38 = vmul.f32 %v8601_v30, %v9870_v4  ;;  %v8310_v30 = vld [vmem:[%s11605_s15 + $0x18] sm:$0xff]  }
0x1473   :  { %v2585_v25 = vmul.f32 %v10003_v14, %v2571_v52  ;;  %v8308_v52 = vld [vmem:[%s11605_s15 + $0x58] sm:$0xff]  }
0x1474   :  { %v8603_v34 = vpop.eup %8602  ;;  %v2586_v28 = vmul.f32 %v10003_v14, %v2572_v38  ;;  %v8315_v38 = vld [vmem:[%s11605_s15 + $0x90] sm:$0xff]  }
0x1475   :  { %v2599_v36 = vadd.f32 %v10010_v11, %v2585_v25  ;;  %v2573_v62 = vmul.f32 %v8603_v34, %v9878_v24  ;;  %v8311_v25 = vld [vmem:[%s11605_s15 + $0x98] sm:$0xff]   ;;  %v8312_v34 = vld [vmem:[%s11605_s15 + $0x50] sm:$0xff]  }
0x1476   :  { %v2600_v35 = vadd.f32 %v10010_v11, %v2586_v28  ;;  %v8319_v28 = vld [vmem:[%s11605_s15 + $0x88] sm:$0xff]  }
0x1477   :  { %v2638_v22 = vpack.c.bf16 %v2599_v36, %v2598_v13  ;;  %v2587_v19 = vmul.f32 %v10003_v14, %v2573_v62  ;;  %v8313_v13 = vld [vmem:[%s11605_s15 + $0xd0] sm:$0xff]   ;;  %v8316_v62 = vld [vmem:[%s11605_s15 + $0x48] sm:$0xff]  }
0x1478   :  { %v8314_v36 = vld [vmem:[%s11605_s15 + $0x10] sm:$0xff]  }
0x1479   :  { %2857 = vmatmul.mubr.bf16.vlgmr.msra.gmra.mxu1 %v2638_v22  ;;  %2930 = vmatmul.mubr.bf16.vlgmr.msra.gmra.mxu0 %v2638_v22  ;;  %v2601_v41 = vadd.f32 %v10010_v11, %v2587_v19  ;;  %v8317_v22 = vld [vmem:[%s11605_s15 + $0xc8] sm:$0xff]  }
0x147a   :  { %2866 = vmatprep.mubr.bf16.mxu1 %v8926_v1  ;;  %2939 = vmatprep.mubr.bf16.mxu0 %v8926_v1  ;;  %v8318_v19 = vld [vmem:[%s11605_s15 + $0x8] sm:$0xff]  }
0x147b   :  { %v2639_v45 = vpack.c.bf16 %v2601_v41, %v2600_v35  ;;  %7525 = vmatpush3.bf16.msra.mxu1 %v8294_v60  ;;  %7565 = vmatpush3.bf16.msra.mxu0 %v8295_v6  ;;  %v8320_v41 = vld [vmem:[%s11605_s15 + $0x40] sm:$0xff]  }
0x147c   :  { %7526 = vmatprep.subr.bf16.mxu1 %v8296_v21  ;;  %7566 = vmatprep.subr.bf16.mxu0 %v8297_v54  ;;  %v8321_v35 = vld [vmem:[%s11605_s15 + $0xc0] sm:$0xff]  }
0x147d   :  { %v2642_v60 = vld [vmem:[%s11604_s14] sm:$0xf] }
0x147f   :  { %7527 = vmatpush3.bf16.msra.mxu1 %v8298_v5  ;;  %7567 = vmatpush3.bf16.msra.mxu0 %v8299_v7  ;;  %v10150_v5 = vrot.slane %v2642_v60, %v9341_v8 }
0x1480   :  { %7528 = vmatprep.subr.bf16.mxu1 %v8300_v10  ;;  %7568 = vmatprep.subr.bf16.mxu0 %v8301_v33  ;;  %v10154_v33 = vrot.slane %v2642_v60, %v11627_v50 }
0x1481   :  { %2867 = vmatmul.mubr.bf16.gmra.mxu1 %v2639_v45  ;;  %2940 = vmatmul.mubr.bf16.gmra.mxu0 %v2639_v45  ;;  %v8322_v45 = vld [vmem:[%s11605_s15] sm:$0xff]  }
0x1482   :  { %2876 = vmatprep.mubr.bf16.mxu1 %v8926_v1  ;;  %2949 = vmatprep.mubr.bf16.mxu0 %v8926_v1 }
0x1483   :  { %7529 = vmatpush3.bf16.msra.mxu1 %v8302_v42  ;;  %7569 = vmatpush3.bf16.msra.mxu0 %v8303_v51 }
0x1484   :  { %7530 = vmatprep.subr.bf16.mxu1 %v8304_v48  ;;  %7570 = vmatprep.subr.bf16.mxu0 %v8305_v12  ;;  %v10157_v48 = vrot.slane %v2642_v60, %v9333_v0 }
0x1487   :  { %7531 = vmatpush3.bf16.msra.mxu1 %v8306_v2  ;;  %7571 = vmatpush3.bf16.msra.mxu0 %v8307_v37  ;;  %v10163_v2 = vrot.slane %v2642_v60, %v9396_v58 }
0x1488   :  { %7532 = vmatprep.subr.bf16.mxu1 %v8308_v52  ;;  %7572 = vmatprep.subr.bf16.mxu0 %v8309_v15 }
0x148b   :  { %7533 = vmatpush3.bf16.msra.mxu1 %v8310_v30  ;;  %7573 = vmatpush3.bf16.msra.mxu0 %v8311_v25 }
0x148c   :  { %7534 = vmatprep.subr.bf16.mxu1 %v8312_v34  ;;  %7574 = vmatprep.subr.bf16.mxu0 %v8313_v13 }
0x148f   :  { %7535 = vmatpush3.bf16.msra.mxu1 %v8314_v36  ;;  %7575 = vmatpush3.bf16.msra.mxu0 %v8315_v38 }
0x1490   :  { %7536 = vmatprep.subr.bf16.mxu1 %v8316_v62  ;;  %7576 = vmatprep.subr.bf16.mxu0 %v8317_v22 }
0x1493   :  { %7537 = vmatpush3.bf16.msra.mxu1 %v8318_v19  ;;  %7577 = vmatpush3.bf16.msra.mxu0 %v8319_v28 }
0x1494   :  { %7538 = vmatprep.subr.bf16.mxu1 %v8320_v41  ;;  %7578 = vmatprep.subr.bf16.mxu0 %v8321_v35 }
0x1497   :  { %7539 = vmatpush3.bf16.msra.mxu1 %v8322_v45 }
0x14ee   :  { %v2499_v4 = vpop.xlane.xlu0 %2498 }
0x14ef   :  { %v2510_v24 = vmul.f32 0.0078125, %v2499_v4  ;;  %v8323_v4 = vld [vmem:[%s11605_s15 + $0x80] sm:$0xff]  }
0x14f0   :  { %7579 = vmatpush3.bf16.msra.mxu0 %v8323_v4 }
0x14f1   :  { %v10026_v57 = vsub.f32 %v9983_v32, %v2510_v24 }
0x14f2   :  { %v2503_v46 = vpop.xlane.xlu0 %2502  ;;  %v2501_v63 = vpop.xlane.xlu1 %2500 }
0x14f3   :  { %v2512_v31 = vmul.f32 0.0078125, %v2503_v46  ;;  %v2511_v40 = vmul.f32 0.0078125, %v2501_v63  ;;  %v2526_v47 = vmul.f32 %v10026_v57, %v10026_v57 }
0x14f5   :  { %v10031_v44 = vsub.f32 %v9988_v59, %v2512_v31  ;;  %v10034_v18 = vsub.f32 %v9994_v20, %v2511_v40  ;;  %2538 = vadd.xlane.f32.xlu0 %v2526_v47 }
0x14f6   :  { %v2505_v53 = vpop.xlane.xlu1 %2504 }
0x14f7   :  { %v2513_v3 = vmul.f32 0.0078125, %v2505_v53  ;;  %v2528_v39 = vmul.f32 %v10031_v44, %v10031_v44  ;;  %v2527_v55 = vmul.f32 %v10034_v18, %v10034_v18 }
0x14f9   :  { %v10041_v56 = vsub.f32 %v9991_v23, %v2513_v3  ;;  %2542 = vadd.xlane.f32.xlu0 %v2528_v39  ;;  %2540 = vadd.xlane.f32.xlu1 %v2527_v55 }
0x14fb   :  { %v2529_v9 = vmul.f32 %v10041_v56, %v10041_v56 }
0x14fd   :  { %2544 = vadd.xlane.f32.xlu1 %v2529_v9 }
0x1539   :  { %v2858_v24 = vpop.f32.mrf.mxu1  ;;  %v2931_v46 = vpop.f32.mrf.mxu0 }
0x153a   :  { %v10175_v62 = vadd.f32 %v2858_v24, %v10157_v48  ;;  %v10179_v19 = vadd.f32 %v2931_v46, %v10163_v2 }
0x153b   :  { %v2860_v63 = vpop.f32.mrf.mxu1  ;;  %v2933_v31 = vpop.f32.mrf.mxu0 }
0x153c   :  { %v10169_v30 = vadd.f32 %v2860_v63, %v10150_v5  ;;  %v10172_v36 = vadd.f32 %v2933_v31, %v10154_v33  ;;  %v3002_v46 = vmul.f32 0.70710677, %v10175_v62 }
0x153d   :  { %v2862_v40 = vpop.f32.mrf.mxu1  ;;  %v2935_v47 = vpop.f32.mrf.mxu0 }
0x153e   :  { %v3003_v45 = vmul.f32 0.70710677, %v10169_v30  ;;  %v10184_v4 = vadd.f32 %v2862_v40, %v10157_v48  ;;  %v3005_v24 = vmul.f32 0.70710677, %v10172_v36  ;;  %v10188_v31 = vadd.f32 %v2935_v47, %v10163_v2 }
0x153f   :  { %v2864_v53 = vpop.f32.mrf.mxu1  ;;  %v2937_v3 = vpop.f32.mrf.mxu0 }
0x1540   :  { %v10160_v12 = vadd.f32 %v2864_v53, %v10150_v5  ;;  %v10166_v37 = vadd.f32 %v2937_v3, %v10154_v33  ;;  %v3004_v3 = vmul.f32 0.70710677, %v10179_v19  ;;  %v3008_v47 = vmul.f32 0.70710677, %v10188_v31 }
0x1541   :  { %v10141_v39 = vpop.f32.mrf.mxu1  ;;  %v10143_v55 = vpop.f32.mrf.mxu0 }
0x1542   :  { %v3007_v22 = vmul.f32 0.70710677, %v10160_v12  ;;  %v3009_v28 = vmul.f32 0.70710677, %v10166_v37 }
0x1543   :  { %v2870_v6 = vpop.f32.mrf.mxu1  ;;  %v2943_v21 = vpop.f32.mrf.mxu0 }
0x1544   :  { %v10204_v60 = vadd.f32 %v2943_v21, %v10154_v33 }
0x1545   :  { %v2872_v52 = vpop.f32.mrf.mxu1  ;;  %v2945_v25 = vpop.f32.mrf.mxu0 }
0x1546   :  { %v10215_v21 = vadd.f32 %v2945_v25, %v10163_v2 }
0x1547   :  { %v2874_v41 = vpop.f32.mrf.mxu1  ;;  %v2947_v63 = vpop.f32.mrf.mxu0 }
0x1548   :  { %v10192_v53 = vadd.f32 %v2874_v41, %v10150_v5  ;;  %v10196_v40 = vadd.f32 %v2947_v63, %v10154_v33  ;;  %v3016_v41 = vmul.f32 0.70710677, %v10215_v21 }
0x157e   :  { %v2539_v9 = vpop.xlane.xlu0 %2538 }
0x157f   :  { %v2550_v17 = vmul.f32 0.0078125, %v2539_v9  ;;  %v3006_v9 = vmul.f32 0.70710677, %v10184_v4 }
0x1581   :  { %v2558_v54 = vadd.f32 1e-05, %v2550_v17  ;;  %v10200_v17 = vadd.f32 %v2870_v6, %v10150_v5  ;;  %v3013_v6 = vmul.f32 0.70710677, %v10204_v60 }
0x1582   :  { %v2543_v7 = vpop.xlane.xlu0 %2542  ;;  %v2541_v10 = vpop.xlane.xlu1 %2540 }
0x1583   :  { %8604 = vrsqrt.f32 %v2558_v54  ;;  %v2552_v42 = vmul.f32 0.0078125, %v2543_v7  ;;  %v2551_v51 = vmul.f32 0.0078125, %v2541_v10  ;;  %v3015_v7 = vmul.f32 0.70710677, %v10192_v53 }
0x1584   :  { %v3017_v10 = vmul.f32 0.70710677, %v10196_v40 }
0x1585   :  { %v2559_v15 = vadd.f32 1e-05, %v2551_v51  ;;  %v2560_v34 = vadd.f32 1e-05, %v2552_v42  ;;  %v3011_v42 = vmul.f32 0.70710677, %v10200_v17 }
0x1586   :  { %v2545_v13 = vpop.xlane.xlu1 %2544 }
0x1587   :  { %v2553_v38 = vmul.f32 0.0078125, %v2545_v13  ;;  %8606 = vrsqrt.f32 %v2559_v15  ;;  %v10212_v15 = vadd.f32 %v2872_v52, %v10157_v48  ;;  %v10219_v13 = vadd.f32 %v10141_v39, %v10157_v48 }
0x1588   :  { %8608 = vrsqrt.f32 %v2560_v34 }
0x1589   :  { %v2561_v35 = vadd.f32 1e-05, %v2553_v38  ;;  %v10223_v38 = vadd.f32 %v10143_v55, %v10163_v2  ;;  %v3014_v25 = vmul.f32 0.70710677, %v10212_v15 }
0x158b   :  { %8610 = vrsqrt.f32 %v2561_v35 }
0x158c   :  { %8612 = verf.f32 %v3007_v22 }
0x158d   :  { %8614 = verf.f32 %v3009_v28 }
0x158e   :  { %8616 = verf.f32 %v3003_v45  ;;  %v3010_v45 = vmul.f32 0.70710677, %v10219_v13 }
0x158f   :  { %8618 = verf.f32 %v3005_v24  ;;  %v3012_v24 = vmul.f32 0.70710677, %v10223_v38 }
0x1590   :  { %v8605_v54 = vpop.eup %8604  ;;  %8620 = verf.f32 %v3002_v46 }
0x1591   :  { %8622 = verf.f32 %v3004_v3  ;;  %v2574_v51 = vmul.f32 %v8605_v54, %v10026_v57 }
0x1592   :  { %8624 = verf.f32 %v3006_v9 }
0x1593   :  { %8626 = verf.f32 %v3008_v47  ;;  %v2588_v52 = vmul.f32 %v10003_v14, %v2574_v51 }
0x1594   :  { %8628 = verf.f32 %v3015_v7  ;;  %v8607_v34 = vpop.eup %8606 }
0x1595   :  { %8630 = verf.f32 %v3017_v10  ;;  %v2575_v57 = vmul.f32 %v8607_v34, %v10034_v18  ;;  %v8609_v22 = vpop.eup %8608  ;;  %v2602_v18 = vadd.f32 %v10010_v11, %v2588_v52  ;;  %v2975_v52 = vmul.f32 0.5, %v10160_v12 }
0x1596   :  { %8632 = verf.f32 %v3011_v42  ;;  %v2576_v3 = vmul.f32 %v8609_v22, %v10031_v44  ;;  %v2977_v22 = vmul.f32 0.5, %v10166_v37 }
0x1597   :  { %8634 = verf.f32 %v3013_v6  ;;  %v2589_v39 = vmul.f32 %v10003_v14, %v2575_v57 }
0x1598   :  { %v8611_v28 = vpop.eup %8610  ;;  %8636 = verf.f32 %v3014_v25  ;;  %v2590_v6 = vmul.f32 %v10003_v14, %v2576_v3 }
0x1599   :  { %v8613_v35 = vpop.eup %8612  ;;  %v2577_v55 = vmul.f32 %v8611_v28, %v10041_v56  ;;  %v2603_v46 = vadd.f32 %v10010_v11, %v2589_v39  ;;  %8638 = verf.f32 %v3016_v41  ;;  %v2971_v39 = vmul.f32 0.5, %v10169_v30 }
0x159a   :  { %v8615_v63 = vpop.eup %8614  ;;  %v3071_v42 = vadd.f32 1.0, %v8613_v35  ;;  %8640 = verf.f32 %v3010_v45  ;;  %v2973_v35 = vmul.f32 0.5, %v10172_v36  ;;  %v2974_v36 = vmul.f32 0.5, %v10184_v4 }
0x159b   :  { %v8617_v9 = vpop.eup %8616  ;;  %v2640_v54 = vpack.c.bf16 %v2603_v46, %v2602_v18  ;;  %v2591_v7 = vmul.f32 %v10003_v14, %v2577_v55  ;;  %v3073_v51 = vadd.f32 1.0, %v8615_v63  ;;  %8642 = verf.f32 %v3012_v24 }
0x159c   :  { %v8619_v47 = vpop.eup %8618  ;;  %v3067_v57 = vadd.f32 1.0, %v8617_v9  ;;  %v3103_v14 = vmul.f32 %v3071_v42, %v2975_v52  ;;  %v2604_v63 = vadd.f32 %v10010_v11, %v2590_v6  ;;  %v2976_v42 = vmul.f32 0.5, %v10188_v31 }
0x159d   :  { %v8621_v10 = vpop.eup %8620  ;;  %2877 = vmatmul.mubr.bf16.gmra.mxu1 %v2640_v54  ;;  %2950 = vmatmul.mubr.bf16.gmra.mxu0 %v2640_v54  ;;  %v3069_v44 = vadd.f32 1.0, %v8619_v47  ;;  %v2605_v28 = vadd.f32 %v10010_v11, %v2591_v7  ;;  %v3105_v45 = vmul.f32 %v3073_v51, %v2977_v22  ;;  %v2983_v6 = vmul.f32 0.5, %v10192_v53 }
0x159e   :  { %v8623_v56 = vpop.eup %8622  ;;  %2886 = vmatprep.mubr.bf16.mxu1 %v8926_v1  ;;  %2959 = vmatprep.mubr.bf16.mxu0 %v8926_v1  ;;  %v3099_v24 = vmul.f32 %v3067_v57, %v2971_v39  ;;  %v3066_v27 = vadd.f32 1.0, %v8621_v10  ;;  %v2972_v10 = vmul.f32 0.5, %v10179_v19  ;;  %v2979_v31 = vmul.f32 0.5, %v10200_v17 }
0x159f   :  { %v8625_v34 = vpop.eup %8624  ;;  %v3101_v37 = vmul.f32 %v3069_v44, %v2973_v35  ;;  %v2641_v9 = vpack.c.bf16 %v2605_v28, %v2604_v63  ;;  %v3068_v30 = vadd.f32 1.0, %v8623_v56  ;;  %v2970_v44 = vmul.f32 0.5, %v10175_v62 }
0x15a0   :  { %v8627_v25 = vpop.eup %8626  ;;  %v3070_v46 = vadd.f32 1.0, %v8625_v34  ;;  %v3195_v7 = vpack.c.bf16 %v3103_v14, %v3099_v24  ;;  %v2985_v34 = vmul.f32 0.5, %v10196_v40  ;;  %v2981_v22 = vmul.f32 0.5, %v10204_v60 }
0x15a1   :  { %v8629_v41 = vpop.eup %8628  ;;  %v3072_v3 = vadd.f32 1.0, %v8627_v25  ;;  %v3197_v50 = vpack.c.bf16 %v3105_v45, %v3101_v37  ;;  %v3098_v53 = vmul.f32 %v3066_v27, %v2970_v44  ;;  %v3100_v39 = vmul.f32 %v3068_v30, %v2972_v10 }
0x15a2   :  { %v8631_v55 = vpop.eup %8630  ;;  %v3079_v47 = vadd.f32 1.0, %v8629_v41  ;;  %v3102_v56 = vmul.f32 %v3070_v46, %v2974_v36  ;;  %v2982_v17 = vmul.f32 0.5, %v10212_v15  ;;  %v2984_v60 = vmul.f32 0.5, %v10215_v21 }
0x15a3   :  { %v8633_v12 = vpop.eup %8632  ;;  %v3081_v54 = vadd.f32 1.0, %v8631_v55  ;;  %v3104_v52 = vmul.f32 %v3072_v3, %v2976_v42  ;;  %v2978_v27 = vmul.f32 0.5, %v10219_v13  ;;  %v2980_v37 = vmul.f32 0.5, %v10223_v38 }
0x15a4   :  { %v8635_v18 = vpop.eup %8634  ;;  %v3075_v11 = vadd.f32 1.0, %v8633_v12  ;;  %v3111_v25 = vmul.f32 %v3079_v47, %v2983_v6  ;;  %v3194_v14 = vpack.c.bf16 %v3102_v56, %v3098_v53 }
0x15a5   :  { %2887 = vmatmul.mubr.bf16.gmra.mxu1 %v2641_v9  ;;  %2960 = vmatmul.mubr.bf16.gmra.mxu0 %v2641_v9  ;;  %v3077_v51 = vadd.f32 1.0, %v8635_v18  ;;  %v8637_v57 = vpop.eup %8636  ;;  %v3113_v28 = vmul.f32 %v3081_v54, %v2985_v34  ;;  %v3196_v45 = vpack.c.bf16 %v3104_v52, %v3100_v39 }
0x15a6   :  { %3434 = vmatprep.mubr.bf16.mxu1 %v3195_v7  ;;  %3499 = vmatprep.mubr.bf16.mxu0 %v3197_v50  ;;  %v8639_v4 = vpop.eup %8638  ;;  %v3107_v35 = vmul.f32 %v3075_v11, %v2979_v31  ;;  %v3078_v62 = vadd.f32 1.0, %v8637_v57 }
0x15a7   :  { %v8641_v41 = vpop.eup %8640  ;;  %v3109_v50 = vmul.f32 %v3077_v51, %v2981_v22  ;;  %v3080_v55 = vadd.f32 1.0, %v8639_v4 }
0x15a8   :  { %v8643_v40 = vpop.eup %8642  ;;  %v3199_v19 = vpack.c.bf16 %v3111_v25, %v3107_v35  ;;  %v3074_v12 = vadd.f32 1.0, %v8641_v41  ;;  %v3110_v18 = vmul.f32 %v3078_v62, %v2982_v17 }
0x15a9   :  { %v3201_v63 = vpack.c.bf16 %v3113_v28, %v3109_v50  ;;  %v3076_v24 = vadd.f32 1.0, %v8643_v40  ;;  %v3112_v46 = vmul.f32 %v3080_v55, %v2984_v60 }
0x15aa   :  { %v3106_v3 = vmul.f32 %v3074_v12, %v2978_v27 }
0x15ab   :  { %v3108_v9 = vmul.f32 %v3076_v24, %v2980_v37 }
0x15ac   :  { %v3198_v47 = vpack.c.bf16 %v3110_v18, %v3106_v3 }
0x15ad   :  { %3435 = vmatmul.mubr.bf16.vlgmr.msra.gmra.mxu1 %v3194_v14  ;;  %3500 = vmatmul.mubr.bf16.vlgmr.msra.gmra.mxu0 %v3196_v45  ;;  %v3200_v54 = vpack.c.bf16 %v3112_v46, %v3108_v9 }
0x15ae   :  { %3442 = vmatprep.mubr.bf16.mxu1 %v3199_v19  ;;  %3507 = vmatprep.mubr.bf16.mxu0 %v3201_v63 }
0x15b5   :  { %3443 = vmatmul.mubr.bf16.gmra.mxu1 %v3198_v47  ;;  %3508 = vmatmul.mubr.bf16.gmra.mxu0 %v3200_v54 }
0x165d   :  { %v2878_v7 = vpop.f32.mrf.mxu1  ;;  %v2951_v15 = vpop.f32.mrf.mxu0 }
0x165e   :  { %v10259_v21 = vadd.f32 %v2878_v7, %v10157_v48  ;;  %v10262_v30 = vadd.f32 %v2951_v15, %v10163_v2 }
0x165f   :  { %v2880_v36 = vpop.f32.mrf.mxu1  ;;  %v2953_v13 = vpop.f32.mrf.mxu0 }
0x1660   :  { %v3018_v38 = vmul.f32 0.70710677, %v10259_v21  ;;  %v3020_v42 = vmul.f32 0.70710677, %v10262_v30  ;;  %v10267_v11 = vadd.f32 %v2880_v36, %v10150_v5  ;;  %v10270_v51 = vadd.f32 %v2953_v13, %v10154_v33 }
0x1661   :  { %v2882_v6 = vpop.f32.mrf.mxu1  ;;  %v2955_v34 = vpop.f32.mrf.mxu0 }
0x1662   :  { %v10273_v57 = vadd.f32 %v2882_v6, %v10157_v48  ;;  %v10276_v44 = vadd.f32 %v2955_v34, %v10163_v2  ;;  %8644 = verf.f32 %v3018_v38  ;;  %v3019_v10 = vmul.f32 0.70710677, %v10267_v11 }
0x1663   :  { %v2884_v56 = vpop.f32.mrf.mxu1  ;;  %v2957_v52 = vpop.f32.mrf.mxu0  ;;  %8646 = verf.f32 %v3020_v42  ;;  %v3021_v4 = vmul.f32 0.70710677, %v10270_v51  ;;  %v2986_v42 = vmul.f32 0.5, %v10259_v21 }
0x1664   :  { %v3022_v31 = vmul.f32 0.70710677, %v10273_v57  ;;  %8648 = verf.f32 %v3019_v10  ;;  %v3024_v22 = vmul.f32 0.70710677, %v10276_v44  ;;  %v2885_v25 = vadd.f32 %v2884_v56, %v10150_v5 }
0x1665   :  { %v10284_v28 = vadd.f32 %v2957_v52, %v10154_v33  ;;  %v2888_v41 = vpop.f32.mrf.mxu1  ;;  %v2961_v53 = vpop.f32.mrf.mxu0  ;;  %8650 = verf.f32 %v3021_v4  ;;  %v2988_v52 = vmul.f32 0.5, %v10262_v30 }
0x1666   :  { %v10287_v39 = vadd.f32 %v2888_v41, %v10157_v48  ;;  %v10290_v40 = vadd.f32 %v2961_v53, %v10163_v2  ;;  %8652 = verf.f32 %v3022_v31  ;;  %v3023_v35 = vmul.f32 0.70710677, %v2885_v25 }
0x1667   :  { %v2890_v50 = vpop.f32.mrf.mxu1  ;;  %v2963_v14 = vpop.f32.mrf.mxu0  ;;  %8654 = verf.f32 %v3024_v22  ;;  %v3025_v45 = vmul.f32 0.70710677, %v10284_v28  ;;  %v2989_v22 = vmul.f32 0.5, %v10270_v51  ;;  %v2990_v41 = vmul.f32 0.5, %v10273_v57 }
0x1668   :  { %v3026_v62 = vmul.f32 0.70710677, %v10287_v39  ;;  %8656 = verf.f32 %v3023_v35  ;;  %v3028_v55 = vmul.f32 0.70710677, %v10290_v40  ;;  %v10296_v19 = vadd.f32 %v2890_v50, %v10150_v5 }
0x1669   :  { %v2892_v63 = vpop.f32.mrf.mxu1  ;;  %v2965_v12 = vpop.f32.mrf.mxu0  ;;  %8658 = verf.f32 %v3025_v45  ;;  %v10299_v24 = vadd.f32 %v2963_v14, %v10154_v33  ;;  %v2992_v53 = vmul.f32 0.5, %v10276_v44  ;;  %v2991_v14 = vmul.f32 0.5, %v2885_v25  ;;  %v10333_v25 = vld [vmem:[%s11606_s16] ss:$0 sm:$0xff] }
0x166a   :  { %v10302_v17 = vadd.f32 %v2892_v63, %v10157_v48  ;;  %v10305_v60 = vadd.f32 %v2965_v12, %v10163_v2  ;;  %8660 = verf.f32 %v3026_v62  ;;  %v3027_v27 = vmul.f32 0.70710677, %v10296_v19 }
0x166b   :  { %v2894_v37 = vpop.f32.mrf.mxu1  ;;  %v2967_v18 = vpop.f32.mrf.mxu0  ;;  %8662 = verf.f32 %v3028_v55  ;;  %v3029_v46 = vmul.f32 0.70710677, %v10299_v24  ;;  %v2993_v12 = vmul.f32 0.5, %v10284_v28 }
0x166c   :  { %8664 = verf.f32 %v3027_v27  ;;  %v3030_v3 = vmul.f32 0.70710677, %v10302_v17  ;;  %v3032_v9 = vmul.f32 0.70710677, %v10305_v60  ;;  %v10312_v48 = vadd.f32 %v2894_v37, %v10150_v5 }
0x166d   :  { %v7540_v47 = vpop.f32.mrf.mxu1  ;;  %v7580_v54 = vpop.f32.mrf.mxu0  ;;  %8666 = verf.f32 %v3029_v46  ;;  %v10315_v2 = vadd.f32 %v2967_v18, %v10154_v33  ;;  %v2987_v33 = vmul.f32 0.5, %v10267_v11  ;;  %v10327_v27 = vmul.f32 0.5, %v10287_v39 }
0x166e   :  { %8668 = verf.f32 %v3030_v3  ;;  %v3031_v13 = vmul.f32 0.70710677, %v10312_v48  ;;  %v10336_v39 = vmul.f32 0.5, %v10290_v40 }
0x166f   :  { %v7541_v7 = vpop.f32.mrf.mxu1  ;;  %v7581_v15 = vpop.f32.mrf.mxu0  ;;  %8670 = verf.f32 %v3032_v9  ;;  %v3033_v6 = vmul.f32 0.70710677, %v10315_v2 }
0x1670   :  { %v8645_v36 = vpop.eup %8644  ;;  %v7542_v34 = vadd.f32 %v7541_v7, %v7540_v47  ;;  %8672 = verf.f32 %v3031_v13  ;;  %v7582_v4 = vadd.f32 %v7581_v15, %v7580_v54 }
0x1671   :  { %v8647_v38 = vpop.eup %8646  ;;  %v7543_v10 = vpop.f32.mrf.mxu1  ;;  %8674 = verf.f32 %v3033_v6  ;;  %v3082_v44 = vadd.f32 1.0, %v8645_v36 }
0x1672   :  { %v7583_v56 = vpop.f32.mrf.mxu0  ;;  %v8649_v5 = vpop.eup %8648  ;;  %v3502_v45 = vadd.f32 %v7582_v4, %v7542_v34  ;;  %v3084_v47 = vadd.f32 1.0, %v8647_v38 }
0x1673   :  { %v8651_v31 = vpop.eup %8650  ;;  %v7544_v21 = vpop.f32.mrf.mxu1  ;;  %v3083_v63 = vadd.f32 1.0, %v8649_v5  ;;  %v3114_v40 = vmul.f32 %v3082_v44, %v2986_v42 }
0x1674   :  { %v7584_v35 = vpop.f32.mrf.mxu0  ;;  %v8653_v50 = vpop.eup %8652  ;;  %v7545_v62 = vadd.f32 %v7544_v21, %v7543_v10  ;;  %v3532_v46 = vadd.f32 %v3502_v45, %v9843_v29  ;;  %v3085_v54 = vadd.f32 1.0, %v8651_v31 }
0x1675   :  { %v7585_v55 = vadd.f32 %v7584_v35, %v7583_v56  ;;  %v8655_v30 = vpop.eup %8654  ;;  %v3086_v11 = vadd.f32 1.0, %v8653_v50  ;;  %v7546_v51 = vpop.f32.mrf.mxu1  ;;  %v3115_v56 = vmul.f32 %v3083_v63, %v2987_v33 }
0x1676   :  { %v7586_v57 = vpop.f32.mrf.mxu0  ;;  %v8657_v37 = vpop.eup %8656  ;;  %v3088_v18 = vadd.f32 1.0, %v8655_v30  ;;  %v10340_v21 = vadd.f32 %v10333_v25, %v3532_v46 }
0x1677   :  { %v3505_v3 = vadd.f32 %v7585_v55, %v7545_v62  ;;  %v8659_v9 = vpop.eup %8658  ;;  %v3087_v28 = vadd.f32 1.0, %v8657_v37  ;;  %v7547_v7 = vpop.f32.mrf.mxu1  ;;  %v3118_v36 = vmul.f32 %v3086_v11, %v2990_v41  ;;  %v3117_v55 = vmul.f32 %v3085_v54, %v2989_v22 }
0x1678   :  { %v7587_v15 = vpop.f32.mrf.mxu0  ;;  %v8661_v13 = vpop.eup %8660  ;;  %v3089_v6 = vadd.f32 1.0, %v8659_v9  ;;  %v7548_v34 = vadd.f32 %v7547_v7, %v7546_v51  ;;  %v3120_v50 = vmul.f32 %v3088_v18, %v2992_v53  ;;  %3559 = vadd.xlane.f32.xlu0 %v10340_v21  ;;  %v3116_v51 = vmul.f32 %v3084_v47, %v2988_v52 }
0x1679   :  { %v3533_v29 = vadd.f32 %v3505_v3, %v9855_v16  ;;  %v8663_v10 = vpop.eup %8662  ;;  %v3119_v5 = vmul.f32 %v3087_v28, %v2991_v14  ;;  %v7588_v4 = vadd.f32 %v7587_v15, %v7586_v57  ;;  %v7549_v38 = vpop.f32.mrf.mxu1  ;;  %v2995_v16 = vmul.f32 0.5, %v10296_v19 }
0x167a   :  { %v7589_v31 = vpop.f32.mrf.mxu0  ;;  %v8665_v35 = vpop.eup %8664  ;;  %v3121_v45 = vmul.f32 %v3089_v6, %v2993_v12  ;;  %v3202_v42 = vpack.c.bf16 %v3118_v36, %v3114_v40  ;;  %v2998_v12 = vmul.f32 0.5, %v10302_v17  ;;  %v3204_v9 = vpack.c.bf16 %v3120_v50, %v3116_v51 }
0x167b   :  { %v10343_v62 = vadd.f32 %v10333_v25, %v3533_v29  ;;  %v8667_v41 = vpop.eup %8666  ;;  %v3510_v30 = vadd.f32 %v7588_v4, %v7548_v34  ;;  %v7550_v33 = vpop.f32.mrf.mxu1  ;;  %v3203_v63 = vpack.c.bf16 %v3119_v5, %v3115_v56  ;;  %v3091_v18 = vadd.f32 1.0, %v8665_v35 }
0x167c   :  { %v7590_v14 = vpop.f32.mrf.mxu0  ;;  %v8669_v11 = vpop.eup %8668  ;;  %v7551_v57 = vadd.f32 %v7550_v33, %v7549_v38  ;;  %v3205_v19 = vpack.c.bf16 %v3121_v45, %v3117_v55  ;;  %v3090_v52 = vadd.f32 1.0, %v8661_v13  ;;  %v3093_v47 = vadd.f32 1.0, %v8667_v41 }
0x167d   :  { %v7591_v37 = vadd.f32 %v7590_v14, %v7589_v31  ;;  %3561 = vadd.xlane.f32.xlu1 %v10343_v62  ;;  %v8671_v53 = vpop.eup %8670  ;;  %v3094_v44 = vadd.f32 1.0, %v8669_v11  ;;  %v3534_v22 = vadd.f32 %v3510_v30, %v9847_v49  ;;  %3450 = vmatprep.mubr.bf16.mxu1 %v3203_v63  ;;  %v3000_v28 = vmul.f32 0.5, %v10305_v60 }
0x167e   :  { %v3096_v46 = vadd.f32 1.0, %v8671_v53  ;;  %3451 = vmatmul.mubr.bf16.gmra.mxu1 %v3202_v42  ;;  %v8673_v54 = vpop.eup %8672  ;;  %3515 = vmatprep.mubr.bf16.mxu0 %v3205_v19  ;;  %v3092_v15 = vadd.f32 1.0, %v8663_v10  ;;  %v2999_v49 = vmul.f32 0.5, %v10312_v48  ;;  %v2997_v29 = vmul.f32 0.5, %v10299_v24  ;;  %v8332_v19 = vld [vmem:[%s11643_s25 + $0x13c] ss:$12 sps:$4 sm:$0xff]  }
0x167f   :  { %v3513_v3 = vadd.f32 %v7591_v37, %v7551_v57  ;;  %v10352_v7 = vadd.f32 %v10333_v25, %v3534_v22  ;;  %v8675_v17 = vpop.eup %8674  ;;  %v3095_v36 = vadd.f32 1.0, %v8673_v54  ;;  %3516 = vmatmul.mubr.bf16.gmra.mxu0 %v3204_v9  ;;  %v3126_v34 = vmul.f32 %v3094_v44, %v2998_v12  ;;  %v8329_v44 = vld [vmem:[%s11643_s25 + $0x154] ss:$12 sps:$4 sm:$0xff]   ;;  %v8327_v22 = vld [vmem:[%s11643_s25 + $0x150] ss:$12 sps:$4 sm:$0xff]  }
0x1680   :  { %v3001_v13 = vmul.f32 0.5, %v10315_v2  ;;  %v3097_v56 = vadd.f32 1.0, %v8675_v17  ;;  %v3123_v60 = vmul.f32 %v3091_v18, %v2995_v16  ;;  %v3128_v5 = vmul.f32 %v3096_v46, %v3000_v28  ;;  %v8333_v18 = vld [vmem:[%s11643_s25 + $0x170] ss:$12 sps:$4 sm:$0xff]   ;;  %v8330_v46 = vld [vmem:[%s11643_s25 + $0x138] ss:$12 sps:$4 sm:$0xff]  }
0x1681   :  { %v3535_v6 = vadd.f32 %v3513_v3, %v9850_v43  ;;  %3563 = vadd.xlane.f32.xlu0 %v10352_v7  ;;  %v3127_v4 = vmul.f32 %v3095_v36, %v2999_v49  ;;  %v3122_v48 = vmul.f32 %v3090_v52, %v10327_v27  ;;  %v3125_v10 = vmul.f32 %v3093_v47, %v2997_v29  ;;  %v8324_v27 = vld [vmem:[%s11643_s25 + $0x168] ss:$12 sps:$4 sm:$0xff]   ;;  %v8336_v3 = vld [vmem:[%s11643_s25 + $0x124] ss:$12 sps:$4 sm:$0xff]   ;;  %v8334_v54 = vld [vmem:[%s11643_s25 + $0x120] ss:$12 sps:$4 sm:$0xff]  }
0x1682   :  { %v3129_v31 = vmul.f32 %v3097_v56, %v3001_v13  ;;  %v3124_v43 = vmul.f32 %v3092_v15, %v10336_v39  ;;  %v8326_v39 = vld [vmem:[%s11643_s25 + $0x16c] ss:$12 sps:$4 sm:$0xff]   ;;  %7957 = vmatprep.subr.bf16.mxu0 %v8333_v18  ;;  %v8338_v28 = vld [vmem:[%s11643_s25 + $0x108] ss:$12 sps:$4 sm:$0xff]   ;;  %v8342_v17 = vld [vmem:[%s11643_s25 + $0xf0] ss:$12 sps:$4 sm:$0xff]  }
0x1683   :  { %v10360_v38 = vadd.f32 %v10333_v25, %v3535_v6  ;;  %v3207_v24 = vpack.c.bf16 %v3127_v4, %v3123_v60  ;;  %v3206_v2 = vpack.c.bf16 %v3126_v34, %v3122_v48  ;;  %3858 = vmatprep.subr.bf16.mxu1 %v8326_v39  ;;  %7958 = vmatpush3.bf16.msra.mxu0 %v8333_v18  ;;  %v8337_v9 = vld [vmem:[%s11643_s25 + $0x158] ss:$12 sps:$4 sm:$0xff]   ;;  %v8341_v47 = vld [vmem:[%s11643_s25 + $0x140] ss:$12 sps:$4 sm:$0xff]   ;;  %v8345_v49 = vld [vmem:[%s11643_s25 + $0x128] ss:$12 sps:$4 sm:$0xff]  }
0x1684   :  { %v3209_v35 = vpack.c.bf16 %v3129_v31, %v3125_v10  ;;  %v3208_v40 = vpack.c.bf16 %v3128_v5, %v3124_v43  ;;  %3859 = vmatpush1.bf16.msra.mxu1 %v8324_v27  ;;  %7959 = vmatprep.subr.bf16.mxu0 %v8337_v9  ;;  %v8340_v52 = vld [vmem:[%s11643_s25 + $0x10c] ss:$12 sps:$4 sm:$0xff]   ;;  %v8344_v15 = vld [vmem:[%s11643_s25 + $0xf4] ss:$12 sps:$4 sm:$0xff]   ;;  %v8348_v36 = vld [vmem:[%s11643_s25 + $0xdc] ss:$12 sps:$4 sm:$0xff]  }
0x1685   :  { %3565 = vadd.xlane.f32.xlu1 %v10360_v38  ;;  %3458 = vmatprep.mubr.bf16.mxu1 %v3207_v24  ;;  %v8349_v6 = vld [vmem:[%s11643_s25 + $0x110] ss:$12 sps:$4 sm:$0xff]   ;;  %v8346_v29 = vld [vmem:[%s11643_s25 + $0xd8] ss:$12 sps:$4 sm:$0xff]   ;;  %v8350_v56 = vld [vmem:[%s11643_s25 + $0xc0] ss:$12 sps:$4 sm:$0xff]  }
0x1686   :  { %3523 = vmatprep.mubr.bf16.mxu0 %v3209_v35  ;;  %3459 = vmatmul.mubr.bf16.gmra.mxu1 %v3206_v2  ;;  %v8352_v34 = vld [vmem:[%s11643_s25 + $0xc4] ss:$12 sps:$4 sm:$0xff]   ;;  %v8354_v60 = vld [vmem:[%s11643_s25 + $0xe0] ss:$12 sps:$4 sm:$0xff]   ;;  %v8355_v5 = vld [vmem:[%s11643_s25 + $0xc8] ss:$12 sps:$4 sm:$0xff]  }
0x1687   :  { %3524 = vmatmul.mubr.bf16.gmra.mxu0 %v3208_v40  ;;  %3890 = vmatprep.mubr.bf16.mxu1 %v8926_v1  ;;  %v8353_v13 = vld [vmem:[%s11643_s25 + $0xf8] ss:$12 sps:$4 sm:$0xff]  }
0x1688   :  { %3860 = vmatprep.subr.bf16.mxu1 %v8329_v44  ;;  %7960 = vmatpush3.bf16.msra.mxu0 %v8337_v9 }
0x1689   :  { %3861 = vmatpush1.bf16.msra.mxu1 %v8327_v22  ;;  %7961 = vmatprep.subr.bf16.mxu0 %v8341_v47 }
0x168a   :  { %3862 = vmatprep.subr.bf16.mxu1 %v8332_v19 }
0x168c   :  { %7962 = vmatpush3.bf16.msra.mxu0 %v8341_v47 }
0x168d   :  { %3863 = vmatpush1.bf16.msra.mxu1 %v8330_v46  ;;  %7963 = vmatprep.subr.bf16.mxu0 %v8345_v49 }
0x168e   :  { %3864 = vmatprep.subr.bf16.mxu1 %v8336_v3 }
0x1690   :  { %7964 = vmatpush3.bf16.msra.mxu0 %v8345_v49 }
0x1691   :  { %3865 = vmatpush1.bf16.msra.mxu1 %v8334_v54  ;;  %7965 = vmatprep.subr.bf16.mxu0 %v8349_v6 }
0x1692   :  { %3866 = vmatprep.subr.bf16.mxu1 %v8340_v52 }
0x1694   :  { %7966 = vmatpush3.bf16.msra.mxu0 %v8349_v6 }
0x1695   :  { %3867 = vmatpush1.bf16.msra.mxu1 %v8338_v28  ;;  %7967 = vmatprep.subr.bf16.mxu0 %v8353_v13 }
0x1696   :  { %3868 = vmatprep.subr.bf16.mxu1 %v8344_v15 }
0x1698   :  { %7968 = vmatpush3.bf16.msra.mxu0 %v8353_v13 }
0x1699   :  { %3869 = vmatpush1.bf16.msra.mxu1 %v8342_v17  ;;  %7969 = vmatprep.subr.bf16.mxu0 %v8354_v60 }
0x169a   :  { %3870 = vmatprep.subr.bf16.mxu1 %v8348_v36 }
0x169c   :  { %7970 = vmatpush3.bf16.msra.mxu0 %v8354_v60 }
0x169d   :  { %3871 = vmatpush1.bf16.msra.mxu1 %v8346_v29  ;;  %7971 = vmatprep.subr.bf16.mxu0 %v8355_v5 }
0x169e   :  { %3872 = vmatprep.subr.bf16.mxu1 %v8352_v34 }
0x16a0   :  { %7972 = vmatpush3.bf16.msra.mxu0 %v8355_v5  ;;  %v10481_v5 = vld [vmem:[%s11644_s2 + $0x1] ss:$0 sm:$0xff] }
0x16a1   :  { %3873 = vmatpush1.bf16.msra.mxu1 %v8350_v56 }
0x1701   :  { %v3560_v50 = vpop.xlane.xlu0 %3559 }
0x1702   :  { %v3575_v45 = vmul.f32 0.0078125, %v3560_v50 }
0x1704   :  { %v10373_v16 = vsub.f32 %v10340_v21, %v3575_v45 }
0x1706   :  { %v3562_v41 = vpop.xlane.xlu1 %3561  ;;  %v3591_v33 = vmul.f32 %v10373_v16, %v10373_v16 }
0x1707   :  { %v3576_v55 = vmul.f32 0.0078125, %v3562_v41 }
0x1708   :  { %3599 = vadd.xlane.f32.xlu0 %v3591_v33 }
0x1709   :  { %v10376_v30 = vsub.f32 %v10343_v62, %v3576_v55 }
0x170a   :  { %v3564_v14 = vpop.xlane.xlu0 %3563 }
0x170b   :  { %v3592_v63 = vmul.f32 %v10376_v30, %v10376_v30  ;;  %v3577_v11 = vmul.f32 0.0078125, %v3564_v14 }
0x170d   :  { %3601 = vadd.xlane.f32.xlu1 %v3592_v63  ;;  %v10383_v51 = vsub.f32 %v10352_v7, %v3577_v11 }
0x170e   :  { %v3566_v57 = vpop.xlane.xlu1 %3565 }
0x170f   :  { %v3578_v37 = vmul.f32 0.0078125, %v3566_v57  ;;  %v3593_v42 = vmul.f32 %v10383_v51, %v10383_v51 }
0x1711   :  { %v10388_v53 = vsub.f32 %v10360_v38, %v3578_v37  ;;  %3603 = vadd.xlane.f32.xlu0 %v3593_v42 }
0x1713   :  { %v3594_v12 = vmul.f32 %v10388_v53, %v10388_v53 }
0x1715   :  { %3605 = vadd.xlane.f32.xlu1 %v3594_v12 }
0x173e   :  { %v7552_v4 = vpop.f32.mrf.mxu1 }
0x173f   :  { %v7592_v48 = vpop.f32.mrf.mxu0 }
0x1740   :  { %v7553_v10 = vpop.f32.mrf.mxu1 }
0x1741   :  { %v7554_v31 = vadd.f32 %v7553_v10, %v7552_v4  ;;  %v7593_v43 = vpop.f32.mrf.mxu0 }
0x1742   :  { %v7555_v24 = vpop.f32.mrf.mxu1  ;;  %v7594_v35 = vadd.f32 %v7593_v43, %v7592_v48 }
0x1743   :  { %v7595_v2 = vpop.f32.mrf.mxu0 }
0x1744   :  { %v7556_v40 = vpop.f32.mrf.mxu1  ;;  %v3518_v27 = vadd.f32 %v7594_v35, %v7554_v31  ;;  %v10488_v31 = vld [vmem:[%s11645_s7 + $0x1] ss:$0 sm:$0xff] }
0x1745   :  { %v7557_v39 = vadd.f32 %v7556_v40, %v7555_v24  ;;  %v7596_v50 = vpop.f32.mrf.mxu0 }
0x1746   :  { %v3536_v45 = vadd.f32 %v3518_v27, %v9983_v32  ;;  %v7597_v41 = vadd.f32 %v7596_v50, %v7595_v2  ;;  %v7558_v55 = vpop.f32.mrf.mxu1 }
0x1747   :  { %v7598_v33 = vpop.f32.mrf.mxu0 }
0x1748   :  { %v3521_v14 = vadd.f32 %v7597_v41, %v7557_v39  ;;  %v7559_v63 = vpop.f32.mrf.mxu1  ;;  %v10460_v11 = vadd.f32 %v10333_v25, %v3536_v45 }
0x1749   :  { %v7560_v57 = vadd.f32 %v7559_v63, %v7558_v55  ;;  %v7599_v37 = vpop.f32.mrf.mxu0 }
0x174a   :  { %v3537_v42 = vadd.f32 %v3521_v14, %v9994_v20  ;;  %v7600_v12 = vadd.f32 %v7599_v37, %v7598_v33  ;;  %3567 = vadd.xlane.f32.xlu0 %v10460_v11  ;;  %v7561_v44 = vpop.f32.mrf.mxu1 }
0x174b   :  { %v7601_v22 = vpop.f32.mrf.mxu0 }
0x174c   :  { %v3526_v19 = vadd.f32 %v7600_v12, %v7560_v57  ;;  %v7562_v18 = vpop.f32.mrf.mxu1  ;;  %v10465_v32 = vadd.f32 %v10333_v25, %v3537_v42 }
0x174d   :  { %v7563_v46 = vadd.f32 %v7562_v18, %v7561_v44  ;;  %v7602_v3 = vpop.f32.mrf.mxu0 }
0x174e   :  { %v3538_v9 = vadd.f32 %v3526_v19, %v9988_v59  ;;  %v7603_v54 = vadd.f32 %v7602_v3, %v7601_v22  ;;  %3569 = vadd.xlane.f32.xlu1 %v10465_v32 }
0x1750   :  { %v3529_v52 = vadd.f32 %v7603_v54, %v7563_v46  ;;  %v10470_v20 = vadd.f32 %v10333_v25, %v3538_v9 }
0x1752   :  { %v3539_v47 = vadd.f32 %v3529_v52, %v9991_v23  ;;  %3571 = vadd.xlane.f32.xlu0 %v10470_v20 }
0x1754   :  { %v10475_v28 = vadd.f32 %v10333_v25, %v3539_v47 }
0x1756   :  { %3573 = vadd.xlane.f32.xlu1 %v10475_v28 }
0x1791   :  { %v3600_v17 = vpop.xlane.xlu0 %3599 }
0x1792   :  { %v3615_v15 = vmul.f32 0.0078125, %v3600_v17 }
0x1794   :  { %v3623_v36 = vadd.f32 1e-05, %v3615_v15 }
0x1796   :  { %v3602_v49 = vpop.xlane.xlu1 %3601  ;;  %8676 = vrsqrt.f32 %v3623_v36 }
0x1797   :  { %v3616_v59 = vmul.f32 0.0078125, %v3602_v49 }
0x1799   :  { %v3624_v6 = vadd.f32 1e-05, %v3616_v59 }
0x179a   :  { %v3604_v29 = vpop.xlane.xlu0 %3603 }
0x179b   :  { %8678 = vrsqrt.f32 %v3624_v6  ;;  %v3617_v34 = vmul.f32 0.0078125, %v3604_v29 }
0x179d   :  { %v3625_v13 = vadd.f32 1e-05, %v3617_v34 }
0x179e   :  { %v3606_v56 = vpop.xlane.xlu1 %3605 }
0x179f   :  { %v3618_v23 = vmul.f32 0.0078125, %v3606_v56  ;;  %8680 = vrsqrt.f32 %v3625_v13 }
0x17a1   :  { %v3626_v60 = vadd.f32 1e-05, %v3618_v23  ;;  %v7173_v23 = vld [vmem:[%s11598_s8 + $0x3] sm:$0x7]  ;;  %s11646_s8 = smov 96  }
0x17a3   :  { %8682 = vrsqrt.f32 %v3626_v60  ;;  %v8677_v25 = vpop.eup %8676 }
0x17a4   :  { %v3639_v48 = vmul.f32 %v8677_v25, %v10373_v16 }
0x17a6   :  { %v3653_v43 = vmul.f32 %v10481_v5, %v3639_v48 }
0x17a8   :  { %v8679_v4 = vpop.eup %8678  ;;  %v3667_v2 = vadd.f32 %v10488_v31, %v3653_v43 }
0x17a9   :  { %v3640_v10 = vmul.f32 %v8679_v4, %v10376_v30  ;;  %v10510_v4 = vrot.slane %v7173_v23, %v9341_v8 }
0x17ab   :  { %v3654_v24 = vmul.f32 %v10481_v5, %v3640_v10 }
0x17ac   :  { %v8681_v35 = vpop.eup %8680 }
0x17ad   :  { %v3668_v40 = vadd.f32 %v10488_v31, %v3654_v24  ;;  %v3641_v27 = vmul.f32 %v8681_v35, %v10383_v51  ;;  %v10513_v24 = vrot.slane %v7173_v23, %v9333_v0 }
0x17af   :  { %v3708_v39 = vpack.c.bf16 %v3668_v40, %v3667_v2  ;;  %v3655_v50 = vmul.f32 %v10481_v5, %v3641_v27 }
0x17b0   :  { %v8683_v16 = vpop.eup %8682 }
0x17b1   :  { %3891 = vmatmul.mubr.bf16.vlgmr.msra.gmra.mxu1 %v3708_v39  ;;  %7973 = vmatprep.mubr.bf16.mxu0 %v3708_v39  ;;  %v3642_v30 = vmul.f32 %v8683_v16, %v10388_v53  ;;  %v3669_v41 = vadd.f32 %v10488_v31, %v3655_v50 }
0x17b2   :  { %3900 = vmatprep.mubr.bf16.mxu1 %v8926_v1 }
0x17b3   :  { %v3656_v45 = vmul.f32 %v10481_v5, %v3642_v30 }
0x17b5   :  { %v3670_v55 = vadd.f32 %v10488_v31, %v3656_v45 }
0x17b7   :  { %v3709_v33 = vpack.c.bf16 %v3670_v55, %v3669_v41 }
0x17b9   :  { %3901 = vmatmul.mubr.bf16.gmra.mxu1 %v3709_v33  ;;  %7974 = vmatmul.mubr.bf16.vlgmr.msra.gmra.mxu0 %v3709_v33 }
0x17ba   :  { %3910 = vmatprep.mubr.bf16.mxu1 %v8926_v1 }
0x17d3   :  { %v3568_v51 = vpop.xlane.xlu0 %3567 }
0x17d4   :  { %v3579_v14 = vmul.f32 0.0078125, %v3568_v51 }
0x17d6   :  { %v3587_v63 = vsub.f32 %v10460_v11, %v3579_v14 }
0x17d7   :  { %v3570_v53 = vpop.xlane.xlu1 %3569 }
0x17d8   :  { %v3580_v57 = vmul.f32 0.0078125, %v3570_v53  ;;  %v3595_v37 = vmul.f32 %v3587_v63, %v3587_v63 }
0x17da   :  { %v3588_v42 = vsub.f32 %v10465_v32, %v3580_v57  ;;  %3607 = vadd.xlane.f32.xlu0 %v3595_v37 }
0x17db   :  { %v3572_v12 = vpop.xlane.xlu0 %3571 }
0x17dc   :  { %v3581_v44 = vmul.f32 0.0078125, %v3572_v12  ;;  %v3596_v22 = vmul.f32 %v3588_v42, %v3588_v42 }
0x17de   :  { %v3589_v19 = vsub.f32 %v10470_v20, %v3581_v44  ;;  %3609 = vadd.xlane.f32.xlu1 %v3596_v22 }
0x17df   :  { %v3574_v18 = vpop.xlane.xlu1 %3573 }
0x17e0   :  { %v3582_v46 = vmul.f32 0.0078125, %v3574_v18  ;;  %v3597_v3 = vmul.f32 %v3589_v19, %v3589_v19 }
0x17e2   :  { %v3590_v9 = vsub.f32 %v10475_v28, %v3582_v46  ;;  %3611 = vadd.xlane.f32.xlu0 %v3597_v3 }
0x17e4   :  { %v3598_v54 = vmul.f32 %v3590_v9, %v3590_v9 }
0x17e6   :  { %3613 = vadd.xlane.f32.xlu1 %v3598_v54 }
0x1863   :  { %v3608_v52 = vpop.xlane.xlu0 %3607 }
0x1864   :  { %v3619_v47 = vmul.f32 0.0078125, %v3608_v52 }
0x1866   :  { %v3627_v17 = vadd.f32 1e-05, %v3619_v47 }
0x1867   :  { %v3610_v15 = vpop.xlane.xlu1 %3609 }
0x1868   :  { %8684 = vrsqrt.f32 %v3627_v17  ;;  %v3620_v49 = vmul.f32 0.0078125, %v3610_v15 }
0x186a   :  { %v3628_v59 = vadd.f32 1e-05, %v3620_v49 }
0x186b   :  { %v3612_v36 = vpop.xlane.xlu0 %3611 }
0x186c   :  { %8686 = vrsqrt.f32 %v3628_v59  ;;  %v3621_v6 = vmul.f32 0.0078125, %v3612_v36 }
0x186e   :  { %v3629_v29 = vadd.f32 1e-05, %v3621_v6 }
0x186f   :  { %v3614_v34 = vpop.xlane.xlu1 %3613 }
0x1870   :  { %8688 = vrsqrt.f32 %v3629_v29  ;;  %v3622_v56 = vmul.f32 0.0078125, %v3614_v34 }
0x1871   :  { %v3892_v13 = vpop.f32.mrf.mxu1 }
0x1872   :  { %v3630_v25 = vadd.f32 1e-05, %v3622_v56  ;;  %v3893_v45 = vadd.f32 %v3892_v13, %v10513_v24 }
0x1873   :  { %v3894_v60 = vpop.f32.mrf.mxu1 }
0x1874   :  { %8690 = vrsqrt.f32 %v3630_v25  ;;  %v3895_v35 = vadd.f32 %v3894_v60, %v10510_v4 }
0x1875   :  { %v3896_v48 = vpop.f32.mrf.mxu1  ;;  %v8685_v10 = vpop.eup %8684 }
0x1876   :  { %v3643_v27 = vmul.f32 %v8685_v10, %v3587_v63  ;;  %v3897_v39 = vadd.f32 %v3896_v48, %v10513_v24 }
0x1877   :  { %v3898_v43 = vpop.f32.mrf.mxu1 }
0x1878   :  { %v3899_v2 = vadd.f32 %v3898_v43, %v10510_v4  ;;  %v3657_v33 = vmul.f32 %v10481_v5, %v3643_v27  ;;  %v10524_v51 = vpack.c.bf16 %v3897_v39, %v3893_v45 }
0x1879   :  { %v3902_v40 = vpop.f32.mrf.mxu1  ;;  %v8687_v30 = vpop.eup %8686 }
0x187a   :  { %v10518_v16 = vpack.c.bf16 %v3899_v2, %v3895_v35  ;;  %v3644_v41 = vmul.f32 %v8687_v30, %v3588_v42  ;;  %v7975_v53 = vpop.f32.mrf.mxu0  ;;  %v3671_v44 = vadd.f32 %v10488_v31, %v3657_v33 }
0x187b   :  { %v3904_v50 = vpop.f32.mrf.mxu1 }
0x187c   :  { %4190 = vrot.lane.b32.xlu1 %v10518_v16, %s11646_s8  ;;  %v3658_v14 = vmul.f32 %v10481_v5, %v3644_v41  ;;  %v3905_v37 = vadd.f32 %v3904_v50, %v10510_v4  ;;  %v3965_v3 = vpop.f32.mrf.mxu0 }
0x187d   :  { %v3906_v55 = vpop.f32.mrf.mxu1  ;;  %v8689_v63 = vpop.eup %8688 }
0x187e   :  { %v3672_v42 = vadd.f32 %v10488_v31, %v3658_v14  ;;  %v3645_v22 = vmul.f32 %v8689_v63, %v3589_v19  ;;  %v3907_v52 = vadd.f32 %v3906_v55, %v10513_v24  ;;  %v3903_v19 = vadd.f32 %v3902_v40, %v10513_v24  ;;  %v7976_v59 = vpop.f32.mrf.mxu0 }
0x187f   :  { %v3908_v57 = vpop.f32.mrf.mxu1 }
0x1880   :  { %v3909_v12 = vadd.f32 %v3908_v57, %v10510_v4  ;;  %4184 = vrot.lane.b32.xlu1 %v10524_v51, %s11646_s8  ;;  %v3710_v54 = vpack.c.bf16 %v3672_v42, %v3671_v44  ;;  %v3659_v15 = vmul.f32 %v10481_v5, %v3645_v22  ;;  %v10553_v36 = vpack.c.bf16 %v3907_v52, %v3903_v19 }
0x1881   :  { %v8691_v46 = vpop.eup %8690 }
0x1882   :  { %v10533_v18 = vpack.c.bf16 %v3909_v12, %v3905_v37  ;;  %v3646_v17 = vmul.f32 %v8691_v46, %v3590_v9  ;;  %3911 = vmatmul.mubr.bf16.gmra.mxu1 %v3710_v54  ;;  %7977 = vmatprep.mubr.bf16.mxu0 %v3710_v54  ;;  %v10551_v9 = vrot.slane %v7173_v23, %v9396_v58  ;;  %v3968_v23 = vpop.f32.mrf.mxu0 }
0x1883   :  { %3920 = vmatprep.mubr.bf16.mxu1 %v8926_v1  ;;  %v3673_v6 = vadd.f32 %v10488_v31, %v3659_v15 }
0x1884   :  { %8169 = vmatprep.subr.msk.bf16.mxu1 %vm744_vm2, %v10533_v18  ;;  %4398 = vrot.lane.b32.xlu1 %v10533_v18, %s11647_s4  ;;  %v4018_v47 = vsel %vm744_vm2, %v10533_v18, 0  ;;  %v3660_v49 = vmul.f32 %v10481_v5, %v3646_v17  ;;  %v3977_v5 = vadd.f32 %v7976_v59, %v10551_v9  ;;  %v3974_v13 = vadd.f32 %v7975_v53, %v10551_v9 }
0x1885   :  { %4192 = vrot.lane.b32.xlu0 %v10533_v18, %s11646_s8  ;;  %7982 = vmatpush3.bf16.xpose.msra.mxu1 %v4018_v47  ;;  %v3969_v60 = vadd.f32 %v3968_v23, %v10551_v9  ;;  %v3966_v25 = vadd.f32 %v3965_v3, %v10551_v9 }
0x1886   :  { %8170 = vmatprep.subr.msk.bf16.mxu1 %vm744_vm2, %v10518_v16  ;;  %v3674_v29 = vadd.f32 %v10488_v31, %v3660_v49  ;;  %v10565_v56 = vpack.c.bf16 %v3977_v5, %v3974_v13  ;;  %v4015_v31 = vsel %vm744_vm2, %v10518_v16, 0 }
0x1887   :  { %v10576_v48 = vpack.c.bf16 %v3969_v60, %v3966_v25 }
0x1888   :  { %4396 = vrot.lane.b32.xlu1 %v10518_v16, %s11647_s4  ;;  %v3711_v34 = vpack.c.bf16 %v3674_v29, %v3673_v6 }
0x1889   :  { %4186 = vrot.lane.b32.xlu0 %v10553_v36, %s11646_s8 }
0x188a   :  { %7978 = vmatmul.mubr.bf16.gmra.mxu0 %v3711_v34  ;;  %3921 = vmatmul.mubr.bf16.gmra.mxu1 %v3711_v34 }
0x188b   :  { %7985 = vmatprep.mubr.msk.bf16.mxu1 %vm744_vm2, %v10524_v51 }
0x188c   :  { %4394 = vrot.lane.b32.xlu1 %v10553_v36, %s11647_s4 }
0x188d   :  { %4392 = vrot.lane.b32.xlu0 %v10524_v51, %s11647_s4  ;;  %7984 = vmatpush3.bf16.xpose.msra.mxu1 %v4015_v31 }
0x188e   :  { %7989 = vmatprep.subr.bf16.mxu1 %v10565_v56 }
0x1894   :  { %7986 = vmatmul.mubr.msk.bf16.vlgmr.msra.gmra.mxu1 %vm744_vm2, %v10553_v36 }
0x1895   :  { %7990 = vmatpush3.bf16.msra.mxu1 %v10565_v56 }
0x1896   :  { %7991 = vmatprep.subr.bf16.mxu1 %v10576_v48 }
0x1899   :  { %7992 = vmatpush3.bf16.msra.mxu1 %v10576_v48 }
0x18ee   :  { %v4191_v10 = vpop.permute.xlu1 %4190 }
0x18ef   :  { %v4201_v40 = vsel %vm744_vm2, %v4191_v10, 0 }
0x18f2   :  { %v4185_v43 = vpop.permute.xlu1 %4184 }
0x18f3   :  { %8001 = vmatprep.mubr.msk.bf16.mxu0 %vm744_vm2, %v4185_v43 }
0x18f6   :  { %v4399_v27 = vpop.permute.xlu1 %4398 }
0x18f7   :  { %v4193_v35 = vpop.permute.xlu0 %4192  ;;  %v4410_v50 = vsel %vm744_vm2, %v4399_v27, 0 }
0x18f8   :  { %8171 = vmatprep.subr.msk.bf16.mxu0 %vm744_vm2, %v4193_v35  ;;  %v4204_v2 = vsel %vm744_vm2, %v4193_v35, 0 }
0x18f9   :  { %7998 = vmatpush3.bf16.xpose.msra.mxu0 %v4204_v2 }
0x18fa   :  { %8172 = vmatprep.subr.msk.bf16.mxu0 %vm744_vm2, %v4191_v10  ;;  %v4397_v45 = vpop.permute.xlu1 %4396 }
0x18fb   :  { %v4187_v39 = vpop.permute.xlu0 %4186  ;;  %v4407_v41 = vsel %vm744_vm2, %v4397_v45, 0 }
0x18fe   :  { %v4395_v55 = vpop.permute.xlu1 %4394 }
0x18ff   :  { %v4393_v30 = vpop.permute.xlu0 %4392 }
0x1901   :  { %8000 = vmatpush3.bf16.xpose.msra.mxu0 %v4201_v40 }
0x1902   :  { %8173 = vmatprep.subr.msk.bf16.mxu0 %vm744_vm2, %v4399_v27 }
0x1908   :  { %8002 = vmatmul.mubr.msk.bf16.vlgmr.msra.gmra.mxu0 %vm744_vm2, %v4187_v39 }
0x1909   :  { %8014 = vmatpush3.bf16.xpose.msra.mxu0 %v4410_v50  ;;  %8017 = vmatprep.mubr.msk.bf16.mxu0 %vm744_vm2, %v4393_v30 }
0x190a   :  { %8174 = vmatprep.subr.msk.bf16.mxu0 %vm744_vm2, %v4397_v45 }
0x1911   :  { %8016 = vmatpush3.bf16.xpose.msra.mxu0 %v4407_v41 }
0x1918   :  { %8018 = vmatmul.mubr.msk.bf16.vlgmr.msra.gmra.mxu0 %vm744_vm2, %v4395_v55 }
0x1942   :  { %v3912_v33 = vpop.f32.mrf.mxu1 }
0x1943   :  { %v3913_v53 = vadd.f32 %v3912_v33, %v10513_v24 }
0x1944   :  { %v3914_v14 = vpop.f32.mrf.mxu1 }
0x1945   :  { %v3915_v12 = vadd.f32 %v3914_v14, %v10510_v4 }
0x1946   :  { %v3916_v63 = vpop.f32.mrf.mxu1 }
0x1947   :  { %v3917_v57 = vadd.f32 %v3916_v63, %v10513_v24 }
0x1948   :  { %v3918_v37 = vpop.f32.mrf.mxu1 }
0x1949   :  { %v10598_v44 = vpack.c.bf16 %v3917_v57, %v3913_v53  ;;  %v3919_v42 = vadd.f32 %v3918_v37, %v10510_v4 }
0x194a   :  { %v7979_v22 = vpop.f32.mrf.mxu0  ;;  %v3922_v46 = vpop.f32.mrf.mxu1 }
0x194b   :  { %v10601_v3 = vpack.c.bf16 %v3919_v42, %v3915_v12  ;;  %v3990_v17 = vadd.f32 %v7979_v22, %v10551_v9  ;;  %v3923_v49 = vadd.f32 %v3922_v46, %v10513_v24 }
0x194c   :  { %v10603_v54 = vpop.f32.mrf.mxu0  ;;  %v3924_v52 = vpop.f32.mrf.mxu1 }
0x194d   :  { %v3925_v5 = vadd.f32 %v3924_v52, %v10510_v4 }
0x194e   :  { %v7980_v47 = vpop.f32.mrf.mxu0  ;;  %v3926_v15 = vpop.f32.mrf.mxu1 }
0x194f   :  { %v3993_v19 = vadd.f32 %v7980_v47, %v10551_v9  ;;  %v3927_v59 = vadd.f32 %v3926_v15, %v10513_v24 }
0x1950   :  { %v3928_v29 = vpop.f32.mrf.mxu1  ;;  %v10635_v55 = vpop.f32.mrf.mxu0 }
0x1951   :  { %v10609_v6 = vpack.c.bf16 %v3993_v19, %v3990_v17  ;;  %v10612_v34 = vpack.c.bf16 %v3927_v59, %v3923_v49  ;;  %v3929_v13 = vadd.f32 %v3928_v29, %v10510_v4 }
0x1953   :  { %v10615_v31 = vpack.c.bf16 %v3929_v13, %v3925_v5 }
0x1954   :  { %v7987_v23 = vpop.f32.mrf.mxu1 }
0x1955   :  { %v4071_v25 = vmul.f32 0.17677669, %v7987_v23 }
0x1956   :  { %v4054_v60 = vpop.f32.mrf.mxu1 }
0x1957   :  { %v4069_v10 = vmul.f32 0.17677669, %v4054_v60  ;;  %v4075_v40 = vsel %vm293_vm3, %v4071_v25, -1e+30 }
0x1958   :  { %v7988_v43 = vpop.f32.mrf.mxu1  ;;  %v4083_v30 = vsel %vm744_vm2, %v4075_v40, -inf }
0x1959   :  { %v10619_v35 = vsel %vm293_vm3, %v4069_v10, -1e+30  ;;  %v4072_v27 = vmul.f32 0.17677669, %v7988_v43 }
0x195a   :  { %v4057_v24 = vpop.f32.mrf.mxu1  ;;  %v4077_v2 = vsel %vm744_vm2, %v10619_v35, -inf }
0x195b   :  { %v4070_v4 = vmul.f32 0.17677669, %v4057_v24  ;;  %4078 = vmax.xlane.f32.xlu0 %v4077_v2  ;;  %v4076_v45 = vsel %vm293_vm3, %v4072_v27, -1e+30 }
0x195c   :  { %v4086_v41 = vsel %vm744_vm2, %v4076_v45, -inf }
0x195d   :  { %v10627_v39 = vsel %vm293_vm3, %v4070_v4, -1e+30 }
0x195e   :  { %v4080_v50 = vsel %vm744_vm2, %v10627_v39, -inf }
0x195f   :  { %4084 = vmax.xlane.f32.xlu0 %v4083_v30  ;;  %4081 = vmax.xlane.f32.xlu1 %v4080_v50 }
0x1963   :  { %4087 = vmax.xlane.f32.xlu0 %v4086_v41 }
0x19c8   :  { %v8003_v33 = vpop.f32.mrf.mxu0 }
0x19c9   :  { %v4257_v63 = vmul.f32 0.17677669, %v8003_v33 }
0x19ca   :  { %v4240_v14 = vpop.f32.mrf.mxu0 }
0x19cb   :  { %v4255_v53 = vmul.f32 0.17677669, %v4240_v14  ;;  %v10645_v22 = vsel %vm293_vm3, %v4257_v63, -1e+30 }
0x19cc   :  { %v8004_v57 = vpop.f32.mrf.mxu0  ;;  %v4269_v17 = vsel %vm744_vm2, %v10645_v22, -inf }
0x19cd   :  { %v10639_v37 = vsel %vm293_vm3, %v4255_v53, -1e+30  ;;  %v4258_v46 = vmul.f32 0.17677669, %v8004_v57 }
0x19ce   :  { %v4243_v12 = vpop.f32.mrf.mxu0  ;;  %v4263_v42 = vsel %vm744_vm2, %v10639_v37, -inf }
0x19cf   :  { %v4256_v52 = vmul.f32 0.17677669, %v4243_v12  ;;  %4264 = vmax.xlane.f32.xlu0 %v4263_v42  ;;  %v10657_v19 = vsel %vm293_vm3, %v4258_v46, -1e+30 }
0x19d0   :  { %v4272_v49 = vsel %vm744_vm2, %v10657_v19, -inf }
0x19d1   :  { %v10649_v47 = vsel %vm293_vm3, %v4256_v52, -1e+30 }
0x19d2   :  { %v4266_v15 = vsel %vm744_vm2, %v10649_v47, -inf }
0x19d3   :  { %4270 = vmax.xlane.f32.xlu0 %v4269_v17  ;;  %4267 = vmax.xlane.f32.xlu1 %v4266_v15 }
0x19d7   :  { %4273 = vmax.xlane.f32.xlu1 %v4272_v49 }
0x19d8   :  { %v8019_v59 = vpop.f32.mrf.mxu0 }
0x19d9   :  { %v4463_v5 = vmul.f32 0.17677669, %v8019_v59 }
0x19da   :  { %v4446_v29 = vpop.f32.mrf.mxu0 }
0x19db   :  { %v4461_v13 = vmul.f32 0.17677669, %v4446_v29  ;;  %v10669_v43 = vsel %vm293_vm3, %v4463_v5, -1e+30 }
0x19dc   :  { %v8020_v23 = vpop.f32.mrf.mxu0  ;;  %v4475_v4 = vsel %vm744_vm2, %v10669_v43, -inf }
0x19dd   :  { %v10663_v60 = vsel %vm293_vm3, %v4461_v13, -1e+30  ;;  %v4464_v24 = vmul.f32 0.17677669, %v8020_v23 }
0x19de   :  { %v4449_v25 = vpop.f32.mrf.mxu0  ;;  %v4469_v10 = vsel %vm744_vm2, %v10663_v60, -inf }
0x19df   :  { %v4462_v2 = vmul.f32 0.17677669, %v4449_v25  ;;  %4470 = vmax.xlane.f32.xlu0 %v4469_v10  ;;  %v10681_v50 = vsel %vm293_vm3, %v4464_v24, -1e+30 }
0x19e0   :  { %v4478_v41 = vsel %vm744_vm2, %v10681_v50, -inf }
0x19e1   :  { %v10673_v27 = vsel %vm293_vm3, %v4462_v2, -1e+30 }
0x19e2   :  { %v4472_v30 = vsel %vm744_vm2, %v10673_v27, -inf }
0x19e3   :  { %4476 = vmax.xlane.f32.xlu0 %v4475_v4  ;;  %4473 = vmax.xlane.f32.xlu1 %v4472_v30 }
0x19e4   :  { %v4079_v33 = vpop.xlane.xlu0 %4078 }
0x19e5   :  { %v4089_v53 = vsub.f32 %v10619_v35, %v4079_v33 }
0x19e7   :  { %4479 = vmax.xlane.f32.xlu1 %v4478_v41  ;;  %v4093_v42 = vmul.f32 1.442695, %v4089_v53 }
0x19e8   :  { %v4085_v14 = vpop.xlane.xlu0 %4084  ;;  %v4082_v52 = vpop.xlane.xlu1 %4081 }
0x19e9   :  { %v4091_v63 = vsub.f32 %v4075_v40, %v4085_v14  ;;  %v4090_v17 = vsub.f32 %v10627_v39, %v4082_v52 }
0x19eb   :  { %v4097_v57 = vmul.f32 1.442695, %v4091_v63  ;;  %v4095_v49 = vmul.f32 1.442695, %v4090_v17 }
0x19ec   :  { %v4088_v12 = vpop.xlane.xlu0 %4087 }
0x19ed   :  { %8692 = vpow2.f32 %v4097_v57  ;;  %v4092_v46 = vsub.f32 %v4076_v45, %v4088_v12 }
0x19ee   :  { %8694 = vpow2.f32 %v4093_v42 }
0x19ef   :  { %v4099_v15 = vmul.f32 1.442695, %v4092_v46 }
0x19f1   :  { %8696 = vpow2.f32 %v4099_v15 }
0x19f2   :  { %8698 = vpow2.f32 %v4095_v49 }
0x19f8   :  { %4311 = vrot.lane.b32.xlu1 %v10576_v48, %s11646_s8 }
0x19f9   :  { %4313 = vrot.lane.b32.xlu0 %v10565_v56, %s11646_s8 }
0x19fa   :  { %v10693_v59 = vpop.eup %8692 }
0x19fb   :  { %v4107_v40 = vsel %vm744_vm2, %v10693_v59, 0.0  ;;  %v10697_v29 = vpop.eup %8694 }
0x19fc   :  { %4517 = vrot.lane.b32.xlu1 %v10565_v56, %s11647_s4  ;;  %v4101_v35 = vsel %vm744_vm2, %v10697_v29, 0.0 }
0x19fe   :  { %v10701_v45 = vpop.eup %8696 }
0x19ff   :  { %v4110_v39 = vsel %vm744_vm2, %v10701_v45, 0.0  ;;  %v10705_v5 = vpop.eup %8698 }
0x1a00   :  { %v4104_v13 = vsel %vm744_vm2, %v10705_v5, 0.0 }
0x1a18   :  { %4108 = vadd.xlane.f32.xlu0 %v4107_v40 }
0x1a1c   :  { %4102 = vadd.xlane.f32.xlu0 %v4101_v35 }
0x1a20   :  { %4111 = vadd.xlane.f32.xlu1 %v4110_v39 }
0x1a24   :  { %4105 = vadd.xlane.f32.xlu1 %v4104_v13 }
0x1a58   :  { %v4265_v23 = vpop.xlane.xlu0 %4264 }
0x1a59   :  { %v4275_v25 = vsub.f32 %v10639_v37, %v4265_v23 }
0x1a5b   :  { %v4279_v41 = vmul.f32 1.442695, %v4275_v25 }
0x1a5c   :  { %v4268_v10 = vpop.xlane.xlu1 %4267  ;;  %v4271_v24 = vpop.xlane.xlu0 %4270 }
0x1a5d   :  { %v4277_v2 = vsub.f32 %v10645_v22, %v4271_v24  ;;  %v4276_v4 = vsub.f32 %v10649_v47, %v4268_v10 }
0x1a5f   :  { %v4283_v30 = vmul.f32 1.442695, %v4277_v2  ;;  %v4281_v63 = vmul.f32 1.442695, %v4276_v4 }
0x1a60   :  { %v4274_v33 = vpop.xlane.xlu1 %4273 }
0x1a61   :  { %v4278_v14 = vsub.f32 %v10657_v19, %v4274_v33  ;;  %8700 = vpow2.f32 %v4283_v30 }
0x1a62   :  { %8702 = vpow2.f32 %v4279_v41 }
0x1a63   :  { %v4285_v53 = vmul.f32 1.442695, %v4278_v14 }
0x1a65   :  { %8704 = vpow2.f32 %v4285_v53 }
0x1a66   :  { %8706 = vpow2.f32 %v4281_v63 }
0x1a68   :  { %v4471_v57 = vpop.xlane.xlu0 %4470 }
0x1a69   :  { %v4481_v37 = vsub.f32 %v10663_v60, %v4471_v57 }
0x1a6b   :  { %v4485_v17 = vmul.f32 1.442695, %v4481_v37 }
0x1a6c   :  { %v4474_v12 = vpop.xlane.xlu1 %4473  ;;  %v4477_v42 = vpop.xlane.xlu0 %4476 }
0x1a6d   :  { %v4483_v22 = vsub.f32 %v10669_v43, %v4477_v42  ;;  %v4482_v47 = vsub.f32 %v10673_v27, %v4474_v12 }
0x1a6e   :  { %v10715_v46 = vpop.eup %8700 }
0x1a6f   :  { %v4489_v52 = vmul.f32 1.442695, %v4483_v22  ;;  %v4293_v15 = vsel %vm744_vm2, %v10715_v46, 0.0  ;;  %v10720_v40 = vpop.eup %8702  ;;  %v4487_v43 = vmul.f32 1.442695, %v4482_v47 }
0x1a70   :  { %v4480_v19 = vpop.xlane.xlu1 %4479  ;;  %v4314_v49 = vpop.permute.xlu0 %4313  ;;  %4294 = vadd.xlane.f32.xlu0 %v4293_v15  ;;  %v4287_v23 = vsel %vm744_vm2, %v10720_v40, 0.0 }
0x1a71   :  { %v4484_v35 = vsub.f32 %v10681_v50, %v4480_v19  ;;  %8005 = vmatprep.subr.bf16.mxu1 %v4314_v49  ;;  %8708 = vpow2.f32 %v4489_v52 }
0x1a72   :  { %v10723_v60 = vpop.eup %8704  ;;  %8710 = vpow2.f32 %v4485_v17 }
0x1a73   :  { %v4491_v39 = vmul.f32 1.442695, %v4484_v35  ;;  %v4296_v27 = vsel %vm744_vm2, %v10723_v60, 0.0  ;;  %v10727_v13 = vpop.eup %8706 }
0x1a74   :  { %4297 = vadd.xlane.f32.xlu1 %v4296_v27  ;;  %4288 = vadd.xlane.f32.xlu0 %v4287_v23  ;;  %v4290_v50 = vsel %vm744_vm2, %v10727_v13, 0.0  ;;  %v4312_v14 = vpop.permute.xlu1 %4311 }
0x1a75   :  { %8712 = vpow2.f32 %v4491_v39 }
0x1a76   :  { %8714 = vpow2.f32 %v4487_v43 }
0x1a78   :  { %4291 = vadd.xlane.f32.xlu1 %v4290_v50  ;;  %v4518_v53 = vpop.permute.xlu1 %4517 }
0x1a7e   :  { %v10733_v25 = vpop.eup %8708 }
0x1a7f   :  { %v4499_v10 = vsel %vm744_vm2, %v10733_v25, 0.0  ;;  %v10737_v24 = vpop.eup %8710 }
0x1a80   :  { %4500 = vadd.xlane.f32.xlu0 %v4499_v10  ;;  %v4493_v41 = vsel %vm744_vm2, %v10737_v24, 0.0 }
0x1a82   :  { %v10739_v2 = vpop.eup %8712 }
0x1a83   :  { %v4502_v4 = vsel %vm744_vm2, %v10739_v2, 0.0  ;;  %v10743_v30 = vpop.eup %8714 }
0x1a84   :  { %4503 = vadd.xlane.f32.xlu1 %v4502_v4  ;;  %4494 = vadd.xlane.f32.xlu0 %v4493_v41  ;;  %v4496_v33 = vsel %vm744_vm2, %v10743_v30, 0.0 }
0x1a88   :  { %4497 = vadd.xlane.f32.xlu1 %v4496_v33 }
0x1a99   :  { %4515 = vrot.lane.b32.xlu1 %v10576_v48, %s11647_s4 }
0x1a9a   :  { %4602 = vrot.lane.b32.xlu0 %v10533_v18, %s11648_s30 }
0x1a9d   :  { %4600 = vrot.lane.b32.xlu1 %v10518_v16, %s11648_s30 }
0x1a9e   :  { %4596 = vrot.lane.b32.xlu0 %v10524_v51, %s11648_s30 }
0x1aa1   :  { %4598 = vrot.lane.b32.xlu1 %v10553_v36, %s11648_s30  ;;  %v4109_v63 = vpop.xlane.xlu0 %4108 }
0x1aa5   :  { %v4103_v57 = vpop.xlane.xlu0 %4102 }
0x1aa9   :  { %v4112_v37 = vpop.xlane.xlu1 %4111 }
0x1aaa   :  { %8716 = vrcp.f32 %v4112_v37 }
0x1aab   :  { %8718 = vrcp.f32 %v4103_v57 }
0x1aac   :  { %8720 = vrcp.f32 %v4109_v63 }
0x1aad   :  { %v4106_v12 = vpop.xlane.xlu1 %4105 }
0x1aae   :  { %8722 = vrcp.f32 %v4106_v12 }
0x1ab7   :  { %v8717_v18 = vpop.eup %8716 }
0x1ab8   :  { %v8719_v42 = vpop.eup %8718  ;;  %v4120_v47 = vmul.f32 %v8717_v18, %v10701_v45 }
0x1ab9   :  { %v8721_v22 = vpop.eup %8720  ;;  %v4117_v51 = vmul.f32 %v8719_v42, %v10697_v29 }
0x1aba   :  { %v4119_v36 = vmul.f32 %v8721_v22, %v10693_v59 }
0x1abb   :  { %v8723_v16 = vpop.eup %8722 }
0x1abc   :  { %v4118_v52 = vmul.f32 %v8723_v16, %v10705_v5  ;;  %v4122_v19 = vpack.c.bf16 %v4120_v47, %v4119_v36 }
0x1abe   :  { %v4121_v17 = vpack.c.bf16 %v4118_v52, %v4117_v51 }
0x1ac0   :  { %7993 = vmatprep.mubr.msk.bf16.mxu1 %vm744_vm2, %v4121_v17 }
0x1ac1   :  { %7994 = vmatmul.mubr.msk.bf16.vlgmr.msra.gmra.mxu1 %vm744_vm2, %v4122_v19 }
0x1ac2   :  { %8006 = vmatpush3.bf16.msra.mxu1 %v4314_v49 }
0x1ac3   :  { %8007 = vmatprep.subr.bf16.mxu1 %v4312_v14 }
0x1ac6   :  { %8008 = vmatpush3.bf16.msra.mxu1 %v4312_v14 }
0x1ac7   :  { %8021 = vmatprep.subr.bf16.mxu1 %v4518_v53 }
0x1af9   :  { %v4295_v15 = vpop.xlane.xlu0 %4294 }
0x1afd   :  { %v4298_v35 = vpop.xlane.xlu1 %4297  ;;  %v4289_v43 = vpop.xlane.xlu0 %4288 }
0x1afe   :  { %8724 = vrcp.f32 %v4298_v35 }
0x1aff   :  { %8726 = vrcp.f32 %v4289_v43 }
0x1b00   :  { %8728 = vrcp.f32 %v4295_v15 }
0x1b01   :  { %v4292_v29 = vpop.xlane.xlu1 %4291 }
0x1b02   :  { %8730 = vrcp.f32 %v4292_v29 }
0x1b09   :  { %v4501_v45 = vpop.xlane.xlu0 %4500 }
0x1b0b   :  { %v8725_v59 = vpop.eup %8724 }
0x1b0c   :  { %v8727_v5 = vpop.eup %8726  ;;  %v4306_v49 = vmul.f32 %v8725_v59, %v10723_v60 }
0x1b0d   :  { %v4504_v39 = vpop.xlane.xlu1 %4503  ;;  %v8729_v27 = vpop.eup %8728  ;;  %v4303_v10 = vmul.f32 %v8727_v5, %v10720_v40 }
0x1b0e   :  { %v4495_v23 = vpop.xlane.xlu0 %4494  ;;  %8732 = vrcp.f32 %v4504_v39  ;;  %v4305_v41 = vmul.f32 %v8729_v27, %v10715_v46 }
0x1b0f   :  { %v8731_v50 = vpop.eup %8730  ;;  %8734 = vrcp.f32 %v4495_v23 }
0x1b10   :  { %v4304_v4 = vmul.f32 %v8731_v50, %v10727_v13  ;;  %8736 = vrcp.f32 %v4501_v45  ;;  %v4308_v63 = vpack.c.bf16 %v4306_v49, %v4305_v41 }
0x1b11   :  { %v4498_v33 = vpop.xlane.xlu1 %4497 }
0x1b12   :  { %8738 = vrcp.f32 %v4498_v33  ;;  %v4307_v14 = vpack.c.bf16 %v4304_v4, %v4303_v10  ;;  %v4603_v60 = vpop.permute.xlu0 %4602 }
0x1b13   :  { %v4614_v51 = vsel %vm744_vm2, %v4603_v60, 0 }
0x1b14   :  { %8009 = vmatprep.mubr.msk.bf16.mxu1 %vm744_vm2, %v4307_v14 }
0x1b15   :  { %v4516_v57 = vpop.permute.xlu1 %4515  ;;  %8010 = vmatmul.mubr.msk.bf16.vlgmr.msra.gmra.mxu1 %vm744_vm2, %v4308_v63 }
0x1b16   :  { %8022 = vmatpush3.bf16.msra.mxu1 %v4518_v53  ;;  %v4597_v53 = vpop.permute.xlu0 %4596 }
0x1b17   :  { %8023 = vmatprep.subr.bf16.mxu1 %v4516_v57 }
0x1b19   :  { %v4601_v52 = vpop.permute.xlu1 %4600 }
0x1b1a   :  { %8024 = vmatpush3.bf16.msra.mxu1 %v4516_v57 }
0x1b1b   :  { %8175 = vmatprep.subr.msk.bf16.mxu1 %vm744_vm2, %v4603_v60  ;;  %v8733_v40 = vpop.eup %8732 }
0x1b1c   :  { %v8735_v13 = vpop.eup %8734  ;;  %v4512_v12 = vmul.f32 %v8733_v40, %v10739_v2  ;;  %v3982_v2 = vadd.f32 %v10603_v54, %v10551_v9 }
0x1b1d   :  { %v8737_v37 = vpop.eup %8736  ;;  %v4509_v18 = vmul.f32 %v8735_v13, %v10737_v24  ;;  %v4611_v24 = vsel %vm744_vm2, %v4601_v52, 0 }
0x1b1e   :  { %v4511_v22 = vmul.f32 %v8737_v37, %v10733_v25  ;;  %v3985_v25 = vadd.f32 %v10635_v55, %v10551_v9 }
0x1b1f   :  { %v8739_v46 = vpop.eup %8738 }
0x1b20   :  { %v4510_v42 = vmul.f32 %v8739_v46, %v10743_v30  ;;  %v4514_v47 = vpack.c.bf16 %v4512_v12, %v4511_v22  ;;  %v4599_v30 = vpop.permute.xlu1 %4598  ;;  %v10787_v36 = vpack.c.bf16 %v3985_v25, %v3982_v2 }
0x1b22   :  { %v4513_v16 = vpack.c.bf16 %v4510_v42, %v4509_v18 }
0x1b24   :  { %8025 = vmatprep.mubr.msk.bf16.mxu1 %vm744_vm2, %v4513_v16 }
0x1b25   :  { %8026 = vmatmul.mubr.msk.bf16.vlgmr.msra.gmra.mxu1 %vm744_vm2, %v4514_v47 }
0x1b26   :  { %8030 = vmatpush3.bf16.xpose.msra.mxu1 %v4614_v51  ;;  %8033 = vmatprep.mubr.msk.bf16.mxu1 %vm744_vm2, %v4597_v53 }
0x1b27   :  { %8176 = vmatprep.subr.msk.bf16.mxu1 %vm744_vm2, %v4601_v52 }
0x1b2e   :  { %8032 = vmatpush3.bf16.xpose.msra.mxu1 %v4611_v24 }
0x1b2f   :  { %8053 = vmatprep.subr.bf16.mxu1 %v10609_v6 }
0x1b35   :  { %8034 = vmatmul.mubr.msk.bf16.vlgmr.msra.gmra.mxu1 %vm744_vm2, %v4599_v30 }
0x1b36   :  { %8054 = vmatpush3.bf16.msra.mxu1 %v10609_v6 }
0x1b37   :  { %8055 = vmatprep.subr.bf16.mxu1 %v10787_v36 }
0x1b3a   :  { %8056 = vmatpush3.bf16.msra.mxu1 %v10787_v36 }
0x1b81   :  { %v7995_v17 = vpop.f32.mrf.mxu1 }
0x1b82   :  { %4180 = vst.msk [vmem:[#allocation2 + $0x10] sm:$0xff] %vm744_vm2, %v7995_v17 }
0x1b83   :  { %v4163_v19 = vpop.f32.mrf.mxu1 }
0x1b84   :  { %4178 = vst.msk [vmem:[#allocation2] sm:$0xff] %vm744_vm2, %v4163_v19 }
0x1b85   :  { %v7996_v55 = vpop.f32.mrf.mxu1 }
0x1b86   :  { %4181 = vst.msk [vmem:[#allocation2 + $0x18] sm:$0xff] %vm744_vm2, %v7996_v55 }
0x1b87   :  { %v4166_v9 = vpop.f32.mrf.mxu1 }
0x1b88   :  { %4179 = vst.msk [vmem:[#allocation2 + $0x8] sm:$0xff] %vm744_vm2, %v4166_v9 }
0x1bd5   :  { %v10797_v54 = vpop.f32.mrf.mxu1 }
0x1bd7   :  { %v10799_v15 = vpop.f32.mrf.mxu1 }
0x1bd9   :  { %v10801_v35 = vpop.f32.mrf.mxu1 }
0x1bdb   :  { %v10803_v43 = vpop.f32.mrf.mxu1 }
0x1be5   :  { %v10805_v29 = vpop.f32.mrf.mxu1 }
0x1be7   :  { %v10807_v45 = vpop.f32.mrf.mxu1 }
0x1be9   :  { %v10809_v59 = vpop.f32.mrf.mxu1 }
0x1beb   :  { %v10811_v5 = vpop.f32.mrf.mxu1 }
0x1bf5   :  { %v8035_v39 = vpop.f32.mrf.mxu1 }
0x1bf6   :  { %v4667_v23 = vmul.f32 0.17677669, %v8035_v39 }
0x1bf7   :  { %v4650_v27 = vpop.f32.mrf.mxu1 }
0x1bf8   :  { %v4665_v50 = vmul.f32 0.17677669, %v4650_v27  ;;  %v4671_v33 = vsel %vm293_vm3, %v4667_v23, -1e+30 }
0x1bf9   :  { %v8036_v49 = vpop.f32.mrf.mxu1  ;;  %v4679_v60 = vsel %vm744_vm2, %v4671_v33, -inf }
0x1bfa   :  { %v4669_v10 = vsel %vm293_vm3, %v4665_v50, -1e+30  ;;  %v4668_v14 = vmul.f32 0.17677669, %v8036_v49 }
0x1bfb   :  { %v4653_v4 = vpop.f32.mrf.mxu1  ;;  %v4673_v41 = vsel %vm744_vm2, %v4669_v10, -inf }
0x1bfc   :  { %v4666_v63 = vmul.f32 0.17677669, %v4653_v4  ;;  %4674 = vmax.xlane.f32.xlu0 %v4673_v41  ;;  %v4672_v13 = vsel %vm293_vm3, %v4668_v14, -1e+30 }
0x1bfd   :  { %v4682_v37 = vsel %vm744_vm2, %v4672_v13, -inf }
0x1bfe   :  { %v4670_v57 = vsel %vm293_vm3, %v4666_v63, -1e+30 }
0x1bff   :  { %v4676_v40 = vsel %vm744_vm2, %v4670_v57, -inf }
0x1c00   :  { %4680 = vmax.xlane.f32.xlu0 %v4679_v60  ;;  %4677 = vmax.xlane.f32.xlu1 %v4676_v40 }
0x1c04   :  { %4683 = vmax.xlane.f32.xlu0 %v4682_v37 }
0x1c85   :  { %v4675_v46 = vpop.xlane.xlu0 %4674 }
0x1c86   :  { %v4685_v12 = vsub.f32 %v4669_v10, %v4675_v46  ;;  %v4810_v46 = vsel %vm744_vm2, %v10615_v31, 0 }
0x1c88   :  { %v4689_v16 = vmul.f32 1.442695, %v4685_v12  ;;  %v4807_v12 = vsel %vm744_vm2, %v10601_v3, 0 }
0x1c89   :  { %v4681_v18 = vpop.xlane.xlu0 %4680  ;;  %v4678_v42 = vpop.xlane.xlu1 %4677 }
0x1c8a   :  { %v4687_v22 = vsub.f32 %v4671_v33, %v4681_v18  ;;  %v4686_v53 = vsub.f32 %v4670_v57, %v4678_v42 }
0x1c8c   :  { %v4693_v47 = vmul.f32 1.442695, %v4687_v22  ;;  %v4691_v24 = vmul.f32 1.442695, %v4686_v53 }
0x1c8d   :  { %v4684_v51 = vpop.xlane.xlu0 %4683 }
0x1c8e   :  { %8740 = vpow2.f32 %v4693_v47  ;;  %v4688_v52 = vsub.f32 %v4672_v13, %v4684_v51 }
0x1c8f   :  { %8742 = vpow2.f32 %v4689_v16 }
0x1c90   :  { %v4695_v25 = vmul.f32 1.442695, %v4688_v52 }
0x1c92   :  { %8744 = vpow2.f32 %v4695_v25 }
0x1c93   :  { %8746 = vpow2.f32 %v4691_v24 }
0x1c9b   :  { %v8741_v2 = vpop.eup %8740 }
0x1c9c   :  { %v4703_v30 = vsel %vm744_vm2, %v8741_v2, 0.0  ;;  %v8743_v17 = vpop.eup %8742 }
0x1c9d   :  { %4704 = vadd.xlane.f32.xlu0 %v4703_v30  ;;  %v4697_v55 = vsel %vm744_vm2, %v8743_v17, 0.0 }
0x1c9f   :  { %v8745_v19 = vpop.eup %8744 }
0x1ca0   :  { %v4706_v9 = vsel %vm744_vm2, %v8745_v19, 0.0  ;;  %v8747_v39 = vpop.eup %8746 }
0x1ca1   :  { %4698 = vadd.xlane.f32.xlu0 %v4697_v55  ;;  %4707 = vadd.xlane.f32.xlu1 %v4706_v9  ;;  %v4700_v27 = vsel %vm744_vm2, %v8747_v39, 0.0 }
0x1ca5   :  { %4701 = vadd.xlane.f32.xlu1 %v4700_v27 }
0x1cb6   :  { %4719 = vrot.lane.b32.xlu1 %v10576_v48, %s11648_s30 }
0x1cb7   :  { %4721 = vrot.lane.b32.xlu0 %v10565_v56, %s11648_s30 }
0x1d26   :  { %v4705_v23 = vpop.xlane.xlu0 %4704 }
0x1d2a   :  { %v4699_v50 = vpop.xlane.xlu0 %4698  ;;  %v4708_v49 = vpop.xlane.xlu1 %4707 }
0x1d2b   :  { %8748 = vrcp.f32 %v4708_v49 }
0x1d2c   :  { %8750 = vrcp.f32 %v4699_v50 }
0x1d2d   :  { %8752 = vrcp.f32 %v4705_v23 }
0x1d2e   :  { %v4722_v10 = vpop.permute.xlu0 %4721  ;;  %v4702_v4 = vpop.xlane.xlu1 %4701 }
0x1d2f   :  { %8754 = vrcp.f32 %v4702_v4  ;;  %8037 = vmatprep.subr.bf16.mxu0 %v4722_v10 }
0x1d30   :  { %8038 = vmatpush3.bf16.msra.mxu0 %v4722_v10 }
0x1d32   :  { %v4720_v41 = vpop.permute.xlu1 %4719 }
0x1d33   :  { %8039 = vmatprep.subr.bf16.mxu0 %v4720_v41 }
0x1d34   :  { %8040 = vmatpush3.bf16.msra.mxu0 %v4720_v41 }
0x1d35   :  { %8177 = vmatprep.subr.msk.bf16.mxu0 %vm744_vm2, %v10615_v31 }
0x1d38   :  { %v8749_v48 = vpop.eup %8748 }
0x1d39   :  { %v8751_v33 = vpop.eup %8750  ;;  %v4716_v63 = vmul.f32 %v8749_v48, %v8745_v19 }
0x1d3a   :  { %v8753_v56 = vpop.eup %8752  ;;  %v4713_v57 = vmul.f32 %v8751_v33, %v8743_v17 }
0x1d3b   :  { %v4715_v40 = vmul.f32 %v8753_v56, %v8741_v2 }
0x1d3c   :  { %v8755_v14 = vpop.eup %8754 }
0x1d3d   :  { %v4714_v60 = vmul.f32 %v8755_v14, %v8747_v39  ;;  %v4718_v37 = vpack.c.bf16 %v4716_v63, %v4715_v40 }
0x1d3f   :  { %v4717_v13 = vpack.c.bf16 %v4714_v60, %v4713_v57 }
0x1d41   :  { %8041 = vmatprep.mubr.msk.bf16.mxu0 %vm744_vm2, %v4717_v13 }
0x1d42   :  { %8042 = vmatmul.mubr.msk.bf16.vlgmr.msra.gmra.mxu0 %vm744_vm2, %v4718_v37 }
0x1d43   :  { %8046 = vmatpush3.bf16.xpose.msra.mxu0 %v4810_v46  ;;  %8049 = vmatprep.mubr.msk.bf16.mxu0 %vm744_vm2, %v10598_v44 }
0x1d44   :  { %8178 = vmatprep.subr.msk.bf16.mxu0 %vm744_vm2, %v10601_v3 }
0x1d4b   :  { %8048 = vmatpush3.bf16.xpose.msra.mxu0 %v4807_v12 }
0x1d52   :  { %8050 = vmatmul.mubr.msk.bf16.vlgmr.msra.gmra.mxu0 %vm744_vm2, %v10612_v34 }
0x1e02   :  { %v10847_v18 = vpop.f32.mrf.mxu0 }
0x1e04   :  { %v10849_v42 = vpop.f32.mrf.mxu0 }
0x1e06   :  { %v10851_v22 = vpop.f32.mrf.mxu0 }
0x1e08   :  { %v10853_v16 = vpop.f32.mrf.mxu0 }
0x1e12   :  { %v8051_v47 = vpop.f32.mrf.mxu0 }
0x1e13   :  { %v4863_v17 = vmul.f32 0.17677669, %v8051_v47 }
0x1e14   :  { %v4846_v53 = vpop.f32.mrf.mxu0 }
0x1e15   :  { %v4861_v51 = vmul.f32 0.17677669, %v4846_v53  ;;  %v4867_v23 = vsel %vm293_vm3, %v4863_v17, -1e+30 }
0x1e16   :  { %v8052_v52 = vpop.f32.mrf.mxu0  ;;  %v4875_v50 = vsel %vm744_vm2, %v4867_v23, -inf }
0x1e17   :  { %v4865_v24 = vsel %vm293_vm3, %v4861_v51, -1e+30  ;;  %v4864_v25 = vmul.f32 0.17677669, %v8052_v52 }
0x1e18   :  { %v4849_v2 = vpop.f32.mrf.mxu0  ;;  %v4869_v30 = vsel %vm744_vm2, %v4865_v24, -inf }
0x1e19   :  { %v4868_v19 = vsel %vm293_vm3, %v4864_v25, -1e+30  ;;  %v4862_v55 = vmul.f32 0.17677669, %v4849_v2  ;;  %4870 = vmax.xlane.f32.xlu1 %v4869_v30 }
0x1e1a   :  { %v4878_v39 = vsel %vm744_vm2, %v4868_v19, -inf }
0x1e1b   :  { %v4866_v9 = vsel %vm293_vm3, %v4862_v55, -1e+30 }
0x1e1c   :  { %v4872_v27 = vsel %vm744_vm2, %v4866_v9, -inf }
0x1e1d   :  { %4879 = vmax.xlane.f32.xlu1 %v4878_v39  ;;  %4873 = vmax.xlane.f32.xlu0 %v4872_v27 }
0x1e21   :  { %4876 = vmax.xlane.f32.xlu0 %v4875_v50 }
0x1ea2   :  { %v4871_v49 = vpop.xlane.xlu1 %4870 }
0x1ea3   :  { %v4881_v33 = vsub.f32 %v4865_v24, %v4871_v49 }
0x1ea5   :  { %v4885_v60 = vmul.f32 1.442695, %v4881_v33 }
0x1ea6   :  { %v4880_v10 = vpop.xlane.xlu1 %4879  ;;  %v4874_v4 = vpop.xlane.xlu0 %4873 }
0x1ea7   :  { %v4884_v41 = vsub.f32 %v4868_v19, %v4880_v10  ;;  %v4882_v48 = vsub.f32 %v4866_v9, %v4874_v4 }
0x1ea9   :  { %v4887_v56 = vmul.f32 1.442695, %v4882_v48  ;;  %v4891_v14 = vmul.f32 1.442695, %v4884_v41 }
0x1eaa   :  { %v4877_v63 = vpop.xlane.xlu0 %4876 }
0x1eab   :  { %v4883_v57 = vsub.f32 %v4867_v23, %v4877_v63  ;;  %8756 = vpow2.f32 %v4887_v56 }
0x1eac   :  { %8758 = vpow2.f32 %v4891_v14 }
0x1ead   :  { %v4889_v40 = vmul.f32 1.442695, %v4883_v57 }
0x1eaf   :  { %8760 = vpow2.f32 %v4889_v40 }
0x1eb0   :  { %8762 = vpow2.f32 %v4885_v60 }
0x1eb8   :  { %v8757_v13 = vpop.eup %8756 }
0x1eb9   :  { %v4896_v37 = vsel %vm744_vm2, %v8757_v13, 0.0  ;;  %v8759_v46 = vpop.eup %8758 }
0x1eba   :  { %4897 = vadd.xlane.f32.xlu1 %v4896_v37  ;;  %v4902_v51 = vsel %vm744_vm2, %v8759_v46, 0.0 }
0x1ebc   :  { %v8761_v12 = vpop.eup %8760 }
0x1ebd   :  { %v4899_v47 = vsel %vm744_vm2, %v8761_v12, 0.0  ;;  %v8763_v53 = vpop.eup %8762 }
0x1ebe   :  { %4900 = vadd.xlane.f32.xlu0 %v4899_v47  ;;  %4903 = vadd.xlane.f32.xlu1 %v4902_v51  ;;  %v4893_v52 = vsel %vm744_vm2, %v8763_v53, 0.0 }
0x1ec2   :  { %4894 = vadd.xlane.f32.xlu0 %v4893_v52 }
0x1ecf   :  { %4982 = vrot.lane.b32.xlu1 %v10601_v3, %s11646_s8 }
0x1ed3   :  { %4976 = vrot.lane.b32.xlu1 %v10598_v44, %s11646_s8 }
0x1ed7   :  { %4978 = vrot.lane.b32.xlu1 %v10612_v34, %s11646_s8 }
0x1ed8   :  { %4984 = vrot.lane.b32.xlu0 %v10615_v31, %s11646_s8 }
0x1f43   :  { %v4898_v24 = vpop.xlane.xlu1 %4897 }
0x1f47   :  { %v4901_v25 = vpop.xlane.xlu0 %4900  ;;  %v4904_v2 = vpop.xlane.xlu1 %4903 }
0x1f48   :  { %8764 = vrcp.f32 %v4901_v25 }
0x1f49   :  { %8766 = vrcp.f32 %v4904_v2 }
0x1f4a   :  { %8768 = vrcp.f32 %v4898_v24 }
0x1f4b   :  { %v4895_v30 = vpop.xlane.xlu0 %4894  ;;  %v4983_v50 = vpop.permute.xlu1 %4982 }
0x1f4c   :  { %8770 = vrcp.f32 %v4895_v30  ;;  %v4993_v56 = vsel %vm744_vm2, %v4983_v50, 0 }
0x1f4f   :  { %v4985_v17 = vpop.permute.xlu0 %4984  ;;  %v4977_v48 = vpop.permute.xlu1 %4976 }
0x1f50   :  { %8179 = vmatprep.subr.msk.bf16.mxu1 %vm744_vm2, %v4985_v17  ;;  %v4996_v33 = vsel %vm744_vm2, %v4985_v17, 0 }
0x1f53   :  { %v4979_v14 = vpop.permute.xlu1 %4978 }
0x1f55   :  { %v8765_v19 = vpop.eup %8764 }
0x1f56   :  { %v8767_v55 = vpop.eup %8766  ;;  %v4911_v23 = vmul.f32 %v8765_v19, %v8761_v12 }
0x1f57   :  { %v8769_v9 = vpop.eup %8768  ;;  %v4912_v27 = vmul.f32 %v8767_v55, %v8759_v46 }
0x1f58   :  { %v4910_v10 = vmul.f32 %v8769_v9, %v8757_v13 }
0x1f59   :  { %v8771_v39 = vpop.eup %8770  ;;  %v4914_v41 = vpack.c.bf16 %v4912_v27, %v4911_v23 }
0x1f5a   :  { %v4909_v49 = vmul.f32 %v8771_v39, %v8763_v53 }
0x1f5c   :  { %v4913_v4 = vpack.c.bf16 %v4910_v10, %v4909_v49 }
0x1f5e   :  { %8057 = vmatprep.mubr.msk.bf16.mxu1 %vm744_vm2, %v4913_v4 }
0x1f5f   :  { %8058 = vmatmul.mubr.msk.bf16.vlgmr.msra.gmra.mxu1 %vm744_vm2, %v4914_v41 }
0x1f60   :  { %8062 = vmatpush3.bf16.xpose.msra.mxu1 %v4996_v33  ;;  %8065 = vmatprep.mubr.msk.bf16.mxu1 %vm744_vm2, %v4977_v48 }
0x1f61   :  { %8180 = vmatprep.subr.msk.bf16.mxu1 %vm744_vm2, %v4983_v50 }
0x1f68   :  { %8064 = vmatpush3.bf16.xpose.msra.mxu1 %v4993_v56 }
0x1f6f   :  { %8066 = vmatmul.mubr.msk.bf16.vlgmr.msra.gmra.mxu1 %vm744_vm2, %v4979_v14 }
0x201f   :  { %v8059_v63 = vpop.f32.mrf.mxu1 }
0x2020   :  { %4972 = vst.msk [vmem:[#allocation2 + $0x30] sm:$0xff] %vm744_vm2, %v8059_v63 }
0x2021   :  { %v4955_v57 = vpop.f32.mrf.mxu1 }
0x2022   :  { %4970 = vst.msk [vmem:[#allocation2 + $0x20] sm:$0xff] %vm744_vm2, %v4955_v57 }
0x2023   :  { %v8060_v60 = vpop.f32.mrf.mxu1 }
0x2024   :  { %4973 = vst.msk [vmem:[#allocation2 + $0x38] sm:$0xff] %vm744_vm2, %v8060_v60 }
0x2025   :  { %v4958_v40 = vpop.f32.mrf.mxu1 }
0x2026   :  { %4971 = vst.msk [vmem:[#allocation2 + $0x28] sm:$0xff] %vm744_vm2, %v4958_v40 }
0x202f   :  { %v8067_v13 = vpop.f32.mrf.mxu1 }
0x2030   :  { %v5049_v46 = vmul.f32 0.17677669, %v8067_v13 }
0x2031   :  { %v5032_v37 = vpop.f32.mrf.mxu1 }
0x2032   :  { %v5047_v12 = vmul.f32 0.17677669, %v5032_v37  ;;  %v5053_v24 = vsel %vm293_vm3, %v5049_v46, -1e+30 }
0x2033   :  { %v8068_v47 = vpop.f32.mrf.mxu1  ;;  %v5061_v17 = vsel %vm744_vm2, %v5053_v24, -inf }
0x2034   :  { %v5051_v53 = vsel %vm293_vm3, %v5047_v12, -1e+30  ;;  %v5050_v25 = vmul.f32 0.17677669, %v8068_v47 }
0x2035   :  { %v5035_v51 = vpop.f32.mrf.mxu1  ;;  %v5055_v52 = vsel %vm744_vm2, %v5051_v53, -inf }
0x2036   :  { %v5048_v2 = vmul.f32 0.17677669, %v5035_v51  ;;  %5056 = vmax.xlane.f32.xlu0 %v5055_v52  ;;  %v5054_v55 = vsel %vm293_vm3, %v5050_v25, -1e+30 }
0x2037   :  { %v5064_v9 = vsel %vm744_vm2, %v5054_v55, -inf }
0x2038   :  { %v5052_v30 = vsel %vm293_vm3, %v5048_v2, -1e+30 }
0x2039   :  { %v5058_v19 = vsel %vm744_vm2, %v5052_v30, -inf }
0x203a   :  { %5062 = vmax.xlane.f32.xlu0 %v5061_v17  ;;  %5059 = vmax.xlane.f32.xlu1 %v5058_v19 }
0x203e   :  { %5065 = vmax.xlane.f32.xlu0 %v5064_v9 }
0x204b   :  { %5103 = vrot.lane.b32.xlu1 %v10787_v36, %s11646_s8 }
0x20bf   :  { %v5057_v39 = vpop.xlane.xlu0 %5056 }
0x20c0   :  { %v5067_v27 = vsub.f32 %v5051_v53, %v5057_v39 }
0x20c2   :  { %v5071_v10 = vmul.f32 1.442695, %v5067_v27 }
0x20c3   :  { %v5063_v23 = vpop.xlane.xlu0 %5062  ;;  %v5060_v50 = vpop.xlane.xlu1 %5059 }
0x20c4   :  { %v5069_v49 = vsub.f32 %v5053_v24, %v5063_v23  ;;  %v5068_v41 = vsub.f32 %v5052_v30, %v5060_v50 }
0x20c6   :  { %v5075_v4 = vmul.f32 1.442695, %v5069_v49  ;;  %v5073_v56 = vmul.f32 1.442695, %v5068_v41 }
0x20c7   :  { %v5066_v48 = vpop.xlane.xlu0 %5065  ;;  %v5104_v47 = vpop.permute.xlu1 %5103 }
0x20c8   :  { %8772 = vpow2.f32 %v5075_v4  ;;  %v5070_v33 = vsub.f32 %v5054_v55, %v5066_v48 }
0x20c9   :  { %8774 = vpow2.f32 %v5071_v10 }
0x20ca   :  { %v5077_v14 = vmul.f32 1.442695, %v5070_v33 }
0x20cc   :  { %8776 = vpow2.f32 %v5077_v14 }
0x20cd   :  { %8778 = vpow2.f32 %v5073_v56 }
0x20d5   :  { %v8773_v63 = vpop.eup %8772 }
0x20d6   :  { %v5085_v57 = vsel %vm744_vm2, %v8773_v63, 0.0  ;;  %v8775_v60 = vpop.eup %8774 }
0x20d7   :  { %5086 = vadd.xlane.f32.xlu0 %v5085_v57  ;;  %v5079_v13 = vsel %vm744_vm2, %v8775_v60, 0.0 }
0x20d9   :  { %v8777_v40 = vpop.eup %8776 }
0x20da   :  { %v5088_v37 = vsel %vm744_vm2, %v8777_v40, 0.0  ;;  %v8779_v46 = vpop.eup %8778 }
0x20db   :  { %5080 = vadd.xlane.f32.xlu0 %v5079_v13  ;;  %5089 = vadd.xlane.f32.xlu1 %v5088_v37  ;;  %v5082_v12 = vsel %vm744_vm2, %v8779_v46, 0.0 }
0x20df   :  { %5083 = vadd.xlane.f32.xlu1 %v5082_v12 }
0x20f0   :  { %5190 = vrot.lane.b32.xlu1 %v10615_v31, %s11647_s4 }
0x20f1   :  { %5105 = vrot.lane.b32.xlu0 %v10609_v6, %s11646_s8 }
0x20f4   :  { %5188 = vrot.lane.b32.xlu1 %v10601_v3, %s11647_s4 }
0x20f5   :  { %5184 = vrot.lane.b32.xlu0 %v10598_v44, %s11647_s4 }
0x20f8   :  { %5186 = vrot.lane.b32.xlu1 %v10612_v34, %s11647_s4 }
0x2160   :  { %v5087_v53 = vpop.xlane.xlu0 %5086 }
0x2164   :  { %v5081_v51 = vpop.xlane.xlu0 %5080  ;;  %v5090_v52 = vpop.xlane.xlu1 %5089 }
0x2165   :  { %8780 = vrcp.f32 %v5090_v52 }
0x2166   :  { %8782 = vrcp.f32 %v5081_v51 }
0x2167   :  { %8784 = vrcp.f32 %v5087_v53 }
0x2168   :  { %v5106_v24 = vpop.permute.xlu0 %5105  ;;  %v5084_v25 = vpop.xlane.xlu1 %5083 }
0x2169   :  { %8786 = vrcp.f32 %v5084_v25  ;;  %8069 = vmatprep.subr.bf16.mxu0 %v5106_v24 }
0x216a   :  { %8070 = vmatpush3.bf16.msra.mxu0 %v5106_v24 }
0x216b   :  { %8071 = vmatprep.subr.bf16.mxu0 %v5104_v47 }
0x216c   :  { %v5191_v2 = vpop.permute.xlu1 %5190  ;;  %v5185_v10 = vpop.permute.xlu0 %5184 }
0x216d   :  { %v5202_v4 = vsel %vm744_vm2, %v5191_v2, 0 }
0x216e   :  { %8072 = vmatpush3.bf16.msra.mxu0 %v5104_v47 }
0x216f   :  { %8181 = vmatprep.subr.msk.bf16.mxu0 %vm744_vm2, %v5191_v2 }
0x2170   :  { %v5189_v41 = vpop.permute.xlu1 %5188 }
0x2171   :  { %v5199_v48 = vsel %vm744_vm2, %v5189_v41, 0 }
0x2172   :  { %v8781_v30 = vpop.eup %8780 }
0x2173   :  { %v8783_v17 = vpop.eup %8782  ;;  %v5098_v9 = vmul.f32 %v8781_v30, %v8777_v40 }
0x2174   :  { %v8785_v19 = vpop.eup %8784  ;;  %v5095_v39 = vmul.f32 %v8783_v17, %v8775_v60  ;;  %v5187_v33 = vpop.permute.xlu1 %5186 }
0x2175   :  { %v5097_v23 = vmul.f32 %v8785_v19, %v8773_v63 }
0x2176   :  { %v8787_v55 = vpop.eup %8786 }
0x2177   :  { %v5096_v27 = vmul.f32 %v8787_v55, %v8779_v46  ;;  %v5100_v49 = vpack.c.bf16 %v5098_v9, %v5097_v23 }
0x2179   :  { %v5099_v50 = vpack.c.bf16 %v5096_v27, %v5095_v39 }
0x217b   :  { %8073 = vmatprep.mubr.msk.bf16.mxu0 %vm744_vm2, %v5099_v50 }
0x217c   :  { %8074 = vmatmul.mubr.msk.bf16.vlgmr.msra.gmra.mxu0 %vm744_vm2, %v5100_v49 }
0x217d   :  { %8078 = vmatpush3.bf16.xpose.msra.mxu0 %v5202_v4  ;;  %8081 = vmatprep.mubr.msk.bf16.mxu0 %vm744_vm2, %v5185_v10 }
0x217e   :  { %8182 = vmatprep.subr.msk.bf16.mxu0 %vm744_vm2, %v5189_v41 }
0x2185   :  { %8080 = vmatpush3.bf16.xpose.msra.mxu0 %v5199_v48 }
0x218c   :  { %8082 = vmatmul.mubr.msk.bf16.vlgmr.msra.gmra.mxu0 %vm744_vm2, %v5187_v33 }
0x223c   :  { %v10927_v56 = vpop.f32.mrf.mxu0 }
0x223e   :  { %v10929_v14 = vpop.f32.mrf.mxu0 }
0x2240   :  { %v10931_v63 = vpop.f32.mrf.mxu0 }
0x2242   :  { %v10933_v57 = vpop.f32.mrf.mxu0 }
0x224c   :  { %v8083_v60 = vpop.f32.mrf.mxu0 }
0x224d   :  { %v5255_v13 = vmul.f32 0.17677669, %v8083_v60 }
0x224e   :  { %v5238_v40 = vpop.f32.mrf.mxu0 }
0x224f   :  { %v5253_v37 = vmul.f32 0.17677669, %v5238_v40  ;;  %v5259_v51 = vsel %vm293_vm3, %v5255_v13, -1e+30 }
0x2250   :  { %v8084_v46 = vpop.f32.mrf.mxu0  ;;  %v5267_v2 = vsel %vm744_vm2, %v5259_v51, -inf }
0x2251   :  { %v5257_v12 = vsel %vm293_vm3, %v5253_v37, -1e+30  ;;  %v5256_v52 = vmul.f32 0.17677669, %v8084_v46 }
0x2252   :  { %v5241_v47 = vpop.f32.mrf.mxu0  ;;  %v5261_v53 = vsel %vm744_vm2, %v5257_v12, -inf }
0x2253   :  { %v5254_v24 = vmul.f32 0.17677669, %v5241_v47  ;;  %5262 = vmax.xlane.f32.xlu0 %v5261_v53  ;;  %v5260_v17 = vsel %vm293_vm3, %v5256_v52, -1e+30 }
0x2254   :  { %v5270_v19 = vsel %vm744_vm2, %v5260_v17, -inf }
0x2255   :  { %v5258_v25 = vsel %vm293_vm3, %v5254_v24, -1e+30 }
0x2256   :  { %v5264_v30 = vsel %vm744_vm2, %v5258_v25, -inf }
0x2257   :  { %5268 = vmax.xlane.f32.xlu0 %v5267_v2  ;;  %5265 = vmax.xlane.f32.xlu1 %v5264_v30 }
0x225b   :  { %5271 = vmax.xlane.f32.xlu0 %v5270_v19 }
0x2268   :  { %5307 = vrot.lane.b32.xlu1 %v10787_v36, %s11647_s4 }
0x22dc   :  { %v5263_v55 = vpop.xlane.xlu0 %5262 }
0x22dd   :  { %v5273_v9 = vsub.f32 %v5257_v12, %v5263_v55 }
0x22df   :  { %v5277_v50 = vmul.f32 1.442695, %v5273_v9 }
0x22e0   :  { %v5269_v39 = vpop.xlane.xlu0 %5268  ;;  %v5266_v27 = vpop.xlane.xlu1 %5265 }
0x22e1   :  { %v5275_v23 = vsub.f32 %v5259_v51, %v5269_v39  ;;  %v5274_v10 = vsub.f32 %v5258_v25, %v5266_v27 }
0x22e3   :  { %v5281_v49 = vmul.f32 1.442695, %v5275_v23  ;;  %v5279_v48 = vmul.f32 1.442695, %v5274_v10 }
0x22e4   :  { %v5272_v4 = vpop.xlane.xlu0 %5271  ;;  %v5308_v51 = vpop.permute.xlu1 %5307 }
0x22e5   :  { %8788 = vpow2.f32 %v5281_v49  ;;  %v5276_v41 = vsub.f32 %v5260_v17, %v5272_v4 }
0x22e6   :  { %8790 = vpow2.f32 %v5277_v50 }
0x22e7   :  { %v5283_v33 = vmul.f32 1.442695, %v5276_v41 }
0x22e9   :  { %8792 = vpow2.f32 %v5283_v33 }
0x22ea   :  { %8794 = vpow2.f32 %v5279_v48 }
0x22f2   :  { %v8789_v60 = vpop.eup %8788 }
0x22f3   :  { %v5291_v40 = vsel %vm744_vm2, %v8789_v60, 0.0  ;;  %v8791_v13 = vpop.eup %8790 }
0x22f4   :  { %5292 = vadd.xlane.f32.xlu0 %v5291_v40  ;;  %v5285_v46 = vsel %vm744_vm2, %v8791_v13, 0.0 }
0x22f6   :  { %v8793_v37 = vpop.eup %8792 }
0x22f7   :  { %v5294_v12 = vsel %vm744_vm2, %v8793_v37, 0.0  ;;  %v8795_v47 = vpop.eup %8794 }
0x22f8   :  { %5286 = vadd.xlane.f32.xlu0 %v5285_v46  ;;  %5295 = vadd.xlane.f32.xlu1 %v5294_v12  ;;  %v5288_v53 = vsel %vm744_vm2, %v8795_v47, 0.0 }
0x22fc   :  { %5289 = vadd.xlane.f32.xlu1 %v5288_v53 }
0x230d   :  { %5394 = vrot.lane.b32.xlu1 %v10615_v31, %s11648_s30 }
0x230e   :  { %5309 = vrot.lane.b32.xlu0 %v10609_v6, %s11647_s4 }
0x2311   :  { %5392 = vrot.lane.b32.xlu1 %v10601_v3, %s11648_s30 }
0x2312   :  { %5388 = vrot.lane.b32.xlu0 %v10598_v44, %s11648_s30 }
0x2315   :  { %5390 = vrot.lane.b32.xlu1 %v10612_v34, %s11648_s30 }
0x237d   :  { %v5293_v52 = vpop.xlane.xlu0 %5292 }
0x2381   :  { %v5287_v24 = vpop.xlane.xlu0 %5286  ;;  %v5296_v25 = vpop.xlane.xlu1 %5295 }
0x2382   :  { %8796 = vrcp.f32 %v5296_v25 }
0x2383   :  { %8798 = vrcp.f32 %v5287_v24 }
0x2384   :  { %8800 = vrcp.f32 %v5293_v52 }
0x2385   :  { %v5310_v31 = vpop.permute.xlu0 %5309  ;;  %v5290_v2 = vpop.xlane.xlu1 %5289 }
0x2386   :  { %8802 = vrcp.f32 %v5290_v2  ;;  %8085 = vmatprep.subr.bf16.mxu1 %v5310_v31 }
0x2387   :  { %8086 = vmatpush3.bf16.msra.mxu1 %v5310_v31 }
0x2388   :  { %8087 = vmatprep.subr.bf16.mxu1 %v5308_v51 }
0x2389   :  { %v5395_v3 = vpop.permute.xlu1 %5394  ;;  %v5389_v50 = vpop.permute.xlu0 %5388 }
0x238a   :  { %v5406_v49 = vsel %vm744_vm2, %v5395_v3, 0 }
0x238b   :  { %8088 = vmatpush3.bf16.msra.mxu1 %v5308_v51 }
0x238c   :  { %8183 = vmatprep.subr.msk.bf16.mxu1 %vm744_vm2, %v5395_v3 }
0x238d   :  { %v5393_v10 = vpop.permute.xlu1 %5392 }
0x238e   :  { %v5403_v4 = vsel %vm744_vm2, %v5393_v10, 0 }
0x238f   :  { %v8797_v44 = vpop.eup %8796 }
0x2390   :  { %v8799_v30 = vpop.eup %8798  ;;  %v5304_v19 = vmul.f32 %v8797_v44, %v8793_v37 }
0x2391   :  { %v8801_v34 = vpop.eup %8800  ;;  %v5301_v55 = vmul.f32 %v8799_v30, %v8791_v13  ;;  %v5391_v41 = vpop.permute.xlu1 %5390 }
0x2392   :  { %v5303_v39 = vmul.f32 %v8801_v34, %v8789_v60 }
0x2393   :  { %v8803_v17 = vpop.eup %8802 }
0x2394   :  { %v5302_v9 = vmul.f32 %v8803_v17, %v8795_v47  ;;  %v5306_v23 = vpack.c.bf16 %v5304_v19, %v5303_v39 }
0x2396   :  { %v5305_v27 = vpack.c.bf16 %v5302_v9, %v5301_v55 }
0x2398   :  { %8089 = vmatprep.mubr.msk.bf16.mxu1 %vm744_vm2, %v5305_v27 }
0x2399   :  { %8090 = vmatmul.mubr.msk.bf16.vlgmr.msra.gmra.mxu1 %vm744_vm2, %v5306_v23 }
0x239a   :  { %8094 = vmatpush3.bf16.xpose.msra.mxu1 %v5406_v49  ;;  %8097 = vmatprep.mubr.msk.bf16.mxu1 %vm744_vm2, %v5389_v50 }
0x239b   :  { %8184 = vmatprep.subr.msk.bf16.mxu1 %vm744_vm2, %v5393_v10 }
0x23a2   :  { %8096 = vmatpush3.bf16.xpose.msra.mxu1 %v5403_v4 }
0x23a9   :  { %8098 = vmatmul.mubr.msk.bf16.vlgmr.msra.gmra.mxu1 %vm744_vm2, %v5391_v41 }
0x23aa   :  { %6122 = vmatprep.mubr.bf16.mxu1 %v8926_v1 }
0x2459   :  { %v10972_v48 = vpop.f32.mrf.mxu1 }
0x245b   :  { %v10974_v33 = vpop.f32.mrf.mxu1 }
0x245d   :  { %v10976_v60 = vpop.f32.mrf.mxu1 }
0x245f   :  { %v10978_v40 = vpop.f32.mrf.mxu1 }
0x2469   :  { %v8099_v13 = vpop.f32.mrf.mxu1 }
0x246a   :  { %v5459_v46 = vmul.f32 0.17677669, %v8099_v13 }
0x246b   :  { %v5442_v37 = vpop.f32.mrf.mxu1 }
0x246c   :  { %v5457_v12 = vmul.f32 0.17677669, %v5442_v37  ;;  %v5463_v24 = vsel %vm293_vm3, %v5459_v46, -1e+30 }
0x246d   :  { %v8100_v47 = vpop.f32.mrf.mxu1  ;;  %v5471_v3 = vsel %vm744_vm2, %v5463_v24, -inf }
0x246e   :  { %v5461_v53 = vsel %vm293_vm3, %v5457_v12, -1e+30  ;;  %v5460_v25 = vmul.f32 0.17677669, %v8100_v47 }
0x246f   :  { %v5445_v51 = vpop.f32.mrf.mxu1  ;;  %v5465_v52 = vsel %vm744_vm2, %v5461_v53, -inf }
0x2470   :  { %v5458_v31 = vmul.f32 0.17677669, %v5445_v51  ;;  %5466 = vmax.xlane.f32.xlu0 %v5465_v52  ;;  %v5464_v30 = vsel %vm293_vm3, %v5460_v25, -1e+30  ;;  %v8357_v25 = vld [vmem:[%s11599_s9 + $0x70] sm:$0xff]  }
0x2471   :  { %v5474_v34 = vsel %vm744_vm2, %v5464_v30, -inf }
0x2472   :  { %v5462_v2 = vsel %vm293_vm3, %v5458_v31, -1e+30 }
0x2473   :  { %v5468_v44 = vsel %vm744_vm2, %v5462_v2, -inf }
0x2474   :  { %5472 = vmax.xlane.f32.xlu0 %v5471_v3  ;;  %5469 = vmax.xlane.f32.xlu1 %v5468_v44  ;;  %v8358_v3 = vld [vmem:[%s11599_s9 + $0x68] sm:$0xff]  }
0x2478   :  { %5475 = vmax.xlane.f32.xlu0 %v5474_v34  ;;  %v8359_v34 = vld [vmem:[%s11599_s9 + $0x60] sm:$0xff]  }
0x24f9   :  { %v5467_v17 = vpop.xlane.xlu0 %5466 }
0x24fa   :  { %v5477_v19 = vsub.f32 %v5461_v53, %v5467_v17 }
0x24fc   :  { %v5481_v27 = vmul.f32 1.442695, %v5477_v19 }
0x24fd   :  { %v5473_v55 = vpop.xlane.xlu0 %5472  ;;  %v5470_v9 = vpop.xlane.xlu1 %5469 }
0x24fe   :  { %v5479_v39 = vsub.f32 %v5463_v24, %v5473_v55  ;;  %v5478_v50 = vsub.f32 %v5462_v2, %v5470_v9  ;;  %v8360_v55 = vld [vmem:[%s11599_s9 + $0x58] sm:$0xff]  }
0x2500   :  { %v5485_v23 = vmul.f32 1.442695, %v5479_v39  ;;  %v5483_v4 = vmul.f32 1.442695, %v5478_v50 }
0x2501   :  { %v5476_v49 = vpop.xlane.xlu0 %5475 }
0x2502   :  { %8804 = vpow2.f32 %v5485_v23  ;;  %v5480_v10 = vsub.f32 %v5464_v30, %v5476_v49 }
0x2503   :  { %8806 = vpow2.f32 %v5481_v27  ;;  %v8361_v27 = vld [vmem:[%s11599_s9 + $0x50] sm:$0xff]  }
0x2504   :  { %v5487_v26 = vmul.f32 1.442695, %v5480_v10 }
0x2506   :  { %8808 = vpow2.f32 %v5487_v26  ;;  %v8362_v26 = vld [vmem:[%s11599_s9 + $0x48] sm:$0xff]  }
0x2507   :  { %8810 = vpow2.f32 %v5483_v4 }
0x250f   :  { %v10992_v41 = vpop.eup %8804 }
0x2510   :  { %v5495_v13 = vsel %vm744_vm2, %v10992_v41, 0.0  ;;  %v10996_v37 = vpop.eup %8806 }
0x2511   :  { %5496 = vadd.xlane.f32.xlu0 %v5495_v13  ;;  %v5489_v12 = vsel %vm744_vm2, %v10996_v37, 0.0  ;;  %v8363_v13 = vld [vmem:[%s11599_s9 + $0x40] sm:$0xff]  }
0x2513   :  { %v8809_v46 = vpop.eup %8808 }
0x2514   :  { %v5498_v47 = vsel %vm744_vm2, %v8809_v46, 0.0  ;;  %v8811_v53 = vpop.eup %8810 }
0x2515   :  { %5490 = vadd.xlane.f32.xlu0 %v5489_v12  ;;  %5499 = vadd.xlane.f32.xlu1 %v5498_v47  ;;  %v5492_v51 = vsel %vm744_vm2, %v8811_v53, 0.0 }
0x2519   :  { %5493 = vadd.xlane.f32.xlu1 %v5492_v51 }
0x252a   :  { %5511 = vrot.lane.b32.xlu1 %v10787_v36, %s11648_s30 }
0x252b   :  { %5513 = vrot.lane.b32.xlu0 %v10609_v6, %s11648_s30 }
0x252e   :  { %4376 = vrot.lane.b32.xlu1 %v10799_v15, %s11648_s30 }
0x252f   :  { %4380 = vrot.lane.b32.xlu0 %v10797_v54, %s11648_s30 }
0x2532   :  { %4378 = vrot.lane.b32.xlu1 %v10803_v43, %s11648_s30  ;;  %v8356_v43 = vld [vmem:[%s11599_s9 + $0x78] sm:$0xff]  }
0x2533   :  { %4580 = vrot.lane.b32.xlu0 %v10807_v45, %s11647_s4 }
0x2536   :  { %4382 = vrot.lane.b32.xlu1 %v10801_v35, %s11648_s30 }
0x2537   :  { %4584 = vrot.lane.b32.xlu0 %v10805_v29, %s11647_s4 }
0x253a   :  { %4582 = vrot.lane.b32.xlu1 %v10811_v5, %s11647_s4 }
0x253b   :  { %4784 = vrot.lane.b32.xlu0 %v10849_v42, %s11646_s8 }
0x253e   :  { %4586 = vrot.lane.b32.xlu1 %v10809_v59, %s11647_s4 }
0x253f   :  { %4788 = vrot.lane.b32.xlu0 %v10847_v18, %s11646_s8 }
0x2542   :  { %4786 = vrot.lane.b32.xlu1 %v10853_v16, %s11646_s8 }
0x2543   :  { %5168 = vrot.lane.b32.xlu0 %v10929_v14, %s11648_s30 }
0x2546   :  { %4790 = vrot.lane.b32.xlu1 %v10851_v22, %s11646_s8 }
0x2547   :  { %5172 = vrot.lane.b32.xlu0 %v10927_v56, %s11648_s30 }
0x254a   :  { %5170 = vrot.lane.b32.xlu1 %v10933_v57, %s11648_s30 }
0x254b   :  { %5372 = vrot.lane.b32.xlu0 %v10974_v33, %s11647_s4 }
0x254e   :  { %5174 = vrot.lane.b32.xlu1 %v10931_v63, %s11648_s30 }
0x254f   :  { %5376 = vrot.lane.b32.xlu0 %v10972_v48, %s11647_s4 }
0x2552   :  { %5374 = vrot.lane.b32.xlu1 %v10978_v40, %s11647_s4 }
0x2556   :  { %5378 = vrot.lane.b32.xlu1 %v10976_v60, %s11647_s4 }
0x259a   :  { %v5497_v6 = vpop.xlane.xlu0 %5496 }
0x259e   :  { %v5491_v36 = vpop.xlane.xlu0 %5490  ;;  %v5500_v54 = vpop.xlane.xlu1 %5499 }
0x259f   :  { %8812 = vrcp.f32 %v5500_v54 }
0x25a0   :  { %8814 = vrcp.f32 %v5491_v36 }
0x25a1   :  { %8816 = vrcp.f32 %v5497_v6 }
0x25a2   :  { %v5514_v15 = vpop.permute.xlu0 %5513  ;;  %v5494_v35 = vpop.xlane.xlu1 %5493 }
0x25a3   :  { %8818 = vrcp.f32 %v5494_v35  ;;  %8101 = vmatprep.subr.bf16.mxu0 %v5514_v15  ;;  %v11101_v35 = vld [vmem:[%s11600_s10 + $0x1] ss:$0 sm:$0xff] }
0x25a4   :  { %8102 = vmatpush3.bf16.msra.mxu0 %v5514_v15 }
0x25a6   :  { %v4381_v29 = vpop.permute.xlu0 %4380  ;;  %v5512_v45 = vpop.permute.xlu1 %5511 }
0x25a7   :  { %4390 = vst.msk [vmem:[#allocation2 + $0x10] sm:$0xff] %vm1125_vm4, %v4381_v29  ;;  %8103 = vmatprep.subr.bf16.mxu0 %v5512_v45 }
0x25a8   :  { %8104 = vmatpush3.bf16.msra.mxu0 %v5512_v45 }
0x25a9   :  { %8109 = vmatprep.subr.bf16.mxu0 %v8356_v43 }
0x25aa   :  { %v4581_v59 = vpop.permute.xlu0 %4580  ;;  %v4377_v5 = vpop.permute.xlu1 %4376 }
0x25ab   :  { %4388 = vst.msk [vmem:[#allocation2] sm:$0xff] %vm1125_vm4, %v4377_v5 }
0x25ac   :  { %4592 = vst.msk [vmem:[#allocation2] sm:$0xff] %vm1330_vm5, %v4581_v59  ;;  %v8813_v18 = vpop.eup %8812 }
0x25ad   :  { %v8815_v42 = vpop.eup %8814  ;;  %v5508_v63 = vmul.f32 %v8813_v18, %v8809_v46 }
0x25ae   :  { %v4585_v22 = vpop.permute.xlu0 %4584  ;;  %v4379_v16 = vpop.permute.xlu1 %4378  ;;  %v5505_v57 = vmul.f32 %v8815_v42, %v10996_v37 }
0x25af   :  { %v8817_v56 = vpop.eup %8816  ;;  %4594 = vst.msk [vmem:[#allocation2 + $0x10] sm:$0xff] %vm1330_vm5, %v4585_v22 }
0x25b0   :  { %4389 = vst.msk [vmem:[#allocation2 + $0x8] sm:$0xff] %vm1125_vm4, %v4379_v16  ;;  %v8819_v14 = vpop.eup %8818  ;;  %v5507_v33 = vmul.f32 %v8817_v56, %v10992_v41 }
0x25b1   :  { %v5506_v48 = vmul.f32 %v8819_v14, %v8811_v53 }
0x25b2   :  { %v4785_v60 = vpop.permute.xlu0 %4784  ;;  %v4383_v40 = vpop.permute.xlu1 %4382  ;;  %v5510_v24 = vpack.c.bf16 %v5508_v63, %v5507_v33 }
0x25b3   :  { %4796 = vst.msk [vmem:[#allocation2] sm:$0xff] %vm1535_vm6, %v4785_v60  ;;  %v5509_v52 = vpack.c.bf16 %v5506_v48, %v5505_v57 }
0x25b4   :  { %4391 = vst.msk [vmem:[#allocation2 + $0x18] sm:$0xff] %vm1125_vm4, %v4383_v40 }
0x25b5   :  { %8105 = vmatprep.mubr.msk.bf16.mxu0 %vm744_vm2, %v5509_v52 }
0x25b6   :  { %v4789_v31 = vpop.permute.xlu0 %4788  ;;  %8106 = vmatmul.mubr.msk.bf16.vlgmr.msra.gmra.mxu0 %vm744_vm2, %v5510_v24  ;;  %v4583_v2 = vpop.permute.xlu1 %4582 }
0x25b7   :  { %4798 = vst.msk [vmem:[#allocation2 + $0x10] sm:$0xff] %vm1535_vm6, %v4789_v31  ;;  %8110 = vmatpush3.bf16.msra.mxu0 %v8356_v43 }
0x25b8   :  { %4593 = vst.msk [vmem:[#allocation2 + $0x8] sm:$0xff] %vm1330_vm5, %v4583_v2  ;;  %8111 = vmatprep.subr.bf16.mxu0 %v8357_v25 }
0x25ba   :  { %v5169_v44 = vpop.permute.xlu0 %5168  ;;  %v4587_v30 = vpop.permute.xlu1 %4586  ;;  %v5592_v49 = vld [vmem:[#allocation2] sm:$0xff] }
0x25bb   :  { %5180 = vst.msk [vmem:[#allocation2 + $0x20] sm:$0xff] %vm1125_vm4, %v5169_v44  ;;  %8112 = vmatpush3.bf16.msra.mxu0 %v8357_v25 }
0x25bc   :  { %4595 = vst.msk [vmem:[#allocation2 + $0x18] sm:$0xff] %vm1330_vm5, %v4587_v30  ;;  %8113 = vmatprep.subr.bf16.mxu0 %v8358_v3 }
0x25be   :  { %v5173_v17 = vpop.permute.xlu0 %5172  ;;  %v4787_v19 = vpop.permute.xlu1 %4786  ;;  %v5594_v47 = vld [vmem:[#allocation2 + $0x10] sm:$0xff] }
0x25bf   :  { %5182 = vst.msk [vmem:[#allocation2 + $0x30] sm:$0xff] %vm1125_vm4, %v5173_v17  ;;  %8114 = vmatpush3.bf16.msra.mxu0 %v8358_v3 }
0x25c0   :  { %4797 = vst.msk [vmem:[#allocation2 + $0x8] sm:$0xff] %vm1535_vm6, %v4787_v19  ;;  %8115 = vmatprep.subr.bf16.mxu0 %v8359_v34 }
0x25c2   :  { %v5373_v9 = vpop.permute.xlu0 %5372  ;;  %v4791_v39 = vpop.permute.xlu1 %4790 }
0x25c3   :  { %5384 = vst.msk [vmem:[#allocation2 + $0x20] sm:$0xff] %vm1330_vm5, %v5373_v9  ;;  %8116 = vmatpush3.bf16.msra.mxu0 %v8359_v34 }
0x25c4   :  { %4799 = vst.msk [vmem:[#allocation2 + $0x18] sm:$0xff] %vm1535_vm6, %v4791_v39  ;;  %8117 = vmatprep.subr.bf16.mxu0 %v8360_v55 }
0x25c6   :  { %v5377_v23 = vpop.permute.xlu0 %5376  ;;  %v5171_v50 = vpop.permute.xlu1 %5170 }
0x25c7   :  { %v5593_v10 = vld [vmem:[#allocation2 + $0x8] sm:$0xff]  ;;  %5386 = vst.msk [vmem:[#allocation2 + $0x30] sm:$0xff] %vm1330_vm5, %v5377_v23  ;;  %8118 = vmatpush3.bf16.msra.mxu0 %v8360_v55 }
0x25c8   :  { %5181 = vst.msk [vmem:[#allocation2 + $0x28] sm:$0xff] %vm1125_vm4, %v5171_v50  ;;  %v5617_v4 = vpack.c.bf16 %v5593_v10, %v5592_v49  ;;  %8119 = vmatprep.subr.bf16.mxu0 %v8361_v27 }
0x25ca   :  { %8125 = vmatprep.mubr.bf16.mxu0 %v5617_v4  ;;  %v5175_v41 = vpop.permute.xlu1 %5174 }
0x25cb   :  { %8120 = vmatpush3.bf16.msra.mxu0 %v8361_v27  ;;  %5183 = vst.msk [vmem:[#allocation2 + $0x38] sm:$0xff] %vm1125_vm4, %v5175_v41  ;;  %v5595_v46 = vld [vmem:[#allocation2 + $0x18] sm:$0xff] }
0x25cc   :  { %8121 = vmatprep.subr.bf16.mxu0 %v8362_v26  ;;  %v5618_v53 = vpack.c.bf16 %v5595_v46, %v5594_v47  ;;  %v8364_v46 = vld [vmem:[%s11603_s13 + $0x1e0] ss:$16 sps:$4 sm:$0xff]   ;;  %v8372_v47 = vld [vmem:[%s11603_s13 + $0x1c4] ss:$16 sps:$4 sm:$0xff]  }
0x25ce   :  { %v5375_v37 = vpop.permute.xlu1 %5374 }
0x25cf   :  { %8122 = vmatpush3.bf16.msra.mxu0 %v8362_v26  ;;  %5385 = vst.msk [vmem:[#allocation2 + $0x28] sm:$0xff] %vm1330_vm5, %v5375_v37  ;;  %v8369_v37 = vld [vmem:[%s11603_s13 + $0x1ec] ss:$16 sps:$4 sm:$0xff]  }
0x25d0   :  { %8123 = vmatprep.subr.bf16.mxu0 %v8363_v13 }
0x25d2   :  { %v5379_v12 = vpop.permute.xlu1 %5378 }
0x25d3   :  { %8124 = vmatpush3.bf16.msra.mxu0 %v8363_v13  ;;  %5387 = vst.msk [vmem:[#allocation2 + $0x38] sm:$0xff] %vm1330_vm5, %v5379_v12  ;;  %v8367_v12 = vld [vmem:[%s11603_s13 + $0x1e8] ss:$16 sps:$4 sm:$0xff]  }
0x25d4   :  { %6163 = vmatprep.subr.bf16.mxu0 %v8369_v37 }
0x25d6   :  { %8126 = vmatmul.mubr.bf16.vlgmr.msra.gmra.mxu0 %v5618_v53  ;;  %v8375_v53 = vld [vmem:[%s11603_s13 + $0x1cc] ss:$16 sps:$4 sm:$0xff]  }
0x25d7   :  { %6164 = vmatpush1.bf16.msra.mxu0 %v8367_v12 }
0x25d8   :  { %6165 = vmatprep.subr.bf16.mxu0 %v8375_v53 }
0x2676   :  { %v8107_v51 = vpop.f32.mrf.mxu0 }
0x2678   :  { %v5557_v6 = vpop.f32.mrf.mxu0 }
0x2679   :  { %5576 = vrot.lane.b32.xlu0 %v5557_v6, %s11646_s8  ;;  %v8373_v6 = vld [vmem:[%s11603_s13 + $0x1c8] ss:$16 sps:$4 sm:$0xff]  }
0x267a   :  { %v8108_v36 = vpop.f32.mrf.mxu0  ;;  %6166 = vmatpush1.bf16.msra.mxu0 %v8373_v6 }
0x267c   :  { %v5560_v54 = vpop.f32.mrf.mxu0 }
0x267d   :  { %5580 = vrot.lane.b32.xlu0 %v8107_v51, %s11646_s8  ;;  %5578 = vrot.lane.b32.xlu1 %v5560_v54, %s11646_s8  ;;  %v8370_v51 = vld [vmem:[%s11603_s13 + $0x1c0] ss:$16 sps:$4 sm:$0xff]   ;;  %v8381_v54 = vld [vmem:[%s11603_s13 + $0x1ac] ss:$16 sps:$4 sm:$0xff]  }
0x267e   :  { %6167 = vmatprep.subr.bf16.mxu0 %v8381_v54 }
0x2681   :  { %5582 = vrot.lane.b32.xlu1 %v8108_v36, %s11646_s8  ;;  %v8378_v36 = vld [vmem:[%s11603_s13 + $0x1a4] ss:$16 sps:$4 sm:$0xff]  }
0x2696   :  { %v8127_v15 = vpop.f32.mrf.mxu0 }
0x2697   :  { %v5720_v59 = vadd.f32 %v8127_v15, %v11101_v35  ;;  %v8376_v15 = vld [vmem:[%s11603_s13 + $0x1a0] ss:$16 sps:$4 sm:$0xff]  }
0x2698   :  { %v5711_v43 = vpop.f32.mrf.mxu0 }
0x2699   :  { %v5712_v29 = vadd.f32 %v11101_v35, %v5711_v43  ;;  %v5744_v42 = vadd.f32 %v5720_v59, %v10352_v7  ;;  %v8379_v43 = vld [vmem:[%s11603_s13 + $0x1a8] ss:$16 sps:$4 sm:$0xff]   ;;  %v8382_v59 = vld [vmem:[%s11603_s13 + $0x180] ss:$16 sps:$4 sm:$0xff]  }
0x269a   :  { %v8128_v45 = vpop.f32.mrf.mxu0  ;;  %6168 = vmatpush1.bf16.msra.mxu0 %v8379_v43 }
0x269b   :  { %v11106_v5 = vadd.f32 %v5712_v29, %v10340_v21  ;;  %v5723_v22 = vadd.f32 %v8128_v45, %v11101_v35  ;;  %v8384_v29 = vld [vmem:[%s11603_s13 + $0x184] ss:$16 sps:$4 sm:$0xff]   ;;  %v8387_v45 = vld [vmem:[%s11603_s13 + $0x18c] ss:$16 sps:$4 sm:$0xff]  }
0x269c   :  { %v5714_v18 = vpop.f32.mrf.mxu0  ;;  %6169 = vmatprep.subr.bf16.mxu0 %v8387_v45 }
0x269d   :  { %5754 = vadd.xlane.f32.xlu0 %v11106_v5  ;;  %v5715_v16 = vadd.f32 %v11101_v35, %v5714_v18  ;;  %v5745_v56 = vadd.f32 %v5723_v22, %v10360_v38  ;;  %v8385_v18 = vld [vmem:[%s11603_s13 + $0x188] ss:$16 sps:$4 sm:$0xff]   ;;  %v8393_v22 = vld [vmem:[%s11603_s13 + $0x16c] ss:$16 sps:$4 sm:$0xff]  }
0x269e   :  { %6170 = vmatpush1.bf16.msra.mxu0 %v8385_v18 }
0x269f   :  { %v5743_v14 = vadd.f32 %v5715_v16, %v10343_v62  ;;  %v8388_v16 = vld [vmem:[%s11603_s13 + $0x160] ss:$16 sps:$4 sm:$0xff]   ;;  %6171 = vmatprep.subr.bf16.mxu0 %v8393_v22 }
0x26a1   :  { %5758 = vadd.xlane.f32.xlu0 %v5744_v42 }
0x26a5   :  { %5760 = vadd.xlane.f32.xlu0 %v5745_v56  ;;  %5756 = vadd.xlane.f32.xlu1 %v5743_v14 }
0x26eb   :  { %v5577_v63 = vpop.permute.xlu0 %5576 }
0x26ec   :  { %5588 = vst.msk [vmem:[#allocation2 + $0x20] sm:$0xff] %vm1535_vm6, %v5577_v63  ;;  %v8399_v63 = vld [vmem:[%s11603_s13 + $0x14c] ss:$16 sps:$4 sm:$0xff]  }
0x26ef   :  { %v5581_v21 = vpop.permute.xlu0 %5580  ;;  %v5579_v57 = vpop.permute.xlu1 %5578 }
0x26f0   :  { %5590 = vst.msk [vmem:[#allocation2 + $0x30] sm:$0xff] %vm1535_vm6, %v5581_v21  ;;  %5589 = vst.msk [vmem:[#allocation2 + $0x28] sm:$0xff] %vm1535_vm6, %v5579_v57  ;;  %v8394_v21 = vld [vmem:[%s11603_s13 + $0x140] ss:$16 sps:$4 sm:$0xff]   ;;  %v8397_v57 = vld [vmem:[%s11603_s13 + $0x148] ss:$16 sps:$4 sm:$0xff]  }
0x26f3   :  { %v5583_v7 = vpop.permute.xlu1 %5582  ;;  %v5596_v48 = vld [vmem:[#allocation2 + $0x20] sm:$0xff] }
0x26f4   :  { %5591 = vst.msk [vmem:[#allocation2 + $0x38] sm:$0xff] %vm1535_vm6, %v5583_v7  ;;  %v8402_v7 = vld [vmem:[%s11603_s13 + $0x124] ss:$16 sps:$4 sm:$0xff]  }
0x26f7   :  { %v5597_v33 = vld [vmem:[#allocation2 + $0x28] sm:$0xff]  ;;  %v5598_v38 = vld [vmem:[#allocation2 + $0x30] sm:$0xff] }
0x26f8   :  { %v5619_v60 = vpack.c.bf16 %v5597_v33, %v5596_v48  ;;  %v8405_v48 = vld [vmem:[%s11603_s13 + $0x12c] ss:$16 sps:$4 sm:$0xff]   ;;  %v8400_v33 = vld [vmem:[%s11603_s13 + $0x120] ss:$16 sps:$4 sm:$0xff]  }
0x26fa   :  { %8129 = vmatprep.mubr.bf16.mxu0 %v5619_v60  ;;  %v8403_v60 = vld [vmem:[%s11603_s13 + $0x128] ss:$16 sps:$4 sm:$0xff]  }
0x26fb   :  { %v5599_v62 = vld [vmem:[#allocation2 + $0x38] sm:$0xff] }
0x26fc   :  { %v5620_v40 = vpack.c.bf16 %v5599_v62, %v5598_v38  ;;  %v8408_v38 = vld [vmem:[%s11603_s13 + $0x104] ss:$16 sps:$4 sm:$0xff]   ;;  %v8406_v62 = vld [vmem:[%s11603_s13 + $0x100] ss:$16 sps:$4 sm:$0xff]  }
0x26fe   :  { %8130 = vmatmul.mubr.bf16.gmra.mxu0 %v5620_v40  ;;  %v8409_v40 = vld [vmem:[%s11603_s13 + $0x108] ss:$16 sps:$4 sm:$0xff]  }
0x26ff   :  { %6195 = vmatprep.mubr.bf16.mxu0 %v8926_v1 }
0x2726   :  { %v5755_v52 = vpop.xlane.xlu0 %5754 }
0x2727   :  { %v5770_v24 = vmul.f32 0.0078125, %v5755_v52  ;;  %v8411_v52 = vld [vmem:[%s11603_s13 + $0x10c] ss:$16 sps:$4 sm:$0xff]  }
0x2729   :  { %v11123_v30 = vsub.f32 %v11106_v5, %v5770_v24 }
0x272a   :  { %v5759_v25 = vpop.xlane.xlu0 %5758 }
0x272b   :  { %v5772_v17 = vmul.f32 0.0078125, %v5759_v25  ;;  %v5786_v23 = vmul.f32 %v11123_v30, %v11123_v30 }
0x272d   :  { %v11134_v50 = vsub.f32 %v5744_v42, %v5772_v17  ;;  %v8390_v42 = vld [vmem:[%s11603_s13 + $0x164] ss:$16 sps:$4 sm:$0xff]  }
0x272e   :  { %v5757_v2 = vpop.xlane.xlu1 %5756  ;;  %v5761_v9 = vpop.xlane.xlu0 %5760 }
0x272f   :  { %v5771_v19 = vmul.f32 0.0078125, %v5757_v2  ;;  %v5773_v49 = vmul.f32 0.0078125, %v5761_v9  ;;  %v5788_v26 = vmul.f32 %v11134_v50, %v11134_v50 }
0x2731   :  { %v11136_v10 = vsub.f32 %v5743_v14, %v5771_v19  ;;  %v8396_v14 = vld [vmem:[%s11603_s13 + $0x144] ss:$16 sps:$4 sm:$0xff]  }
0x2733   :  { %v5787_v41 = vmul.f32 %v11136_v10, %v11136_v10 }
0x27be   :  { %v11119_v31 = vpop.f32.mrf.mxu0 }
0x27c0   :  { %v5727_v3 = vpop.f32.mrf.mxu0 }
0x27c1   :  { %v5728_v44 = vadd.f32 %v11101_v35, %v5727_v3  ;;  %v5736_v3 = vadd.f32 %v11119_v31, %v11101_v35 }
0x27c2   :  { %v11125_v34 = vpop.f32.mrf.mxu0 }
0x27c3   :  { %v11128_v55 = vadd.f32 %v5728_v44, %v10460_v11  ;;  %v11142_v11 = vsub.f32 %v5745_v56, %v5773_v49  ;;  %v8391_v56 = vld [vmem:[%s11603_s13 + $0x168] ss:$16 sps:$4 sm:$0xff]   ;;  %v5748_v49 = vadd.f32 %v5736_v3, %v10470_v20 }
0x27c4   :  { %v5730_v39 = vpop.f32.mrf.mxu0  ;;  %6172 = vmatpush1.bf16.msra.mxu0 %v8391_v56 }
0x27c5   :  { %v5731_v27 = vadd.f32 %v11101_v35, %v5730_v39  ;;  %5762 = vadd.xlane.f32.xlu0 %v11128_v55  ;;  %v5789_v13 = vmul.f32 %v11142_v11, %v11142_v11  ;;  %6173 = vmatprep.subr.bf16.mxu0 %v8399_v63 }
0x27c7   :  { %v11139_v4 = vadd.f32 %v5731_v27, %v10465_v32  ;;  %v8366_v32 = vld [vmem:[%s11603_s13 + $0x1e4] ss:$16 sps:$4 sm:$0xff]  }
0x27c8   :  { %6090 = vmatprep.subr.bf16.mxu1 %v8366_v32  ;;  %6174 = vmatpush1.bf16.msra.mxu0 %v8397_v57 }
0x27c9   :  { %5764 = vadd.xlane.f32.xlu1 %v11139_v4  ;;  %5794 = vadd.xlane.f32.xlu0 %v5786_v23 }
0x27ca   :  { %6091 = vmatpush1.bf16.msra.mxu1 %v8364_v46  ;;  %6175 = vmatprep.subr.bf16.mxu0 %v8405_v48 }
0x27cb   :  { %6092 = vmatprep.subr.bf16.mxu1 %v8372_v47 }
0x27cc   :  { %6176 = vmatpush1.bf16.msra.mxu0 %v8403_v60 }
0x27cd   :  { %5798 = vadd.xlane.f32.xlu0 %v5788_v26  ;;  %5796 = vadd.xlane.f32.xlu1 %v5787_v41  ;;  %v5739_v26 = vadd.f32 %v11125_v34, %v11101_v35 }
0x27ce   :  { %6093 = vmatpush1.bf16.msra.mxu1 %v8370_v51  ;;  %6177 = vmatprep.subr.bf16.mxu0 %v8411_v52  ;;  %v11266_v51 = vld [vmem:[%s11601_s11 + $0x1] ss:$0 sm:$0xff] }
0x27cf   :  { %6094 = vmatprep.subr.bf16.mxu1 %v8378_v36  ;;  %v5749_v47 = vadd.f32 %v5739_v26, %v10475_v28  ;;  %v8412_v26 = vld [vmem:[%s11605_s15 + $0x178] sm:$0xff]  }
0x27d0   :  { %6178 = vmatpush1.bf16.msra.mxu0 %v8409_v40 }
0x27d1   :  { %5800 = vadd.xlane.f32.xlu1 %v5789_v13 }
0x27d2   :  { %6095 = vmatpush1.bf16.msra.mxu1 %v8376_v15  ;;  %v11273_v15 = vld [vmem:[%s11602_s12 + $0x1] ss:$0 sm:$0xff] }
0x27d3   :  { %6096 = vmatprep.subr.bf16.mxu1 %v8384_v29 }
0x27d6   :  { %6097 = vmatpush1.bf16.msra.mxu1 %v8382_v59 }
0x27d7   :  { %6098 = vmatprep.subr.bf16.mxu1 %v8390_v42 }
0x27da   :  { %6099 = vmatpush1.bf16.msra.mxu1 %v8388_v16 }
0x27db   :  { %6100 = vmatprep.subr.bf16.mxu1 %v8396_v14 }
0x27de   :  { %6101 = vmatpush1.bf16.msra.mxu1 %v8394_v21 }
0x27df   :  { %6102 = vmatprep.subr.bf16.mxu1 %v8402_v7 }
0x27e2   :  { %6103 = vmatpush1.bf16.msra.mxu1 %v8400_v33 }
0x27e3   :  { %6104 = vmatprep.subr.bf16.mxu1 %v8408_v38 }
0x27e6   :  { %6105 = vmatpush1.bf16.msra.mxu1 %v8406_v62 }
0x27e7   :  { %7692 = vmatprep.subr.bf16.mxu1 %v8412_v26 }
0x284e   :  { %v5763_v24 = vpop.xlane.xlu0 %5762 }
0x284f   :  { %v5774_v25 = vmul.f32 0.0078125, %v5763_v24 }
0x2851   :  { %v11247_v2 = vsub.f32 %v11128_v55, %v5774_v25 }
0x2852   :  { %v5795_v44 = vpop.xlane.xlu0 %5794  ;;  %v5765_v17 = vpop.xlane.xlu1 %5764 }
0x2853   :  { %v5810_v19 = vmul.f32 0.0078125, %v5795_v44  ;;  %v5775_v9 = vmul.f32 0.0078125, %v5765_v17  ;;  %v5790_v39 = vmul.f32 %v11247_v2, %v11247_v2 }
0x2855   :  { %v5818_v27 = vadd.f32 1e-05, %v5810_v19  ;;  %v11254_v23 = vsub.f32 %v11139_v4, %v5775_v9  ;;  %5802 = vadd.xlane.f32.xlu0 %v5790_v39 }
0x2856   :  { %v5799_v41 = vpop.xlane.xlu0 %5798  ;;  %v5797_v13 = vpop.xlane.xlu1 %5796 }
0x2857   :  { %8820 = vrsqrt.f32 %v5818_v27  ;;  %v5812_v31 = vmul.f32 0.0078125, %v5799_v41  ;;  %v5811_v32 = vmul.f32 0.0078125, %v5797_v13  ;;  %v5791_v37 = vmul.f32 %v11254_v23, %v11254_v23  ;;  %v8415_v41 = vld [vmem:[%s11605_s15 + $0x1b8] sm:$0xff]   ;;  %v8416_v13 = vld [vmem:[%s11605_s15 + $0x170] sm:$0xff]  }
0x2859   :  { %v5819_v46 = vadd.f32 1e-05, %v5811_v32  ;;  %5766 = vadd.xlane.f32.xlu0 %v5748_v49  ;;  %5804 = vadd.xlane.f32.xlu1 %v5791_v37  ;;  %v5820_v12 = vadd.f32 1e-05, %v5812_v31  ;;  %v8417_v31 = vld [vmem:[%s11605_s15 + $0x1f0] sm:$0xff]  }
0x285a   :  { %v5801_v4 = vpop.xlane.xlu1 %5800  ;;  %v8418_v32 = vld [vmem:[%s11605_s15 + $0x130] sm:$0xff]  }
0x285b   :  { %v5813_v53 = vmul.f32 0.0078125, %v5801_v4  ;;  %8822 = vrsqrt.f32 %v5819_v46  ;;  %v8419_v37 = vld [vmem:[%s11605_s15 + $0x1b0] sm:$0xff]   ;;  %v8420_v46 = vld [vmem:[%s11605_s15 + $0x168] sm:$0xff]  }
0x285c   :  { %8824 = vrsqrt.f32 %v5820_v12  ;;  %v8421_v12 = vld [vmem:[%s11605_s15 + $0x1e8] sm:$0xff]  }
0x285d   :  { %v5821_v20 = vadd.f32 1e-05, %v5813_v53  ;;  %5768 = vadd.xlane.f32.xlu1 %v5749_v47  ;;  %v8422_v4 = vld [vmem:[%s11605_s15 + $0x128] sm:$0xff]   ;;  %v8424_v53 = vld [vmem:[%s11605_s15 + $0x160] sm:$0xff]  }
0x285f   :  { %8826 = vrsqrt.f32 %v5821_v20  ;;  %v8426_v20 = vld [vmem:[%s11605_s15 + $0x120] sm:$0xff]  }
0x2864   :  { %v8821_v35 = vpop.eup %8820 }
0x2865   :  { %v5834_v34 = vmul.f32 %v8821_v35, %v11123_v30  ;;  %v8427_v35 = vld [vmem:[%s11605_s15 + $0x1a0] sm:$0xff]  }
0x2867   :  { %v5848_v54 = vmul.f32 %v11266_v51, %v5834_v34  ;;  %v8428_v34 = vld [vmem:[%s11605_s15 + $0x158] sm:$0xff]  }
0x2868   :  { %v8823_v6 = vpop.eup %8822 }
0x2869   :  { %v5835_v36 = vmul.f32 %v8823_v6, %v11136_v10  ;;  %v8825_v28 = vpop.eup %8824  ;;  %v5862_v45 = vadd.f32 %v11273_v15, %v5848_v54  ;;  %v8429_v6 = vld [vmem:[%s11605_s15 + $0x1d8] sm:$0xff]  }
0x286a   :  { %v5836_v18 = vmul.f32 %v8825_v28, %v11134_v50  ;;  %v8431_v54 = vld [vmem:[%s11605_s15 + $0x198] sm:$0xff]   ;;  %v8432_v28 = vld [vmem:[%s11605_s15 + $0x150] sm:$0xff]  }
0x286b   :  { %v5849_v29 = vmul.f32 %v11266_v51, %v5835_v36  ;;  %v8430_v36 = vld [vmem:[%s11605_s15 + $0x118] sm:$0xff]  }
0x286c   :  { %v8827_v43 = vpop.eup %8826  ;;  %v5850_v22 = vmul.f32 %v11266_v51, %v5836_v18  ;;  %v8438_v18 = vld [vmem:[%s11605_s15 + $0x108] sm:$0xff]  }
0x286d   :  { %v5837_v30 = vmul.f32 %v8827_v43, %v11142_v11  ;;  %v5863_v59 = vadd.f32 %v11273_v15, %v5849_v29  ;;  %v8433_v43 = vld [vmem:[%s11605_s15 + $0x1d0] sm:$0xff]  }
0x286e   :  { %v5864_v11 = vadd.f32 %v11273_v15, %v5850_v22  ;;  %v8434_v29 = vld [vmem:[%s11605_s15 + $0x110] sm:$0xff]   ;;  %v8441_v22 = vld [vmem:[%s11605_s15 + $0x1c0] sm:$0xff]  }
0x286f   :  { %v5903_v10 = vpack.c.bf16 %v5863_v59, %v5862_v45  ;;  %v5851_v42 = vmul.f32 %v11266_v51, %v5837_v30  ;;  %v8435_v30 = vld [vmem:[%s11605_s15 + $0x190] sm:$0xff]   ;;  %v8436_v45 = vld [vmem:[%s11605_s15 + $0x148] sm:$0xff]  }
0x2870   :  { %v8437_v59 = vld [vmem:[%s11605_s15 + $0x1c8] sm:$0xff]  }
0x2871   :  { %6123 = vmatmul.mubr.bf16.vlgmr.msra.gmra.mxu1 %v5903_v10  ;;  %6196 = vmatmul.mubr.bf16.vlgmr.msra.gmra.mxu0 %v5903_v10  ;;  %v5865_v16 = vadd.f32 %v11273_v15, %v5851_v42  ;;  %v8439_v10 = vld [vmem:[%s11605_s15 + $0x188] sm:$0xff]   ;;  %v8440_v42 = vld [vmem:[%s11605_s15 + $0x140] sm:$0xff]  }
0x2872   :  { %6132 = vmatprep.mubr.bf16.mxu1 %v8926_v1  ;;  %6205 = vmatprep.mubr.bf16.mxu0 %v8926_v1 }
0x2873   :  { %v5904_v56 = vpack.c.bf16 %v5865_v16, %v5864_v11  ;;  %v8442_v16 = vld [vmem:[%s11605_s15 + $0x100] sm:$0xff]  }
0x2874   :  { %v8443_v11 = vld [vmem:[%s11605_s15 + $0x180] sm:$0xff]  }
0x2879   :  { %6133 = vmatmul.mubr.bf16.gmra.mxu1 %v5904_v56  ;;  %6206 = vmatmul.mubr.bf16.gmra.mxu0 %v5904_v56  ;;  %v11649_v56 = vmov 0.0  }
0x287a   :  { %6142 = vmatprep.mubr.bf16.mxu1 %v8926_v1  ;;  %6215 = vmatprep.mubr.bf16.mxu0 %v8926_v1 }
0x28de   :  { %v5803_v50 = vpop.xlane.xlu0 %5802 }
0x28df   :  { %v5814_v14 = vmul.f32 0.0078125, %v5803_v50 }
0x28e1   :  { %v5822_v63 = vadd.f32 1e-05, %v5814_v14 }
0x28e2   :  { %v5767_v21 = vpop.xlane.xlu0 %5766  ;;  %v5805_v57 = vpop.xlane.xlu1 %5804 }
0x28e3   :  { %8828 = vrsqrt.f32 %v5822_v63  ;;  %v5776_v7 = vmul.f32 0.0078125, %v5767_v21  ;;  %v5815_v48 = vmul.f32 0.0078125, %v5805_v57 }
0x28e5   :  { %v11288_v33 = vsub.f32 %v5748_v49, %v5776_v7  ;;  %v5823_v60 = vadd.f32 1e-05, %v5815_v48 }
0x28e6   :  { %v5769_v38 = vpop.xlane.xlu1 %5768 }
0x28e7   :  { %8830 = vrsqrt.f32 %v5823_v60  ;;  %v5777_v62 = vmul.f32 0.0078125, %v5769_v38  ;;  %v5792_v40 = vmul.f32 %v11288_v33, %v11288_v33  ;;  %v7292_v38 = vld [vmem:[%s11604_s14 + $0x4] sm:$0xf] }
0x28e9   :  { %v11292_v52 = vsub.f32 %v5749_v47, %v5777_v62  ;;  %5806 = vadd.xlane.f32.xlu0 %v5792_v40  ;;  %v8423_v47 = vld [vmem:[%s11605_s15 + $0x1a8] sm:$0xff]   ;;  %v11405_v40 = vrot.slane %v7292_v38, %v9333_v0 }
0x28eb   :  { %v5793_v24 = vmul.f32 %v11292_v52, %v11292_v52 }
0x28ed   :  { %5808 = vadd.xlane.f32.xlu1 %v5793_v24 }
0x28f0   :  { %v8829_v25 = vpop.eup %8828 }
0x28f1   :  { %v5838_v3 = vmul.f32 %v8829_v25, %v11247_v2  ;;  %v8413_v2 = vld [vmem:[%s11605_s15 + $0x1f8] sm:$0xff]   ;;  %v11408_v25 = vrot.slane %v7292_v38, %v9341_v8 }
0x28f2   :  { %7732 = vmatprep.subr.bf16.mxu0 %v8413_v2 }
0x28f3   :  { %v5852_v19 = vmul.f32 %v11266_v51, %v5838_v3  ;;  %7733 = vmatpush3.bf16.msra.mxu0 %v8415_v41 }
0x28f4   :  { %v8831_v44 = vpop.eup %8830  ;;  %7734 = vmatprep.subr.bf16.mxu0 %v8417_v31 }
0x28f5   :  { %v5839_v17 = vmul.f32 %v8831_v44, %v11254_v23  ;;  %v5866_v39 = vadd.f32 %v11273_v15, %v5852_v19  ;;  %v8414_v23 = vld [vmem:[%s11605_s15 + $0x138] sm:$0xff]   ;;  %v11650_v19 = vsub.s32 3, %v9330_v61 }
0x28f6   :  { %7693 = vmatpush3.bf16.msra.mxu1 %v8414_v23 }
0x28f7   :  { %v5853_v9 = vmul.f32 %v11266_v51, %v5839_v17  ;;  %7694 = vmatprep.subr.bf16.mxu1 %v8416_v13  ;;  %7735 = vmatpush3.bf16.msra.mxu0 %v8419_v37 }
0x28f8   :  { %7736 = vmatprep.subr.bf16.mxu0 %v8421_v12 }
0x28f9   :  { %v5867_v27 = vadd.f32 %v11273_v15, %v5853_v9  ;;  %v11415_v9 = vrot.slane %v7292_v38, %v11650_v19 }
0x28fa   :  { %7695 = vmatpush3.bf16.msra.mxu1 %v8418_v32 }
0x28fb   :  { %v5905_v49 = vpack.c.bf16 %v5867_v27, %v5866_v39  ;;  %7696 = vmatprep.subr.bf16.mxu1 %v8420_v46  ;;  %7737 = vmatpush3.bf16.msra.mxu0 %v8423_v47  ;;  %v11421_v27 = vrot.slane %v7292_v38, %v9396_v58 }
0x28fd   :  { %6143 = vmatmul.mubr.bf16.gmra.mxu1 %v5905_v49  ;;  %6216 = vmatmul.mubr.bf16.gmra.mxu0 %v5905_v49 }
0x28fe   :  { %6152 = vmatprep.mubr.bf16.mxu1 %v8926_v1  ;;  %6225 = vmatprep.mubr.bf16.mxu0 %v8926_v1  ;;  %v8425_v1 = vld [vmem:[%s11605_s15 + $0x1e0] sm:$0xff]   ;;  %s8932_s15 = smov [#allocation3]  }
0x28ff   :  { %7697 = vmatpush3.bf16.msra.mxu1 %v8422_v4  ;;  %7738 = vmatprep.subr.bf16.mxu0 %v8425_v1 }
0x2900   :  { %7698 = vmatprep.subr.bf16.mxu1 %v8424_v53  ;;  %7739 = vmatpush3.bf16.msra.mxu0 %v8427_v35 }
0x2901   :  { %7740 = vmatprep.subr.bf16.mxu0 %v8429_v6 }
0x2903   :  { %7699 = vmatpush3.bf16.msra.mxu1 %v8426_v20 }
0x2904   :  { %7700 = vmatprep.subr.bf16.mxu1 %v8428_v34  ;;  %7741 = vmatpush3.bf16.msra.mxu0 %v8431_v54 }
0x2905   :  { %7742 = vmatprep.subr.bf16.mxu0 %v8433_v43 }
0x2907   :  { %7701 = vmatpush3.bf16.msra.mxu1 %v8430_v36 }
0x2908   :  { %7702 = vmatprep.subr.bf16.mxu1 %v8432_v28  ;;  %7743 = vmatpush3.bf16.msra.mxu0 %v8435_v30 }
0x2909   :  { %7744 = vmatprep.subr.bf16.mxu0 %v8437_v59 }
0x290b   :  { %7703 = vmatpush3.bf16.msra.mxu1 %v8434_v29 }
0x290c   :  { %7704 = vmatprep.subr.bf16.mxu1 %v8436_v45  ;;  %7745 = vmatpush3.bf16.msra.mxu0 %v8439_v10 }
0x290d   :  { %7746 = vmatprep.subr.bf16.mxu0 %v8441_v22 }
0x290f   :  { %7705 = vmatpush3.bf16.msra.mxu1 %v8438_v18 }
0x2910   :  { %7706 = vmatprep.subr.bf16.mxu1 %v8440_v42  ;;  %7747 = vmatpush3.bf16.msra.mxu0 %v8443_v11 }
0x2913   :  { %7707 = vmatpush3.bf16.msra.mxu1 %v8442_v16 }
0x2914   :  { %8133 = vmatprep.subr.bf16.mxu1 %v11649_v56 }
0x2931   :  { %v6124_v50 = vpop.f32.mrf.mxu1  ;;  %v6197_v14 = vpop.f32.mrf.mxu0 }
0x2932   :  { %v11411_v44 = vadd.f32 %v6124_v50, %v11405_v40  ;;  %v11435_v58 = vadd.f32 %v6197_v14, %v11421_v27 }
0x2933   :  { %v6126_v63 = vpop.f32.mrf.mxu1  ;;  %v6199_v21 = vpop.f32.mrf.mxu0 }
0x2934   :  { %v6268_v49 = vmul.f32 0.70710677, %v11411_v44  ;;  %v11428_v26 = vadd.f32 %v6126_v63, %v11408_v25  ;;  %v11431_v61 = vadd.f32 %v6199_v21, %v11415_v9  ;;  %v6270_v34 = vmul.f32 0.70710677, %v11435_v58 }
0x2935   :  { %v6128_v57 = vpop.f32.mrf.mxu1  ;;  %v6201_v7 = vpop.f32.mrf.mxu0 }
0x2936   :  { %8832 = verf.f32 %v6268_v49  ;;  %v6269_v37 = vmul.f32 0.70710677, %v11428_v26  ;;  %v11440_v46 = vadd.f32 %v6128_v57, %v11405_v40  ;;  %v6271_v47 = vmul.f32 0.70710677, %v11431_v61 }
0x2937   :  { %v6130_v48 = vpop.f32.mrf.mxu1  ;;  %v6203_v60 = vpop.f32.mrf.mxu0  ;;  %v11444_v53 = vadd.f32 %v6201_v7, %v11421_v27 }
0x2938   :  { %v11418_v39 = vadd.f32 %v6130_v48, %v11408_v25  ;;  %v11424_v0 = vadd.f32 %v6203_v60, %v11415_v9  ;;  %v6272_v36 = vmul.f32 0.70710677, %v11440_v46 }
0x2939   :  { %v6134_v62 = vpop.f32.mrf.mxu1  ;;  %v6207_v24 = vpop.f32.mrf.mxu0  ;;  %v6274_v43 = vmul.f32 0.70710677, %v11444_v53 }
0x293a   :  { %v6273_v23 = vmul.f32 0.70710677, %v11418_v39  ;;  %v6275_v31 = vmul.f32 0.70710677, %v11424_v0  ;;  %v11472_v22 = vadd.f32 %v6134_v62, %v11405_v40  ;;  %v11475_v16 = vadd.f32 %v6207_v24, %v11421_v27 }
0x293b   :  { %v6136_v3 = vpop.f32.mrf.mxu1  ;;  %v6209_v17 = vpop.f32.mrf.mxu0 }
0x293c   :  { %8834 = verf.f32 %v6273_v23  ;;  %v11455_v54 = vadd.f32 %v6136_v3, %v11408_v25  ;;  %v11459_v29 = vadd.f32 %v6209_v17, %v11415_v9  ;;  %v6276_v57 = vmul.f32 0.70710677, %v11472_v22 }
0x293d   :  { %v6138_v8 = vpop.f32.mrf.mxu1  ;;  %v6211_v2 = vpop.f32.mrf.mxu0  ;;  %v6278_v48 = vmul.f32 0.70710677, %v11475_v16 }
0x293e   :  { %v6277_v59 = vmul.f32 0.70710677, %v11455_v54  ;;  %v6279_v18 = vmul.f32 0.70710677, %v11459_v29  ;;  %v11466_v10 = vadd.f32 %v6138_v8, %v11405_v40  ;;  %v11469_v42 = vadd.f32 %v6211_v2, %v11421_v27 }
0x293f   :  { %v6140_v32 = vpop.f32.mrf.mxu1  ;;  %v6213_v12 = vpop.f32.mrf.mxu0 }
0x2940   :  { %v11447_v20 = vadd.f32 %v6140_v32, %v11408_v25  ;;  %v11451_v6 = vadd.f32 %v6213_v12, %v11415_v9  ;;  %v6280_v50 = vmul.f32 0.70710677, %v11466_v10  ;;  %v6282_v63 = vmul.f32 0.70710677, %v11469_v42 }
0x2941   :  { %v6237_v12 = vmul.f32 0.5, %v11428_v26 }
0x2942   :  { %v6281_v30 = vmul.f32 0.70710677, %v11447_v20  ;;  %v6283_v45 = vmul.f32 0.70710677, %v11451_v6 }
0x2943   :  { %v8833_v11 = vpop.eup %8832 }
0x2949   :  { %v8835_v14 = vpop.eup %8834 }
0x294a   :  { %v6337_v3 = vadd.f32 1.0, %v8835_v14  ;;  %v6240_v14 = vmul.f32 0.5, %v11440_v46 }
0x2972   :  { %v5807_v41 = vpop.xlane.xlu0 %5806 }
0x2973   :  { %v5816_v13 = vmul.f32 0.0078125, %v5807_v41 }
0x2975   :  { %v5824_v4 = vadd.f32 1e-05, %v5816_v13  ;;  %v6241_v13 = vmul.f32 0.5, %v11418_v39 }
0x2976   :  { %v5809_v1 = vpop.xlane.xlu1 %5808 }
0x2977   :  { %8836 = vrsqrt.f32 %v5824_v4  ;;  %v5817_v35 = vmul.f32 0.0078125, %v5809_v1  ;;  %v6239_v4 = vmul.f32 0.5, %v11431_v61 }
0x2978   :  { %8838 = verf.f32 %v6275_v31 }
0x2979   :  { %8840 = verf.f32 %v6269_v37  ;;  %v5825_v28 = vadd.f32 1e-05, %v5817_v35 }
0x297a   :  { %8842 = verf.f32 %v6271_v47  ;;  %v6369_v47 = vmul.f32 %v6337_v3, %v6241_v13 }
0x297b   :  { %8844 = vrsqrt.f32 %v5825_v28 }
0x297c   :  { %8846 = verf.f32 %v6270_v34 }
0x297d   :  { %8848 = verf.f32 %v6272_v36 }
0x297e   :  { %8850 = verf.f32 %v6274_v43 }
0x297f   :  { %8852 = verf.f32 %v6281_v30 }
0x2980   :  { %8854 = verf.f32 %v6283_v45 }
0x2981   :  { %8856 = verf.f32 %v6277_v59 }
0x2982   :  { %8858 = verf.f32 %v6279_v18 }
0x2983   :  { %8860 = verf.f32 %v6280_v50  ;;  %v6332_v50 = vadd.f32 1.0, %v8833_v11  ;;  %v6238_v11 = vmul.f32 0.5, %v11435_v58 }
0x2984   :  { %v8837_v21 = vpop.eup %8836  ;;  %8862 = verf.f32 %v6282_v63  ;;  %v6242_v63 = vmul.f32 0.5, %v11444_v53  ;;  %v6245_v53 = vmul.f32 0.5, %v11455_v54  ;;  %v6248_v54 = vmul.f32 0.5, %v11466_v10 }
0x2985   :  { %v8839_v7 = vpop.eup %8838  ;;  %v5840_v60 = vmul.f32 %v8837_v21, %v11288_v33  ;;  %8864 = verf.f32 %v6276_v57  ;;  %v6243_v33 = vmul.f32 0.5, %v11424_v0  ;;  %v6249_v57 = vmul.f32 0.5, %v11447_v20 }
0x2986   :  { %v8841_v38 = vpop.eup %8840  ;;  %v6339_v17 = vadd.f32 1.0, %v8839_v7  ;;  %8866 = verf.f32 %v6278_v48  ;;  %v6251_v7 = vmul.f32 0.5, %v11451_v6 }
0x2987   :  { %v8843_v62 = vpop.eup %8842  ;;  %v5854_v49 = vmul.f32 %v11266_v51, %v5840_v60  ;;  %v6333_v23 = vadd.f32 1.0, %v8841_v38  ;;  %v6236_v60 = vmul.f32 0.5, %v11411_v44 }
0x2988   :  { %v8845_v24 = vpop.eup %8844  ;;  %v6335_v41 = vadd.f32 1.0, %v8843_v62  ;;  %v6371_v1 = vmul.f32 %v6339_v17, %v6243_v33 }
0x2989   :  { %v8847_v19 = vpop.eup %8846  ;;  %v5841_v8 = vmul.f32 %v8845_v24, %v11292_v52  ;;  %v5868_v35 = vadd.f32 %v11273_v15, %v5854_v49  ;;  %v6365_v28 = vmul.f32 %v6333_v23, %v6237_v12  ;;  %v6247_v24 = vmul.f32 0.5, %v11459_v29 }
0x298a   :  { %v8849_v2 = vpop.eup %8848  ;;  %v6367_v39 = vmul.f32 %v6335_v41, %v6239_v4  ;;  %v6334_v61 = vadd.f32 1.0, %v8847_v19  ;;  %v6364_v20 = vmul.f32 %v6332_v50, %v6236_v60  ;;  %v6250_v29 = vmul.f32 0.5, %v11469_v42 }
0x298b   :  { %v8851_v31 = vpop.eup %8850  ;;  %v5855_v32 = vmul.f32 %v11266_v51, %v5841_v8  ;;  %v6336_v0 = vadd.f32 1.0, %v8849_v2  ;;  %v6462_v18 = vpack.c.bf16 %v6369_v47, %v6365_v28  ;;  %v6246_v12 = vmul.f32 0.5, %v11475_v16 }
0x298c   :  { %v8853_v37 = vpop.eup %8852  ;;  %v6338_v30 = vadd.f32 1.0, %v8851_v31  ;;  %v6464_v26 = vpack.c.bf16 %v6371_v1, %v6367_v39  ;;  %v6366_v8 = vmul.f32 %v6334_v61, %v6238_v11 }
0x298d   :  { %v8855_v52 = vpop.eup %8854  ;;  %v5869_v34 = vadd.f32 %v11273_v15, %v5855_v32  ;;  %v6345_v51 = vadd.f32 1.0, %v8853_v37  ;;  %v6368_v38 = vmul.f32 %v6336_v0, %v6240_v14  ;;  %v6244_v37 = vmul.f32 0.5, %v11472_v22 }
0x298e   :  { %v8857_v36 = vpop.eup %8856  ;;  %v6347_v59 = vadd.f32 1.0, %v8855_v52  ;;  %v6370_v62 = vmul.f32 %v6338_v30, %v6242_v63 }
0x298f   :  { %v8859_v43 = vpop.eup %8858  ;;  %v5906_v45 = vpack.c.bf16 %v5869_v34, %v5868_v35  ;;  %v6341_v15 = vadd.f32 1.0, %v8857_v36  ;;  %v6377_v3 = vmul.f32 %v6345_v51, %v6249_v57  ;;  %v6461_v23 = vpack.c.bf16 %v6368_v38, %v6364_v20 }
0x2990   :  { %v6343_v21 = vadd.f32 1.0, %v8859_v43  ;;  %v8861_v48 = vpop.eup %8860  ;;  %v6379_v17 = vmul.f32 %v6347_v59, %v6251_v7  ;;  %v6463_v41 = vpack.c.bf16 %v6370_v62, %v6366_v8 }
0x2991   :  { %6153 = vmatmul.mubr.bf16.gmra.mxu1 %v5906_v45  ;;  %6226 = vmatmul.mubr.bf16.gmra.mxu0 %v5906_v45  ;;  %v8863_v46 = vpop.eup %8862  ;;  %v6373_v49 = vmul.f32 %v6341_v15, %v6245_v53  ;;  %v6344_v44 = vadd.f32 1.0, %v8861_v48 }
0x2992   :  { %6701 = vmatprep.mubr.bf16.mxu1 %v6462_v18  ;;  %6760 = vmatprep.mubr.bf16.mxu0 %v6464_v26  ;;  %v8865_v19 = vpop.eup %8864  ;;  %v6375_v2 = vmul.f32 %v6343_v21, %v6247_v24  ;;  %v6346_v13 = vadd.f32 1.0, %v8863_v46 }
0x2993   :  { %v8867_v6 = vpop.eup %8866  ;;  %v6466_v58 = vpack.c.bf16 %v6377_v3, %v6373_v49  ;;  %v6340_v31 = vadd.f32 1.0, %v8865_v19  ;;  %v6376_v4 = vmul.f32 %v6344_v44, %v6248_v54 }
0x2994   :  { %v6468_v33 = vpack.c.bf16 %v6379_v17, %v6375_v2  ;;  %v6342_v32 = vadd.f32 1.0, %v8867_v6  ;;  %v6378_v47 = vmul.f32 %v6346_v13, %v6250_v29 }
0x2995   :  { %v6372_v1 = vmul.f32 %v6340_v31, %v6244_v37 }
0x2996   :  { %v6374_v52 = vmul.f32 %v6342_v32, %v6246_v12 }
0x2997   :  { %v6465_v35 = vpack.c.bf16 %v6376_v4, %v6372_v1 }
0x2998   :  { %v6467_v34 = vpack.c.bf16 %v6378_v47, %v6374_v52 }
0x2999   :  { %6702 = vmatmul.mubr.bf16.vlgmr.msra.gmra.mxu1 %v6461_v23  ;;  %6761 = vmatmul.mubr.bf16.vlgmr.msra.gmra.mxu0 %v6463_v41 }
0x299a   :  { %6708 = vmatprep.mubr.bf16.mxu1 %v6466_v58  ;;  %6767 = vmatprep.mubr.bf16.mxu0 %v6468_v33 }
0x29a1   :  { %6709 = vmatmul.mubr.bf16.gmra.mxu1 %v6465_v35  ;;  %6768 = vmatmul.mubr.bf16.gmra.mxu0 %v6467_v34 }
0x29bd   :  { %v6144_v36 = vpop.f32.mrf.mxu1  ;;  %v6217_v10 = vpop.f32.mrf.mxu0 }
0x29be   :  { %v6145_v42 = vadd.f32 %v6144_v36, %v11405_v40  ;;  %v6218_v28 = vadd.f32 %v6217_v10, %v11421_v27 }
0x29bf   :  { %v6146_v39 = vpop.f32.mrf.mxu1  ;;  %v6219_v43 = vpop.f32.mrf.mxu0 }
0x29c0   :  { %v6284_v0 = vmul.f32 0.70710677, %v6145_v42  ;;  %v6286_v22 = vmul.f32 0.70710677, %v6218_v28  ;;  %v6147_v16 = vadd.f32 %v6146_v39, %v11408_v25  ;;  %v6220_v30 = vadd.f32 %v6219_v43, %v11415_v9 }
0x29c1   :  { %v6148_v45 = vpop.f32.mrf.mxu1  ;;  %v6221_v51 = vpop.f32.mrf.mxu0  ;;  %v6252_v24 = vmul.f32 0.5, %v6145_v42  ;;  %v6254_v29 = vmul.f32 0.5, %v6218_v28 }
0x29c2   :  { %v6149_v59 = vadd.f32 %v6148_v45, %v11405_v40  ;;  %v6222_v18 = vadd.f32 %v6221_v51, %v11421_v27  ;;  %8868 = verf.f32 %v6284_v0  ;;  %v6285_v26 = vmul.f32 0.70710677, %v6147_v16 }
0x29c3   :  { %v6150_v50 = vpop.f32.mrf.mxu1  ;;  %v6223_v61 = vpop.f32.mrf.mxu0  ;;  %8870 = verf.f32 %v6286_v22  ;;  %v6287_v14 = vmul.f32 0.70710677, %v6220_v30  ;;  %v6253_v3 = vmul.f32 0.5, %v6147_v16  ;;  %v6255_v33 = vmul.f32 0.5, %v6220_v30 }
0x29c4   :  { %v6288_v63 = vmul.f32 0.70710677, %v6149_v59  ;;  %8872 = verf.f32 %v6285_v26  ;;  %v6290_v15 = vmul.f32 0.70710677, %v6222_v18  ;;  %v6151_v21 = vadd.f32 %v6150_v50, %v11408_v25 }
0x29c5   :  { %v6224_v57 = vadd.f32 %v6223_v61, %v11415_v9  ;;  %8874 = verf.f32 %v6287_v14  ;;  %v6256_v49 = vmul.f32 0.5, %v6149_v59  ;;  %v6258_v44 = vmul.f32 0.5, %v6222_v18 }
0x29c6   :  { %8876 = verf.f32 %v6288_v63  ;;  %v6289_v7 = vmul.f32 0.70710677, %v6151_v21  ;;  %v6257_v13 = vmul.f32 0.5, %v6151_v21 }
0x29c7   :  { %8878 = verf.f32 %v6290_v15  ;;  %v6291_v48 = vmul.f32 0.70710677, %v6224_v57  ;;  %v6259_v32 = vmul.f32 0.5, %v6224_v57 }
0x29c8   :  { %8880 = verf.f32 %v6289_v7 }
0x29c9   :  { %8882 = verf.f32 %v6291_v48 }
0x29cf   :  { %v8869_v60 = vpop.eup %8868 }
0x29d0   :  { %v8871_v11 = vpop.eup %8870  ;;  %v6348_v8 = vadd.f32 1.0, %v8869_v60 }
0x29d1   :  { %v8873_v38 = vpop.eup %8872  ;;  %v6350_v41 = vadd.f32 1.0, %v8871_v11 }
0x29d2   :  { %v8875_v62 = vpop.eup %8874  ;;  %v6349_v17 = vadd.f32 1.0, %v8873_v38  ;;  %v6380_v47 = vmul.f32 %v6348_v8, %v6252_v24 }
0x29d3   :  { %v8877_v46 = vpop.eup %8876  ;;  %v6351_v6 = vadd.f32 1.0, %v8875_v62  ;;  %v6382_v35 = vmul.f32 %v6350_v41, %v6254_v29 }
0x29d4   :  { %v8879_v53 = vpop.eup %8878  ;;  %v6352_v19 = vadd.f32 1.0, %v8877_v46  ;;  %v6381_v37 = vmul.f32 %v6349_v17, %v6253_v3 }
0x29d5   :  { %v8881_v20 = vpop.eup %8880  ;;  %v6354_v2 = vadd.f32 1.0, %v8879_v53  ;;  %v6383_v1 = vmul.f32 %v6351_v6, %v6255_v33 }
0x29d6   :  { %v8883_v23 = vpop.eup %8882  ;;  %v6353_v58 = vadd.f32 1.0, %v8881_v20  ;;  %v6384_v31 = vmul.f32 %v6352_v19, %v6256_v49 }
0x29d7   :  { %v6355_v54 = vadd.f32 1.0, %v8883_v23  ;;  %v6386_v12 = vmul.f32 %v6354_v2, %v6258_v44 }
0x29d8   :  { %v6385_v4 = vmul.f32 %v6353_v58, %v6257_v13  ;;  %v6469_v36 = vpack.c.bf16 %v6384_v31, %v6380_v47 }
0x29d9   :  { %v6387_v52 = vmul.f32 %v6355_v54, %v6259_v32  ;;  %v6471_v42 = vpack.c.bf16 %v6386_v12, %v6382_v35 }
0x29da   :  { %v6470_v34 = vpack.c.bf16 %v6385_v4, %v6381_v37 }
0x29db   :  { %v6472_v10 = vpack.c.bf16 %v6387_v52, %v6383_v1 }
0x29dc   :  { %6714 = vmatprep.mubr.bf16.mxu1 %v6470_v34 }
0x29dd   :  { %6773 = vmatprep.mubr.bf16.mxu0 %v6472_v10  ;;  %6715 = vmatmul.mubr.bf16.gmra.mxu1 %v6469_v36 }
0x29de   :  { %6774 = vmatmul.mubr.bf16.gmra.mxu0 %v6471_v42 }
0x2a51   :  { %v6154_v39 = vpop.f32.mrf.mxu1  ;;  %v6227_v43 = vpop.f32.mrf.mxu0 }
0x2a52   :  { %v6155_v0 = vadd.f32 %v6154_v39, %v11405_v40  ;;  %v11513_v28 = vadd.f32 %v6227_v43, %v11421_v27 }
0x2a53   :  { %v6156_v22 = vpop.f32.mrf.mxu1  ;;  %v6229_v16 = vpop.f32.mrf.mxu0 }
0x2a54   :  { %v6292_v30 = vmul.f32 0.70710677, %v6155_v0  ;;  %v6294_v45 = vmul.f32 0.70710677, %v11513_v28  ;;  %v6157_v51 = vadd.f32 %v6156_v22, %v11408_v25  ;;  %v11518_v59 = vadd.f32 %v6229_v16, %v11415_v9 }
0x2a55   :  { %v6158_v18 = vpop.f32.mrf.mxu1  ;;  %v6231_v26 = vpop.f32.mrf.mxu0  ;;  %v6260_v4 = vmul.f32 0.5, %v6155_v0  ;;  %v6262_v0 = vmul.f32 0.5, %v11513_v28 }
0x2a56   :  { %v6159_v50 = vadd.f32 %v6158_v18, %v11405_v40  ;;  %v6232_v61 = vadd.f32 %v6231_v26, %v11421_v27  ;;  %8884 = verf.f32 %v6292_v30  ;;  %v6293_v14 = vmul.f32 0.70710677, %v6157_v51 }
0x2a57   :  { %v6160_v63 = vpop.f32.mrf.mxu1  ;;  %v6233_v15 = vpop.f32.mrf.mxu0  ;;  %8886 = verf.f32 %v6294_v45  ;;  %v6295_v21 = vmul.f32 0.70710677, %v11518_v59  ;;  %v6261_v47 = vmul.f32 0.5, %v6157_v51  ;;  %v6263_v30 = vmul.f32 0.5, %v11518_v59 }
0x2a58   :  { %v6296_v57 = vmul.f32 0.70710677, %v6159_v50  ;;  %8888 = verf.f32 %v6293_v14  ;;  %v6298_v7 = vmul.f32 0.70710677, %v6232_v61  ;;  %v6161_v48 = vadd.f32 %v6160_v63, %v11408_v25  ;;  %v11528_v25 = vld [vmem:[%s11606_s16 + $0x1] ss:$0 sm:$0xff] }
0x2a59   :  { %v6234_v60 = vadd.f32 %v6233_v15, %v11415_v9  ;;  %v7708_v11 = vpop.f32.mrf.mxu1  ;;  %v7748_v38 = vpop.f32.mrf.mxu0  ;;  %8890 = verf.f32 %v6295_v21  ;;  %v6264_v36 = vmul.f32 0.5, %v6159_v50  ;;  %v6266_v43 = vmul.f32 0.5, %v6232_v61  ;;  %s6980_s16 = sshll.u32 %s8932_s15, 4  ;;  %s6981_s16 = int_to_ptr.vmem [resolvable:$true] %s6980_s16 }
0x2a5a   :  { %8892 = verf.f32 %v6296_v57  ;;  %v6297_v40 = vmul.f32 0.70710677, %v6161_v48  ;;  %v6265_v22 = vmul.f32 0.5, %v6161_v48  ;;  %p8909_p1 = scmp.lt.s32.totalorder %s6981_s16, %s6981_s16 }
0x2a5b   :  { %v7709_v27 = vpop.f32.mrf.mxu1  ;;  %v7749_v62 = vpop.f32.mrf.mxu0  ;;  %8894 = verf.f32 %v6298_v7  ;;  %v6299_v46 = vmul.f32 0.70710677, %v6234_v60  ;;  %v6267_v18 = vmul.f32 0.5, %v6234_v60 }
0x2a5c   :  { %v7710_v53 = vadd.f32 %v7709_v27, %v7708_v11  ;;  %v7750_v24 = vadd.f32 %v7749_v62, %v7748_v38  ;;  %8896 = verf.f32 %v6297_v40 }
0x2a5d   :  { %v7711_v3 = vpop.f32.mrf.mxu1  ;;  %v7751_v17 = vpop.f32.mrf.mxu0  ;;  %8898 = verf.f32 %v6299_v46 }
0x2a5e   :  { %v6763_v19 = vadd.f32 %v7750_v24, %v7710_v53 }
0x2a5f   :  { %v7712_v9 = vpop.f32.mrf.mxu1  ;;  %v7752_v20 = vpop.f32.mrf.mxu0 }
0x2a60   :  { %v6787_v8 = vadd.f32 %v6763_v19, %v11106_v5 }
0x2a61   :  { %v7714_v6 = vpop.f32.mrf.mxu1  ;;  %v7754_v49 = vpop.f32.mrf.mxu0 }
0x2a62   :  { %v6797_v2 = vadd.f32 %v11528_v25, %v6787_v8 }
0x2a63   :  { %v7715_v23 = vpop.f32.mrf.mxu1  ;;  %v7755_v41 = vpop.f32.mrf.mxu0 }
0x2a64   :  { %v8885_v44 = vpop.eup %8884  ;;  %6799 = vst [vmem:[#allocation2] sm:$0x1] %v6797_v2 }
0x2a65   :  { %v8887_v13 = vpop.eup %8886  ;;  %v7717_v58 = vpop.f32.mrf.mxu1  ;;  %v6356_v35 = vadd.f32 1.0, %v8885_v44 }
0x2a66   :  { %v7757_v33 = vpop.f32.mrf.mxu0  ;;  %v8889_v31 = vpop.eup %8888  ;;  %v6358_v39 = vadd.f32 1.0, %v8887_v13 }
0x2a67   :  { %v8891_v32 = vpop.eup %8890  ;;  %v7718_v54 = vpop.f32.mrf.mxu1  ;;  %v6357_v5 = vadd.f32 1.0, %v8889_v31  ;;  %v6388_v15 = vmul.f32 %v6356_v35, %v6260_v4  ;;  %v8444_v35 = vld [vmem:[%s11611_s21 + $0x38] sm:$0xff]  }
0x2a68   :  { %v7758_v29 = vpop.f32.mrf.mxu0  ;;  %v8893_v37 = vpop.eup %8892  ;;  %v6359_v34 = vadd.f32 1.0, %v8891_v32  ;;  %v6390_v50 = vmul.f32 %v6358_v39, %v6262_v0  ;;  %8134 = vmatpush3.bf16.msra.mxu1 %v8444_v35 }
0x2a69   :  { %v8895_v12 = vpop.eup %8894  ;;  %v6360_v1 = vadd.f32 1.0, %v8893_v37  ;;  %v6389_v51 = vmul.f32 %v6357_v5, %v6261_v47  ;;  %v7424_v47 = vld [vmem:[%s11608_s18] ss:$0 sm:$0xff]  ;;  %8135 = vmatprep.subr.bf16.mxu1 %v11649_v56 }
0x2a6a   :  { %v8897_v52 = vpop.eup %8896  ;;  %v6362_v10 = vadd.f32 1.0, %v8895_v12  ;;  %v6391_v21 = vmul.f32 %v6359_v34, %v6263_v30  ;;  %v7423_v12 = vld [vmem:[%s11607_s17] ss:$0 sm:$0xff]  ;;  %v8445_v34 = vld [vmem:[%s11611_s21 + $0x30] sm:$0xff]   ;;  %v8448_v30 = vld [vmem:[%s11611_s21 + $0x18] sm:$0xff]  }
0x2a6b   :  { %v8899_v42 = vpop.eup %8898  ;;  %v6361_v16 = vadd.f32 1.0, %v8897_v52  ;;  %v6392_v45 = vmul.f32 %v6360_v1, %v6264_v36 }
0x2a6c   :  { %v6363_v26 = vadd.f32 1.0, %v8899_v42  ;;  %v6394_v14 = vmul.f32 %v6362_v10, %v6266_v43  ;;  %8136 = vmatpush3.bf16.msra.mxu1 %v8445_v34 }
0x2a6d   :  { %v6393_v63 = vmul.f32 %v6361_v16, %v6265_v22  ;;  %v6473_v11 = vpack.c.bf16 %v6392_v45, %v6388_v15  ;;  %8137 = vmatprep.subr.bf16.mxu1 %v11649_v56  ;;  %v8446_v22 = vld [vmem:[%s11611_s21 + $0x28] sm:$0xff]   ;;  %v8447_v16 = vld [vmem:[%s11611_s21 + $0x20] sm:$0xff]   ;;  %v8449_v45 = vld [vmem:[%s11611_s21 + $0x10] sm:$0xff]  }
0x2a6e   :  { %v6395_v57 = vmul.f32 %v6363_v26, %v6267_v18  ;;  %v6475_v61 = vpack.c.bf16 %v6394_v14, %v6390_v50  ;;  %v8450_v18 = vld [vmem:[%s11611_s21 + $0x8] sm:$0xff]   ;;  %v8451_v26 = vld [vmem:[%s11611_s21] sm:$0xff]  }
0x2a6f   :  { %v6474_v7 = vpack.c.bf16 %v6393_v63, %v6389_v51  ;;  %v7425_v15 = vld [vmem:[%s11609_s19] ss:$0 sm:$0xff]  ;;  %s8904_s19 = scalar_lea.vmem %s6981_s16, 32 }
0x2a70   :  { %v6476_v38 = vpack.c.bf16 %v6395_v57, %v6391_v21  ;;  %8138 = vmatpush3.bf16.msra.mxu1 %v8446_v22  ;;  %v7426_v57 = vld [vmem:[%s11610_s20] ss:$0 sm:$0xff]  ;;  %p8905_p0 = scmp.ne.s32.totalorder %s6981_s16, %s8904_s19  ;;  %p8910_p2 = scmp.lt.s32.totalorder %s8904_s19, %s8904_s19 }
0x2a71   :  { %6721 = vmatprep.mubr.bf16.mxu1 %v6474_v7  ;;  %8139 = vmatprep.subr.bf16.mxu1 %v11649_v56 }
0x2a72   :  { %6780 = vmatprep.mubr.bf16.mxu0 %v6476_v38  ;;  %6722 = vmatmul.mubr.bf16.gmra.mxu1 %v6473_v11  ;;  %p8911_p3 = por %p8910_p2, %p8909_p1 }
0x2a73   :  { %6781 = vmatmul.mubr.bf16.gmra.mxu0 %v6475_v61  ;;  %8149 = vmatprep.mubr.msk.bf16.mxu1 %vm8931_vm8, %v11649_v56 }
0x2a74   :  { %8140 = vmatpush3.bf16.msra.mxu1 %v8447_v16  ;;  %p8912_p4 = pnand %p8911_p3, %p8905_p0 }
0x2a75   :  { %8141 = vmatprep.subr.bf16.mxu1 %v11649_v56 }
0x2a78   :  { %8142 = vmatpush3.bf16.msra.mxu1 %v8448_v30 }
0x2a79   :  { %8143 = vmatprep.subr.bf16.mxu1 %v11649_v56 }
0x2a7c   :  { %8144 = vmatpush3.bf16.msra.mxu1 %v8449_v45 }
0x2a7d   :  { %8145 = vmatprep.subr.bf16.mxu1 %v11649_v56 }
0x2a80   :  { %8146 = vmatpush3.bf16.msra.mxu1 %v8450_v18 }
0x2a81   :  { %8147 = vmatprep.subr.bf16.mxu1 %v11649_v56  ;;  %v7427_v56 = vld [vmem:[%s11612_s22] ss:$0 sm:$0xff] }
0x2a84   :  { %8148 = vmatpush3.bf16.msra.mxu1 %v8451_v26 }
0x2a9d   :  { %v7720_v59 = vpop.f32.mrf.mxu1 }
0x2a9e   :  { %v7760_v48 = vpop.f32.mrf.mxu0 }
0x2a9f   :  { %v7721_v60 = vpop.f32.mrf.mxu1 }
0x2aa0   :  { %v7722_v40 = vadd.f32 %v7721_v60, %v7720_v59  ;;  %v7761_v28 = vpop.f32.mrf.mxu0 }
0x2aa1   :  { %v7762_v27 = vadd.f32 %v7761_v28, %v7760_v48  ;;  %v7723_v62 = vpop.f32.mrf.mxu1 }
0x2aa2   :  { %v7763_v46 = vpop.f32.mrf.mxu0 }
0x2aa3   :  { %v6776_v53 = vadd.f32 %v7762_v27, %v7722_v40  ;;  %v7724_v24 = vpop.f32.mrf.mxu1 }
0x2aa4   :  { %v7764_v3 = vpop.f32.mrf.mxu0 }
0x2aa5   :  { %v6788_v17 = vadd.f32 %v6776_v53, %v11128_v55 }
0x2aa7   :  { %v6798_v19 = vadd.f32 %v11528_v25, %v6788_v17 }
0x2aa9   :  { %6800 = vst [vmem:[#allocation2 + $0x1] sm:$0x1] %v6798_v19 }
0x2ab0   :  { %v6801_v9 = vld [vmem:[#allocation2] sm:$0x3] }
0x2ab1   :  { %v6805_v20 = vsel %vm6804_vm7, %v6801_v9, 0.0 }
0x2ab2   :  { %6806 = vadd.xlane.f32.xlu0 %v6805_v20 }
0x2b32   :  { %v7726_v8 = vpop.f32.mrf.mxu1 }
0x2b33   :  { %v7766_v6 = vpop.f32.mrf.mxu0 }
0x2b34   :  { %v7727_v49 = vpop.f32.mrf.mxu1 }
0x2b35   :  { %v7767_v2 = vpop.f32.mrf.mxu0 }
0x2b36   :  { %v7729_v23 = vpop.f32.mrf.mxu1 }
0x2b37   :  { %v7769_v41 = vpop.f32.mrf.mxu0 }
0x2b38   :  { %v7730_v44 = vpop.f32.mrf.mxu1 }
0x2b39   :  { %v7770_v13 = vpop.f32.mrf.mxu0 }
0x2b3b   :  { %v6807_v58 = vpop.xlane.xlu0 %6806 }
0x2b3c   :  { %v6808_v33 = vmul.f32 0.0078125, %v6807_v58 }
0x2b3e   :  { %v6809_v31 = vsub.f32 %v6801_v9, %v6808_v33 }
0x2b40   :  { %v6810_v55 = vmul.f32 %v6809_v31, %v6809_v31 }
0x2b42   :  { %v6811_v25 = vsel %vm6804_vm7, %v6810_v55, 0.0 }
0x2b43   :  { %6812 = vadd.xlane.f32.xlu1 %v6811_v25 }
0x2bcc   :  { %v6813_v32 = vpop.xlane.xlu1 %6812 }
0x2bcd   :  { %v6814_v54 = vmul.f32 0.0078125, %v6813_v32 }
0x2bcf   :  { %v6815_v29 = vadd.f32 1e-05, %v6814_v54 }
0x2bd1   :  { %8900 = vrsqrt.f32 %v6815_v29 }
0x2bde   :  { %v8901_v37 = vpop.eup %8900 }
0x2bdf   :  { %v6817_v4 = vmul.f32 %v8901_v37, %v6809_v31 }
0x2be1   :  { %v6824_v5 = vmul.f32 %v7423_v12, %v6817_v4 }
0x2be3   :  { %v6831_v1 = vadd.f32 %v7424_v47, %v6824_v5 }
0x2be5   :  { %v6834_v52 = vsel %vm6804_vm7, %v6831_v1, 0.0 }
0x2be6   :  { %6835 = vadd.xlane.f32.xlu0 %v6834_v52 }
0x2c6f   :  { %v6836_v36 = vpop.xlane.xlu0 %6835 }
0x2c70   :  { %v6837_v10 = vmul.f32 0.0078125, %v6836_v36 }
0x2c72   :  { %v6838_v42 = vsub.f32 %v6831_v1, %v6837_v10 }
0x2c74   :  { %v6839_v39 = vmul.f32 %v6838_v42, %v6838_v42 }
0x2c76   :  { %v6840_v43 = vsel %vm6804_vm7, %v6839_v39, 0.0 }
0x2c77   :  { %6841 = vadd.xlane.f32.xlu1 %v6840_v43 }
0x2d00   :  { %v6842_v0 = vpop.xlane.xlu1 %6841 }
0x2d01   :  { %v6843_v51 = vmul.f32 0.0078125, %v6842_v0 }
0x2d03   :  { %v6844_v14 = vadd.f32 1e-05, %v6843_v51 }
0x2d05   :  { %8902 = vrsqrt.f32 %v6844_v14 }
0x2d12   :  { %v8903_v63 = vpop.eup %8902 }
0x2d13   :  { %v6846_v21 = vmul.f32 %v8903_v63, %v6838_v42 }
0x2d15   :  { %v6853_v50 = vmul.f32 %v7425_v15, %v6846_v21 }
0x2d17   :  { %v6860_v7 = vadd.f32 %v7426_v57, %v6853_v50 }
0x2d19   :  { %v6877_v11 = vpack.c.bf16 %v6860_v7, %v6860_v7 }
0x2d1b   :  { %8150 = vmatmul.mubr.bf16.vlgmr.msra.gmra.mxu1 %v6877_v11 }
0x2ddb   :  { %v6967_v38 = vpop.f32.mrf.mxu1 }
0x2ddc   :  { %v6968_v61 = vadd.f32 %v7427_v56, %v6967_v38 }
0x2ddd   :  { %v8151_v59 = vpop.f32.mrf.mxu1 }
0x2dde   :  { %6973 = vst [vmem:[#allocation3] sm:$0x3] %v6968_v61 }
0x2ddf   :  { %v6970_v48 = vpop.f32.mrf.mxu1 }
0x2de0   :  { %8915 = shalt.err (!%p8912_p4)
}
0x2de1   :  { %6983 = dma.vmem_to_hbm [thread:$0]  %s6981_s16, 32, %s11613_s23, [#allocation4]   ;;  %v8152_v60 = vpop.f32.mrf.mxu1 }
0x2de2   :  { %8924 = dma.done.wait [#allocation4], 32  }
0x2de3   :  { %8925 = vsyncadd [#allocation4], 4294967264 }
0x2de4   :  { %6987 = vsyncpa [#allocation4], 1 }

</bundles_post_ra>
